<compile_context>
chip_gen: v7x
topology: tpu7x:2x2x1
jax: 0.10.0
libtpu: 0.0.40
codegen_flags: <defaults>
</compile_context>

<pallas_src>
import jax
import jax.numpy as jnp
from jax.experimental import pallas as pl
from jax.experimental.pallas import tpu as pltpu

LANES = 128      # vreg lane width
SUBLANES = 8     # f32 sublanes per vreg


def _round_up(x, m):
    return (x + m - 1) // m * m


_SQRT_2_OVER_PI = 0.7978845608028654


def _gelu(x):
    # tanh-approximate GELU: the transcendental routes to the EUP slot (perf review).
    return 0.5 * x * (1.0 + jnp.tanh(_SQRT_2_OVER_PI * (x + 0.044715 * x * x * x)))


def _fold_bn(bconv, gamma, beta, mean, var, eps=1e-5):
    """Fold conv bias + eval-mode BatchNorm into per-channel (scale, shift)."""
    scale = gamma / jnp.sqrt(var + eps)
    shift = (bconv - mean) * scale + beta
    return scale.reshape(1, -1), shift.reshape(1, -1)


def _make_kernel(H, W, Wp, Cin, Cout):
    """H, W: spatial size; Wp: padded width (halo + right pad, multiple of 8);
    Cin/Cout: lane-padded channel counts (multiples of 128)."""
    R = H * Wp                # flat rows of one conv output
    RT = (H + 2) * Wp         # flat rows of the zero-padded image
    HO, WO = H // 2, W // 2

    def conv3x3(src_ref, w_ref):
        """3x3 'same' conv on a zero-padded, row-major flattened (RT, C) bf16 ref.

        Taps are grouped by column offset dx: each dy window is a tile-aligned static
        slice (dy*Wp is a multiple of 8) feeding a 2-D bf16 MXU dot with f32
        accumulation; the three f32 per-dx partials are then combined with cyclic
        sublane rolls:  out[p] = A0[p-1] + A1[p] + A2[p+1]   (shift R-1 == shift -1).
        Wraparound lands only in halo/pad columns, which are zero-masked or unread.
        """
        rows = [src_ref[pl.ds(dy * Wp, R), :] for dy in range(3)]
        parts = []
        for dx in range(3):
            a = jnp.dot(rows[0], w_ref[0, dx], preferred_element_type=jnp.float32)
            a = a + jnp.dot(rows[1], w_ref[1, dx], preferred_element_type=jnp.float32)
            a = a + jnp.dot(rows[2], w_ref[2, dx], preferred_element_type=jnp.float32)
            parts.append(a)
        return (pltpu.roll(parts[0], shift=1, axis=0) + parts[1]
                + pltpu.roll(parts[2], shift=R - 1, axis=0))

    def kernel(x_ref, mask_ref, w1_ref, s1_ref, b1_ref, w2_ref, s2_ref, b2_ref,
               out_ref, h1pad_ref, pool_ref):
        # ---------------- conv1 + folded BN + GELU ----------------
        acc1 = conv3x3(x_ref, w1_ref)
        h1 = _gelu(acc1 * s1_ref[...] + b1_ref[...])          # f32 epilogue
        # Zero halo/pad columns so h1pad has the same zero-halo invariant as the
        # padded input.  mask is (R, 1): lane broadcast is free.
        h1 = h1 * mask_ref[...]

        # Re-pad for conv2.  Halo rows are re-zeroed EVERY grid step on purpose: with
        # dimension_semantics=("parallel",) each TensorCore owns its own scratch, so a
        # pl.when(program_id == 0) init would be wrong.
        zrow = jnp.zeros((Wp, Cout), jnp.bfloat16)
        h1pad_ref[pl.ds(0, Wp), :] = zrow
        h1pad_ref[pl.ds((H + 1) * Wp, Wp), :] = zrow
        h1pad_ref[pl.ds(Wp, R), :] = h1.astype(jnp.bfloat16)

        # ---------------- conv2 + folded BN + GELU ----------------
        acc2 = conv3x3(h1pad_ref, w2_ref)
        h2 = _gelu(acc2 * s2_ref[...] + b2_ref[...])

        # ---------------- MaxPool2d(2), fused ----------------
        # Row pairs: (HO, 2*Wp, C) split of the sublane dim is tile-aligned (Wp%8==0).
        h2p = h2.reshape(HO, 2 * Wp, Cout)
        pool_ref[...] = jnp.maximum(h2p[:, :Wp, :], h2p[:, Wp:, :])
        # Column pairs (valid columns are 1..W) via two stride-2 sublane reads, then a
        # single unmasked lane-dense full-block store (no per-column vst.msk loop).
        left = pool_ref[:, pl.ds(1, WO, stride=2), :]
        right = pool_ref[:, pl.ds(2, WO, stride=2), :]
        out_ref[...] = jnp.maximum(left, right).astype(out_ref.dtype)

    return kernel


@jax.jit
def unet_down(x_nchw, params):
    """UnetDown.forward: ResidualConvBlock(in,out) (is_res=False) -> MaxPool2d(2).

    x_nchw: (N, Cin, H, W) f32 (PyTorch layout). Returns (N, Cout, H//2, W//2) f32.
    """
    N, Cin, H, W = x_nchw.shape
    Cout = params["w1"].shape[-1]
    assert H % 2 == 0 and W % 2 == 0, "MaxPool2d(2) needs even spatial dims"

    cin_p = _round_up(Cin, LANES)
    cout_p = _round_up(Cout, LANES)
    wp = _round_up(W + 2, SUBLANES)            # conv halo + right pad, sublane-aligned
    ho, wo = H // 2, W // 2
    r, rt = H * wp, (H + 2) * wp

    # NCHW -> NHWC, halo + lane padding, bf16, flattened row-major (tile-aligned).
    x = jnp.transpose(x_nchw, (0, 2, 3, 1))
    x = jnp.pad(x, ((0, 0), (1, 1), (1, wp - W - 1), (0, cin_p - Cin)))
    x = x.astype(jnp.bfloat16).reshape(N, rt, cin_p)

    # 0/1 mask over flat conv-output rows: 1 for valid columns 1..W of each image row.
    col = jnp.arange(wp)
    col_mask = ((col >= 1) & (col <= W)).astype(jnp.float32)
    col_mask = jnp.tile(col_mask, H).reshape(r, 1)

    w1 = jnp.pad(params["w1"],
                 ((0, 0), (0, 0), (0, cin_p - Cin), (0, cout_p - Cout))).astype(jnp.bfloat16)
    w2 = jnp.pad(params["w2"],
                 ((0, 0), (0, 0), (0, cout_p - Cout), (0, cout_p - Cout))).astype(jnp.bfloat16)

    s1, b1 = _fold_bn(params["b1"], params["gamma1"], params["beta1"],
                      params["mean1"], params["var1"])
    s2, b2 = _fold_bn(params["b2"], params["gamma2"], params["beta2"],
                      params["mean2"], params["var2"])
    cpad = ((0, 0), (0, cout_p - Cout))
    s1, b1, s2, b2 = (jnp.pad(a, cpad).astype(jnp.float32) for a in (s1, b1, s2, b2))

    kernel = _make_kernel(H, W, wp, cin_p, cout_p)

    # Size the VMEM limit from the actual per-step working set (double-buffered in/out
    # blocks, resident weights, scratches, in-flight f32 accumulators).
    step_bytes = (2 * rt * cin_p * 2 + 9 * (cin_p + cout_p) * cout_p * 2
                  + rt * cout_p * 2 + ho * wp * cout_p * 4
                  + 2 * ho * wo * cout_p * 4 + r * 4 + 6 * r * cout_p * 4)
    vmem_limit = int(min(100 * 1024 * 1024, max(32 * 1024 * 1024, 2 * step_bytes)))

    flops = 2 * N * r * 9 * (cin_p * cout_p + cout_p * cout_p)
    bytes_accessed = (x.size * 2 + w1.size * 2 + w2.size * 2
                      + 4 * cout_p * 4 + r * 4 + N * ho * wo * cout_p * 4)
    cost = pl.CostEstimate(flops=flops,
                           transcendentals=2 * N * r * cout_p,
                           bytes_accessed=bytes_accessed)

    out = pl.pallas_call(
        kernel,
        # Kept f32 for parity with the PyTorch module / test; a full UNet would emit
        # bf16 here (and keep the padded NHWC layout) to halve HBM writeback.
        out_shape=jax.ShapeDtypeStruct((N, ho, wo, cout_p), jnp.float32),
        grid=(N,),                                        # one batch element / step
        in_specs=[
            pl.BlockSpec((None, rt, cin_p), lambda n: (n, 0, 0)),
            pl.BlockSpec((r, 1), lambda n: (0, 0)),
            pl.BlockSpec((3, 3, cin_p, cout_p), lambda n: (0, 0, 0, 0)),
            pl.BlockSpec((1, cout_p), lambda n: (0, 0)),
            pl.BlockSpec((1, cout_p), lambda n: (0, 0)),
            pl.BlockSpec((3, 3, cout_p, cout_p), lambda n: (0, 0, 0, 0)),
            pl.BlockSpec((1, cout_p), lambda n: (0, 0)),
            pl.BlockSpec((1, cout_p), lambda n: (0, 0)),
        ],
        out_specs=pl.BlockSpec((None, ho, wo, cout_p), lambda n: (n, 0, 0, 0)),
        scratch_shapes=[pltpu.VMEM((rt, cout_p), jnp.bfloat16),   # re-padded h1
                        pltpu.VMEM((ho, wp, cout_p), jnp.float32)],  # pool rows
        compiler_params=pltpu.CompilerParams(
            dimension_semantics=("parallel",),            # megacore-sharded on v7x
            vmem_limit_bytes=vmem_limit,
        ),
        cost_estimate=cost,
    )(x, col_mask, w1, s1, b1, w2, s2, b2)

    out = out[..., :Cout]                                 # drop channel padding
    return jnp.transpose(out, (0, 3, 1, 2))               # NHWC -> NCHW


def _reference(x_nchw, params, eps=1e-5):
    """Plain-JAX/XLA reference for UnetDown (eval-mode BatchNorm, exact GELU)."""
    x = jnp.transpose(x_nchw, (0, 2, 3, 1)).astype(jnp.float32)

    def conv_bn_gelu(h, w, b, gamma, beta, mean, var):
        y = jax.lax.conv_general_dilated(
            h, w, (1, 1), "SAME",
            dimension_numbers=("NHWC", "HWIO", "NHWC")) + b
        y = (y - mean) / jnp.sqrt(var + eps) * gamma + beta
        return jax.nn.gelu(y, approximate=False)

    x1 = conv_bn_gelu(x, params["w1"], params["b1"], params["gamma1"],
                      params["beta1"], params["mean1"], params["var1"])
    x2 = conv_bn_gelu(x1, params["w2"], params["b2"], params["gamma2"],
                      params["beta2"], params["mean2"], params["var2"])
    n, h, w, c = x2.shape
    pooled = x2.reshape(n, h // 2, 2, w // 2, 2, c).max(axis=(2, 4))
    return jnp.transpose(pooled, (0, 3, 1, 2))


if __name__ == "__main__":
    N, Cin, Cout, H, W = 2, 4, 8, 16, 16
    key = jax.random.PRNGKey(0)
    ks = jax.random.split(key, 13)

    params = dict(
        w1=0.1 * jax.random.normal(ks[0], (3, 3, Cin, Cout), jnp.float32),
        b1=0.1 * jax.random.normal(ks[1], (Cout,), jnp.float32),
        gamma1=1.0 + 0.1 * jax.random.normal(ks[2], (Cout,), jnp.float32),
        beta1=0.1 * jax.random.normal(ks[3], (Cout,), jnp.float32),
        mean1=0.1 * jax.random.normal(ks[4], (Cout,), jnp.float32),
        var1=1.0 + 0.1 * jnp.abs(jax.random.normal(ks[5], (Cout,), jnp.float32)),
        w2=0.1 * jax.random.normal(ks[6], (3, 3, Cout, Cout), jnp.float32),
        b2=0.1 * jax.random.normal(ks[7], (Cout,), jnp.float32),
        gamma2=1.0 + 0.1 * jax.random.normal(ks[8], (Cout,), jnp.float32),
        beta2=0.1 * jax.random.normal(ks[9], (Cout,), jnp.float32),
        mean2=0.1 * jax.random.normal(ks[10], (Cout,), jnp.float32),
        var2=1.0 + 0.1 * jnp.abs(jax.random.normal(ks[11], (Cout,), jnp.float32)),
    )
    x = jax.random.normal(ks[12], (N, Cin, H, W), jnp.float32)

    out = unet_down(x, params)
    out = jax.block_until_ready(out)

    ref = _reference(x, params)
    assert out.shape == (N, Cout, H // 2, W // 2), out.shape
    err = float(jnp.max(jnp.abs(out - ref)))
    # bf16 MXU inputs / bf16 h1 with f32 accumulation (+ tanh GELU) -> relaxed tol.
    assert err < 5e-2, f"max abs err = {err}"

    print("KERNEL_OK")
</pallas_src>

<mosaic_0001>
module attributes {stable_mosaic.version = 11 : i64} {
  func.func @kernel(%arg0: i32, %arg1: memref<1x432x128xbf16, #tpu.memory_space<vmem>>, %arg2: memref<384x1xf32, #tpu.memory_space<vmem>>, %arg3: memref<3x3x128x128xbf16, #tpu.memory_space<vmem>>, %arg4: memref<1x128xf32, #tpu.memory_space<vmem>>, %arg5: memref<1x128xf32, #tpu.memory_space<vmem>>, %arg6: memref<3x3x128x128xbf16, #tpu.memory_space<vmem>>, %arg7: memref<1x128xf32, #tpu.memory_space<vmem>>, %arg8: memref<1x128xf32, #tpu.memory_space<vmem>>, %arg9: memref<1x8x8x128xf32, #tpu.memory_space<vmem>>, %arg10: memref<432x128xbf16, #tpu.memory_space<vmem>>, %arg11: memref<8x24x128xf32, #tpu.memory_space<vmem>>) attributes {dimension_semantics = [#tpu.dimension_semantics<parallel>], iteration_bounds = array<i64: 2>, scalar_prefetch = 0 : i64, scratch_operands = 2 : i64, tpu.core_type = #tpu.core_type<tc>, window_params = [{transform_indices = @transform_0, window_bounds = array<i64: 1, 432, 128>}, {pipeline_mode = #tpu.pipeline_mode<synchronous>, transform_indices = @transform_1, window_bounds = array<i64: 384, 1>}, {pipeline_mode = #tpu.pipeline_mode<synchronous>, transform_indices = @transform_2, window_bounds = array<i64: 3, 3, 128, 128>}, {pipeline_mode = #tpu.pipeline_mode<synchronous>, transform_indices = @transform_3, window_bounds = array<i64: 1, 128>}, {pipeline_mode = #tpu.pipeline_mode<synchronous>, transform_indices = @transform_4, window_bounds = array<i64: 1, 128>}, {pipeline_mode = #tpu.pipeline_mode<synchronous>, transform_indices = @transform_5, window_bounds = array<i64: 3, 3, 128, 128>}, {pipeline_mode = #tpu.pipeline_mode<synchronous>, transform_indices = @transform_6, window_bounds = array<i64: 1, 128>}, {pipeline_mode = #tpu.pipeline_mode<synchronous>, transform_indices = @transform_7, window_bounds = array<i64: 1, 128>}, {transform_indices = @transform_8, window_bounds = array<i64: 1, 8, 8, 128>}]} {
    %c0 = arith.constant 0 : index
    %c0_0 = arith.constant 0 : index
    %c0_1 = arith.constant 0 : index
    %0 = vector.load %arg1[%c0, %c0_0, %c0_1] : memref<1x432x128xbf16, #tpu.memory_space<vmem>>, vector<1x384x128xbf16>
    %1 = vector.shape_cast %0 : vector<1x384x128xbf16> to vector<384x128xbf16>
    %c0_2 = arith.constant 0 : index
    %c24 = arith.constant 24 : index
    %c0_3 = arith.constant 0 : index
    %2 = vector.load %arg1[%c0_2, %c24, %c0_3] : memref<1x432x128xbf16, #tpu.memory_space<vmem>>, vector<1x384x128xbf16>
    %3 = vector.shape_cast %2 : vector<1x384x128xbf16> to vector<384x128xbf16>
    %c0_4 = arith.constant 0 : index
    %c48 = arith.constant 48 : index
    %c0_5 = arith.constant 0 : index
    %4 = vector.load %arg1[%c0_4, %c48, %c0_5] : memref<1x432x128xbf16, #tpu.memory_space<vmem>>, vector<1x384x128xbf16>
    %5 = vector.shape_cast %4 : vector<1x384x128xbf16> to vector<384x128xbf16>
    %c0_6 = arith.constant 0 : index
    %c0_7 = arith.constant 0 : index
    %c0_8 = arith.constant 0 : index
    %c0_9 = arith.constant 0 : index
    %6 = vector.load %arg3[%c0_6, %c0_7, %c0_8, %c0_9] : memref<3x3x128x128xbf16, #tpu.memory_space<vmem>>, vector<1x1x128x128xbf16>
    %7 = vector.shape_cast %6 : vector<1x1x128x128xbf16> to vector<128x128xbf16>
    %cst = arith.constant dense<0.000000e+00> : vector<384x128xf32>
    %8 = tpu.matmul %1, %7, %cst {dimension_numbers = #tpu.dot_dimension_numbers<[1], [0], [0], [1], [0, 0, 1, 1], [], []>} : vector<384x128xbf16>, vector<128x128xbf16>, vector<384x128xf32> -> vector<384x128xf32>
    %c1 = arith.constant 1 : index
    %c0_10 = arith.constant 0 : index
    %c0_11 = arith.constant 0 : index
    %c0_12 = arith.constant 0 : index
    %9 = vector.load %arg3[%c1, %c0_10, %c0_11, %c0_12] : memref<3x3x128x128xbf16, #tpu.memory_space<vmem>>, vector<1x1x128x128xbf16>
    %10 = vector.shape_cast %9 : vector<1x1x128x128xbf16> to vector<128x128xbf16>
    %cst_13 = arith.constant dense<0.000000e+00> : vector<384x128xf32>
    %11 = tpu.matmul %3, %10, %cst_13 {dimension_numbers = #tpu.dot_dimension_numbers<[1], [0], [0], [1], [0, 0, 1, 1], [], []>} : vector<384x128xbf16>, vector<128x128xbf16>, vector<384x128xf32> -> vector<384x128xf32>
    %12 = arith.addf %8, %11 : vector<384x128xf32>
    %c2 = arith.constant 2 : index
    %c0_14 = arith.constant 0 : index
    %c0_15 = arith.constant 0 : index
    %c0_16 = arith.constant 0 : index
    %13 = vector.load %arg3[%c2, %c0_14, %c0_15, %c0_16] : memref<3x3x128x128xbf16, #tpu.memory_space<vmem>>, vector<1x1x128x128xbf16>
    %14 = vector.shape_cast %13 : vector<1x1x128x128xbf16> to vector<128x128xbf16>
    %cst_17 = arith.constant dense<0.000000e+00> : vector<384x128xf32>
    %15 = tpu.matmul %5, %14, %cst_17 {dimension_numbers = #tpu.dot_dimension_numbers<[1], [0], [0], [1], [0, 0, 1, 1], [], []>} : vector<384x128xbf16>, vector<128x128xbf16>, vector<384x128xf32> -> vector<384x128xf32>
    %16 = arith.addf %12, %15 : vector<384x128xf32>
    %c0_18 = arith.constant 0 : index
    %c1_19 = arith.constant 1 : index
    %c0_20 = arith.constant 0 : index
    %c0_21 = arith.constant 0 : index
    %17 = vector.load %arg3[%c0_18, %c1_19, %c0_20, %c0_21] : memref<3x3x128x128xbf16, #tpu.memory_space<vmem>>, vector<1x1x128x128xbf16>
    %18 = vector.shape_cast %17 : vector<1x1x128x128xbf16> to vector<128x128xbf16>
    %cst_22 = arith.constant dense<0.000000e+00> : vector<384x128xf32>
    %19 = tpu.matmul %1, %18, %cst_22 {dimension_numbers = #tpu.dot_dimension_numbers<[1], [0], [0], [1], [0, 0, 1, 1], [], []>} : vector<384x128xbf16>, vector<128x128xbf16>, vector<384x128xf32> -> vector<384x128xf32>
    %c1_23 = arith.constant 1 : index
    %c1_24 = arith.constant 1 : index
    %c0_25 = arith.constant 0 : index
    %c0_26 = arith.constant 0 : index
    %20 = vector.load %arg3[%c1_23, %c1_24, %c0_25, %c0_26] : memref<3x3x128x128xbf16, #tpu.memory_space<vmem>>, vector<1x1x128x128xbf16>
    %21 = vector.shape_cast %20 : vector<1x1x128x128xbf16> to vector<128x128xbf16>
    %cst_27 = arith.constant dense<0.000000e+00> : vector<384x128xf32>
    %22 = tpu.matmul %3, %21, %cst_27 {dimension_numbers = #tpu.dot_dimension_numbers<[1], [0], [0], [1], [0, 0, 1, 1], [], []>} : vector<384x128xbf16>, vector<128x128xbf16>, vector<384x128xf32> -> vector<384x128xf32>
    %23 = arith.addf %19, %22 : vector<384x128xf32>
    %c2_28 = arith.constant 2 : index
    %c1_29 = arith.constant 1 : index
    %c0_30 = arith.constant 0 : index
    %c0_31 = arith.constant 0 : index
    %24 = vector.load %arg3[%c2_28, %c1_29, %c0_30, %c0_31] : memref<3x3x128x128xbf16, #tpu.memory_space<vmem>>, vector<1x1x128x128xbf16>
    %25 = vector.shape_cast %24 : vector<1x1x128x128xbf16> to vector<128x128xbf16>
    %cst_32 = arith.constant dense<0.000000e+00> : vector<384x128xf32>
    %26 = tpu.matmul %5, %25, %cst_32 {dimension_numbers = #tpu.dot_dimension_numbers<[1], [0], [0], [1], [0, 0, 1, 1], [], []>} : vector<384x128xbf16>, vector<128x128xbf16>, vector<384x128xf32> -> vector<384x128xf32>
    %27 = arith.addf %23, %26 : vector<384x128xf32>
    %c0_33 = arith.constant 0 : index
    %c2_34 = arith.constant 2 : index
    %c0_35 = arith.constant 0 : index
    %c0_36 = arith.constant 0 : index
    %28 = vector.load %arg3[%c0_33, %c2_34, %c0_35, %c0_36] : memref<3x3x128x128xbf16, #tpu.memory_space<vmem>>, vector<1x1x128x128xbf16>
    %29 = vector.shape_cast %28 : vector<1x1x128x128xbf16> to vector<128x128xbf16>
    %cst_37 = arith.constant dense<0.000000e+00> : vector<384x128xf32>
    %30 = tpu.matmul %1, %29, %cst_37 {dimension_numbers = #tpu.dot_dimension_numbers<[1], [0], [0], [1], [0, 0, 1, 1], [], []>} : vector<384x128xbf16>, vector<128x128xbf16>, vector<384x128xf32> -> vector<384x128xf32>
    %c1_38 = arith.constant 1 : index
    %c2_39 = arith.constant 2 : index
    %c0_40 = arith.constant 0 : index
    %c0_41 = arith.constant 0 : index
    %31 = vector.load %arg3[%c1_38, %c2_39, %c0_40, %c0_41] : memref<3x3x128x128xbf16, #tpu.memory_space<vmem>>, vector<1x1x128x128xbf16>
    %32 = vector.shape_cast %31 : vector<1x1x128x128xbf16> to vector<128x128xbf16>
    %cst_42 = arith.constant dense<0.000000e+00> : vector<384x128xf32>
    %33 = tpu.matmul %3, %32, %cst_42 {dimension_numbers = #tpu.dot_dimension_numbers<[1], [0], [0], [1], [0, 0, 1, 1], [], []>} : vector<384x128xbf16>, vector<128x128xbf16>, vector<384x128xf32> -> vector<384x128xf32>
    %34 = arith.addf %30, %33 : vector<384x128xf32>
    %c2_43 = arith.constant 2 : index
    %c2_44 = arith.constant 2 : index
    %c0_45 = arith.constant 0 : index
    %c0_46 = arith.constant 0 : index
    %35 = vector.load %arg3[%c2_43, %c2_44, %c0_45, %c0_46] : memref<3x3x128x128xbf16, #tpu.memory_space<vmem>>, vector<1x1x128x128xbf16>
    %36 = vector.shape_cast %35 : vector<1x1x128x128xbf16> to vector<128x128xbf16>
    %cst_47 = arith.constant dense<0.000000e+00> : vector<384x128xf32>
    %37 = tpu.matmul %5, %36, %cst_47 {dimension_numbers = #tpu.dot_dimension_numbers<[1], [0], [0], [1], [0, 0, 1, 1], [], []>} : vector<384x128xbf16>, vector<128x128xbf16>, vector<384x128xf32> -> vector<384x128xf32>
    %38 = arith.addf %34, %37 : vector<384x128xf32>
    %c1_i32 = arith.constant 1 : i32
    %39 = tpu.dynamic_rotate %16 by %c1_i32 dim 0 : vector<384x128xf32>, i32 -> vector<384x128xf32>
    %40 = arith.addf %39, %27 : vector<384x128xf32>
    %c383_i32 = arith.constant 383 : i32
    %41 = tpu.dynamic_rotate %38 by %c383_i32 dim 0 : vector<384x128xf32>, i32 -> vector<384x128xf32>
    %42 = arith.addf %40, %41 : vector<384x128xf32>
    %c0_48 = arith.constant 0 : index
    %c0_49 = arith.constant 0 : index
    %43 = vector.load %arg4[%c0_48, %c0_49] : memref<1x128xf32, #tpu.memory_space<vmem>>, vector<1x128xf32>
    %44 = vector.broadcast %43 : vector<1x128xf32> to vector<384x128xf32>
    %45 = arith.mulf %42, %44 : vector<384x128xf32>
    %c0_50 = arith.constant 0 : index
    %c0_51 = arith.constant 0 : index
    %46 = vector.load %arg5[%c0_50, %c0_51] : memref<1x128xf32, #tpu.memory_space<vmem>>, vector<1x128xf32>
    %47 = vector.broadcast %46 : vector<1x128xf32> to vector<384x128xf32>
    %48 = arith.addf %45, %47 : vector<384x128xf32>
    %cst_52 = arith.constant 5.000000e-01 : f32
    %49 = vector.broadcast %cst_52 : f32 to vector<384x128xf32>
    %50 = arith.mulf %49, %48 : vector<384x128xf32>
    %cst_53 = arith.constant 4.471500e-02 : f32
    %51 = vector.broadcast %cst_53 : f32 to vector<384x128xf32>
    %52 = arith.mulf %51, %48 : vector<384x128xf32>
    %53 = arith.mulf %52, %48 : vector<384x128xf32>
    %54 = arith.mulf %53, %48 : vector<384x128xf32>
    %55 = arith.addf %48, %54 : vector<384x128xf32>
    %cst_54 = arith.constant 0.797884583 : f32
    %56 = vector.broadcast %cst_54 : f32 to vector<384x128xf32>
    %57 = arith.mulf %56, %55 : vector<384x128xf32>
    %58 = math.tanh %57 : vector<384x128xf32>
    %cst_55 = arith.constant 1.000000e+00 : f32
    %59 = vector.broadcast %cst_55 : f32 to vector<384x128xf32>
    %60 = arith.addf %59, %58 : vector<384x128xf32>
    %61 = arith.mulf %50, %60 : vector<384x128xf32>
    %c0_56 = arith.constant 0 : index
    %c0_57 = arith.constant 0 : index
    %62 = vector.load %arg2[%c0_56, %c0_57] : memref<384x1xf32, #tpu.memory_space<vmem>>, vector<384x1xf32>
    %63 = vector.broadcast %62 : vector<384x1xf32> to vector<384x128xf32>
    %64 = arith.mulf %61, %63 : vector<384x128xf32>
    %cst_58 = arith.constant 0.000000e+00 : bf16
    %65 = vector.broadcast %cst_58 : bf16 to vector<24x128xbf16>
    %c0_59 = arith.constant 0 : index
    %c0_60 = arith.constant 0 : index
    %66 = vector.load %arg10[%c0_59, %c0_60] : memref<432x128xbf16, #tpu.memory_space<vmem>>, vector<24x128xbf16>
    tpu.vector_store %arg10[%c0_59, %c0_60], %65 {strides = array<i32>} : memref<432x128xbf16, #tpu.memory_space<vmem>>, vector<24x128xbf16>,
    %c408 = arith.constant 408 : index
    %c0_61 = arith.constant 0 : index
    %67 = vector.load %arg10[%c408, %c0_61] : memref<432x128xbf16, #tpu.memory_space<vmem>>, vector<24x128xbf16>
    tpu.vector_store %arg10[%c408, %c0_61], %65 {strides = array<i32>} : memref<432x128xbf16, #tpu.memory_space<vmem>>, vector<24x128xbf16>,
    %68 = arith.truncf %64 : vector<384x128xf32> to vector<384x128xbf16>
    %c24_62 = arith.constant 24 : index
    %c0_63 = arith.constant 0 : index
    %69 = vector.load %arg10[%c24_62, %c0_63] : memref<432x128xbf16, #tpu.memory_space<vmem>>, vector<384x128xbf16>
    tpu.vector_store %arg10[%c24_62, %c0_63], %68 {strides = array<i32>} : memref<432x128xbf16, #tpu.memory_space<vmem>>, vector<384x128xbf16>,
    %c0_64 = arith.constant 0 : index
    %c0_65 = arith.constant 0 : index
    %70 = vector.load %arg10[%c0_64, %c0_65] : memref<432x128xbf16, #tpu.memory_space<vmem>>, vector<384x128xbf16>
    %c24_66 = arith.constant 24 : index
    %c0_67 = arith.constant 0 : index
    %71 = vector.load %arg10[%c24_66, %c0_67] : memref<432x128xbf16, #tpu.memory_space<vmem>>, vector<384x128xbf16>
    %c48_68 = arith.constant 48 : index
    %c0_69 = arith.constant 0 : index
    %72 = vector.load %arg10[%c48_68, %c0_69] : memref<432x128xbf16, #tpu.memory_space<vmem>>, vector<384x128xbf16>
    %c0_70 = arith.constant 0 : index
    %c0_71 = arith.constant 0 : index
    %c0_72 = arith.constant 0 : index
    %c0_73 = arith.constant 0 : index
    %73 = vector.load %arg6[%c0_70, %c0_71, %c0_72, %c0_73] : memref<3x3x128x128xbf16, #tpu.memory_space<vmem>>, vector<1x1x128x128xbf16>
    %74 = vector.shape_cast %73 : vector<1x1x128x128xbf16> to vector<128x128xbf16>
    %cst_74 = arith.constant dense<0.000000e+00> : vector<384x128xf32>
    %75 = tpu.matmul %70, %74, %cst_74 {dimension_numbers = #tpu.dot_dimension_numbers<[1], [0], [0], [1], [0, 0, 1, 1], [], []>} : vector<384x128xbf16>, vector<128x128xbf16>, vector<384x128xf32> -> vector<384x128xf32>
    %c1_75 = arith.constant 1 : index
    %c0_76 = arith.constant 0 : index
    %c0_77 = arith.constant 0 : index
    %c0_78 = arith.constant 0 : index
    %76 = vector.load %arg6[%c1_75, %c0_76, %c0_77, %c0_78] : memref<3x3x128x128xbf16, #tpu.memory_space<vmem>>, vector<1x1x128x128xbf16>
    %77 = vector.shape_cast %76 : vector<1x1x128x128xbf16> to vector<128x128xbf16>
    %cst_79 = arith.constant dense<0.000000e+00> : vector<384x128xf32>
    %78 = tpu.matmul %71, %77, %cst_79 {dimension_numbers = #tpu.dot_dimension_numbers<[1], [0], [0], [1], [0, 0, 1, 1], [], []>} : vector<384x128xbf16>, vector<128x128xbf16>, vector<384x128xf32> -> vector<384x128xf32>
    %79 = arith.addf %75, %78 : vector<384x128xf32>
    %c2_80 = arith.constant 2 : index
    %c0_81 = arith.constant 0 : index
    %c0_82 = arith.constant 0 : index
    %c0_83 = arith.constant 0 : index
    %80 = vector.load %arg6[%c2_80, %c0_81, %c0_82, %c0_83] : memref<3x3x128x128xbf16, #tpu.memory_space<vmem>>, vector<1x1x128x128xbf16>
    %81 = vector.shape_cast %80 : vector<1x1x128x128xbf16> to vector<128x128xbf16>
    %cst_84 = arith.constant dense<0.000000e+00> : vector<384x128xf32>
    %82 = tpu.matmul %72, %81, %cst_84 {dimension_numbers = #tpu.dot_dimension_numbers<[1], [0], [0], [1], [0, 0, 1, 1], [], []>} : vector<384x128xbf16>, vector<128x128xbf16>, vector<384x128xf32> -> vector<384x128xf32>
    %83 = arith.addf %79, %82 : vector<384x128xf32>
    %c0_85 = arith.constant 0 : index
    %c1_86 = arith.constant 1 : index
    %c0_87 = arith.constant 0 : index
    %c0_88 = arith.constant 0 : index
    %84 = vector.load %arg6[%c0_85, %c1_86, %c0_87, %c0_88] : memref<3x3x128x128xbf16, #tpu.memory_space<vmem>>, vector<1x1x128x128xbf16>
    %85 = vector.shape_cast %84 : vector<1x1x128x128xbf16> to vector<128x128xbf16>
    %cst_89 = arith.constant dense<0.000000e+00> : vector<384x128xf32>
    %86 = tpu.matmul %70, %85, %cst_89 {dimension_numbers = #tpu.dot_dimension_numbers<[1], [0], [0], [1], [0, 0, 1, 1], [], []>} : vector<384x128xbf16>, vector<128x128xbf16>, vector<384x128xf32> -> vector<384x128xf32>
    %c1_90 = arith.constant 1 : index
    %c1_91 = arith.constant 1 : index
    %c0_92 = arith.constant 0 : index
    %c0_93 = arith.constant 0 : index
    %87 = vector.load %arg6[%c1_90, %c1_91, %c0_92, %c0_93] : memref<3x3x128x128xbf16, #tpu.memory_space<vmem>>, vector<1x1x128x128xbf16>
    %88 = vector.shape_cast %87 : vector<1x1x128x128xbf16> to vector<128x128xbf16>
    %cst_94 = arith.constant dense<0.000000e+00> : vector<384x128xf32>
    %89 = tpu.matmul %71, %88, %cst_94 {dimension_numbers = #tpu.dot_dimension_numbers<[1], [0], [0], [1], [0, 0, 1, 1], [], []>} : vector<384x128xbf16>, vector<128x128xbf16>, vector<384x128xf32> -> vector<384x128xf32>
    %90 = arith.addf %86, %89 : vector<384x128xf32>
    %c2_95 = arith.constant 2 : index
    %c1_96 = arith.constant 1 : index
    %c0_97 = arith.constant 0 : index
    %c0_98 = arith.constant 0 : index
    %91 = vector.load %arg6[%c2_95, %c1_96, %c0_97, %c0_98] : memref<3x3x128x128xbf16, #tpu.memory_space<vmem>>, vector<1x1x128x128xbf16>
    %92 = vector.shape_cast %91 : vector<1x1x128x128xbf16> to vector<128x128xbf16>
    %cst_99 = arith.constant dense<0.000000e+00> : vector<384x128xf32>
    %93 = tpu.matmul %72, %92, %cst_99 {dimension_numbers = #tpu.dot_dimension_numbers<[1], [0], [0], [1], [0, 0, 1, 1], [], []>} : vector<384x128xbf16>, vector<128x128xbf16>, vector<384x128xf32> -> vector<384x128xf32>
    %94 = arith.addf %90, %93 : vector<384x128xf32>
    %c0_100 = arith.constant 0 : index
    %c2_101 = arith.constant 2 : index
    %c0_102 = arith.constant 0 : index
    %c0_103 = arith.constant 0 : index
    %95 = vector.load %arg6[%c0_100, %c2_101, %c0_102, %c0_103] : memref<3x3x128x128xbf16, #tpu.memory_space<vmem>>, vector<1x1x128x128xbf16>
    %96 = vector.shape_cast %95 : vector<1x1x128x128xbf16> to vector<128x128xbf16>
    %cst_104 = arith.constant dense<0.000000e+00> : vector<384x128xf32>
    %97 = tpu.matmul %70, %96, %cst_104 {dimension_numbers = #tpu.dot_dimension_numbers<[1], [0], [0], [1], [0, 0, 1, 1], [], []>} : vector<384x128xbf16>, vector<128x128xbf16>, vector<384x128xf32> -> vector<384x128xf32>
    %c1_105 = arith.constant 1 : index
    %c2_106 = arith.constant 2 : index
    %c0_107 = arith.constant 0 : index
    %c0_108 = arith.constant 0 : index
    %98 = vector.load %arg6[%c1_105, %c2_106, %c0_107, %c0_108] : memref<3x3x128x128xbf16, #tpu.memory_space<vmem>>, vector<1x1x128x128xbf16>
    %99 = vector.shape_cast %98 : vector<1x1x128x128xbf16> to vector<128x128xbf16>
    %cst_109 = arith.constant dense<0.000000e+00> : vector<384x128xf32>
    %100 = tpu.matmul %71, %99, %cst_109 {dimension_numbers = #tpu.dot_dimension_numbers<[1], [0], [0], [1], [0, 0, 1, 1], [], []>} : vector<384x128xbf16>, vector<128x128xbf16>, vector<384x128xf32> -> vector<384x128xf32>
    %101 = arith.addf %97, %100 : vector<384x128xf32>
    %c2_110 = arith.constant 2 : index
    %c2_111 = arith.constant 2 : index
    %c0_112 = arith.constant 0 : index
    %c0_113 = arith.constant 0 : index
    %102 = vector.load %arg6[%c2_110, %c2_111, %c0_112, %c0_113] : memref<3x3x128x128xbf16, #tpu.memory_space<vmem>>, vector<1x1x128x128xbf16>
    %103 = vector.shape_cast %102 : vector<1x1x128x128xbf16> to vector<128x128xbf16>
    %cst_114 = arith.constant dense<0.000000e+00> : vector<384x128xf32>
    %104 = tpu.matmul %72, %103, %cst_114 {dimension_numbers = #tpu.dot_dimension_numbers<[1], [0], [0], [1], [0, 0, 1, 1], [], []>} : vector<384x128xbf16>, vector<128x128xbf16>, vector<384x128xf32> -> vector<384x128xf32>
    %105 = arith.addf %101, %104 : vector<384x128xf32>
    %c1_i32_115 = arith.constant 1 : i32
    %106 = tpu.dynamic_rotate %83 by %c1_i32_115 dim 0 : vector<384x128xf32>, i32 -> vector<384x128xf32>
    %107 = arith.addf %106, %94 : vector<384x128xf32>
    %c383_i32_116 = arith.constant 383 : i32
    %108 = tpu.dynamic_rotate %105 by %c383_i32_116 dim 0 : vector<384x128xf32>, i32 -> vector<384x128xf32>
    %109 = arith.addf %107, %108 : vector<384x128xf32>
    %c0_117 = arith.constant 0 : index
    %c0_118 = arith.constant 0 : index
    %110 = vector.load %arg7[%c0_117, %c0_118] : memref<1x128xf32, #tpu.memory_space<vmem>>, vector<1x128xf32>
    %111 = vector.broadcast %110 : vector<1x128xf32> to vector<384x128xf32>
    %112 = arith.mulf %109, %111 : vector<384x128xf32>
    %c0_119 = arith.constant 0 : index
    %c0_120 = arith.constant 0 : index
    %113 = vector.load %arg8[%c0_119, %c0_120] : memref<1x128xf32, #tpu.memory_space<vmem>>, vector<1x128xf32>
    %114 = vector.broadcast %113 : vector<1x128xf32> to vector<384x128xf32>
    %115 = arith.addf %112, %114 : vector<384x128xf32>
    %cst_121 = arith.constant 5.000000e-01 : f32
    %116 = vector.broadcast %cst_121 : f32 to vector<384x128xf32>
    %117 = arith.mulf %116, %115 : vector<384x128xf32>
    %cst_122 = arith.constant 4.471500e-02 : f32
    %118 = vector.broadcast %cst_122 : f32 to vector<384x128xf32>
    %119 = arith.mulf %118, %115 : vector<384x128xf32>
    %120 = arith.mulf %119, %115 : vector<384x128xf32>
    %121 = arith.mulf %120, %115 : vector<384x128xf32>
    %122 = arith.addf %115, %121 : vector<384x128xf32>
    %cst_123 = arith.constant 0.797884583 : f32
    %123 = vector.broadcast %cst_123 : f32 to vector<384x128xf32>
    %124 = arith.mulf %123, %122 : vector<384x128xf32>
    %125 = math.tanh %124 : vector<384x128xf32>
    %cst_124 = arith.constant 1.000000e+00 : f32
    %126 = vector.broadcast %cst_124 : f32 to vector<384x128xf32>
    %127 = arith.addf %126, %125 : vector<384x128xf32>
    %128 = arith.mulf %117, %127 : vector<384x128xf32>
    %129 = vector.shape_cast %128 : vector<384x128xf32> to vector<8x48x128xf32>
    %130 = vector.extract_strided_slice %129 {offsets = [0, 0, 0], sizes = [8, 24, 128], strides = [1, 1, 1]} : vector<8x48x128xf32> to vector<8x24x128xf32>
    %131 = vector.extract_strided_slice %129 {offsets = [0, 24, 0], sizes = [8, 24, 128], strides = [1, 1, 1]} : vector<8x48x128xf32> to vector<8x24x128xf32>
    %132 = arith.maximumf %130, %131 : vector<8x24x128xf32>
    %c0_125 = arith.constant 0 : index
    %c0_126 = arith.constant 0 : index
    %c0_127 = arith.constant 0 : index
    %133 = vector.load %arg11[%c0_125, %c0_126, %c0_127] : memref<8x24x128xf32, #tpu.memory_space<vmem>>, vector<8x24x128xf32>
    tpu.vector_store %arg11[%c0_125, %c0_126, %c0_127], %132 {strides = array<i32>} : memref<8x24x128xf32, #tpu.memory_space<vmem>>, vector<8x24x128xf32>,
    %c0_128 = arith.constant 0 : index
    %c1_129 = arith.constant 1 : index
    %c0_130 = arith.constant 0 : index
    %134 = tpu.strided_load %arg11[%c0_128, %c1_129, %c0_130] {strides = array<i32: 1, 2, 1>} : memref<8x24x128xf32, #tpu.memory_space<vmem>>, vector<8x8x128xf32>
    %c0_131 = arith.constant 0 : index
    %c2_132 = arith.constant 2 : index
    %c0_133 = arith.constant 0 : index
    %135 = tpu.strided_load %arg11[%c0_131, %c2_132, %c0_133] {strides = array<i32: 1, 2, 1>} : memref<8x24x128xf32, #tpu.memory_space<vmem>>, vector<8x8x128xf32>
    %136 = arith.maximumf %134, %135 : vector<8x8x128xf32>
    %c0_134 = arith.constant 0 : index
    %c0_135 = arith.constant 0 : index
    %c0_136 = arith.constant 0 : index
    %c0_137 = arith.constant 0 : index
    %137 = vector.load %arg9[%c0_134, %c0_135, %c0_136, %c0_137] : memref<1x8x8x128xf32, #tpu.memory_space<vmem>>, vector<1x8x8x128xf32>
    %138 = vector.shape_cast %137 : vector<1x8x8x128xf32> to vector<8x8x128xf32>
    %139 = vector.shape_cast %136 : vector<8x8x128xf32> to vector<1x8x8x128xf32>
    tpu.vector_store %arg9[%c0_134, %c0_135, %c0_136, %c0_137], %139 {strides = array<i32>} : memref<1x8x8x128xf32, #tpu.memory_space<vmem>>, vector<1x8x8x128xf32>,
    return
  }
  func.func @transform_0(%arg0: i32) -> (i32, i32, i32) {
    %c0_i32 = arith.constant 0 : i32
    %c0_i32_0 = arith.constant 0 : i32
    %c0_i32_1 = arith.constant 0 : i32
    return %arg0, %c0_i32, %c0_i32_0 : i32, i32, i32
  }
  func.func @transform_1(%arg0: i32) -> (i32, i32) {
    %c0_i32 = arith.constant 0 : i32
    %c0_i32_0 = arith.constant 0 : i32
    %c0_i32_1 = arith.constant 0 : i32
    return %c0_i32, %c0_i32_0 : i32, i32
  }
  func.func @transform_2(%arg0: i32) -> (i32, i32, i32, i32) {
    %c0_i32 = arith.constant 0 : i32
    %c0_i32_0 = arith.constant 0 : i32
    %c0_i32_1 = arith.constant 0 : i32
    %c0_i32_2 = arith.constant 0 : i32
    %c0_i32_3 = arith.constant 0 : i32
    return %c0_i32, %c0_i32_0, %c0_i32_1, %c0_i32_2 : i32, i32, i32, i32
  }
  func.func @transform_3(%arg0: i32) -> (i32, i32) {
    %c0_i32 = arith.constant 0 : i32
    %c0_i32_0 = arith.constant 0 : i32
    %c0_i32_1 = arith.constant 0 : i32
    return %c0_i32, %c0_i32_0 : i32, i32
  }
  func.func @transform_4(%arg0: i32) -> (i32, i32) {
    %c0_i32 = arith.constant 0 : i32
    %c0_i32_0 = arith.constant 0 : i32
    %c0_i32_1 = arith.constant 0 : i32
    return %c0_i32, %c0_i32_0 : i32, i32
  }
  func.func @transform_5(%arg0: i32) -> (i32, i32, i32, i32) {
    %c0_i32 = arith.constant 0 : i32
    %c0_i32_0 = arith.constant 0 : i32
    %c0_i32_1 = arith.constant 0 : i32
    %c0_i32_2 = arith.constant 0 : i32
    %c0_i32_3 = arith.constant 0 : i32
    return %c0_i32, %c0_i32_0, %c0_i32_1, %c0_i32_2 : i32, i32, i32, i32
  }
  func.func @transform_6(%arg0: i32) -> (i32, i32) {
    %c0_i32 = arith.constant 0 : i32
    %c0_i32_0 = arith.constant 0 : i32
    %c0_i32_1 = arith.constant 0 : i32
    return %c0_i32, %c0_i32_0 : i32, i32
  }
  func.func @transform_7(%arg0: i32) -> (i32, i32) {
    %c0_i32 = arith.constant 0 : i32
    %c0_i32_0 = arith.constant 0 : i32
    %c0_i32_1 = arith.constant 0 : i32
    return %c0_i32, %c0_i32_0 : i32, i32
  }
  func.func @transform_8(%arg0: i32) -> (i32, i32, i32, i32) {
    %c0_i32 = arith.constant 0 : i32
    %c0_i32_0 = arith.constant 0 : i32
    %c0_i32_1 = arith.constant 0 : i32
    %c0_i32_2 = arith.constant 0 : i32
    return %arg0, %c0_i32, %c0_i32_0, %c0_i32_1 : i32, i32, i32, i32
  }
}

</mosaic_0001>

<bundles_post_ra>
// kernel: tile.8
= control target key start
LH: loop header
LB: loop body
LE: loop exit
PB: predicated region body
PF: predicated region fallthrough
CT: control target
= control target key end

     0   :  { %s28_s0 = inlined_call_operand.vmem [shape: f32[24], index: 0, kind: input, shape index: {}]   ;;  %s29_s1 = inlined_call_operand.vmem [shape: f32[16,24], index: 1, kind: output, shape index: {}]  }
   0x1   :  { %v4_v0 = vld [vmem:[%s28_s0] ss:$0 sm:$0xff] }
   0x2   :  { %5 = vst [vmem:[%s29_s1] sm:$0xff] %v4_v0  ;;  %8 = vst [vmem:[%s29_s1 + $0x8] sm:$0xff] %v4_v0 }

// kernel: tile.0
= control target key start
LH: loop header
LB: loop body
LE: loop exit
PB: predicated region body
PF: predicated region fallthrough
CT: control target
= control target key end

     0   :  { %s821_s8 = smov 126   ;;  %s822_s9 = smov 127   ;;  %vm3_vm0 = vcmask 7168   ;;  %s1630_s0 = inlined_call_operand.vmem [shape: f32[16,24], index: 0, kind: input, shape index: {}]   ;;  %s1631_s1 = inlined_call_operand.vmem [shape: f32[384,1], index: 1, kind: output, shape index: {}]  }
   0x1   :  { %v38_v0 = vld.sshfl [vmem:[%s1630_s0] sm:$0xff pattern:$0x56741230]   ;;  %v604_v1 = vld.sshfl [vmem:[%s1630_s0 + $0x8] sm:$0xff pattern:$0x56741230]  }
   0x2   :  { %39 = vrot.lane.b32.xlu1 %v38_v0, %s821_s8  ;;  %14 = vrot.lane.b32.xlu0 %v38_v0, %s822_s9  ;;  %s823_s12 = smov 125   ;;  %s824_s13 = smov 124   ;;  %v658_v2 = vld.sshfl [vmem:[%s1630_s0 + $0x8] sm:$0xff pattern:$0x67452301]   ;;  %v2_v6 = vld [vmem:[%s1630_s0] sm:$0xff]  }
   0x3   :  { %s825_s14 = smov 123   ;;  %s826_s15 = smov 122   ;;  %v188_v3 = vld.sshfl [vmem:[%s1630_s0] sm:$0xff pattern:$0x67452301]   ;;  %v588_v7 = vld [vmem:[%s1630_s0 + $0x8] sm:$0xff]  }
   0x4   :  { %s827_s16 = smov 121   ;;  %s828_s21 = smov 120   ;;  %v730_v4 = vld.sshfl [vmem:[%s1630_s0 + $0x8] sm:$0xff pattern:$0x74563012]  }
   0x5   :  { %s829_s22 = smov 119   ;;  %s830_s23 = smov 118   ;;  %v388_v5 = vld.sshfl [vmem:[%s1630_s0] sm:$0xff pattern:$0x74563012]  }
   0x6   :  { %52 = vrot.lane.b32.xlu1 %v604_v1, %s821_s8  ;;  %27 = vrot.lane.b32.xlu0 %v604_v1, %s822_s9  ;;  %s831_s24 = smov 117   ;;  %s832_s25 = smov 116   ;;  %4 = vst.msk [vmem:[%s1631_s1] ss:$24 sm:$0xf] %vm3_vm0, %v2_v6  }
   0x7   :  { %s833_s26 = smov 115   ;;  %s834_s27 = smov 114   ;;  %5 = vst.msk [vmem:[%s1631_s1] ss:$24 sm:$0xf0] %vm3_vm0, %v2_v6  }
   0x8   :  { %s835_s28 = smov 113   ;;  %s836_s4 = smov 112   ;;  %589 = vst.msk [vmem:[%s1631_s1 + $0xc0] ss:$24 sm:$0xf] %vm3_vm0, %v588_v7  }
   0x9   :  { %s837_s5 = smov 111   ;;  %s838_s6 = smov 110   ;;  %590 = vst.msk [vmem:[%s1631_s1 + $0xc0] ss:$24 sm:$0xf0] %vm3_vm0, %v588_v7  }
   0xa   :  { %77 = vrot.lane.b32.xlu1 %v604_v1, %s823_s12  ;;  %64 = vrot.lane.b32.xlu0 %v38_v0, %s823_s12  ;;  %s839_s7 = smov 109   ;;  %s840_s19 = smov 108  }
   0xb   :  { %s841_s20 = smov 107  }
   0xe   :  { %102 = vrot.lane.b32.xlu1 %v604_v1, %s824_s13  ;;  %89 = vrot.lane.b32.xlu0 %v38_v0, %s824_s13 }
  0x12   :  { %127 = vrot.lane.b32.xlu1 %v604_v1, %s825_s14  ;;  %114 = vrot.lane.b32.xlu0 %v38_v0, %s825_s14 }
  0x16   :  { %152 = vrot.lane.b32.xlu1 %v604_v1, %s826_s15  ;;  %139 = vrot.lane.b32.xlu0 %v38_v0, %s826_s15 }
  0x1a   :  { %177 = vrot.lane.b32.xlu1 %v604_v1, %s827_s16  ;;  %164 = vrot.lane.b32.xlu0 %v38_v0, %s827_s16 }
  0x1e   :  { %202 = vrot.lane.b32.xlu1 %v658_v2, %s828_s21  ;;  %189 = vrot.lane.b32.xlu0 %v188_v3, %s828_s21  ;;  %s842_s21 = smov 106  }
  0x22   :  { %227 = vrot.lane.b32.xlu1 %v658_v2, %s829_s22  ;;  %214 = vrot.lane.b32.xlu0 %v188_v3, %s829_s22  ;;  %s843_s22 = smov 105  }
  0x26   :  { %252 = vrot.lane.b32.xlu1 %v658_v2, %s830_s23  ;;  %239 = vrot.lane.b32.xlu0 %v188_v3, %s830_s23 }
  0x2a   :  { %277 = vrot.lane.b32.xlu1 %v658_v2, %s831_s24  ;;  %264 = vrot.lane.b32.xlu0 %v188_v3, %s831_s24 }
  0x2e   :  { %302 = vrot.lane.b32.xlu1 %v658_v2, %s832_s25  ;;  %289 = vrot.lane.b32.xlu0 %v188_v3, %s832_s25 }
  0x32   :  { %327 = vrot.lane.b32.xlu1 %v658_v2, %s833_s26  ;;  %314 = vrot.lane.b32.xlu0 %v188_v3, %s833_s26 }
  0x36   :  { %352 = vrot.lane.b32.xlu1 %v658_v2, %s834_s27  ;;  %339 = vrot.lane.b32.xlu0 %v188_v3, %s834_s27 }
  0x3a   :  { %377 = vrot.lane.b32.xlu1 %v658_v2, %s835_s28  ;;  %364 = vrot.lane.b32.xlu0 %v188_v3, %s835_s28 }
  0x3e   :  { %402 = vrot.lane.b32.xlu1 %v730_v4, %s836_s4  ;;  %389 = vrot.lane.b32.xlu0 %v388_v5, %s836_s4 }
  0x42   :  { %427 = vrot.lane.b32.xlu1 %v730_v4, %s837_s5  ;;  %414 = vrot.lane.b32.xlu0 %v388_v5, %s837_s5 }
  0x46   :  { %452 = vrot.lane.b32.xlu1 %v730_v4, %s838_s6  ;;  %439 = vrot.lane.b32.xlu0 %v388_v5, %s838_s6 }
  0x4a   :  { %477 = vrot.lane.b32.xlu1 %v730_v4, %s839_s7  ;;  %464 = vrot.lane.b32.xlu0 %v388_v5, %s839_s7 }
  0x4e   :  { %502 = vrot.lane.b32.xlu1 %v730_v4, %s840_s19  ;;  %489 = vrot.lane.b32.xlu0 %v388_v5, %s840_s19 }
  0x52   :  { %527 = vrot.lane.b32.xlu1 %v730_v4, %s841_s20  ;;  %514 = vrot.lane.b32.xlu0 %v388_v5, %s841_s20 }
  0x56   :  { %552 = vrot.lane.b32.xlu1 %v730_v4, %s842_s21  ;;  %539 = vrot.lane.b32.xlu0 %v388_v5, %s842_s21 }
  0x5a   :  { %577 = vrot.lane.b32.xlu1 %v730_v4, %s843_s22  ;;  %564 = vrot.lane.b32.xlu0 %v388_v5, %s843_s22 }
  0x74   :  { %v40_v8 = vpop.permute.xlu1 %39   ;;  %v15_v9 = vpop.permute.xlu0 %14  }
  0x75   :  { %600 = vst.msk [vmem:[%s1631_s1 + $0x2] ss:$72 sm:$0x3] %vm3_vm0, %v40_v8   ;;  %601 = vst.msk [vmem:[%s1631_s1 + $0x62] ss:$-24 sm:$0xc] %vm3_vm0, %v40_v8  }
  0x76   :  { %602 = vst.msk [vmem:[%s1631_s1 - $0xbe] ss:$72 sm:$0x30] %vm3_vm0, %v40_v8   ;;  %603 = vst.msk [vmem:[%s1631_s1 + $0x122] ss:$-24 sm:$0xc0] %vm3_vm0, %v40_v8  }
  0x77   :  { %591 = vst.msk [vmem:[%s1631_s1 + $0x1] ss:$72 sm:$0x3] %vm3_vm0, %v15_v9   ;;  %592 = vst.msk [vmem:[%s1631_s1 + $0x61] ss:$-24 sm:$0xc] %vm3_vm0, %v15_v9  }
  0x78   :  { %593 = vst.msk [vmem:[%s1631_s1 - $0xbf] ss:$72 sm:$0x30] %vm3_vm0, %v15_v9   ;;  %594 = vst.msk [vmem:[%s1631_s1 + $0x121] ss:$-24 sm:$0xc0] %vm3_vm0, %v15_v9   ;;  %v53_v10 = vpop.permute.xlu1 %52   ;;  %v28_v11 = vpop.permute.xlu0 %27  }
  0x79   :  { %605 = vst.msk [vmem:[%s1631_s1 + $0xc2] ss:$72 sm:$0x3] %vm3_vm0, %v53_v10   ;;  %606 = vst.msk [vmem:[%s1631_s1 + $0x122] ss:$-24 sm:$0xc] %vm3_vm0, %v53_v10  }
  0x7a   :  { %607 = vst.msk [vmem:[%s1631_s1 + $0x2] ss:$72 sm:$0x30] %vm3_vm0, %v53_v10   ;;  %608 = vst.msk [vmem:[%s1631_s1 + $0x1e2] ss:$-24 sm:$0xc0] %vm3_vm0, %v53_v10  }
  0x7b   :  { %596 = vst.msk [vmem:[%s1631_s1 + $0xc1] ss:$72 sm:$0x3] %vm3_vm0, %v28_v11   ;;  %597 = vst.msk [vmem:[%s1631_s1 + $0x121] ss:$-24 sm:$0xc] %vm3_vm0, %v28_v11  }
  0x7c   :  { %598 = vst.msk [vmem:[%s1631_s1 + $0x1] ss:$72 sm:$0x30] %vm3_vm0, %v28_v11   ;;  %599 = vst.msk [vmem:[%s1631_s1 + $0x1e1] ss:$-24 sm:$0xc0] %vm3_vm0, %v28_v11   ;;  %v78_v12 = vpop.permute.xlu1 %77   ;;  %v65_v13 = vpop.permute.xlu0 %64  }
  0x7d   :  { %614 = vst.msk [vmem:[%s1631_s1 + $0xc3] ss:$72 sm:$0x3] %vm3_vm0, %v78_v12   ;;  %615 = vst.msk [vmem:[%s1631_s1 + $0x123] ss:$-24 sm:$0xc] %vm3_vm0, %v78_v12  }
  0x7e   :  { %616 = vst.msk [vmem:[%s1631_s1 + $0x3] ss:$72 sm:$0x30] %vm3_vm0, %v78_v12   ;;  %617 = vst.msk [vmem:[%s1631_s1 + $0x1e3] ss:$-24 sm:$0xc0] %vm3_vm0, %v78_v12  }
  0x7f   :  { %609 = vst.msk [vmem:[%s1631_s1 + $0x3] ss:$72 sm:$0x3] %vm3_vm0, %v65_v13   ;;  %610 = vst.msk [vmem:[%s1631_s1 + $0x63] ss:$-24 sm:$0xc] %vm3_vm0, %v65_v13  }
  0x80   :  { %611 = vst.msk [vmem:[%s1631_s1 - $0xbd] ss:$72 sm:$0x30] %vm3_vm0, %v65_v13   ;;  %612 = vst.msk [vmem:[%s1631_s1 + $0x123] ss:$-24 sm:$0xc0] %vm3_vm0, %v65_v13   ;;  %v103_v14 = vpop.permute.xlu1 %102   ;;  %v90_v15 = vpop.permute.xlu0 %89  }
  0x81   :  { %623 = vst.msk [vmem:[%s1631_s1 + $0xc4] ss:$72 sm:$0x3] %vm3_vm0, %v103_v14   ;;  %624 = vst.msk [vmem:[%s1631_s1 + $0x124] ss:$-24 sm:$0xc] %vm3_vm0, %v103_v14  }
  0x82   :  { %625 = vst.msk [vmem:[%s1631_s1 + $0x4] ss:$72 sm:$0x30] %vm3_vm0, %v103_v14   ;;  %626 = vst.msk [vmem:[%s1631_s1 + $0x1e4] ss:$-24 sm:$0xc0] %vm3_vm0, %v103_v14  }
  0x83   :  { %618 = vst.msk [vmem:[%s1631_s1 + $0x4] ss:$72 sm:$0x3] %vm3_vm0, %v90_v15   ;;  %619 = vst.msk [vmem:[%s1631_s1 + $0x64] ss:$-24 sm:$0xc] %vm3_vm0, %v90_v15  }
  0x84   :  { %620 = vst.msk [vmem:[%s1631_s1 - $0xbc] ss:$72 sm:$0x30] %vm3_vm0, %v90_v15   ;;  %621 = vst.msk [vmem:[%s1631_s1 + $0x124] ss:$-24 sm:$0xc0] %vm3_vm0, %v90_v15   ;;  %v128_v16 = vpop.permute.xlu1 %127   ;;  %v115_v17 = vpop.permute.xlu0 %114  }
  0x85   :  { %632 = vst.msk [vmem:[%s1631_s1 + $0xc5] ss:$72 sm:$0x3] %vm3_vm0, %v128_v16   ;;  %633 = vst.msk [vmem:[%s1631_s1 + $0x125] ss:$-24 sm:$0xc] %vm3_vm0, %v128_v16  }
  0x86   :  { %634 = vst.msk [vmem:[%s1631_s1 + $0x5] ss:$72 sm:$0x30] %vm3_vm0, %v128_v16   ;;  %635 = vst.msk [vmem:[%s1631_s1 + $0x1e5] ss:$-24 sm:$0xc0] %vm3_vm0, %v128_v16  }
  0x87   :  { %627 = vst.msk [vmem:[%s1631_s1 + $0x5] ss:$72 sm:$0x3] %vm3_vm0, %v115_v17   ;;  %628 = vst.msk [vmem:[%s1631_s1 + $0x65] ss:$-24 sm:$0xc] %vm3_vm0, %v115_v17  }
  0x88   :  { %629 = vst.msk [vmem:[%s1631_s1 - $0xbb] ss:$72 sm:$0x30] %vm3_vm0, %v115_v17   ;;  %630 = vst.msk [vmem:[%s1631_s1 + $0x125] ss:$-24 sm:$0xc0] %vm3_vm0, %v115_v17   ;;  %v153_v18 = vpop.permute.xlu1 %152   ;;  %v140_v19 = vpop.permute.xlu0 %139  }
  0x89   :  { %641 = vst.msk [vmem:[%s1631_s1 + $0xc6] ss:$72 sm:$0x3] %vm3_vm0, %v153_v18   ;;  %642 = vst.msk [vmem:[%s1631_s1 + $0x126] ss:$-24 sm:$0xc] %vm3_vm0, %v153_v18  }
  0x8a   :  { %643 = vst.msk [vmem:[%s1631_s1 + $0x6] ss:$72 sm:$0x30] %vm3_vm0, %v153_v18   ;;  %644 = vst.msk [vmem:[%s1631_s1 + $0x1e6] ss:$-24 sm:$0xc0] %vm3_vm0, %v153_v18  }
  0x8b   :  { %636 = vst.msk [vmem:[%s1631_s1 + $0x6] ss:$72 sm:$0x3] %vm3_vm0, %v140_v19   ;;  %637 = vst.msk [vmem:[%s1631_s1 + $0x66] ss:$-24 sm:$0xc] %vm3_vm0, %v140_v19  }
  0x8c   :  { %638 = vst.msk [vmem:[%s1631_s1 - $0xba] ss:$72 sm:$0x30] %vm3_vm0, %v140_v19   ;;  %639 = vst.msk [vmem:[%s1631_s1 + $0x126] ss:$-24 sm:$0xc0] %vm3_vm0, %v140_v19   ;;  %v178_v20 = vpop.permute.xlu1 %177   ;;  %v165_v21 = vpop.permute.xlu0 %164  }
  0x8d   :  { %650 = vst.msk [vmem:[%s1631_s1 + $0xc7] ss:$72 sm:$0x3] %vm3_vm0, %v178_v20   ;;  %651 = vst.msk [vmem:[%s1631_s1 + $0x127] ss:$-24 sm:$0xc] %vm3_vm0, %v178_v20  }
  0x8e   :  { %652 = vst.msk [vmem:[%s1631_s1 + $0x7] ss:$72 sm:$0x30] %vm3_vm0, %v178_v20   ;;  %653 = vst.msk [vmem:[%s1631_s1 + $0x1e7] ss:$-24 sm:$0xc0] %vm3_vm0, %v178_v20  }
  0x8f   :  { %645 = vst.msk [vmem:[%s1631_s1 + $0x7] ss:$72 sm:$0x3] %vm3_vm0, %v165_v21   ;;  %646 = vst.msk [vmem:[%s1631_s1 + $0x67] ss:$-24 sm:$0xc] %vm3_vm0, %v165_v21  }
  0x90   :  { %647 = vst.msk [vmem:[%s1631_s1 - $0xb9] ss:$72 sm:$0x30] %vm3_vm0, %v165_v21   ;;  %648 = vst.msk [vmem:[%s1631_s1 + $0x127] ss:$-24 sm:$0xc0] %vm3_vm0, %v165_v21   ;;  %v203_v22 = vpop.permute.xlu1 %202   ;;  %v190_v23 = vpop.permute.xlu0 %189  }
  0x91   :  { %659 = vst.msk [vmem:[%s1631_s1 + $0xe0] ss:$-24 sm:$0x3] %vm3_vm0, %v203_v22   ;;  %660 = vst.msk [vmem:[%s1631_s1 + $0x140] ss:$-24 sm:$0xc] %vm3_vm0, %v203_v22  }
  0x92   :  { %661 = vst.msk [vmem:[%s1631_s1 + $0x1a0] ss:$-24 sm:$0x30] %vm3_vm0, %v203_v22   ;;  %662 = vst.msk [vmem:[%s1631_s1 + $0x200] ss:$-24 sm:$0xc0] %vm3_vm0, %v203_v22  }
  0x93   :  { %654 = vst.msk [vmem:[%s1631_s1 + $0x20] ss:$-24 sm:$0x3] %vm3_vm0, %v190_v23   ;;  %655 = vst.msk [vmem:[%s1631_s1 + $0x80] ss:$-24 sm:$0xc] %vm3_vm0, %v190_v23  }
  0x94   :  { %656 = vst.msk [vmem:[%s1631_s1 + $0xe0] ss:$-24 sm:$0x30] %vm3_vm0, %v190_v23   ;;  %657 = vst.msk [vmem:[%s1631_s1 + $0x140] ss:$-24 sm:$0xc0] %vm3_vm0, %v190_v23   ;;  %v228_v24 = vpop.permute.xlu1 %227   ;;  %v215_v25 = vpop.permute.xlu0 %214  }
  0x95   :  { %668 = vst.msk [vmem:[%s1631_s1 + $0xe1] ss:$-24 sm:$0x3] %vm3_vm0, %v228_v24   ;;  %669 = vst.msk [vmem:[%s1631_s1 + $0x141] ss:$-24 sm:$0xc] %vm3_vm0, %v228_v24  }
  0x96   :  { %670 = vst.msk [vmem:[%s1631_s1 + $0x1a1] ss:$-24 sm:$0x30] %vm3_vm0, %v228_v24   ;;  %671 = vst.msk [vmem:[%s1631_s1 + $0x201] ss:$-24 sm:$0xc0] %vm3_vm0, %v228_v24  }
  0x97   :  { %663 = vst.msk [vmem:[%s1631_s1 + $0x21] ss:$-24 sm:$0x3] %vm3_vm0, %v215_v25   ;;  %664 = vst.msk [vmem:[%s1631_s1 + $0x81] ss:$-24 sm:$0xc] %vm3_vm0, %v215_v25  }
  0x98   :  { %665 = vst.msk [vmem:[%s1631_s1 + $0xe1] ss:$-24 sm:$0x30] %vm3_vm0, %v215_v25   ;;  %666 = vst.msk [vmem:[%s1631_s1 + $0x141] ss:$-24 sm:$0xc0] %vm3_vm0, %v215_v25   ;;  %v253_v26 = vpop.permute.xlu1 %252   ;;  %v240_v27 = vpop.permute.xlu0 %239  }
  0x99   :  { %677 = vst.msk [vmem:[%s1631_s1 + $0xe2] ss:$-24 sm:$0x3] %vm3_vm0, %v253_v26   ;;  %678 = vst.msk [vmem:[%s1631_s1 + $0x142] ss:$-24 sm:$0xc] %vm3_vm0, %v253_v26  }
  0x9a   :  { %679 = vst.msk [vmem:[%s1631_s1 + $0x1a2] ss:$-24 sm:$0x30] %vm3_vm0, %v253_v26   ;;  %680 = vst.msk [vmem:[%s1631_s1 + $0x202] ss:$-24 sm:$0xc0] %vm3_vm0, %v253_v26  }
  0x9b   :  { %672 = vst.msk [vmem:[%s1631_s1 + $0x22] ss:$-24 sm:$0x3] %vm3_vm0, %v240_v27   ;;  %673 = vst.msk [vmem:[%s1631_s1 + $0x82] ss:$-24 sm:$0xc] %vm3_vm0, %v240_v27  }
  0x9c   :  { %674 = vst.msk [vmem:[%s1631_s1 + $0xe2] ss:$-24 sm:$0x30] %vm3_vm0, %v240_v27   ;;  %675 = vst.msk [vmem:[%s1631_s1 + $0x142] ss:$-24 sm:$0xc0] %vm3_vm0, %v240_v27   ;;  %v278_v28 = vpop.permute.xlu1 %277   ;;  %v265_v29 = vpop.permute.xlu0 %264  }
  0x9d   :  { %686 = vst.msk [vmem:[%s1631_s1 + $0xe3] ss:$-24 sm:$0x3] %vm3_vm0, %v278_v28   ;;  %687 = vst.msk [vmem:[%s1631_s1 + $0x143] ss:$-24 sm:$0xc] %vm3_vm0, %v278_v28  }
  0x9e   :  { %688 = vst.msk [vmem:[%s1631_s1 + $0x1a3] ss:$-24 sm:$0x30] %vm3_vm0, %v278_v28   ;;  %689 = vst.msk [vmem:[%s1631_s1 + $0x203] ss:$-24 sm:$0xc0] %vm3_vm0, %v278_v28  }
  0x9f   :  { %681 = vst.msk [vmem:[%s1631_s1 + $0x23] ss:$-24 sm:$0x3] %vm3_vm0, %v265_v29   ;;  %682 = vst.msk [vmem:[%s1631_s1 + $0x83] ss:$-24 sm:$0xc] %vm3_vm0, %v265_v29  }
  0xa0   :  { %683 = vst.msk [vmem:[%s1631_s1 + $0xe3] ss:$-24 sm:$0x30] %vm3_vm0, %v265_v29   ;;  %684 = vst.msk [vmem:[%s1631_s1 + $0x143] ss:$-24 sm:$0xc0] %vm3_vm0, %v265_v29   ;;  %v303_v30 = vpop.permute.xlu1 %302   ;;  %v290_v31 = vpop.permute.xlu0 %289  }
  0xa1   :  { %695 = vst.msk [vmem:[%s1631_s1 + $0xe4] ss:$-24 sm:$0x3] %vm3_vm0, %v303_v30   ;;  %696 = vst.msk [vmem:[%s1631_s1 + $0x144] ss:$-24 sm:$0xc] %vm3_vm0, %v303_v30  }
  0xa2   :  { %697 = vst.msk [vmem:[%s1631_s1 + $0x1a4] ss:$-24 sm:$0x30] %vm3_vm0, %v303_v30   ;;  %698 = vst.msk [vmem:[%s1631_s1 + $0x204] ss:$-24 sm:$0xc0] %vm3_vm0, %v303_v30  }
  0xa3   :  { %690 = vst.msk [vmem:[%s1631_s1 + $0x24] ss:$-24 sm:$0x3] %vm3_vm0, %v290_v31   ;;  %691 = vst.msk [vmem:[%s1631_s1 + $0x84] ss:$-24 sm:$0xc] %vm3_vm0, %v290_v31  }
  0xa4   :  { %692 = vst.msk [vmem:[%s1631_s1 + $0xe4] ss:$-24 sm:$0x30] %vm3_vm0, %v290_v31   ;;  %693 = vst.msk [vmem:[%s1631_s1 + $0x144] ss:$-24 sm:$0xc0] %vm3_vm0, %v290_v31   ;;  %v328_v32 = vpop.permute.xlu1 %327   ;;  %v315_v33 = vpop.permute.xlu0 %314  }
  0xa5   :  { %704 = vst.msk [vmem:[%s1631_s1 + $0xe5] ss:$-24 sm:$0x3] %vm3_vm0, %v328_v32   ;;  %705 = vst.msk [vmem:[%s1631_s1 + $0x145] ss:$-24 sm:$0xc] %vm3_vm0, %v328_v32  }
  0xa6   :  { %706 = vst.msk [vmem:[%s1631_s1 + $0x1a5] ss:$-24 sm:$0x30] %vm3_vm0, %v328_v32   ;;  %707 = vst.msk [vmem:[%s1631_s1 + $0x205] ss:$-24 sm:$0xc0] %vm3_vm0, %v328_v32  }
  0xa7   :  { %699 = vst.msk [vmem:[%s1631_s1 + $0x25] ss:$-24 sm:$0x3] %vm3_vm0, %v315_v33   ;;  %700 = vst.msk [vmem:[%s1631_s1 + $0x85] ss:$-24 sm:$0xc] %vm3_vm0, %v315_v33  }
  0xa8   :  { %701 = vst.msk [vmem:[%s1631_s1 + $0xe5] ss:$-24 sm:$0x30] %vm3_vm0, %v315_v33   ;;  %702 = vst.msk [vmem:[%s1631_s1 + $0x145] ss:$-24 sm:$0xc0] %vm3_vm0, %v315_v33   ;;  %v353_v34 = vpop.permute.xlu1 %352   ;;  %v340_v35 = vpop.permute.xlu0 %339  }
  0xa9   :  { %713 = vst.msk [vmem:[%s1631_s1 + $0xe6] ss:$-24 sm:$0x3] %vm3_vm0, %v353_v34   ;;  %714 = vst.msk [vmem:[%s1631_s1 + $0x146] ss:$-24 sm:$0xc] %vm3_vm0, %v353_v34  }
  0xaa   :  { %715 = vst.msk [vmem:[%s1631_s1 + $0x1a6] ss:$-24 sm:$0x30] %vm3_vm0, %v353_v34   ;;  %716 = vst.msk [vmem:[%s1631_s1 + $0x206] ss:$-24 sm:$0xc0] %vm3_vm0, %v353_v34  }
  0xab   :  { %708 = vst.msk [vmem:[%s1631_s1 + $0x26] ss:$-24 sm:$0x3] %vm3_vm0, %v340_v35   ;;  %709 = vst.msk [vmem:[%s1631_s1 + $0x86] ss:$-24 sm:$0xc] %vm3_vm0, %v340_v35  }
  0xac   :  { %710 = vst.msk [vmem:[%s1631_s1 + $0xe6] ss:$-24 sm:$0x30] %vm3_vm0, %v340_v35   ;;  %711 = vst.msk [vmem:[%s1631_s1 + $0x146] ss:$-24 sm:$0xc0] %vm3_vm0, %v340_v35   ;;  %v378_v36 = vpop.permute.xlu1 %377   ;;  %v365_v37 = vpop.permute.xlu0 %364  }
  0xad   :  { %722 = vst.msk [vmem:[%s1631_s1 + $0xe7] ss:$-24 sm:$0x3] %vm3_vm0, %v378_v36   ;;  %723 = vst.msk [vmem:[%s1631_s1 + $0x147] ss:$-24 sm:$0xc] %vm3_vm0, %v378_v36  }
  0xae   :  { %724 = vst.msk [vmem:[%s1631_s1 + $0x1a7] ss:$-24 sm:$0x30] %vm3_vm0, %v378_v36   ;;  %725 = vst.msk [vmem:[%s1631_s1 + $0x207] ss:$-24 sm:$0xc0] %vm3_vm0, %v378_v36  }
  0xaf   :  { %717 = vst.msk [vmem:[%s1631_s1 + $0x27] ss:$-24 sm:$0x3] %vm3_vm0, %v365_v37   ;;  %718 = vst.msk [vmem:[%s1631_s1 + $0x87] ss:$-24 sm:$0xc] %vm3_vm0, %v365_v37  }
  0xb0   :  { %719 = vst.msk [vmem:[%s1631_s1 + $0xe7] ss:$-24 sm:$0x30] %vm3_vm0, %v365_v37   ;;  %720 = vst.msk [vmem:[%s1631_s1 + $0x147] ss:$-24 sm:$0xc0] %vm3_vm0, %v365_v37   ;;  %v403_v38 = vpop.permute.xlu1 %402   ;;  %v390_v39 = vpop.permute.xlu0 %389  }
  0xb1   :  { %731 = vst.msk [vmem:[%s1631_s1 + $0x100] ss:$-24 sm:$0x7] %vm3_vm0, %v403_v38   ;;  %732 = vst.msk [vmem:[%s1631_s1 + $0x40] ss:$72 sm:$0x18] %vm3_vm0, %v403_v38  }
  0xb2   :  { %733 = vst.msk [vmem:[%s1631_s1 + $0x1c0] ss:$-24 sm:$0x60] %vm3_vm0, %v403_v38   ;;  %734 = vst.msk [vmem:[%s1631_s1 + $0x171] sm:$0x80] %vm3_vm0, %v403_v38  }
  0xb3   :  { %726 = vst.msk [vmem:[%s1631_s1 + $0x40] ss:$-24 sm:$0x7] %vm3_vm0, %v390_v39   ;;  %727 = vst.msk [vmem:[%s1631_s1 - $0x80] ss:$72 sm:$0x18] %vm3_vm0, %v390_v39  }
  0xb4   :  { %728 = vst.msk [vmem:[%s1631_s1 + $0x100] ss:$-24 sm:$0x60] %vm3_vm0, %v390_v39   ;;  %729 = vst.msk [vmem:[%s1631_s1 + $0xb1] sm:$0x80] %vm3_vm0, %v390_v39   ;;  %v428_v40 = vpop.permute.xlu1 %427   ;;  %v415_v41 = vpop.permute.xlu0 %414  }
  0xb5   :  { %740 = vst.msk [vmem:[%s1631_s1 + $0x101] ss:$-24 sm:$0x7] %vm3_vm0, %v428_v40   ;;  %741 = vst.msk [vmem:[%s1631_s1 + $0x41] ss:$72 sm:$0x18] %vm3_vm0, %v428_v40  }
  0xb6   :  { %742 = vst.msk [vmem:[%s1631_s1 + $0x1c1] ss:$-24 sm:$0x60] %vm3_vm0, %v428_v40   ;;  %743 = vst.msk [vmem:[%s1631_s1 + $0x172] sm:$0x80] %vm3_vm0, %v428_v40  }
  0xb7   :  { %735 = vst.msk [vmem:[%s1631_s1 + $0x41] ss:$-24 sm:$0x7] %vm3_vm0, %v415_v41   ;;  %736 = vst.msk [vmem:[%s1631_s1 - $0x7f] ss:$72 sm:$0x18] %vm3_vm0, %v415_v41  }
  0xb8   :  { %737 = vst.msk [vmem:[%s1631_s1 + $0x101] ss:$-24 sm:$0x60] %vm3_vm0, %v415_v41   ;;  %738 = vst.msk [vmem:[%s1631_s1 + $0xb2] sm:$0x80] %vm3_vm0, %v415_v41   ;;  %v453_v42 = vpop.permute.xlu1 %452   ;;  %v440_v43 = vpop.permute.xlu0 %439  }
  0xb9   :  { %749 = vst.msk [vmem:[%s1631_s1 + $0x102] ss:$-24 sm:$0x7] %vm3_vm0, %v453_v42   ;;  %750 = vst.msk [vmem:[%s1631_s1 + $0x42] ss:$72 sm:$0x18] %vm3_vm0, %v453_v42  }
  0xba   :  { %751 = vst.msk [vmem:[%s1631_s1 + $0x1c2] ss:$-24 sm:$0x60] %vm3_vm0, %v453_v42   ;;  %752 = vst.msk [vmem:[%s1631_s1 + $0x173] sm:$0x80] %vm3_vm0, %v453_v42  }
  0xbb   :  { %744 = vst.msk [vmem:[%s1631_s1 + $0x42] ss:$-24 sm:$0x7] %vm3_vm0, %v440_v43   ;;  %745 = vst.msk [vmem:[%s1631_s1 - $0x7e] ss:$72 sm:$0x18] %vm3_vm0, %v440_v43  }
  0xbc   :  { %746 = vst.msk [vmem:[%s1631_s1 + $0x102] ss:$-24 sm:$0x60] %vm3_vm0, %v440_v43   ;;  %747 = vst.msk [vmem:[%s1631_s1 + $0xb3] sm:$0x80] %vm3_vm0, %v440_v43   ;;  %v478_v44 = vpop.permute.xlu1 %477   ;;  %v465_v45 = vpop.permute.xlu0 %464  }
  0xbd   :  { %758 = vst.msk [vmem:[%s1631_s1 + $0x103] ss:$-24 sm:$0x7] %vm3_vm0, %v478_v44   ;;  %759 = vst.msk [vmem:[%s1631_s1 + $0x43] ss:$72 sm:$0x18] %vm3_vm0, %v478_v44  }
  0xbe   :  { %760 = vst.msk [vmem:[%s1631_s1 + $0x1c3] ss:$-24 sm:$0x60] %vm3_vm0, %v478_v44   ;;  %761 = vst.msk [vmem:[%s1631_s1 + $0x174] sm:$0x80] %vm3_vm0, %v478_v44  }
  0xbf   :  { %753 = vst.msk [vmem:[%s1631_s1 + $0x43] ss:$-24 sm:$0x7] %vm3_vm0, %v465_v45   ;;  %754 = vst.msk [vmem:[%s1631_s1 - $0x7d] ss:$72 sm:$0x18] %vm3_vm0, %v465_v45  }
  0xc0   :  { %755 = vst.msk [vmem:[%s1631_s1 + $0x103] ss:$-24 sm:$0x60] %vm3_vm0, %v465_v45   ;;  %756 = vst.msk [vmem:[%s1631_s1 + $0xb4] sm:$0x80] %vm3_vm0, %v465_v45   ;;  %v503_v46 = vpop.permute.xlu1 %502   ;;  %v490_v47 = vpop.permute.xlu0 %489  }
  0xc1   :  { %767 = vst.msk [vmem:[%s1631_s1 + $0x104] ss:$-24 sm:$0x7] %vm3_vm0, %v503_v46   ;;  %768 = vst.msk [vmem:[%s1631_s1 + $0x44] ss:$72 sm:$0x18] %vm3_vm0, %v503_v46  }
  0xc2   :  { %769 = vst.msk [vmem:[%s1631_s1 + $0x1c4] ss:$-24 sm:$0x60] %vm3_vm0, %v503_v46   ;;  %770 = vst.msk [vmem:[%s1631_s1 + $0x175] sm:$0x80] %vm3_vm0, %v503_v46  }
  0xc3   :  { %762 = vst.msk [vmem:[%s1631_s1 + $0x44] ss:$-24 sm:$0x7] %vm3_vm0, %v490_v47   ;;  %763 = vst.msk [vmem:[%s1631_s1 - $0x7c] ss:$72 sm:$0x18] %vm3_vm0, %v490_v47  }
  0xc4   :  { %764 = vst.msk [vmem:[%s1631_s1 + $0x104] ss:$-24 sm:$0x60] %vm3_vm0, %v490_v47   ;;  %765 = vst.msk [vmem:[%s1631_s1 + $0xb5] sm:$0x80] %vm3_vm0, %v490_v47   ;;  %v528_v48 = vpop.permute.xlu1 %527   ;;  %v515_v49 = vpop.permute.xlu0 %514  }
  0xc5   :  { %776 = vst.msk [vmem:[%s1631_s1 + $0x105] ss:$-24 sm:$0x7] %vm3_vm0, %v528_v48   ;;  %777 = vst.msk [vmem:[%s1631_s1 + $0x45] ss:$72 sm:$0x18] %vm3_vm0, %v528_v48  }
  0xc6   :  { %778 = vst.msk [vmem:[%s1631_s1 + $0x1c5] ss:$-24 sm:$0x60] %vm3_vm0, %v528_v48   ;;  %779 = vst.msk [vmem:[%s1631_s1 + $0x176] sm:$0x80] %vm3_vm0, %v528_v48  }
  0xc7   :  { %771 = vst.msk [vmem:[%s1631_s1 + $0x45] ss:$-24 sm:$0x7] %vm3_vm0, %v515_v49   ;;  %772 = vst.msk [vmem:[%s1631_s1 - $0x7b] ss:$72 sm:$0x18] %vm3_vm0, %v515_v49  }
  0xc8   :  { %773 = vst.msk [vmem:[%s1631_s1 + $0x105] ss:$-24 sm:$0x60] %vm3_vm0, %v515_v49   ;;  %774 = vst.msk [vmem:[%s1631_s1 + $0xb6] sm:$0x80] %vm3_vm0, %v515_v49   ;;  %v553_v50 = vpop.permute.xlu1 %552   ;;  %v540_v51 = vpop.permute.xlu0 %539  }
  0xc9   :  { %785 = vst.msk [vmem:[%s1631_s1 + $0x106] ss:$-24 sm:$0x7] %vm3_vm0, %v553_v50   ;;  %786 = vst.msk [vmem:[%s1631_s1 + $0x46] ss:$72 sm:$0x18] %vm3_vm0, %v553_v50  }
  0xca   :  { %787 = vst.msk [vmem:[%s1631_s1 + $0x1c6] ss:$-24 sm:$0x60] %vm3_vm0, %v553_v50   ;;  %788 = vst.msk [vmem:[%s1631_s1 + $0x177] sm:$0x80] %vm3_vm0, %v553_v50  }
  0xcb   :  { %780 = vst.msk [vmem:[%s1631_s1 + $0x46] ss:$-24 sm:$0x7] %vm3_vm0, %v540_v51   ;;  %781 = vst.msk [vmem:[%s1631_s1 - $0x7a] ss:$72 sm:$0x18] %vm3_vm0, %v540_v51  }
  0xcc   :  { %782 = vst.msk [vmem:[%s1631_s1 + $0x106] ss:$-24 sm:$0x60] %vm3_vm0, %v540_v51   ;;  %783 = vst.msk [vmem:[%s1631_s1 + $0xb7] sm:$0x80] %vm3_vm0, %v540_v51   ;;  %v578_v52 = vpop.permute.xlu1 %577   ;;  %v565_v53 = vpop.permute.xlu0 %564  }
  0xcd   :  { %794 = vst.msk [vmem:[%s1631_s1 + $0x107] ss:$-24 sm:$0x7] %vm3_vm0, %v578_v52   ;;  %795 = vst.msk [vmem:[%s1631_s1 + $0x47] ss:$72 sm:$0x18] %vm3_vm0, %v578_v52  }
  0xce   :  { %796 = vst.msk [vmem:[%s1631_s1 + $0x1c7] ss:$-24 sm:$0x60] %vm3_vm0, %v578_v52   ;;  %797 = vst.msk [vmem:[%s1631_s1 + $0x178] sm:$0x80] %vm3_vm0, %v578_v52  }
  0xcf   :  { %789 = vst.msk [vmem:[%s1631_s1 + $0x47] ss:$-24 sm:$0x7] %vm3_vm0, %v565_v53   ;;  %790 = vst.msk [vmem:[%s1631_s1 - $0x79] ss:$72 sm:$0x18] %vm3_vm0, %v565_v53  }
  0xd0   :  { %791 = vst.msk [vmem:[%s1631_s1 + $0x107] ss:$-24 sm:$0x60] %vm3_vm0, %v565_v53   ;;  %792 = vst.msk [vmem:[%s1631_s1 + $0xb8] sm:$0x80] %vm3_vm0, %v565_v53  }

// kernel: unet_down.1
= control target key start
LH: loop header
LB: loop body
LE: loop exit
PB: predicated region body
PF: predicated region fallthrough
CT: control target
= control target key end

     0   :  { %s12003_s27 = smov 0   ;;  %s15395_s0 = inlined_call_operand.vmem [shape: bf16[2,432,128], index: 0, kind: input, shape index: {}]   ;;  %s15396_s1 = inlined_call_operand.vmem [shape: f32[384,1], index: 1, kind: input, shape index: {}]   ;;  %s15397_s2 = inlined_call_operand.vmem [shape: bf16[3,3,128,128], index: 2, kind: input, shape index: {}]   ;;  %s15398_s3 = inlined_call_operand.vmem [shape: f32[1,128], index: 3, kind: input, shape index: {}]   ;;  %s15399_s4 = inlined_call_operand.vmem [shape: f32[1,128], index: 4, kind: input, shape index: {}]   ;;  %s15400_s5 = inlined_call_operand.vmem [shape: bf16[3,3,128,128], index: 5, kind: input, shape index: {}]   ;;  %s15401_s6 = inlined_call_operand.vmem [shape: f32[1,128], index: 6, kind: input, shape index: {}]   ;;  %s15402_s7 = inlined_call_operand.vmem [shape: f32[1,128], index: 7, kind: input, shape index: {}]   ;;  %s15403_s8 = inlined_call_operand.vmem [shape: f32[2,8,8,128], index: 8, kind: output, shape index: {}]  }
   0x1 LB: > { %s8704_s28 = sadd.s32 4294967295, %s11955_s27   ;;  %p8708_p0 = scmp.ge.s32.totalorder %s11955_s27, 1  ;;  %s11955_s27 = sphi %s12003_s27, %s18_s27  }
   0x2   : > { %p262_p1 = scmp.lt.s32.totalorder %s11955_s27, 3 }
   0x4   : > { %p263_p2 = pnand %p8708_p0, %p262_p1 }
   0x6   : > { %266 = sbr.rel (%p263_p2) target bundleno = 1801 (0x709), region = 52 }
   0xd   : > { %v11507_v0 = vld [vmem:[%s15397_s2 + $0xc0] sm:$0xff]   ;;  %p296_p3 = scmp.lt.s32.totalorder %s8704_s28, 1  ;;  %v11509_v2 = vld [vmem:[%s15397_s2 + $0xc8] sm:$0xff]   ;;  %v11511_v4 = vld [vmem:[%s15397_s2 + $0xd0] sm:$0xff]   ;;  %vm4723_vm2 = vcmask 1043456  }
   0xe   : > { %v11508_v1 = vld [vmem:[%s15397_s2 + $0x100] sm:$0xff]   ;;  %9767 = vmatprep.subr.bf16.mxu0 %v11507_v0  ;;  %v11510_v3 = vld [vmem:[%s15397_s2 + $0x108] sm:$0xff]   ;;  %v11512_v5 = vld [vmem:[%s15397_s2 + $0x110] sm:$0xff]  }
   0xf   : > { %9768 = vmatpush3.bf16.msra.mxu0 %v11507_v0  ;;  %9959 = vmatprep.subr.bf16.mxu1 %v11508_v1  ;;  %s15526_s28 = smov (!%p296_p3, %s8704_s28), 1  ;;  %v11513_v6 = vld [vmem:[%s15397_s2 + $0xd8] sm:$0xff]   ;;  %v11515_v8 = vld [vmem:[%s15397_s2 + $0xe0] sm:$0xff]   ;;  %v11517_v12 = vld [vmem:[%s15397_s2 + $0xe8] sm:$0xff]  }
  0x10   : > { %9769 = vmatprep.subr.bf16.mxu0 %v11509_v2  ;;  %9960 = vmatpush3.bf16.msra.mxu1 %v11508_v1  ;;  %s11495_s21 = smul.u32 216, %s15526_s28  ;;  %v11514_v7 = vld [vmem:[%s15397_s2 + $0x118] sm:$0xff]   ;;  %v11516_v9 = vld [vmem:[%s15397_s2 + $0x120] sm:$0xff]   ;;  %v11518_v14 = vld [vmem:[%s15397_s2 + $0x128] sm:$0xff]   ;;  %s9190_s20 = sshll.u32 %s15526_s28, 6 }
  0x11   : > { %9961 = vmatprep.subr.bf16.mxu1 %v11510_v3  ;;  %v11519_v16 = vld [vmem:[%s15397_s2 + $0xf0] sm:$0xff]   ;;  %v11521_v34 = vld [vmem:[%s15397_s2 + $0xf8] sm:$0xff]   ;;  %v11526_v42 = vld [vmem:[%s15397_s2] sm:$0xff]   ;;  %s14880_s22 = scalar_lea.vmem %s15403_s8, %s9190_s20 }
  0x12   : > { %s12044_s30 = scalar_lea.vmem %s15395_s0, %s11495_s21  ;;  %v11520_v20 = vld [vmem:[%s15397_s2 + $0x130] sm:$0xff]   ;;  %v11524_v35 = vld [vmem:[%s15397_s2 + $0x138] sm:$0xff]   ;;  %v11529_v45 = vld [vmem:[%s15397_s2 + $0x8] sm:$0xff]  }
  0x13   : > { %9770 = vmatpush3.bf16.msra.mxu0 %v11509_v2  ;;  %v12050_v10 = vld [vmem:[%s12044_s30 + $0xc] sm:$0xf]  ;;  %v311_v11 = vld [vmem:[%s12044_s30 + $0x10] sm:$0xf]  ;;  %v312_v15 = vld [vmem:[%s12044_s30 + $0x14] sm:$0xf] }
  0x14   : > { %9771 = vmatprep.subr.bf16.mxu0 %v11511_v4  ;;  %9962 = vmatpush3.bf16.msra.mxu1 %v11510_v3  ;;  %v12057_v13 = vcombine.low %v12050_v10, %v311_v11  ;;  %v313_v17 = vld [vmem:[%s12044_s30 + $0x18] sm:$0xf]  ;;  %v314_v18 = vld [vmem:[%s12044_s30 + $0x1c] sm:$0xf]  ;;  %v12070_v19 = vcombine.low %v311_v11, %v312_v15  ;;  %v315_v21 = vld [vmem:[%s12044_s30 + $0x20] sm:$0xf] }
  0x15   : > { %9963 = vmatprep.subr.bf16.mxu1 %v11512_v5  ;;  %v316_v22 = vld [vmem:[%s12044_s30 + $0x24] sm:$0xf]  ;;  %v12077_v23 = vcombine.low %v313_v17, %v314_v18  ;;  %v317_v24 = vld [vmem:[%s12044_s30 + $0x28] sm:$0xf]  ;;  %v318_v26 = vld [vmem:[%s12044_s30 + $0x2c] sm:$0xf]  ;;  %v12128_v43 = vcombine.low %v312_v15, %v313_v17  ;;  %v12130_v44 = vcombine.low %v314_v18, %v315_v21 }
  0x16   : > { %9783 = vmatprep.mubr.bf16.mxu0 %v12057_v13  ;;  %9975 = vmatprep.mubr.bf16.mxu1 %v12057_v13  ;;  %v12080_v25 = vcombine.low %v315_v21, %v316_v22  ;;  %v319_v27 = vld [vmem:[%s12044_s30 + $0x30] sm:$0xf]  ;;  %v12085_v28 = vld [vmem:[%s12044_s30 + $0x34] sm:$0xf]  ;;  %v12088_v29 = vld [vmem:[%s12044_s30 + $0x38] sm:$0xf]  ;;  %v12093_v31 = vcombine.low %v317_v24, %v318_v26  ;;  %v12168_v55 = vcombine.low %v316_v22, %v317_v24 }
  0x17   : > { %9772 = vmatpush3.bf16.msra.mxu0 %v11511_v4  ;;  %v12091_v30 = vld [vmem:[%s12044_s30 + $0x3c] sm:$0xf]  ;;  %v12096_v32 = vcombine.low %v319_v27, %v12085_v28  ;;  %v323_v36 = vld [vmem:[%s12044_s30 + $0x40] sm:$0xf]  ;;  %v12110_v37 = vld [vmem:[%s12044_s30 + $0x44] sm:$0xf]  ;;  %v12170_v56 = vcombine.low %v318_v26, %v319_v27  ;;  %v12210_v3 = vcombine.low %v12085_v28, %v12088_v29 }
  0x18   : > { %9773 = vmatprep.subr.bf16.mxu0 %v11513_v6  ;;  %9964 = vmatpush3.bf16.msra.mxu1 %v11512_v5  ;;  %v12100_v33 = vcombine.low %v12088_v29, %v12091_v30  ;;  %v12113_v38 = vld [vmem:[%s12044_s30 + $0x48] sm:$0xf]  ;;  %v12116_v39 = vld [vmem:[%s12044_s30 + $0x4c] sm:$0xf]  ;;  %v12119_v40 = vcombine.low %v323_v36, %v12110_v37  ;;  %v12136_v46 = vld [vmem:[%s12044_s30 + $0x50] sm:$0xf]  ;;  %v12213_v4 = vcombine.low %v12091_v30, %v323_v36 }
  0x19   : > { %9965 = vmatprep.subr.bf16.mxu1 %v11514_v7  ;;  %v12123_v41 = vcombine.low %v12113_v38, %v12116_v39  ;;  %v12139_v47 = vld [vmem:[%s12044_s30 + $0x54] sm:$0xf]  ;;  %v12142_v48 = vld [vmem:[%s12044_s30 + $0x58] sm:$0xf]  ;;  %v12146_v49 = vld [vmem:[%s12044_s30 + $0x5c] sm:$0xf]  ;;  %v12253_v17 = vcombine.low %v12110_v37, %v12113_v38  ;;  %v12257_v18 = vcombine.low %v12116_v39, %v12136_v46 }
  0x1a   : > { %v11534_v50 = vld [vmem:[%s15397_s2 + $0x10] sm:$0xff]   ;;  %v11548_v51 = vld [vmem:[%s15397_s2 + $0x40] sm:$0xff]   ;;  %v12157_v52 = vcombine.low %v12136_v46, %v12139_v47  ;;  %v12161_v53 = vcombine.low %v12142_v48, %v12146_v49  ;;  %v11550_v54 = vld [vmem:[%s15397_s2 + $0x48] sm:$0xff]  }
  0x1b   : > { %9774 = vmatpush3.bf16.msra.mxu0 %v11513_v6  ;;  %v11537_v57 = vld [vmem:[%s15397_s2 + $0x18] sm:$0xff]   ;;  %v12176_v58 = vld [vmem:[%s12044_s30 + $0x60] sm:$0xf]  ;;  %v12179_v59 = vld [vmem:[%s12044_s30 + $0x64] sm:$0xf] }
  0x1c   : > { %9775 = vmatprep.subr.bf16.mxu0 %v11515_v8  ;;  %9966 = vmatpush3.bf16.msra.mxu1 %v11514_v7  ;;  %v12182_v60 = vld [vmem:[%s12044_s30 + $0x68] sm:$0xf]  ;;  %v11553_v61 = vld [vmem:[%s15397_s2 + $0x50] sm:$0xff]   ;;  %v12189_v62 = vld [vmem:[%s12044_s30 + $0x6c] sm:$0xf]  ;;  %v12198_v0 = vcombine.low %v12176_v58, %v12179_v59  ;;  %v12291_v36 = vcombine.low %v12146_v49, %v12176_v58 }
  0x1d   : > { %9967 = vmatprep.subr.bf16.mxu1 %v11516_v9  ;;  %v11555_v63 = vld [vmem:[%s15397_s2 + $0x58] sm:$0xff]   ;;  %v12202_v1 = vcombine.low %v12182_v60, %v12189_v62  ;;  %v11542_v2 = vld [vmem:[%s15397_s2 + $0x20] sm:$0xff]   ;;  %v12216_v5 = vld [vmem:[%s12044_s30 + $0x70] sm:$0xf] }
  0x1e   : > { %v12219_v6 = vld [vmem:[%s12044_s30 + $0x74] sm:$0xf]  ;;  %v12222_v7 = vld [vmem:[%s12044_s30 + $0x78] sm:$0xf]  ;;  %v12232_v11 = vld [vmem:[%s12044_s30 + $0x7c] sm:$0xf]  ;;  %v12318_v49 = vcombine.low %v12189_v62, %v12216_v5 }
  0x1f   : > { %9776 = vmatpush3.bf16.msra.mxu0 %v11515_v8  ;;  %v11545_v8 = vld [vmem:[%s15397_s2 + $0x28] sm:$0xff]   ;;  %v12245_v15 = vcombine.low %v12222_v7, %v12232_v11  ;;  %v11562_v21 = vld [vmem:[%s15397_s2 + $0x70] sm:$0xff]   ;;  %v339_v22 = vld [vmem:[%s12044_s30 + $0x80] sm:$0xf] }
  0x20   : > { %9777 = vmatprep.subr.bf16.mxu0 %v11517_v12  ;;  %9968 = vmatpush3.bf16.msra.mxu1 %v11516_v9  ;;  %v11557_v9 = vld [vmem:[%s15397_s2 + $0x60] sm:$0xff]   ;;  %v341_v26 = vld [vmem:[%s12044_s30 + $0x88] sm:$0xf]  ;;  %v342_v27 = vld [vmem:[%s12044_s30 + $0x8c] sm:$0xf] }
  0x21   : > { %9969 = vmatprep.subr.bf16.mxu1 %v11518_v14  ;;  %v340_v24 = vld [vmem:[%s12044_s30 + $0x84] sm:$0xf]  ;;  %v11564_v28 = vld [vmem:[%s15397_s2 + $0x78] sm:$0xff]   ;;  %v343_v37 = vld [vmem:[%s12044_s30 + $0x90] sm:$0xf] }
  0x22   : > { %v12278_v29 = vld [vmem:[%s15397_s2 + $0x180] sm:$0xff]   ;;  %v12280_v30 = vcombine.low %v339_v22, %v340_v24  ;;  %v344_v38 = vld [vmem:[%s12044_s30 + $0x94] sm:$0xf]  ;;  %v345_v39 = vld [vmem:[%s12044_s30 + $0x98] sm:$0xf] }
  0x23   : > { %9778 = vmatpush3.bf16.msra.mxu0 %v11517_v12  ;;  %v11560_v12 = vld [vmem:[%s15397_s2 + $0x68] sm:$0xff]   ;;  %v12306_v46 = vcombine.low %v343_v37, %v344_v38  ;;  %v351_v62 = vld [vmem:[%s12044_s30 + $0xb0] sm:$0xf] }
  0x24   : > { %9779 = vmatprep.subr.bf16.mxu0 %v11519_v16  ;;  %9970 = vmatpush3.bf16.msra.mxu1 %v11518_v14  ;;  %v12241_v14 = vcombine.low %v12216_v5, %v12219_v6  ;;  %v354_v5 = vld [vmem:[%s12044_s30 + $0xbc] sm:$0xf] }
  0x25   : > { %9971 = vmatprep.subr.bf16.mxu1 %v11520_v20 }
  0x27   : > { %9780 = vmatpush3.bf16.msra.mxu0 %v11519_v16  ;;  %v11552_v16 = vld [vmem:[%s15397_s2 + $0x30] sm:$0xff]  }
  0x28   : > { %9781 = vmatprep.subr.bf16.mxu0 %v11521_v34  ;;  %9972 = vmatpush3.bf16.msra.mxu1 %v11520_v20  ;;  %v11558_v20 = vld [vmem:[%s15397_s2 + $0x38] sm:$0xff]  }
  0x29   : > { %9973 = vmatprep.subr.bf16.mxu1 %v11524_v35 }
  0x2b   : > { %9782 = vmatpush3.bf16.msra.mxu0 %v11521_v34  ;;  %v12282_v34 = vcombine.low %v341_v26, %v342_v27 }
  0x2c   : > { %9831 = vmatprep.subr.bf16.mxu0 %v11526_v42  ;;  %9974 = vmatpush3.bf16.msra.mxu1 %v11524_v35  ;;  %v12287_v35 = vcombine.low %v12139_v47, %v12142_v48  ;;  %v12314_v48 = vcombine.low %v12179_v59, %v12182_v60  ;;  %v12334_v60 = vcombine.low %v12219_v6, %v12222_v7 }
  0x2d   : > { %10023 = vmatprep.subr.bf16.mxu1 %v11548_v51  ;;  %v12351_v6 = vcombine.low %v340_v24, %v341_v26  ;;  %v12353_v7 = vcombine.low %v342_v27, %v343_v37  ;;  %v12384_v26 = vld [vmem:[%s12044_s30 + $0xc4] sm:$0xff]  }
  0x2e   : > { %9784 = vmatmul.mubr.bf16.vlgmr.msra.gmra.mrb[0].mxu0 %v12128_v43  ;;  %v12388_v27 = vld [vmem:[%s12044_s30] sm:$0xff]  }
  0x2f   : > { %9832 = vmatpush3.bf16.msra.mxu0 %v11526_v42  ;;  %9976 = vmatmul.mubr.bf16.vlgmr.msra.gmra.mrb[0].mxu1 %v12128_v43  ;;  %v346_v42 = vld [vmem:[%s12044_s30 + $0x9c] sm:$0xf] }
  0x30   : > { %9787 = vmatprep.mubr.bf16.mxu0 %v12130_v44  ;;  %9979 = vmatprep.mubr.bf16.mxu1 %v12130_v44  ;;  %v12308_v47 = vcombine.low %v345_v39, %v346_v42 }
  0x31   : > { %9833 = vmatprep.subr.bf16.mxu0 %v11529_v45  ;;  %10024 = vmatpush3.bf16.msra.mxu1 %v11548_v51  ;;  %v348_v51 = vld [vmem:[%s12044_s30 + $0xa4] sm:$0xf] }
  0x32   : > { %10025 = vmatprep.subr.bf16.mxu1 %v11550_v54 }
  0x33   : > { %9834 = vmatpush3.bf16.msra.mxu0 %v11529_v45  ;;  %v12304_v45 = vld [vmem:[%s15397_s2 + $0x1c0] sm:$0xff]  }
  0x34   : > { %9835 = vmatprep.subr.bf16.mxu0 %v11534_v50 }
  0x35   : > { %10026 = vmatpush3.bf16.msra.mxu1 %v11550_v54  ;;  %v349_v54 = vld [vmem:[%s12044_s30 + $0xa8] sm:$0xf] }
  0x36   : > { %9788 = vmatmul.mubr.bf16.gmra.mrb[4].mxu0 %v12168_v55  ;;  %10027 = vmatprep.subr.bf16.mxu1 %v11553_v61 }
  0x37   : > { %9980 = vmatmul.mubr.bf16.gmra.mrb[4].mxu1 %v12168_v55  ;;  %9791 = vmatprep.mubr.bf16.mxu0 %v12170_v56 }
  0x38   : > { %9983 = vmatprep.mubr.bf16.mxu1 %v12170_v56  ;;  %9836 = vmatpush3.bf16.msra.mxu0 %v11534_v50  ;;  %v347_v50 = vld [vmem:[%s12044_s30 + $0xa0] sm:$0xf] }
  0x39   : > { %9837 = vmatprep.subr.bf16.mxu0 %v11537_v57  ;;  %10028 = vmatpush3.bf16.msra.mxu1 %v11553_v61  ;;  %v12327_v58 = vcombine.low %v347_v50, %v348_v51  ;;  %v12337_v61 = vcombine.low %v12232_v11, %v339_v22  ;;  %v12359_v11 = vcombine.low %v344_v38, %v345_v39  ;;  %v11568_v38 = vld [vmem:[%s15397_s2 + $0x188] sm:$0xff]  }
  0x3a   : > { %10029 = vmatprep.subr.bf16.mxu1 %v11555_v63  ;;  %v11589_v39 = vld [vmem:[%s15397_s2 + $0x1c8] sm:$0xff]  }
  0x3c   : > { %9838 = vmatpush3.bf16.msra.mxu0 %v11537_v57  ;;  %v350_v57 = vld [vmem:[%s12044_s30 + $0xac] sm:$0xf] }
  0x3d   : > { %9839 = vmatprep.subr.bf16.mxu0 %v11542_v2  ;;  %10030 = vmatpush3.bf16.msra.mxu1 %v11555_v63  ;;  %v12329_v59 = vcombine.low %v349_v54, %v350_v57  ;;  %v352_v63 = vld [vmem:[%s12044_s30 + $0xb4] sm:$0xf] }
  0x3e   : > { %9792 = vmatmul.mubr.bf16.gmra.mrb[8].mxu0 %v12210_v3  ;;  %10031 = vmatprep.subr.bf16.mxu1 %v11557_v9 }
  0x3f   : > { %9984 = vmatmul.mubr.bf16.gmra.mrb[8].mxu1 %v12210_v3  ;;  %9795 = vmatprep.mubr.bf16.mxu0 %v12213_v4 }
  0x40   : > { %9987 = vmatprep.mubr.bf16.mxu1 %v12213_v4  ;;  %9840 = vmatpush3.bf16.msra.mxu0 %v11542_v2  ;;  %v353_v2 = vld [vmem:[%s12044_s30 + $0xb8] sm:$0xf] }
  0x41   : > { %9841 = vmatprep.subr.bf16.mxu0 %v11545_v8  ;;  %10032 = vmatpush3.bf16.msra.mxu1 %v11557_v9  ;;  %v12348_v9 = vcombine.low %v353_v2, %v354_v5  ;;  %v12376_v22 = vcombine.low %v352_v63, %v353_v2  ;;  %v11597_v2 = vld [vmem:[%s15397_s2 + $0x1b8] sm:$0xff]  }
  0x42   : > { %10033 = vmatprep.subr.bf16.mxu1 %v11560_v12 }
  0x44   : > { %9842 = vmatpush3.bf16.msra.mxu0 %v11545_v8  ;;  %v12346_v8 = vcombine.low %v351_v62, %v352_v63  ;;  %v11601_v63 = vld [vmem:[%s15397_s2 + $0x1f0] sm:$0xff]  }
  0x45   : > { %9843 = vmatprep.subr.bf16.mxu0 %v11552_v16  ;;  %10034 = vmatpush3.bf16.msra.mxu1 %v11560_v12  ;;  %v12361_v12 = vcombine.low %v346_v42, %v347_v50  ;;  %v11573_v42 = vld [vmem:[%s15397_s2 + $0x190] sm:$0xff]   ;;  %v11594_v50 = vld [vmem:[%s15397_s2 + $0x1d8] sm:$0xff]  }
  0x46   : > { %9796 = vmatmul.mubr.bf16.gmra.mrb[12].mxu0 %v12253_v17  ;;  %10035 = vmatprep.subr.bf16.mxu1 %v11562_v21 }
  0x47   : > { %9988 = vmatmul.mubr.bf16.gmra.mrb[12].mxu1 %v12253_v17  ;;  %9799 = vmatprep.mubr.bf16.mxu0 %v12257_v18 }
  0x48   : > { %9991 = vmatprep.mubr.bf16.mxu1 %v12257_v18  ;;  %9844 = vmatpush3.bf16.msra.mxu0 %v11552_v16  ;;  %v12367_v16 = vcombine.low %v348_v51, %v349_v54  ;;  %v11596_v51 = vld [vmem:[%s15397_s2 + $0x1e0] sm:$0xff]   ;;  %v11584_v54 = vld [vmem:[%s15397_s2 + $0x1a8] sm:$0xff]  }
  0x49   : > { %9845 = vmatprep.subr.bf16.mxu0 %v11558_v20  ;;  %10036 = vmatpush3.bf16.msra.mxu1 %v11562_v21  ;;  %v355_v21 = vld [vmem:[%s12044_s30 + $0xc0] sm:$0xf] }
  0x4a   : > { %10037 = vmatprep.subr.bf16.mxu1 %v11564_v28  ;;  %v12378_v24 = vcombine.low %v354_v5, %v355_v21  ;;  %v11603_v5 = vld [vmem:[%s15397_s2 + $0x1f8] sm:$0xff]   ;;  %v11605_v21 = vld [vmem:[%s15397_s2 + $0x140] sm:$0xff]  }
  0x4c   : > { %9846 = vmatpush3.bf16.msra.mxu0 %v11558_v20  ;;  %v12369_v20 = vcombine.low %v350_v57, %v351_v62  ;;  %v11599_v57 = vld [vmem:[%s15397_s2 + $0x1e8] sm:$0xff]   ;;  %v11591_v62 = vld [vmem:[%s15397_s2 + $0x1b0] sm:$0xff]  }
  0x4d   : > { %9895 = vmatprep.subr.bf16.mxu0 %v12278_v29  ;;  %10038 = vmatpush3.bf16.msra.mxu1 %v11564_v28  ;;  %v309_v28 = vld [vmem:[%s12044_s30 + $0x8] sm:$0xf] }
  0x4e   : > { %9800 = vmatmul.mubr.bf16.gmra.mrb[16].mxu0 %v12287_v35  ;;  %10087 = vmatprep.subr.bf16.mxu1 %v12304_v45  ;;  %v12396_v37 = vcombine.low %v309_v28, %v12050_v10  ;;  %v11592_v10 = vld [vmem:[%s15397_s2 + $0x1d0] sm:$0xff]   ;;  %v12490_v28 = vld [vmem:[%s12044_s30 + $0x18] sm:$0xff]  }
  0x4f   : > { %9992 = vmatmul.mubr.bf16.gmra.mrb[16].mxu1 %v12287_v35  ;;  %9803 = vmatprep.mubr.bf16.mxu0 %v12291_v36 }
  0x50   : > { %9995 = vmatprep.mubr.bf16.mxu1 %v12291_v36 }
  0x56   : > { %9804 = vmatmul.mubr.bf16.gmra.mrb[20].mxu0 %v12314_v48 }
  0x57   : > { %9996 = vmatmul.mubr.bf16.gmra.mrb[20].mxu1 %v12314_v48  ;;  %9807 = vmatprep.mubr.bf16.mxu0 %v12318_v49 }
  0x58   : > { %9999 = vmatprep.mubr.bf16.mxu1 %v12318_v49 }
  0x5e   : > { %9808 = vmatmul.mubr.bf16.gmra.mrb[24].mxu0 %v12334_v60 }
  0x5f   : > { %10000 = vmatmul.mubr.bf16.gmra.mrb[24].mxu1 %v12334_v60  ;;  %9811 = vmatprep.mubr.bf16.mxu0 %v12337_v61 }
  0x60   : > { %10003 = vmatprep.mubr.bf16.mxu1 %v12337_v61 }
  0x66   : > { %9812 = vmatmul.mubr.bf16.gmra.mrb[28].mxu0 %v12351_v6 }
  0x67   : > { %10004 = vmatmul.mubr.bf16.gmra.mrb[28].mxu1 %v12351_v6  ;;  %9815 = vmatprep.mubr.bf16.mxu0 %v12353_v7 }
  0x68   : > { %10007 = vmatprep.mubr.bf16.mxu1 %v12353_v7 }
  0x6e   : > { %9816 = vmatmul.mubr.bf16.gmra.mrb[32].mxu0 %v12359_v11 }
  0x6f   : > { %10008 = vmatmul.mubr.bf16.gmra.mrb[32].mxu1 %v12359_v11  ;;  %9819 = vmatprep.mubr.bf16.mxu0 %v12361_v12 }
  0x70   : > { %10011 = vmatprep.mubr.bf16.mxu1 %v12361_v12 }
  0x76   : > { %9820 = vmatmul.mubr.bf16.gmra.mrb[36].mxu0 %v12367_v16 }
  0x77   : > { %10012 = vmatmul.mubr.bf16.gmra.mrb[36].mxu1 %v12367_v16  ;;  %9823 = vmatprep.mubr.bf16.mxu0 %v12369_v20 }
  0x78   : > { %10015 = vmatprep.mubr.bf16.mxu1 %v12369_v20 }
  0x7e   : > { %9824 = vmatmul.mubr.bf16.gmra.mrb[40].mxu0 %v12376_v22 }
  0x7f   : > { %10016 = vmatmul.mubr.bf16.gmra.mrb[40].mxu1 %v12376_v22  ;;  %9827 = vmatprep.mubr.bf16.mxu0 %v12378_v24 }
  0x80   : > { %10019 = vmatprep.mubr.bf16.mxu1 %v12378_v24 }
  0x86   : > { %9828 = vmatmul.mubr.bf16.gmra.mrb[44].mxu0 %v12384_v26 }
  0x87   : > { %10020 = vmatmul.mubr.bf16.gmra.mrb[44].mxu1 %v12384_v26  ;;  %9847 = vmatprep.mubr.bf16.mxu0 %v12388_v27 }
  0x88   : > { %10039 = vmatprep.mubr.bf16.mxu1 %v12388_v27 }
  0x8e   : > { %9848 = vmatmul.mubr.bf16.vlgmr.msra.gmra.mrb[0].mxu0 %v12396_v37 }
  0x8f   : > { %9896 = vmatpush3.bf16.msra.mxu0 %v12278_v29  ;;  %10040 = vmatmul.mubr.bf16.vlgmr.msra.gmra.mrb[0].mxu1 %v12396_v37  ;;  %v11576_v29 = vld [vmem:[%s15397_s2 + $0x198] sm:$0xff]  }
  0x90   : > { %9851 = vmatprep.mubr.bf16.mxu0 %v12070_v19  ;;  %10043 = vmatprep.mubr.bf16.mxu1 %v12070_v19 }
  0x91   : > { %9897 = vmatprep.subr.bf16.mxu0 %v11568_v38  ;;  %10088 = vmatpush3.bf16.msra.mxu1 %v12304_v45  ;;  %v11581_v45 = vld [vmem:[%s15397_s2 + $0x1a0] sm:$0xff]  }
  0x92   : > { %10089 = vmatprep.subr.bf16.mxu1 %v11589_v39 }
  0x93   : > { %9898 = vmatpush3.bf16.msra.mxu0 %v11568_v38  ;;  %v12497_v38 = vld [vmem:[%s12044_s30 + $0x20] sm:$0xff]  }
  0x94   : > { %9899 = vmatprep.subr.bf16.mxu0 %v11573_v42 }
  0x95   : > { %10090 = vmatpush3.bf16.msra.mxu1 %v11589_v39  ;;  %v12500_v39 = vld [vmem:[%s12044_s30 + $0x28] sm:$0xff]  }
  0x96   : > { %9852 = vmatmul.mubr.bf16.gmra.mrb[4].mxu0 %v12077_v23  ;;  %10091 = vmatprep.subr.bf16.mxu1 %v11592_v10 }
  0x97   : > { %10044 = vmatmul.mubr.bf16.gmra.mrb[4].mxu1 %v12077_v23  ;;  %9855 = vmatprep.mubr.bf16.mxu0 %v12080_v25 }
  0x98   : > { %10047 = vmatprep.mubr.bf16.mxu1 %v12080_v25  ;;  %9900 = vmatpush3.bf16.msra.mxu0 %v11573_v42  ;;  %v11608_v42 = vld [vmem:[%s15397_s2 + $0x148] sm:$0xff]  }
  0x99   : > { %9901 = vmatprep.subr.bf16.mxu0 %v11576_v29  ;;  %10092 = vmatpush3.bf16.msra.mxu1 %v11592_v10  ;;  %v11613_v10 = vld [vmem:[%s15397_s2 + $0x150] sm:$0xff]  }
  0x9a   : > { %10093 = vmatprep.subr.bf16.mxu1 %v11594_v50 }
  0x9c   : > { %9902 = vmatpush3.bf16.msra.mxu0 %v11576_v29  ;;  %v12513_v29 = vld [vmem:[%s12044_s30 + $0x30] sm:$0xff]  }
  0x9d   : > { %9903 = vmatprep.subr.bf16.mxu0 %v11581_v45  ;;  %10094 = vmatpush3.bf16.msra.mxu1 %v11594_v50  ;;  %v12516_v50 = vld [vmem:[%s12044_s30 + $0x38] sm:$0xff]  }
  0x9e   : > { %9856 = vmatmul.mubr.bf16.gmra.mrb[8].mxu0 %v12093_v31  ;;  %10095 = vmatprep.subr.bf16.mxu1 %v11596_v51 }
  0x9f   : > { %10048 = vmatmul.mubr.bf16.gmra.mrb[8].mxu1 %v12093_v31  ;;  %9859 = vmatprep.mubr.bf16.mxu0 %v12096_v32 }
  0xa0   : > { %10051 = vmatprep.mubr.bf16.mxu1 %v12096_v32  ;;  %9904 = vmatpush3.bf16.msra.mxu0 %v11581_v45  ;;  %v11616_v45 = vld [vmem:[%s15397_s2 + $0x158] sm:$0xff]  }
  0xa1   : > { %9905 = vmatprep.subr.bf16.mxu0 %v11584_v54  ;;  %10096 = vmatpush3.bf16.msra.mxu1 %v11596_v51  ;;  %v11621_v51 = vld [vmem:[%s15397_s2 + $0x160] sm:$0xff]  }
  0xa2   : > { %10097 = vmatprep.subr.bf16.mxu1 %v11599_v57 }
  0xa4   : > { %9906 = vmatpush3.bf16.msra.mxu0 %v11584_v54  ;;  %v11610_v54 = vld [vmem:[%s12044_s30 + $0x40] sm:$0xff]  }
  0xa5   : > { %9907 = vmatprep.subr.bf16.mxu0 %v11591_v62  ;;  %10098 = vmatpush3.bf16.msra.mxu1 %v11599_v57  ;;  %v11611_v57 = vld [vmem:[%s12044_s30 + $0x48] sm:$0xff]  }
  0xa6   : > { %9860 = vmatmul.mubr.bf16.gmra.mrb[12].mxu0 %v12100_v33  ;;  %10099 = vmatprep.subr.bf16.mxu1 %v11601_v63 }
  0xa7   : > { %10052 = vmatmul.mubr.bf16.gmra.mrb[12].mxu1 %v12100_v33  ;;  %9863 = vmatprep.mubr.bf16.mxu0 %v12119_v40 }
  0xa8   : > { %10055 = vmatprep.mubr.bf16.mxu1 %v12119_v40  ;;  %9908 = vmatpush3.bf16.msra.mxu0 %v11591_v62  ;;  %v11624_v62 = vld [vmem:[%s15397_s2 + $0x168] sm:$0xff]  }
  0xa9   : > { %9909 = vmatprep.subr.bf16.mxu0 %v11597_v2  ;;  %10100 = vmatpush3.bf16.msra.mxu1 %v11601_v63  ;;  %v11629_v63 = vld [vmem:[%s15397_s2 + $0x170] sm:$0xff]  }
  0xaa   : > { %10101 = vmatprep.subr.bf16.mxu1 %v11603_v5 }
  0xac   : > { %9910 = vmatpush3.bf16.msra.mxu0 %v11597_v2  ;;  %v11612_v2 = vld [vmem:[%s12044_s30 + $0x50] sm:$0xff]  }
  0xad   : > { %10102 = vmatpush3.bf16.msra.mxu1 %v11603_v5  ;;  %10151 = vmatprep.subr.bf16.mxu0 %v11605_v21  ;;  %v11614_v5 = vld [vmem:[%s12044_s30 + $0x58] sm:$0xff]  }
  0xae   : > { %9864 = vmatmul.mubr.bf16.gmra.mrb[16].mxu0 %v12123_v41 }
  0xaf   : > { %10056 = vmatmul.mubr.bf16.gmra.mrb[16].mxu1 %v12123_v41  ;;  %9867 = vmatprep.mubr.bf16.mxu0 %v12157_v52 }
  0xb0   : > { %10059 = vmatprep.mubr.bf16.mxu1 %v12157_v52 }
  0xb6   : > { %9868 = vmatmul.mubr.bf16.gmra.mrb[20].mxu0 %v12161_v53 }
  0xb7   : > { %10060 = vmatmul.mubr.bf16.gmra.mrb[20].mxu1 %v12161_v53  ;;  %9871 = vmatprep.mubr.bf16.mxu0 %v12198_v0 }
  0xb8   : > { %10063 = vmatprep.mubr.bf16.mxu1 %v12198_v0 }
  0xbe   : > { %9872 = vmatmul.mubr.bf16.gmra.mrb[24].mxu0 %v12202_v1 }
  0xbf   : > { %10064 = vmatmul.mubr.bf16.gmra.mrb[24].mxu1 %v12202_v1  ;;  %9875 = vmatprep.mubr.bf16.mxu0 %v12241_v14 }
  0xc0   : > { %10067 = vmatprep.mubr.bf16.mxu1 %v12241_v14 }
  0xc6   : > { %9876 = vmatmul.mubr.bf16.gmra.mrb[28].mxu0 %v12245_v15 }
  0xc7   : > { %10068 = vmatmul.mubr.bf16.gmra.mrb[28].mxu1 %v12245_v15  ;;  %9879 = vmatprep.mubr.bf16.mxu0 %v12280_v30 }
  0xc8   : > { %10071 = vmatprep.mubr.bf16.mxu1 %v12280_v30 }
  0xce   : > { %9880 = vmatmul.mubr.bf16.gmra.mrb[32].mxu0 %v12282_v34 }
  0xcf   : > { %10072 = vmatmul.mubr.bf16.gmra.mrb[32].mxu1 %v12282_v34  ;;  %9883 = vmatprep.mubr.bf16.mxu0 %v12306_v46 }
  0xd0   : > { %10075 = vmatprep.mubr.bf16.mxu1 %v12306_v46 }
  0xd6   : > { %9884 = vmatmul.mubr.bf16.gmra.mrb[36].mxu0 %v12308_v47 }
  0xd7   : > { %10076 = vmatmul.mubr.bf16.gmra.mrb[36].mxu1 %v12308_v47  ;;  %9887 = vmatprep.mubr.bf16.mxu0 %v12327_v58 }
  0xd8   : > { %10079 = vmatprep.mubr.bf16.mxu1 %v12327_v58 }
  0xde   : > { %9888 = vmatmul.mubr.bf16.gmra.mrb[40].mxu0 %v12329_v59 }
  0xdf   : > { %10080 = vmatmul.mubr.bf16.gmra.mrb[40].mxu1 %v12329_v59  ;;  %9891 = vmatprep.mubr.bf16.mxu0 %v12346_v8 }
  0xe0   : > { %10083 = vmatprep.mubr.bf16.mxu1 %v12346_v8 }
  0xe6   : > { %9892 = vmatmul.mubr.bf16.gmra.mrb[44].mxu0 %v12348_v9 }
  0xe7   : > { %10084 = vmatmul.mubr.bf16.gmra.mrb[44].mxu1 %v12348_v9  ;;  %9911 = vmatprep.mubr.bf16.mxu0 %v12490_v28 }
  0xe8   : > { %10103 = vmatprep.mubr.bf16.mxu1 %v12490_v28 }
  0xee   : > { %9912 = vmatmul.mubr.bf16.vlgmr.msra.gmra.mrb[0].mxu0 %v12497_v38 }
  0xef   : > { %10152 = vmatpush3.bf16.msra.mxu0 %v11605_v21  ;;  %10104 = vmatmul.mubr.bf16.vlgmr.msra.gmra.mrb[0].mxu1 %v12497_v38  ;;  %v11632_v21 = vld [vmem:[%s15397_s2 + $0x178] sm:$0xff]  }
  0xf0   : > { %9915 = vmatprep.mubr.bf16.mxu0 %v12500_v39  ;;  %10107 = vmatprep.mubr.bf16.mxu1 %v12500_v39 }
  0xf1   : > { %10153 = vmatprep.subr.bf16.mxu0 %v11608_v42 }
  0xf3   : > { %10154 = vmatpush3.bf16.msra.mxu0 %v11608_v42  ;;  %v11635_v42 = vld [vmem:[%s15397_s2 + $0x80] sm:$0xff]  }
  0xf4   : > { %10155 = vmatprep.subr.bf16.mxu0 %v11613_v10 }
  0xf6   : > { %9916 = vmatmul.mubr.bf16.gmra.mrb[4].mxu0 %v12513_v29 }
  0xf7   : > { %10108 = vmatmul.mubr.bf16.gmra.mrb[4].mxu1 %v12513_v29  ;;  %9919 = vmatprep.mubr.bf16.mxu0 %v12516_v50 }
  0xf8   : > { %10111 = vmatprep.mubr.bf16.mxu1 %v12516_v50  ;;  %10156 = vmatpush3.bf16.msra.mxu0 %v11613_v10  ;;  %v12545_v10 = vld [vmem:[%s12044_s30 + $0x60] sm:$0xff]  }
  0xf9   : > { %10157 = vmatprep.subr.bf16.mxu0 %v11616_v45 }
  0xfc   : > { %10158 = vmatpush3.bf16.msra.mxu0 %v11616_v45  ;;  %v12548_v45 = vld [vmem:[%s12044_s30 + $0x68] sm:$0xff]  }
  0xfd   : > { %10159 = vmatprep.subr.bf16.mxu0 %v11621_v51 }
  0xfe   : > { %9920 = vmatmul.mubr.bf16.gmra.mrb[8].mxu0 %v11610_v54 }
  0xff   : > { %10112 = vmatmul.mubr.bf16.gmra.mrb[8].mxu1 %v11610_v54  ;;  %9923 = vmatprep.mubr.bf16.mxu0 %v11611_v57  ;;  %v12558_v54 = vld [vmem:[%s12044_s30 + $0x78] sm:$0xff]  }
 0x100   : > { %10115 = vmatprep.mubr.bf16.mxu1 %v11611_v57  ;;  %10160 = vmatpush3.bf16.msra.mxu0 %v11621_v51  ;;  %v12555_v51 = vld [vmem:[%s12044_s30 + $0x70] sm:$0xff]   ;;  %v12565_v57 = vld [vmem:[%s12044_s30 + $0x80] sm:$0xff]  }
 0x101   : > { %10161 = vmatprep.subr.bf16.mxu0 %v11624_v62  ;;  %15419 = vst [vmem:[#allocation4_spill] sm:$0xff] %v12565_v57 }
 0x104   : > { %10162 = vmatpush3.bf16.msra.mxu0 %v11624_v62  ;;  %v12568_v62 = vld [vmem:[%s12044_s30 + $0x88] sm:$0xff]  }
 0x105   : > { %10163 = vmatprep.subr.bf16.mxu0 %v11629_v63  ;;  %15420 = vst [vmem:[#allocation5_spill] sm:$0xff] %v12568_v62 }
 0x106   : > { %9924 = vmatmul.mubr.bf16.gmra.mrb[12].mxu0 %v11612_v2 }
 0x107   : > { %10116 = vmatmul.mubr.bf16.gmra.mrb[12].mxu1 %v11612_v2  ;;  %9927 = vmatprep.mubr.bf16.mxu0 %v11614_v5  ;;  %v12578_v2 = vld [vmem:[%s12044_s30 + $0x98] sm:$0xff]  }
 0x108   : > { %10119 = vmatprep.mubr.bf16.mxu1 %v11614_v5  ;;  %10164 = vmatpush3.bf16.msra.mxu0 %v11629_v63  ;;  %v12575_v63 = vld [vmem:[%s12044_s30 + $0x90] sm:$0xff]   ;;  %15422 = vst [vmem:[#allocation7_spill] sm:$0xff] %v12578_v2  ;;  %v12585_v5 = vld [vmem:[%s12044_s30 + $0xa0] sm:$0xff]  }
 0x109   : > { %10165 = vmatprep.subr.bf16.mxu0 %v11632_v21  ;;  %15421 = vst [vmem:[#allocation6_spill] sm:$0xff] %v12575_v63 }
 0x10c   : > { %10166 = vmatpush3.bf16.msra.mxu0 %v11632_v21  ;;  %v12588_v21 = vld [vmem:[%s12044_s30 + $0xa8] sm:$0xff]  }
 0x10d   : > { %10215 = vmatprep.subr.bf16.mxu0 %v11635_v42  ;;  %15423 = vst [vmem:[#allocation8_spill] sm:$0xff] %v12588_v21 }
 0x10e   : > { %9928 = vmatmul.mubr.bf16.gmra.mrb[16].mxu0 %v12545_v10 }
 0x10f   : > { %10120 = vmatmul.mubr.bf16.gmra.mrb[16].mxu1 %v12545_v10  ;;  %9931 = vmatprep.mubr.bf16.mxu0 %v12548_v45 }
 0x110   : > { %10123 = vmatprep.mubr.bf16.mxu1 %v12548_v45 }
 0x116   : > { %9932 = vmatmul.mubr.bf16.gmra.mrb[20].mxu0 %v12555_v51 }
 0x117   : > { %10124 = vmatmul.mubr.bf16.gmra.mrb[20].mxu1 %v12555_v51  ;;  %9935 = vmatprep.mubr.bf16.mxu0 %v12558_v54 }
 0x118   : > { %10127 = vmatprep.mubr.bf16.mxu1 %v12558_v54 }
 0x11e   : > { %9936 = vmatmul.mubr.bf16.gmra.mrb[24].mxu0 %v12565_v57 }
 0x11f   : > { %10128 = vmatmul.mubr.bf16.gmra.mrb[24].mxu1 %v12565_v57  ;;  %9939 = vmatprep.mubr.bf16.mxu0 %v12568_v62  ;;  %v12608_v57 = vld [vmem:[%s12044_s30 + $0xc8] sm:$0xff]  }
 0x120   : > { %10131 = vmatprep.mubr.bf16.mxu1 %v12568_v62  ;;  %v12595_v62 = vld [vmem:[%s12044_s30 + $0xb0] sm:$0xff]   ;;  %15425 = vst [vmem:[#allocation10_spill] sm:$0xff] %v12608_v57 }
 0x126   : > { %9940 = vmatmul.mubr.bf16.gmra.mrb[28].mxu0 %v12575_v63 }
 0x127   : > { %10132 = vmatmul.mubr.bf16.gmra.mrb[28].mxu1 %v12575_v63  ;;  %9943 = vmatprep.mubr.bf16.mxu0 %v12578_v2  ;;  %v12598_v63 = vld [vmem:[%s12044_s30 + $0xb8] sm:$0xff]  }
 0x128   : > { %10135 = vmatprep.mubr.bf16.mxu1 %v12578_v2  ;;  %15424 = vst [vmem:[#allocation9_spill] sm:$0xff] %v12598_v63  ;;  %v12605_v2 = vld [vmem:[%s12044_s30 + $0xc0] sm:$0xff]  }
 0x12e   : > { %9944 = vmatmul.mubr.bf16.gmra.mrb[32].mxu0 %v12585_v5 }
 0x12f   : > { %10136 = vmatmul.mubr.bf16.gmra.mrb[32].mxu1 %v12585_v5  ;;  %9947 = vmatprep.mubr.bf16.mxu0 %v12588_v21 }
 0x130   : > { %10139 = vmatprep.mubr.bf16.mxu1 %v12588_v21  ;;  %v12615_v21 = vld [vmem:[%s12044_s30 + $0xd0] sm:$0xff]  }
 0x136   : > { %9948 = vmatmul.mubr.bf16.gmra.mrb[36].mxu0 %v12595_v62 }
 0x137   : > { %10140 = vmatmul.mubr.bf16.gmra.mrb[36].mxu1 %v12595_v62  ;;  %9951 = vmatprep.mubr.bf16.mxu0 %v12598_v63 }
 0x138   : > { %10143 = vmatprep.mubr.bf16.mxu1 %v12598_v63  ;;  %v11636_v63 = vld [vmem:[%s15397_s2 + $0x88] sm:$0xff]  }
 0x13e   : > { %9952 = vmatmul.mubr.bf16.gmra.mrb[40].mxu0 %v12605_v2 }
 0x13f   : > { %10144 = vmatmul.mubr.bf16.gmra.mrb[40].mxu1 %v12605_v2  ;;  %9955 = vmatprep.mubr.bf16.mxu0 %v12608_v57 }
 0x140   : > { %10147 = vmatprep.mubr.bf16.mxu1 %v12608_v57  ;;  %v11637_v57 = vld [vmem:[%s15397_s2 + $0x90] sm:$0xff]  }
 0x146   : > { %9956 = vmatmul.mubr.bf16.gmra.mrb[44].mxu0 %v12615_v21 }
 0x147   : > { %10148 = vmatmul.mubr.bf16.gmra.mrb[44].mxu1 %v12615_v21  ;;  %10167 = vmatprep.mubr.bf16.mxu0 %v12057_v13  ;;  %v11638_v13 = vld [vmem:[%s15397_s2 + $0x98] sm:$0xff]  }
 0x14e   : > { %10168 = vmatmul.mubr.bf16.vlgmr.msra.gmra.mrb[48].mxu0 %v12128_v43  ;;  %v11639_v43 = vld [vmem:[%s15397_s2 + $0xa0] sm:$0xff]  }
 0x14f   : > { %10216 = vmatpush3.bf16.msra.mxu0 %v11635_v42  ;;  %10171 = vmatprep.mubr.bf16.mxu0 %v12130_v44  ;;  %v11640_v44 = vld [vmem:[%s15397_s2 + $0xa8] sm:$0xff]  }
 0x150   : > { %10217 = vmatprep.subr.bf16.mxu0 %v11636_v63 }
 0x153   : > { %10218 = vmatpush3.bf16.msra.mxu0 %v11636_v63 }
 0x154   : > { %10219 = vmatprep.subr.bf16.mxu0 %v11637_v57 }
 0x156   : > { %10172 = vmatmul.mubr.bf16.gmra.mrb[52].mxu0 %v12168_v55  ;;  %v11641_v55 = vld [vmem:[%s15397_s2 + $0xb0] sm:$0xff]  }
 0x157   : > { %10175 = vmatprep.mubr.bf16.mxu0 %v12170_v56  ;;  %10220 = vmatpush3.bf16.msra.mxu0 %v11637_v57  ;;  %v11642_v56 = vld [vmem:[%s15397_s2 + $0xb8] sm:$0xff]  }
 0x158   : > { %10221 = vmatprep.subr.bf16.mxu0 %v11638_v13 }
 0x15b   : > { %10222 = vmatpush3.bf16.msra.mxu0 %v11638_v13 }
 0x15c   : > { %10223 = vmatprep.subr.bf16.mxu0 %v11639_v43 }
 0x15e   : > { %10176 = vmatmul.mubr.bf16.gmra.mrb[56].mxu0 %v12210_v3  ;;  %v11643_v3 = vld [vmem:[%s15397_s2 + $0x200] sm:$0xff]  }
 0x15f   : > { %10179 = vmatprep.mubr.bf16.mxu0 %v12213_v4  ;;  %10224 = vmatpush3.bf16.msra.mxu0 %v11639_v43  ;;  %v4337_v4 = vld [vmem:[%s15396_s1 + $0x10] sm:$0xff] }
 0x160   : > { %10225 = vmatprep.subr.bf16.mxu0 %v11640_v44 }
 0x163   : > { %10226 = vmatpush3.bf16.msra.mxu0 %v11640_v44 }
 0x164   : > { %10227 = vmatprep.subr.bf16.mxu0 %v11641_v55 }
 0x166   : > { %10180 = vmatmul.mubr.bf16.gmra.mrb[60].mxu0 %v12253_v17  ;;  %v4335_v17 = vld [vmem:[%s15396_s1] sm:$0xff] }
 0x167   : > { %10183 = vmatprep.mubr.bf16.mxu0 %v12257_v18  ;;  %10228 = vmatpush3.bf16.msra.mxu0 %v11641_v55  ;;  %v11957_v18 = vmov 0  }
 0x168   : > { %10229 = vmatprep.subr.bf16.mxu0 %v11642_v56  ;;  %11506 = vset.pattern.permute.xlu1 %v11957_v18  ;;  %4671 = vst [vmem:[#allocation2] sm:$0xff] %v11957_v18  ;;  %4672 = vst [vmem:[#allocation2 + $0x8] sm:$0xf] %v11957_v18 }
 0x169   : > { %4673 = vst [vmem:[#allocation2 + $0xc8] sm:$0xf0] %v11957_v18  ;;  %11505 = vset.pattern.permute.xlu0 %v11957_v18  ;;  %4395 = vperm.xlu1 %11506, %v4337_v4  }
 0x16a   : > { %4385 = vperm.xlu0 %11505, %v4335_v17  }
 0x16b   : > { %10230 = vmatpush3.bf16.msra.mxu0 %v11642_v56  ;;  %v11650_v56 = vld [vmem:[%s15397_s2 + $0x238] sm:$0xff]  }
 0x16c   : > { %10279 = vmatprep.subr.bf16.mxu0 %v11643_v3 }
 0x16e   : > { %10184 = vmatmul.mubr.bf16.gmra.mrb[64].mxu0 %v12287_v35  ;;  %v11644_v35 = vld [vmem:[%s15397_s2 + $0x208] sm:$0xff]  }
 0x16f   : > { %10187 = vmatprep.mubr.bf16.mxu0 %v12291_v36  ;;  %v4338_v36 = vld [vmem:[%s15396_s1 + $0x18] sm:$0xff] }
 0x170   : > { %4400 = vperm.xlu1 %11506, %v4338_v36   ;;  %v4349_v36 = vld [vmem:[%s15396_s1 + $0x70] sm:$0xff] }
 0x176   : > { %10188 = vmatmul.mubr.bf16.gmra.mrb[68].mxu0 %v12314_v48  ;;  %v4336_v48 = vld [vmem:[%s15396_s1 + $0x8] sm:$0xff] }
 0x177   : > { %10191 = vmatprep.mubr.bf16.mxu0 %v12318_v49  ;;  %v11645_v49 = vld [vmem:[%s15397_s2 + $0x210] sm:$0xff]   ;;  %4390 = vperm.xlu0 %11505, %v4336_v48  }
 0x17e   : > { %10192 = vmatmul.mubr.bf16.gmra.mrb[72].mxu0 %v12334_v60  ;;  %v4340_v60 = vld [vmem:[%s15396_s1 + $0x28] sm:$0xff] }
 0x17f   : > { %10195 = vmatprep.mubr.bf16.mxu0 %v12337_v61  ;;  %v4339_v61 = vld [vmem:[%s15396_s1 + $0x20] sm:$0xff]  ;;  %4410 = vperm.xlu1 %11506, %v4340_v60  }
 0x180   : > { %4405 = vperm.xlu0 %11505, %v4339_v61  }
 0x186   : > { %10196 = vmatmul.mubr.bf16.gmra.mrb[76].mxu0 %v12351_v6  ;;  %v4342_v6 = vld [vmem:[%s15396_s1 + $0x38] sm:$0xff] }
 0x187   : > { %10199 = vmatprep.mubr.bf16.mxu0 %v12353_v7  ;;  %v4341_v7 = vld [vmem:[%s15396_s1 + $0x30] sm:$0xff]  ;;  %4420 = vperm.xlu1 %11506, %v4342_v6   ;;  %v4352_v6 = vld [vmem:[%s15396_s1 + $0x88] sm:$0xff] }
 0x188   : > { %4415 = vperm.xlu0 %11505, %v4341_v7  }
 0x18e   : > { %10200 = vmatmul.mubr.bf16.gmra.mrb[80].mxu0 %v12359_v11  ;;  %v11647_v11 = vld [vmem:[%s15397_s2 + $0x220] sm:$0xff]  }
 0x18f   : > { %10203 = vmatprep.mubr.bf16.mxu0 %v12361_v12  ;;  %v4343_v12 = vld [vmem:[%s15396_s1 + $0x40] sm:$0xff] }
 0x190   : > { %4425 = vperm.xlu0 %11505, %v4343_v12  }
 0x196   : > { %10204 = vmatmul.mubr.bf16.gmra.mrb[84].mxu0 %v12367_v16  ;;  %v3549_v16 = vlaneseq }
 0x197   : > { %10207 = vmatprep.mubr.bf16.mxu0 %v12369_v20  ;;  %v4346_v20 = vld [vmem:[%s15396_s1 + $0x58] sm:$0xff] }
 0x19e   : > { %10208 = vmatmul.mubr.bf16.gmra.mrb[88].mxu0 %v12376_v22  ;;  %v4345_v22 = vld [vmem:[%s15396_s1 + $0x50] sm:$0xff] }
 0x19f   : > { %10211 = vmatprep.mubr.bf16.mxu0 %v12378_v24  ;;  %v12724_v24 = vshrl.u32 %v3549_v16, 7  ;;  %4435 = vperm.xlu0 %11505, %v4345_v22  }
 0x1a1   : > { %vm3551_vm0 = vcmp.lt.s32.totalorder %v12724_v24, 1  ;;  %vm3696_vm1 = vcmp.lt.s32.totalorder %v12724_v24, 7 }
 0x1a6   : > { %10212 = vmatmul.mubr.bf16.gmra.mrb[92].mxu0 %v12384_v26  ;;  %v11649_v26 = vld [vmem:[%s15397_s2 + $0x230] sm:$0xff]  }
 0x1a7   : > { %10231 = vmatprep.mubr.bf16.mxu0 %v12388_v27  ;;  %v4348_v27 = vld [vmem:[%s15396_s1 + $0x68] sm:$0xff] }
 0x1ae   : > { %10232 = vmatmul.mubr.bf16.vlgmr.msra.gmra.mrb[48].mxu0 %v12396_v37 }
 0x1af   : > { %10280 = vmatpush3.bf16.msra.mxu0 %v11643_v3  ;;  %10235 = vmatprep.mubr.bf16.mxu0 %v12070_v19  ;;  %v11646_v19 = vld [vmem:[%s15397_s2 + $0x218] sm:$0xff]  }
 0x1b0   : > { %10281 = vmatprep.subr.bf16.mxu0 %v11644_v35 }
 0x1b3   : > { %10282 = vmatpush3.bf16.msra.mxu0 %v11644_v35  ;;  %v4350_v35 = vld [vmem:[%s15396_s1 + $0x78] sm:$0xff] }
 0x1b4   : > { %10283 = vmatprep.subr.bf16.mxu0 %v11645_v49 }
 0x1b6   : > { %10236 = vmatmul.mubr.bf16.gmra.mrb[52].mxu0 %v12077_v23  ;;  %v4344_v23 = vld [vmem:[%s15396_s1 + $0x48] sm:$0xff] }
 0x1b7   : > { %10239 = vmatprep.mubr.bf16.mxu0 %v12080_v25  ;;  %10284 = vmatpush3.bf16.msra.mxu0 %v11645_v49  ;;  %v11648_v25 = vld [vmem:[%s15397_s2 + $0x228] sm:$0xff]  }
 0x1b8   : > { %10285 = vmatprep.subr.bf16.mxu0 %v11646_v19  ;;  %4430 = vperm.xlu1 %11506, %v4344_v23   ;;  %v4351_v23 = vld [vmem:[%s15396_s1 + $0x80] sm:$0xff] }
 0x1bb   : > { %10286 = vmatpush3.bf16.msra.mxu0 %v11646_v19 }
 0x1bc   : > { %10287 = vmatprep.subr.bf16.mxu0 %v11647_v11  ;;  %4440 = vperm.xlu1 %11506, %v4346_v20  }
 0x1be   : > { %10240 = vmatmul.mubr.bf16.gmra.mrb[56].mxu0 %v12093_v31 }
 0x1bf   : > { %10243 = vmatprep.mubr.bf16.mxu0 %v12096_v32  ;;  %10288 = vmatpush3.bf16.msra.mxu0 %v11647_v11  ;;  %v4347_v32 = vld [vmem:[%s15396_s1 + $0x60] sm:$0xff] }
 0x1c0   : > { %10289 = vmatprep.subr.bf16.mxu0 %v11648_v25  ;;  %4450 = vperm.xlu1 %11506, %v4348_v27  }
 0x1c1   : > { %v9913_v31 = vpop.f32.mrb[0].mxu0  ;;  %4445 = vperm.xlu0 %11505, %v4347_v32  }
 0x1c2   : > { %v12733_v37 = vpop.f32.mrb[1].mxu0  ;;  %v10105_v42 = vpop.f32.mrb[0].mxu1  ;;  %v3503_v13 = vrot.slane %v9913_v31, 7 }
 0x1c3   : > { %v9914_v57 = vpop.f32.mrb[2].mxu0  ;;  %v12739_v63 = vpop.f32.mrb[1].mxu1  ;;  %10290 = vmatpush3.bf16.msra.mxu0 %v11648_v25  ;;  %v15411_v3 = vrot.slane %v12733_v37, 7 }
 0x1c4   : > { %v3504_v43 = vrot.slane %v9914_v57, 7  ;;  %v1429_v44 = vpop.f32.mrb[3].mxu0  ;;  %v10106_v55 = vpop.f32.mrb[2].mxu1  ;;  %10291 = vmatprep.subr.bf16.mxu0 %v11649_v26  ;;  %4460 = vperm.xlu1 %11506, %v4350_v35  }
 0x1c5   : > { %v3502_v4 = vrot.slane %v1429_v44, 7  ;;  %v2347_v17 = vpop.f32.mrb[3].mxu1  ;;  %4455 = vperm.xlu0 %11505, %v4349_v36   ;;  %v4353_v44 = vld [vmem:[%s15396_s1 + $0x90] sm:$0xff] }
 0x1c6   : > { %v3596_v18 = vsel %vm3551_vm0, %v3503_v13, %v3504_v43  ;;  %10244 = vmatmul.mubr.bf16.gmra.mrb[60].mxu0 %v12100_v33 }
 0x1c7   : > { %v3597_v48 = vsel %vm3551_vm0, %v3502_v4, %v3503_v13  ;;  %v12756_v49 = vadd.f32 %v10106_v55, %v3596_v18  ;;  %v3598_v60 = vsel %vm3551_vm0, %v15411_v3, %v3502_v4  ;;  %10247 = vmatprep.mubr.bf16.mxu0 %v12119_v40  ;;  %10292 = vmatpush3.bf16.msra.mxu0 %v11649_v26  ;;  %v4354_v13 = vld [vmem:[%s15396_s1 + $0x98] sm:$0xff]  ;;  %v4356_v18 = vld [vmem:[%s15396_s1 + $0xa8] sm:$0xff] }
 0x1c8   : > { %v12763_v33 = vadd.f32 %v10105_v42, %v3597_v48  ;;  %v12765_v61 = vadd.f32 %v3598_v60, %v2347_v17  ;;  %10293 = vmatprep.subr.bf16.mxu0 %v11650_v56  ;;  %4470 = vperm.xlu1 %11506, %v4352_v6   ;;  %v4355_v48 = vld [vmem:[%s15396_s1 + $0xa0] sm:$0xff] }
 0x1c9   : > { %v9917_v19 = vpop.f32.mrb[4].mxu0  ;;  %4465 = vperm.xlu0 %11505, %v4351_v23  }
 0x1ca   : > { %v1442_v7 = vpop.f32.mrb[5].mxu0  ;;  %v10109_v11 = vpop.f32.mrb[4].mxu1  ;;  %v3507_v25 = vrot.slane %v9917_v19, 7 }
 0x1cb   : > { %v3505_v40 = vrot.slane %v1442_v7, 7  ;;  %v9918_v12 = vpop.f32.mrb[6].mxu0  ;;  %v2360_v16 = vpop.f32.mrb[5].mxu1  ;;  %10294 = vmatpush3.bf16.msra.mxu0 %v11650_v56 }
 0x1cc   : > { %v3508_v20 = vrot.slane %v9918_v12, 7  ;;  %v1445_v22 = vpop.f32.mrb[7].mxu0  ;;  %v10110_v26 = vpop.f32.mrb[6].mxu1  ;;  %4480 = vperm.xlu1 %11506, %v4354_v13  }
 0x1cd   : > { %v3506_v31 = vrot.slane %v1445_v22, 7  ;;  %v3595_v27 = vsel %vm3551_vm0, %v3504_v43, %v3505_v40  ;;  %v2363_v42 = vpop.f32.mrb[7].mxu1  ;;  %4475 = vperm.xlu0 %11505, %v4353_v44   ;;  %v4360_v44 = vld [vmem:[%s15396_s1 + $0xc8] sm:$0xff] }
 0x1ce   : > { %v12775_v32 = vadd.f32 %v3595_v27, %v2360_v16  ;;  %v3592_v57 = vsel %vm3551_vm0, %v3507_v25, %v3508_v20  ;;  %10248 = vmatmul.mubr.bf16.gmra.mrb[64].mxu0 %v12123_v41 }
 0x1cf   : > { %v3593_v43 = vsel %vm3551_vm0, %v3506_v31, %v3507_v25  ;;  %v12788_v55 = vadd.f32 %v10110_v26, %v3592_v57  ;;  %v3594_v56 = vsel %vm3551_vm0, %v3505_v40, %v3506_v31  ;;  %10251 = vmatprep.mubr.bf16.mxu0 %v12157_v52  ;;  %v4358_v26 = vld [vmem:[%s15396_s1 + $0xb8] sm:$0xff]  ;;  %v4357_v31 = vld [vmem:[%s15396_s1 + $0xb0] sm:$0xff] }
 0x1d0   : > { %v12793_v4 = vadd.f32 %v10109_v11, %v3593_v43  ;;  %v12795_v41 = vadd.f32 %v3594_v56, %v2363_v42  ;;  %4490 = vperm.xlu1 %11506, %v4356_v18  }
 0x1d1   : > { %v9921_v17 = vpop.f32.mrb[8].mxu0  ;;  %4485 = vperm.xlu0 %11505, %v4355_v48  }
 0x1d2   : > { %v1458_v35 = vpop.f32.mrb[9].mxu0  ;;  %v10113_v36 = vpop.f32.mrb[8].mxu1  ;;  %v3511_v6 = vrot.slane %v9921_v17, 7  ;;  %v4359_v17 = vld [vmem:[%s15396_s1 + $0xc0] sm:$0xff] }
 0x1d3   : > { %v3509_v60 = vrot.slane %v1458_v35, 7  ;;  %v9922_v19 = vpop.f32.mrb[10].mxu0  ;;  %v2376_v52 = vpop.f32.mrb[9].mxu1 }
 0x1d4   : > { %v3512_v7 = vrot.slane %v9922_v19, 7  ;;  %v1461_v11 = vpop.f32.mrb[11].mxu0  ;;  %v10114_v23 = vpop.f32.mrb[10].mxu1  ;;  %4500 = vperm.xlu1 %11506, %v4358_v26  }
 0x1d5   : > { %v3510_v40 = vrot.slane %v1461_v11, 7  ;;  %v3591_v12 = vsel %vm3551_vm0, %v3508_v20, %v3509_v60  ;;  %v2379_v16 = vpop.f32.mrb[11].mxu1  ;;  %4495 = vperm.xlu0 %11505, %v4357_v31  }
 0x1d6   : > { %v12805_v25 = vadd.f32 %v3591_v12, %v2376_v52  ;;  %v3588_v22 = vsel %vm3551_vm0, %v3511_v6, %v3512_v7  ;;  %10252 = vmatmul.mubr.bf16.gmra.mrb[68].mxu0 %v12161_v53  ;;  %v4362_v12 = vld [vmem:[%s15396_s1 + $0xd8] sm:$0xff] }
 0x1d7   : > { %v3589_v20 = vsel %vm3551_vm0, %v3510_v40, %v3511_v6  ;;  %v12818_v27 = vadd.f32 %v10114_v23, %v3588_v22  ;;  %v3590_v42 = vsel %vm3551_vm0, %v3509_v60, %v3510_v40  ;;  %10255 = vmatprep.mubr.bf16.mxu0 %v12198_v0 }
 0x1d8   : > { %v12823_v57 = vadd.f32 %v10113_v36, %v3589_v20  ;;  %v12825_v53 = vadd.f32 %v3590_v42, %v2379_v16  ;;  %4510 = vperm.xlu1 %11506, %v4360_v44   ;;  %v4361_v16 = vld [vmem:[%s15396_s1 + $0xd0] sm:$0xff]  ;;  %v4364_v42 = vld [vmem:[%s15396_s1 + $0xe8] sm:$0xff] }
 0x1d9   : > { %v9925_v13 = vpop.f32.mrb[12].mxu0  ;;  %4505 = vperm.xlu0 %11505, %v4359_v17  }
 0x1da   : > { %v1474_v43 = vpop.f32.mrb[13].mxu0  ;;  %v10117_v56 = vpop.f32.mrb[12].mxu1  ;;  %v3515_v36 = vrot.slane %v9925_v13, 7 }
 0x1db   : > { %v3513_v18 = vrot.slane %v1474_v43, 7  ;;  %v9926_v35 = vpop.f32.mrb[14].mxu0  ;;  %v2392_v0 = vpop.f32.mrb[13].mxu1  ;;  %v4363_v43 = vld [vmem:[%s15396_s1 + $0xe0] sm:$0xff] }
 0x1dc   : > { %v3516_v48 = vrot.slane %v9926_v35, 7  ;;  %v1477_v60 = vpop.f32.mrb[15].mxu0  ;;  %v10118_v19 = vpop.f32.mrb[14].mxu1  ;;  %4520 = vperm.xlu1 %11506, %v4362_v12   ;;  %v4365_v12 = vld [vmem:[%s15396_s1 + $0xf0] sm:$0xff] }
 0x1dd   : > { %v3514_v52 = vrot.slane %v1477_v60, 7  ;;  %v3587_v6 = vsel %vm3551_vm0, %v3512_v7, %v3513_v18  ;;  %v2395_v11 = vpop.f32.mrb[15].mxu1  ;;  %4515 = vperm.xlu0 %11505, %v4361_v16  }
 0x1de   : > { %v12835_v23 = vadd.f32 %v3587_v6, %v2392_v0  ;;  %v3584_v40 = vsel %vm3551_vm0, %v3515_v36, %v3516_v48  ;;  %10256 = vmatmul.mubr.bf16.gmra.mrb[72].mxu0 %v12202_v1 }
 0x1df   : > { %v3585_v7 = vsel %vm3551_vm0, %v3514_v52, %v3515_v36  ;;  %v12848_v22 = vadd.f32 %v10118_v19, %v3584_v40  ;;  %v3586_v26 = vsel %vm3551_vm0, %v3513_v18, %v3514_v52  ;;  %10259 = vmatprep.mubr.bf16.mxu0 %v12241_v14  ;;  %v4366_v40 = vld [vmem:[%s15396_s1 + $0xf8] sm:$0xff] }
 0x1e0   : > { %v12853_v31 = vadd.f32 %v10117_v56, %v3585_v7  ;;  %v12855_v1 = vadd.f32 %v3586_v26, %v2395_v11  ;;  %4530 = vperm.xlu1 %11506, %v4364_v42   ;;  %v4368_v42 = vld [vmem:[%s15396_s1 + $0x108] sm:$0xff] }
 0x1e1   : > { %v9929_v20 = vpop.f32.mrb[16].mxu0  ;;  %4525 = vperm.xlu0 %11505, %v4363_v43  }
 0x1e2   : > { %v1490_v13 = vpop.f32.mrb[17].mxu0  ;;  %v10121_v44 = vpop.f32.mrb[16].mxu1  ;;  %v3519_v56 = vrot.slane %v9929_v20, 7 }
 0x1e3   : > { %v3517_v17 = vrot.slane %v1490_v13, 7  ;;  %v9930_v18 = vpop.f32.mrb[18].mxu0  ;;  %v2408_v14 = vpop.f32.mrb[17].mxu1 }
 0x1e4   : > { %v3520_v35 = vrot.slane %v9930_v18, 7  ;;  %v1493_v0 = vpop.f32.mrb[19].mxu0  ;;  %v10122_v36 = vpop.f32.mrb[18].mxu1  ;;  %4540 = vperm.xlu1 %11506, %v4366_v40   ;;  %v4367_v18 = vld [vmem:[%s15396_s1 + $0x100] sm:$0xff] }
 0x1e5   : > { %v3518_v60 = vrot.slane %v1493_v0, 7  ;;  %v3583_v19 = vsel %vm3551_vm0, %v3516_v48, %v3517_v17  ;;  %v2411_v52 = vpop.f32.mrb[19].mxu1  ;;  %4535 = vperm.xlu0 %11505, %v4365_v12   ;;  %v4370_v12 = vld [vmem:[%s15396_s1 + $0x118] sm:$0xff] }
 0x1e6   : > { %v12865_v6 = vadd.f32 %v3583_v19, %v2408_v14  ;;  %v3580_v11 = vsel %vm3551_vm0, %v3519_v56, %v3520_v35  ;;  %10260 = vmatmul.mubr.bf16.gmra.mrb[76].mxu0 %v12245_v15  ;;  %v11652_v19 = vld [vmem:[%s15400_s5 + $0xc8] sm:$0xff]  }
 0x1e7   : > { %v3581_v48 = vsel %vm3551_vm0, %v3518_v60, %v3519_v56  ;;  %v12878_v16 = vadd.f32 %v10122_v36, %v3580_v11  ;;  %v3582_v7 = vsel %vm3551_vm0, %v3517_v17, %v3518_v60  ;;  %10263 = vmatprep.mubr.bf16.mxu0 %v12280_v30  ;;  %v11651_v60 = vld [vmem:[%s15400_s5 + $0xc0] sm:$0xff]  }
 0x1e8   : > { %v12883_v26 = vadd.f32 %v10121_v44, %v3581_v48  ;;  %v12885_v15 = vadd.f32 %v3582_v7, %v2411_v52  ;;  %4550 = vperm.xlu1 %11506, %v4368_v42   ;;  %10343 = vmatprep.subr.bf16.mxu1 %v11651_v60 }
 0x1e9   : > { %v9933_v20 = vpop.f32.mrb[20].mxu0  ;;  %4545 = vperm.xlu0 %11505, %v4367_v18   ;;  %10344 = vmatpush3.bf16.msra.mxu1 %v11651_v60 }
 0x1ea   : > { %v1506_v13 = vpop.f32.mrb[21].mxu0  ;;  %v10125_v43 = vpop.f32.mrb[20].mxu1  ;;  %v3523_v44 = vrot.slane %v9933_v20, 7  ;;  %v4369_v20 = vld [vmem:[%s15396_s1 + $0x110] sm:$0xff]  ;;  %10345 = vmatprep.subr.bf16.mxu1 %v11652_v19 }
 0x1eb   : > { %v3521_v17 = vrot.slane %v1506_v13, 7  ;;  %v9934_v14 = vpop.f32.mrb[22].mxu0  ;;  %v2424_v30 = vpop.f32.mrb[21].mxu1 }
 0x1ec   : > { %v3524_v56 = vrot.slane %v9934_v14, 7  ;;  %v1509_v0 = vpop.f32.mrb[23].mxu0  ;;  %v10126_v36 = vpop.f32.mrb[22].mxu1  ;;  %4560 = vperm.xlu1 %11506, %v4370_v12  }
 0x1ed   : > { %v3522_v52 = vrot.slane %v1509_v0, 7  ;;  %v3579_v11 = vsel %vm3551_vm0, %v3520_v35, %v3521_v17  ;;  %v2427_v40 = vpop.f32.mrb[23].mxu1  ;;  %4555 = vperm.xlu0 %11505, %v4369_v20   ;;  %10346 = vmatpush3.bf16.msra.mxu1 %v11652_v19 }
 0x1ee   : > { %v12904_v48 = vadd.f32 %v3579_v11, %v2424_v30  ;;  %v3576_v7 = vsel %vm3551_vm0, %v3523_v44, %v3524_v56  ;;  %10264 = vmatmul.mubr.bf16.gmra.mrb[80].mxu0 %v12282_v34  ;;  %v11653_v34 = vld [vmem:[%s15400_s5 + $0xd0] sm:$0xff]  }
 0x1ef   : > { %v3577_v35 = vsel %vm3551_vm0, %v3522_v52, %v3523_v44  ;;  %v12914_v42 = vadd.f32 %v10126_v36, %v3576_v7  ;;  %v3578_v13 = vsel %vm3551_vm0, %v3521_v17, %v3522_v52  ;;  %10267 = vmatprep.mubr.bf16.mxu0 %v12306_v46  ;;  %v4372_v44 = vld [vmem:[%s15396_s1 + $0x128] sm:$0xff]  ;;  %v4371_v46 = vld [vmem:[%s15396_s1 + $0x120] sm:$0xff]  ;;  %10347 = vmatprep.subr.bf16.mxu1 %v11653_v34 }
 0x1f0   : > { %v12919_v18 = vadd.f32 %v10125_v43, %v3577_v35  ;;  %v12921_v14 = vadd.f32 %v3578_v13, %v2427_v40  ;;  %4570 = vperm.xlu1 %11506, %v4372_v44   ;;  %v4374_v13 = vld [vmem:[%s15396_s1 + $0x138] sm:$0xff] }
 0x1f1   : > { %v9937_v30 = vpop.f32.mrb[24].mxu0  ;;  %4565 = vperm.xlu0 %11505, %v4371_v46   ;;  %10348 = vmatpush3.bf16.msra.mxu1 %v11653_v34 }
 0x1f2   : > { %v1522_v17 = vpop.f32.mrb[25].mxu0  ;;  %v10129_v0 = vpop.f32.mrb[24].mxu1  ;;  %v3527_v52 = vrot.slane %v9937_v30, 7  ;;  %v4373_v30 = vld [vmem:[%s15396_s1 + $0x130] sm:$0xff] }
 0x1f3   : > { %v3525_v43 = vrot.slane %v1522_v17, 7  ;;  %v9938_v36 = vpop.f32.mrb[26].mxu0  ;;  %v2440_v60 = vpop.f32.mrb[25].mxu1 }
 0x1f4   : > { %v3528_v11 = vrot.slane %v9938_v36, 7  ;;  %v1525_v40 = vpop.f32.mrb[27].mxu0  ;;  %v10130_v12 = vpop.f32.mrb[26].mxu1  ;;  %4580 = vperm.xlu1 %11506, %v4374_v13  }
 0x1f5   : > { %v3526_v7 = vrot.slane %v1525_v40, 7  ;;  %v3575_v20 = vsel %vm3551_vm0, %v3524_v56, %v3525_v43  ;;  %v2443_v35 = vpop.f32.mrb[27].mxu1  ;;  %4575 = vperm.xlu0 %11505, %v4373_v30   ;;  %v4376_v40 = vld [vmem:[%s15396_s1 + $0x148] sm:$0xff] }
 0x1f6   : > { %v12937_v17 = vadd.f32 %v3575_v20, %v2440_v60  ;;  %v3572_v19 = vsel %vm3551_vm0, %v3527_v52, %v3528_v11  ;;  %10268 = vmatmul.mubr.bf16.gmra.mrb[84].mxu0 %v12308_v47 }
 0x1f7   : > { %v3573_v56 = vsel %vm3551_vm0, %v3526_v7, %v3527_v52  ;;  %v12947_v44 = vadd.f32 %v10130_v12, %v3572_v19  ;;  %v3574_v46 = vsel %vm3551_vm0, %v3525_v43, %v3526_v7  ;;  %10271 = vmatprep.mubr.bf16.mxu0 %v12327_v58  ;;  %v4375_v43 = vld [vmem:[%s15396_s1 + $0x140] sm:$0xff] }
 0x1f8   : > { %v12952_v36 = vadd.f32 %v10129_v0, %v3573_v56  ;;  %v12954_v60 = vadd.f32 %v3574_v46, %v2443_v35  ;;  %4590 = vperm.xlu1 %11506, %v4376_v40   ;;  %v4378_v46 = vld [vmem:[%s15396_s1 + $0x158] sm:$0xff] }
 0x1f9   : > { %15426 = vst [vmem:[#allocation11_spill] sm:$0xff] %v12947_v44  ;;  %v9941_v47 = vpop.f32.mrb[28].mxu0  ;;  %4585 = vperm.xlu0 %11505, %v4375_v43  }
 0x1fa   : > { %v1538_v52 = vpop.f32.mrb[29].mxu0  ;;  %v10133_v12 = vpop.f32.mrb[28].mxu1  ;;  %v3531_v0 = vrot.slane %v9941_v47, 7  ;;  %v4377_v47 = vld [vmem:[%s15396_s1 + $0x150] sm:$0xff] }
 0x1fb   : > { %v3529_v7 = vrot.slane %v1538_v52, 7  ;;  %v9942_v58 = vpop.f32.mrb[30].mxu0  ;;  %v2456_v34 = vpop.f32.mrb[29].mxu1 }
 0x1fc   : > { %v3532_v20 = vrot.slane %v9942_v58, 7  ;;  %v1541_v35 = vpop.f32.mrb[31].mxu0  ;;  %v10134_v19 = vpop.f32.mrb[30].mxu1  ;;  %4600 = vperm.xlu1 %11506, %v4378_v46  }
 0x1fd   : > { %v3530_v13 = vrot.slane %v1541_v35, 7  ;;  %v3571_v30 = vsel %vm3551_vm0, %v3528_v11, %v3529_v7  ;;  %v2459_v56 = vpop.f32.mrb[31].mxu1  ;;  %4595 = vperm.xlu0 %11505, %v4377_v47   ;;  %v4380_v35 = vld [vmem:[%s15396_s1 + $0x168] sm:$0xff] }
 0x1fe   : > { %v12967_v3 = vadd.f32 %v3571_v30, %v2456_v34  ;;  %v3568_v52 = vsel %vm3551_vm0, %v3531_v0, %v3532_v20  ;;  %10272 = vmatmul.mubr.bf16.gmra.mrb[88].mxu0 %v12329_v59 }
 0x1ff   : > { %v3569_v11 = vsel %vm3551_vm0, %v3530_v13, %v3531_v0  ;;  %v12977_v40 = vadd.f32 %v10134_v19, %v3568_v52  ;;  %v3570_v43 = vsel %vm3551_vm0, %v3529_v7, %v3530_v13  ;;  %10275 = vmatprep.mubr.bf16.mxu0 %v12346_v8  ;;  %v4379_v19 = vld [vmem:[%s15396_s1 + $0x160] sm:$0xff] }
 0x200   : > { %15427 = vst [vmem:[#allocation12_spill] sm:$0xff] %v12967_v3  ;;  %v12982_v58 = vadd.f32 %v10133_v12, %v3569_v11  ;;  %v12984_v34 = vadd.f32 %v3570_v43, %v2459_v56  ;;  %4610 = vperm.xlu1 %11506, %v4380_v35  }
 0x201   : > { %15428 = vst [vmem:[#allocation13_spill] sm:$0xff] %v12977_v40  ;;  %v9945_v59 = vpop.f32.mrb[32].mxu0  ;;  %4605 = vperm.xlu0 %11505, %v4379_v19   ;;  %v4382_v40 = vld [vmem:[%s15396_s1 + $0x178] sm:$0xff] }
 0x202   : > { %15429 = vst [vmem:[#allocation14_spill] sm:$0xff] %v12982_v58  ;;  %15430 = vst [vmem:[#allocation15_spill] sm:$0xff] %v12984_v34  ;;  %v1554_v30 = vpop.f32.mrb[33].mxu0  ;;  %v10137_v0 = vpop.f32.mrb[32].mxu1  ;;  %v3535_v12 = vrot.slane %v9945_v59, 7  ;;  %v4381_v59 = vld [vmem:[%s15396_s1 + $0x170] sm:$0xff] }
 0x203   : > { %v3533_v7 = vrot.slane %v1554_v30, 7  ;;  %v9946_v13 = vpop.f32.mrb[34].mxu0  ;;  %v2472_v8 = vpop.f32.mrb[33].mxu1 }
 0x204   : > { %v3536_v52 = vrot.slane %v9946_v13, 7  ;;  %v1557_v56 = vpop.f32.mrb[35].mxu0  ;;  %v10138_v11 = vpop.f32.mrb[34].mxu1  ;;  %4620 = vperm.xlu1 %11506, %v4382_v40  }
 0x205   : > { %v3534_v46 = vrot.slane %v1557_v56, 7  ;;  %v3567_v47 = vsel %vm3551_vm0, %v3532_v20, %v3533_v7  ;;  %v2475_v43 = vpop.f32.mrb[35].mxu1  ;;  %4615 = vperm.xlu0 %11505, %v4381_v59  }
 0x206   : > { %v12997_v34 = vadd.f32 %v3567_v47, %v2472_v8  ;;  %v3564_v30 = vsel %vm3551_vm0, %v3535_v12, %v3536_v52  ;;  %10276 = vmatmul.mubr.bf16.gmra.mrb[92].mxu0 %v12348_v9 }
 0x207   : > { %v3565_v20 = vsel %vm3551_vm0, %v3534_v46, %v3535_v12  ;;  %v13007_v35 = vadd.f32 %v10138_v11, %v3564_v30  ;;  %v3566_v19 = vsel %vm3551_vm0, %v3533_v7, %v3534_v46  ;;  %10295 = vmatprep.mubr.bf16.mxu0 %v12490_v28 }
 0x208   : > { %15431 = vst [vmem:[#allocation16_spill] sm:$0xff] %v12997_v34  ;;  %v13012_v13 = vadd.f32 %v10137_v0, %v3565_v20  ;;  %v13014_v8 = vadd.f32 %v3566_v19, %v2475_v43 }
 0x209   : > { %15432 = vst [vmem:[#allocation17_spill] sm:$0xff] %v13007_v35  ;;  %v9949_v9 = vpop.f32.mrb[36].mxu0 }
 0x20a   : > { %15433 = vst [vmem:[#allocation18_spill] sm:$0xff] %v13014_v8  ;;  %v1570_v56 = vpop.f32.mrb[37].mxu0  ;;  %v10141_v47 = vpop.f32.mrb[36].mxu1  ;;  %v3539_v12 = vrot.slane %v9949_v9, 7 }
 0x20b   : > { %v3537_v34 = vrot.slane %v1570_v56, 7  ;;  %v9950_v3 = vpop.f32.mrb[38].mxu0  ;;  %v2488_v58 = vpop.f32.mrb[37].mxu1 }
 0x20c   : > { %v3540_v11 = vrot.slane %v9950_v3, 7  ;;  %v1573_v30 = vpop.f32.mrb[39].mxu0  ;;  %v10142_v35 = vpop.f32.mrb[38].mxu1 }
 0x20d   : > { %v3538_v44 = vrot.slane %v1573_v30, 7  ;;  %v3563_v28 = vsel %vm3551_vm0, %v3536_v52, %v3537_v34  ;;  %v2491_v0 = vpop.f32.mrb[39].mxu1 }
 0x20e   : > { %v13018_v7 = vadd.f32 %v3563_v28, %v2488_v58  ;;  %v3560_v40 = vsel %vm3551_vm0, %v3539_v12, %v3540_v11  ;;  %10296 = vmatmul.mubr.bf16.vlgmr.msra.gmra.mrb[48].mxu0 %v12497_v38 }
 0x20f   : > { %v3561_v46 = vsel %vm3551_vm0, %v3538_v44, %v3539_v12  ;;  %v13025_v43 = vadd.f32 %v10142_v35, %v3560_v40  ;;  %v3562_v3 = vsel %vm3551_vm0, %v3537_v34, %v3538_v44  ;;  %10299 = vmatprep.mubr.bf16.mxu0 %v12500_v39 }
 0x210   : > { %15434 = vst [vmem:[#allocation19_spill] sm:$0xff] %v13018_v7  ;;  %v13030_v59 = vadd.f32 %v10141_v47, %v3561_v46  ;;  %v13032_v52 = vadd.f32 %v3562_v3, %v2491_v0 }
 0x211   : > { %15435 = vst [vmem:[#allocation20_spill] sm:$0xff] %v13025_v43  ;;  %v9953_v58 = vpop.f32.mrb[40].mxu0 }
 0x212   : > { %15436 = vst [vmem:[#allocation21_spill] sm:$0xff] %v13030_v59  ;;  %15437 = vst [vmem:[#allocation22_spill] sm:$0xff] %v13032_v52  ;;  %v1586_v20 = vpop.f32.mrb[41].mxu0  ;;  %v10145_v19 = vpop.f32.mrb[40].mxu1  ;;  %v3543_v30 = vrot.slane %v9953_v58, 7 }
 0x213   : > { %v3541_v9 = vrot.slane %v1586_v20, 7  ;;  %v9954_v56 = vpop.f32.mrb[42].mxu0  ;;  %v2504_v38 = vpop.f32.mrb[41].mxu1 }
 0x214   : > { %v3544_v28 = vrot.slane %v9954_v56, 7  ;;  %v1589_v12 = vpop.f32.mrb[43].mxu0  ;;  %v10146_v35 = vpop.f32.mrb[42].mxu1 }
 0x215   : > { %v3542_v40 = vrot.slane %v1589_v12, 7  ;;  %v3559_v44 = vsel %vm3551_vm0, %v3540_v11, %v3541_v9  ;;  %v2507_v34 = vpop.f32.mrb[43].mxu1 }
 0x216   : > { %v13036_v39 = vadd.f32 %v3559_v44, %v2504_v38  ;;  %v3556_v47 = vsel %vm3551_vm0, %v3543_v30, %v3544_v28  ;;  %10300 = vmatmul.mubr.bf16.gmra.mrb[52].mxu0 %v12513_v29 }
 0x217   : > { %v3557_v0 = vsel %vm3551_vm0, %v3542_v40, %v3543_v30  ;;  %v13043_v46 = vadd.f32 %v10146_v35, %v3556_v47  ;;  %v3558_v3 = vsel %vm3551_vm0, %v3541_v9, %v3542_v40  ;;  %10303 = vmatprep.mubr.bf16.mxu0 %v12516_v50  ;;  %v15442_v9 = vrot.slane %v12733_v37, 7 }
 0x218   : > { %15438 = vst [vmem:[#allocation23_spill] sm:$0xff] %v13036_v39  ;;  %v13048_v58 = vadd.f32 %v10145_v19, %v3557_v0  ;;  %v13050_v11 = vadd.f32 %v3558_v3, %v2507_v34  ;;  %v11915_v3 = vld [vmem:[%s12044_s30 + $0x40] sm:$0xff]  }
 0x219   : > { %15439 = vst [vmem:[#allocation24_spill] sm:$0xff] %v13043_v46  ;;  %v9957_v20 = vpop.f32.mrb[44].mxu0 }
 0x21a   : > { %15440 = vst [vmem:[#allocation25_spill] sm:$0xff] %v13048_v58  ;;  %15441 = vst [vmem:[#allocation26_spill] sm:$0xff] %v13050_v11  ;;  %v1602_v56 = vpop.f32.mrb[45].mxu0  ;;  %v10149_v38 = vpop.f32.mrb[44].mxu1  ;;  %v3547_v39 = vrot.slane %v9957_v20, 7 }
 0x21b   : > { %v3545_v12 = vrot.slane %v1602_v56, 7  ;;  %v9958_v29 = vpop.f32.mrb[46].mxu0  ;;  %v2520_v44 = vpop.f32.mrb[45].mxu1 }
 0x21c   : > { %v3548_v30 = vrot.slane %v9958_v29, 7  ;;  %v1605_v35 = vpop.f32.mrb[47].mxu0  ;;  %v10150_v47 = vpop.f32.mrb[46].mxu1  ;;  %v11916_v29 = vld [vmem:[%s12044_s30 + $0x48] sm:$0xff]  }
 0x21d   : > { %v3546_v46 = vrot.slane %v1605_v35, 7  ;;  %v3555_v50 = vsel %vm3551_vm0, %v3544_v28, %v3545_v12  ;;  %v2523_v19 = vpop.f32.mrb[47].mxu1 }
 0x21e   : > { %v3599_v40 = vsel %vm3551_vm0, %v3548_v30, %v15442_v9  ;;  %v13058_v34 = vadd.f32 %v3555_v50, %v2520_v44  ;;  %v3552_v0 = vsel %vm3551_vm0, %v3547_v39, %v3548_v30  ;;  %10304 = vmatmul.mubr.bf16.gmra.mrb[56].mxu0 %v11915_v3  ;;  %v11917_v30 = vld [vmem:[%s12044_s30 + $0x50] sm:$0xff]   ;;  %v11918_v50 = vld [vmem:[%s12044_s30 + $0x58] sm:$0xff]   ;;  %v11662_v9 = vld [vmem:[%s15400_s5 + $0x120] sm:$0xff]  }
 0x21f   : > { %v13064_v20 = vadd.f32 %v3599_v40, %v12739_v63  ;;  %v3553_v28 = vsel %vm3551_vm0, %v3546_v46, %v3547_v39  ;;  %v13068_v56 = vadd.f32 %v10150_v47, %v3552_v0  ;;  %v3554_v37 = vsel %vm3551_vm0, %v3545_v12, %v3546_v46  ;;  %10307 = vmatprep.mubr.bf16.mxu0 %v11916_v29  ;;  %v15447_v63 = vld [vmem:[#allocation4_spill] sm:$0xff]  ;;  %v15448_v39 = vld [vmem:[#allocation5_spill] sm:$0xff]  ;;  %v15449_v46 = vld [vmem:[#allocation6_spill] sm:$0xff] }
 0x220   : > { %15443 = vst [vmem:[#allocation27_spill] sm:$0xff] %v13058_v34  ;;  %v13073_v44 = vadd.f32 %v10149_v38, %v3553_v28  ;;  %v13075_v35 = vadd.f32 %v3554_v37, %v2523_v19  ;;  %v15450_v38 = vld [vmem:[#allocation7_spill] sm:$0xff]  ;;  %v15451_v12 = vld [vmem:[#allocation8_spill] sm:$0xff]  ;;  %v11664_v40 = vld [vmem:[%s15400_s5 + $0x128] sm:$0xff]  }
 0x221   : > { %15444 = vst [vmem:[#allocation28_spill] sm:$0xff] %v13068_v56  ;;  %v11661_v47 = vld [vmem:[%s15400_s5 + $0x118] sm:$0xff]   ;;  %v11659_v19 = vld [vmem:[%s15400_s5 + $0xf0] sm:$0xff]  }
 0x222   : > { %15445 = vst [vmem:[#allocation29_spill] sm:$0xff] %v13073_v44  ;;  %15446 = vst [vmem:[#allocation30_spill] sm:$0xff] %v13075_v35  ;;  %v11665_v0 = vld [vmem:[%s15400_s5 + $0x130] sm:$0xff]   ;;  %v11663_v3 = vld [vmem:[%s15400_s5 + $0xf8] sm:$0xff]  }
 0x223   : > { %v11666_v28 = vld [vmem:[%s15400_s5 + $0x138] sm:$0xff]  }
 0x226   : > { %10308 = vmatmul.mubr.bf16.gmra.mrb[60].mxu0 %v11917_v30 }
 0x227   : > { %10311 = vmatprep.mubr.bf16.mxu0 %v11918_v50 }
 0x22e   : > { %10312 = vmatmul.mubr.bf16.gmra.mrb[64].mxu0 %v12545_v10  ;;  %v15452_v10 = vld [vmem:[#allocation9_spill] sm:$0xff] }
 0x22f   : > { %10315 = vmatprep.mubr.bf16.mxu0 %v12548_v45  ;;  %v15453_v45 = vld [vmem:[#allocation10_spill] sm:$0xff] }
 0x236   : > { %10316 = vmatmul.mubr.bf16.gmra.mrb[68].mxu0 %v12555_v51  ;;  %v11654_v51 = vld [vmem:[%s15400_s5 + $0xd8] sm:$0xff]  }
 0x237   : > { %10319 = vmatprep.mubr.bf16.mxu0 %v12558_v54  ;;  %10349 = vmatprep.subr.bf16.mxu1 %v11654_v51  ;;  %v11655_v54 = vld [vmem:[%s15400_s5 + $0xe0] sm:$0xff]  }
 0x238   : > { %10350 = vmatpush3.bf16.msra.mxu1 %v11654_v51 }
 0x239   : > { %10351 = vmatprep.subr.bf16.mxu1 %v11655_v54 }
 0x23c   : > { %10352 = vmatpush3.bf16.msra.mxu1 %v11655_v54 }
 0x23e   : > { %10320 = vmatmul.mubr.bf16.gmra.mrb[72].mxu0 %v15447_v63 }
 0x23f   : > { %10323 = vmatprep.mubr.bf16.mxu0 %v15448_v39 }
 0x246   : > { %10324 = vmatmul.mubr.bf16.gmra.mrb[76].mxu0 %v15449_v46 }
 0x247   : > { %10327 = vmatprep.mubr.bf16.mxu0 %v15450_v38 }
 0x24e   : > { %10328 = vmatmul.mubr.bf16.gmra.mrb[80].mxu0 %v12585_v5  ;;  %v11660_v5 = vld [vmem:[%s15400_s5 + $0x110] sm:$0xff]  }
 0x24f   : > { %10331 = vmatprep.mubr.bf16.mxu0 %v15451_v12 }
 0x256   : > { %10332 = vmatmul.mubr.bf16.gmra.mrb[84].mxu0 %v12595_v62  ;;  %v11657_v62 = vld [vmem:[%s15400_s5 + $0x100] sm:$0xff]  }
 0x257   : > { %10335 = vmatprep.mubr.bf16.mxu0 %v15452_v10  ;;  %10535 = vmatprep.subr.bf16.mxu0 %v11657_v62  ;;  %v13142_v10 = vld [vmem:[%s15398_s3] ss:$0 sm:$0xff] }
 0x258   : > { %10536 = vmatpush3.bf16.msra.mxu0 %v11657_v62  ;;  %v13154_v62 = vld [vmem:[%s15399_s4] ss:$0 sm:$0xff] }
 0x25e   : > { %10336 = vmatmul.mubr.bf16.gmra.mrb[88].mxu0 %v12605_v2  ;;  %v11658_v2 = vld [vmem:[%s15400_s5 + $0x108] sm:$0xff]  }
 0x25f   : > { %10339 = vmatprep.mubr.bf16.mxu0 %v15453_v45  ;;  %10537 = vmatprep.subr.bf16.mxu0 %v11658_v2 }
 0x260   : > { %10538 = vmatpush3.bf16.msra.mxu0 %v11658_v2 }
 0x261   : > { %10539 = vmatprep.subr.bf16.mxu0 %v11660_v5 }
 0x264   : > { %10540 = vmatpush3.bf16.msra.mxu0 %v11660_v5 }
 0x265   : > { %10541 = vmatprep.subr.bf16.mxu0 %v11661_v47 }
 0x266   : > { %10340 = vmatmul.mubr.bf16.gmra.mrb[92].mxu0 %v12615_v21  ;;  %v11656_v21 = vld [vmem:[%s15400_s5 + $0xe8] sm:$0xff]  }
 0x267   : > { %10353 = vmatprep.subr.bf16.mxu1 %v11656_v21 }
 0x268   : > { %10354 = vmatpush3.bf16.msra.mxu1 %v11656_v21  ;;  %10542 = vmatpush3.bf16.msra.mxu0 %v11661_v47 }
 0x269   : > { %10355 = vmatprep.subr.bf16.mxu1 %v11659_v19  ;;  %10543 = vmatprep.subr.bf16.mxu0 %v11662_v9 }
 0x26c   : > { %10356 = vmatpush3.bf16.msra.mxu1 %v11659_v19  ;;  %10544 = vmatpush3.bf16.msra.mxu0 %v11662_v9 }
 0x26d   : > { %10545 = vmatprep.subr.bf16.mxu0 %v11664_v40  ;;  %10357 = vmatprep.subr.bf16.mxu1 %v11663_v3 }
 0x270   : > { %10546 = vmatpush3.bf16.msra.mxu0 %v11664_v40  ;;  %10358 = vmatpush3.bf16.msra.mxu1 %v11663_v3 }
 0x271   : > { %10547 = vmatprep.subr.bf16.mxu0 %v11665_v0 }
 0x274   : > { %10548 = vmatpush3.bf16.msra.mxu0 %v11665_v0 }
 0x275   : > { %10549 = vmatprep.subr.bf16.mxu0 %v11666_v28 }
 0x278   : > { %10550 = vmatpush3.bf16.msra.mxu0 %v11666_v28 }
 0x2e1   : > { %v10297_v37 = vpop.f32.mrb[48].mxu0 }
 0x2e2   : > { %v13133_v29 = vpop.f32.mrb[49].mxu0  ;;  %v3650_v50 = vrot.slane %v10297_v37, 1 }
 0x2e3   : > { %15454 = vst [vmem:[#allocation4_spill] sm:$0xff] %v13133_v29  ;;  %v10298_v30 = vpop.f32.mrb[50].mxu0  ;;  %v15412_v46 = vrot.slane %v13133_v29, 1 }
 0x2e4   : > { %v3651_v63 = vrot.slane %v10298_v30, 1  ;;  %v3265_v39 = vpop.f32.mrb[51].mxu0 }
 0x2e5   : > { %v3649_v38 = vrot.slane %v3265_v39, 1 }
 0x2e6   : > { %v3741_v12 = vsel %vm3696_vm1, %v3650_v50, %v3651_v63 }
 0x2e7   : > { %v3747_v45 = vadd.f32 %v3741_v12, %v12763_v33  ;;  %v3742_v51 = vsel %vm3696_vm1, %v3649_v38, %v3650_v50  ;;  %v3743_v54 = vsel %vm3696_vm1, %v15412_v46, %v3649_v38 }
 0x2e8   : > { %v3745_v2 = vadd.f32 %v3743_v54, %v13064_v20  ;;  %v3746_v5 = vadd.f32 %v3742_v51, %v12765_v61 }
 0x2e9   : > { %v3802_v21 = vmul.f32 %v13142_v10, %v3747_v45  ;;  %v10301_v33 = vpop.f32.mrb[52].mxu0 }
 0x2ea   : > { %v3800_v47 = vmul.f32 %v13142_v10, %v3745_v2  ;;  %v3801_v19 = vmul.f32 %v13142_v10, %v3746_v5  ;;  %v3278_v9 = vpop.f32.mrb[53].mxu0  ;;  %v3654_v61 = vrot.slane %v10301_v33, 1 }
 0x2eb   : > { %v3857_v40 = vadd.f32 %v13154_v62, %v3802_v21  ;;  %v3652_v0 = vrot.slane %v3278_v9, 1  ;;  %v10302_v3 = vpop.f32.mrb[54].mxu0 }
 0x2ec   : > { %v3855_v28 = vadd.f32 %v13154_v62, %v3800_v47  ;;  %v3856_v37 = vadd.f32 %v13154_v62, %v3801_v19  ;;  %v3655_v30 = vrot.slane %v10302_v3, 1  ;;  %v3281_v20 = vpop.f32.mrb[55].mxu0 }
 0x2ed   : > { %v3953_v50 = vmul.f32 0.044715, %v3857_v40  ;;  %v3740_v39 = vsel %vm3696_vm1, %v3651_v63, %v3652_v0  ;;  %v3653_v38 = vrot.slane %v3281_v20, 1 }
 0x2ee   : > { %v3951_v12 = vmul.f32 0.044715, %v3855_v28  ;;  %v3952_v45 = vmul.f32 0.044715, %v3856_v37  ;;  %v3748_v54 = vadd.f32 %v3740_v39, %v12756_v49  ;;  %v3737_v2 = vsel %vm3696_vm1, %v3654_v61, %v3655_v30 }
 0x2ef   : > { %v4001_v51 = vmul.f32 %v3953_v50, %v3857_v40  ;;  %v3738_v5 = vsel %vm3696_vm1, %v3653_v38, %v3654_v61  ;;  %v3751_v19 = vadd.f32 %v3737_v2, %v12793_v4  ;;  %v3739_v33 = vsel %vm3696_vm1, %v3652_v0, %v3653_v38 }
 0x2f0   : > { %v3999_v21 = vmul.f32 %v3951_v12, %v3855_v28  ;;  %v4000_v47 = vmul.f32 %v3952_v45, %v3856_v37  ;;  %v3803_v9 = vmul.f32 %v13142_v10, %v3748_v54  ;;  %v3749_v3 = vadd.f32 %v3739_v33, %v12775_v32 }
 0x2f1   : > { %v4049_v63 = vmul.f32 %v4001_v51, %v3857_v40  ;;  %v3750_v49 = vadd.f32 %v3738_v5, %v12795_v41  ;;  %v10305_v20 = vpop.f32.mrb[56].mxu0  ;;  %v3806_v46 = vmul.f32 %v13142_v10, %v3751_v19  ;;  %v13183_v51 = vmul.f32 0.5, %v3857_v40 }
 0x2f2   : > { %v4047_v50 = vmul.f32 %v3999_v21, %v3855_v28  ;;  %v4048_v39 = vmul.f32 %v4000_v47, %v3856_v37  ;;  %v3294_v61 = vpop.f32.mrb[57].mxu0  ;;  %v3858_v45 = vadd.f32 %v13154_v62, %v3803_v9  ;;  %v3804_v4 = vmul.f32 %v13142_v10, %v3749_v3 }
 0x2f3   : > { %v4097_v12 = vadd.f32 %v4049_v63, %v3857_v40  ;;  %v3805_v0 = vmul.f32 %v13142_v10, %v3750_v49  ;;  %v13181_v38 = vpop.f32.mrb[58].mxu0  ;;  %v3861_v41 = vadd.f32 %v13154_v62, %v3806_v46  ;;  %v3656_v19 = vrot.slane %v3294_v61, 1 }
 0x2f4   : > { %v4095_v32 = vadd.f32 %v4047_v50, %v3855_v28  ;;  %v4096_v54 = vadd.f32 %v4048_v39, %v3856_v37  ;;  %v3297_v2 = vpop.f32.mrb[59].mxu0  ;;  %v3954_v21 = vmul.f32 0.044715, %v3858_v45  ;;  %v3859_v47 = vadd.f32 %v13154_v62, %v3804_v4 }
 0x2f5   : > { %v4145_v5 = vmul.f32 0.7978846, %v4097_v12  ;;  %v13187_v33 = vmul.f32 0.5, %v3855_v28  ;;  %v13190_v3 = vadd.f32 %v13154_v62, %v3805_v0  ;;  %v13192_v40 = vmul.f32 0.5, %v3856_v37 }
 0x2f6   : > { %v4143_v63 = vmul.f32 0.7978846, %v4095_v32  ;;  %v4144_v9 = vmul.f32 0.7978846, %v4096_v54  ;;  %v4002_v49 = vmul.f32 %v3954_v21, %v3858_v45  ;;  %v3957_v50 = vmul.f32 0.044715, %v3861_v41 }
 0x2f7   : > { %11723 = vtanh.f32 %v4145_v5  ;;  %v3955_v46 = vmul.f32 0.044715, %v3859_v47  ;;  %v3956_v39 = vmul.f32 0.044715, %v13190_v3  ;;  %v3658_v12 = vrot.slane %v10305_v20, 1 }
 0x2f8   : > { %11725 = vtanh.f32 %v4143_v63  ;;  %v4050_v4 = vmul.f32 %v4002_v49, %v3858_v45  ;;  %v4005_v61 = vmul.f32 %v3957_v50, %v3861_v41  ;;  %v3736_v28 = vsel %vm3696_vm1, %v3655_v30, %v3656_v19 }
 0x2f9   : > { %11727 = vtanh.f32 %v4144_v9  ;;  %v13197_v32 = vpop.f32.mrb[60].mxu0  ;;  %v4003_v0 = vmul.f32 %v3955_v46, %v3859_v47  ;;  %v4004_v54 = vmul.f32 %v3956_v39, %v13190_v3  ;;  %v3752_v37 = vadd.f32 %v3736_v28, %v12788_v55 }
 0x2fa   : > { %v3659_v5 = vrot.slane %v13181_v38, 1  ;;  %v13202_v21 = vpop.f32.mrb[61].mxu0  ;;  %v13204_v63 = vmul.f32 0.5, %v3858_v45  ;;  %v4098_v20 = vadd.f32 %v4050_v4, %v3858_v45  ;;  %v4053_v9 = vmul.f32 %v4005_v61, %v3861_v41 }
 0x2fb   : > { %v3657_v49 = vrot.slane %v3297_v2, 1  ;;  %v13206_v50 = vpop.f32.mrb[62].mxu0  ;;  %v4051_v35 = vmul.f32 %v4003_v0, %v3859_v47  ;;  %v4052_v30 = vmul.f32 %v4004_v54, %v13190_v3  ;;  %v3807_v46 = vmul.f32 %v13142_v10, %v3752_v37  ;;  %v11667_v2 = vld [vmem:[%s15400_s5] sm:$0xff]  }
 0x2fc   : > { %v3733_v39 = vsel %vm3696_vm1, %v3658_v12, %v3659_v5  ;;  %v13212_v55 = vpop.f32.mrb[63].mxu0  ;;  %v4146_v38 = vmul.f32 0.7978846, %v4098_v20  ;;  %v4101_v28 = vadd.f32 %v4053_v9, %v3861_v41  ;;  %10407 = vmatprep.subr.bf16.mxu1 %v11667_v2 }
 0x2fd   : > { %v3755_v34 = vadd.f32 %v3733_v39, %v12823_v57  ;;  %v3734_v45 = vsel %vm3696_vm1, %v3657_v49, %v3658_v12  ;;  %v4099_v4 = vadd.f32 %v4051_v35, %v3859_v47  ;;  %v4100_v61 = vadd.f32 %v4052_v30, %v13190_v3  ;;  %v4386_v30 = vpop.permute.xlu0 %4385 }
 0x2fe   : > { %v3862_v0 = vadd.f32 %v13154_v62, %v3807_v46  ;;  %v3735_v54 = vsel %vm3696_vm1, %v3656_v19, %v3657_v49  ;;  %11729 = vtanh.f32 %v4146_v38  ;;  %v4149_v37 = vmul.f32 0.7978846, %v4101_v28 }
 0x2ff   : > { %v3810_v20 = vmul.f32 %v13142_v10, %v3755_v34  ;;  %v3753_v57 = vadd.f32 %v3735_v54, %v12805_v25  ;;  %v13226_v12 = vmul.f32 0.5, %v3861_v41  ;;  %v4147_v9 = vmul.f32 0.7978846, %v4099_v4 }
 0x300   : > { %v4148_v39 = vmul.f32 0.7978846, %v4100_v61  ;;  %v3754_v35 = vadd.f32 %v3734_v45, %v12825_v53  ;;  %11731 = vtanh.f32 %v4149_v37  ;;  %v3958_v46 = vmul.f32 0.044715, %v3862_v0 }
 0x301   : > { %v11724_v56 = vpop.eup %11723  ;;  %v3865_v29 = vadd.f32 %v13154_v62, %v3810_v20  ;;  %v3808_v19 = vmul.f32 %v13142_v10, %v3753_v57  ;;  %v13231_v49 = vpop.f32.mrb[64].mxu0  ;;  %v13233_v38 = vmul.f32 0.5, %v3859_v47  ;;  %11733 = vtanh.f32 %v4147_v9 }
 0x302   : > { %v11726_v34 = vpop.eup %11725  ;;  %v3809_v25 = vmul.f32 %v13142_v10, %v3754_v35  ;;  %v13237_v28 = vpop.f32.mrb[65].mxu0  ;;  %v4241_v45 = vadd.f32 1.0, %v11724_v56  ;;  %11735 = vtanh.f32 %v4148_v39  ;;  %v4006_v4 = vmul.f32 %v3958_v46, %v3862_v0 }
 0x303   : > { %v11728_v53 = vpop.eup %11727  ;;  %v4239_v2 = vadd.f32 1.0, %v11726_v34  ;;  %v13239_v61 = vpop.f32.mrb[66].mxu0  ;;  %v13242_v37 = vmul.f32 0.5, %v13190_v3  ;;  %v3961_v47 = vmul.f32 0.044715, %v3865_v29  ;;  %v3863_v20 = vadd.f32 %v13154_v62, %v3808_v19 }
 0x304   : > { %v4240_v54 = vadd.f32 1.0, %v11728_v53  ;;  %v13245_v57 = vpop.f32.mrb[67].mxu0  ;;  %v4396_v9 = vpop.permute.xlu1 %4395  ;;  %v4054_v41 = vmul.f32 %v4006_v4, %v3862_v0  ;;  %v13249_v56 = vadd.f32 %v13154_v62, %v3809_v25  ;;  %v15455_v39 = vrot.slane %v13202_v21, 1 }
 0x305   : > { %v4287_v35 = vmul.f32 %v4239_v2, %v13187_v33  ;;  %v13256_v34 = vmul.f32 0.5, %v3862_v0  ;;  %v4009_v53 = vmul.f32 %v3961_v47, %v3865_v29  ;;  %v4391_v44 = vpop.permute.xlu0 %4390  ;;  %v4289_v11 = vmul.f32 %v4241_v45, %v13183_v51 }
 0x306   : > { %v3732_v46 = vsel %vm3696_vm1, %v3659_v5, %v15455_v39  ;;  %v4288_v3 = vmul.f32 %v4240_v54, %v13192_v40  ;;  %v4102_v2 = vadd.f32 %v4054_v41, %v3862_v0  ;;  %v3959_v4 = vmul.f32 0.044715, %v3863_v20 }
 0x307   : > { %v4623_v33 = vmul.f32 %v4386_v30, %v4287_v35  ;;  %v4057_v58 = vmul.f32 %v4009_v53, %v3865_v29  ;;  %v3960_v43 = vmul.f32 0.044715, %v13249_v56  ;;  %v3756_v7 = vadd.f32 %v3732_v46, %v12818_v27 }
 0x308   : > { %v4624_v25 = vmul.f32 %v4391_v44, %v4288_v3  ;;  %v11730_v5 = vpop.eup %11729  ;;  %v4150_v40 = vmul.f32 0.7978846, %v4102_v2  ;;  %v13262_v54 = vmul.f32 0.5, %v3865_v29  ;;  %v4007_v47 = vmul.f32 %v3959_v4, %v3863_v20  ;;  %v4401_v35 = vpop.permute.xlu1 %4400 }
 0x309   : > { %v15414_v39 = vrot.slane %v13206_v50, 1  ;;  %v13265_v19 = vpop.f32.mrb[68].mxu0  ;;  %v4242_v30 = vadd.f32 1.0, %v11730_v5  ;;  %v4105_v0 = vadd.f32 %v4057_v58, %v3865_v29  ;;  %v4008_v44 = vmul.f32 %v3960_v43, %v13249_v56 }
 0x30a   : > { %v4675_v51 = vpack.c.bf16 %v4624_v25, %v4623_v33  ;;  %v13268_v41 = vpop.f32.mrb[69].mxu0  ;;  %v11732_v45 = vpop.eup %11731  ;;  %11737 = vtanh.f32 %v4150_v40  ;;  %v4055_v27 = vmul.f32 %v4007_v47, %v3863_v20  ;;  %v3811_v46 = vmul.f32 %v13142_v10, %v3756_v7 }
 0x30b   : > { %v15456_v3 = vrot.slane %v13197_v32, 1  ;;  %v13277_v33 = vpop.f32.mrb[70].mxu0  ;;  %v11734_v58 = vpop.eup %11733  ;;  %v4625_v29 = vmul.f32 %v4396_v9, %v4289_v11  ;;  %v4290_v2 = vmul.f32 %v4242_v30, %v13204_v63  ;;  %v4153_v4 = vmul.f32 0.7978846, %v4105_v0 }
 0x30c   : > { %v4724_v43 = vrot.slane %v4675_v51, 4  ;;  %v13280_v25 = vpop.f32.mrb[71].mxu0  ;;  %v11736_v5 = vpop.eup %11735  ;;  %v4243_v40 = vadd.f32 1.0, %v11734_v58  ;;  %v4056_v7 = vmul.f32 %v4008_v44, %v13249_v56  ;;  %v4103_v47 = vadd.f32 %v4055_v27, %v3863_v20 }
 0x30d   : > { %v3729_v53 = vsel %vm3696_vm1, %v15456_v3, %v15414_v39  ;;  %v3866_v52 = vadd.f32 %v13154_v62, %v3811_v46  ;;  %v4626_v59 = vmul.f32 %v4401_v35, %v4290_v2  ;;  %v4244_v3 = vadd.f32 1.0, %v11736_v5  ;;  %v4406_v0 = vpop.permute.xlu0 %4405  ;;  %v4411_v46 = vpop.permute.xlu1 %4410 }
 0x30e   : > { %4796 = vst [vmem:[#allocation2 + $0x8] sm:$0xf0] %v4724_v43  ;;  %v13284_v39 = vmul.f32 0.5, %v3863_v20  ;;  %v3661_v11 = vrot.slane %v13212_v55, 1  ;;  %v4245_v9 = vadd.f32 1.0, %v11732_v45  ;;  %v4291_v63 = vmul.f32 %v4243_v40, %v13233_v38 }
 0x30f   : > { %v4104_v51 = vadd.f32 %v4056_v7, %v13249_v56  ;;  %v4151_v30 = vmul.f32 0.7978846, %v4103_v47  ;;  %v4676_v58 = vpack.c.bf16 %v4626_v59, %v4625_v29  ;;  %v4292_v44 = vmul.f32 %v4244_v3, %v13242_v37 }
 0x310   : > { %11739 = vtanh.f32 %v4153_v4  ;;  %v3962_v27 = vmul.f32 0.044715, %v3866_v52  ;;  %v4627_v8 = vmul.f32 %v4406_v0, %v4291_v63  ;;  %v3759_v20 = vadd.f32 %v3729_v53, %v12853_v31 }
 0x311   : > { %v4152_v35 = vmul.f32 0.7978846, %v4104_v51  ;;  %11741 = vtanh.f32 %v4151_v30  ;;  %v13291_v2 = vpop.f32.mrb[72].mxu0  ;;  %v4725_v55 = vrot.slane %v4676_v58, 4  ;;  %v4628_v45 = vmul.f32 %v4411_v46, %v4292_v44  ;;  %v4416_v46 = vpop.permute.xlu0 %4415 }
 0x312   : > { %v4010_v38 = vmul.f32 %v3962_v27, %v3866_v52  ;;  %v15457_v5 = vrot.slane %v13197_v32, 1  ;;  %v13297_v29 = vpop.f32.mrb[73].mxu0  ;;  %v3814_v37 = vmul.f32 %v13142_v10, %v3759_v20  ;;  %v15458_v4 = vrot.slane %v13202_v21, 1 }
 0x313   : > { %11743 = vtanh.f32 %v4152_v35  ;;  %v13305_v40 = vpop.f32.mrb[74].mxu0  ;;  %v4726_v7 = vsel %vm4723_vm2, %v4724_v43, %v4725_v55  ;;  %v4677_v32 = vpack.c.bf16 %v4628_v45, %v4627_v8  ;;  %v4293_v30 = vmul.f32 %v4245_v9, %v13226_v12 }
 0x314   : > { %v3730_v59 = vsel %vm3696_vm1, %v3661_v11, %v15457_v5  ;;  %v3731_v31 = vsel %vm3696_vm1, %v15458_v4, %v3661_v11  ;;  %v4058_v47 = vmul.f32 %v4010_v38, %v3866_v52  ;;  %v13309_v63 = vpop.f32.mrb[75].mxu0  ;;  %v11738_v51 = vpop.eup %11737  ;;  %4797 = vst [vmem:[#allocation2 + $0x10] sm:$0xff] %v4726_v7  ;;  %v3869_v21 = vadd.f32 %v13154_v62, %v3814_v37 }
 0x315   : > { %v3758_v53 = vadd.f32 %v3730_v59, %v12855_v1  ;;  %v3757_v3 = vadd.f32 %v3731_v31, %v12835_v23  ;;  %v3664_v1 = vrot.slane %v13237_v28, 1  ;;  %v4727_v0 = vrot.slane %v4677_v32, 4 }
 0x316   : > { %v4246_v58 = vadd.f32 1.0, %v11738_v51  ;;  %v4106_v44 = vadd.f32 %v4058_v47, %v3866_v52  ;;  %v3912_v43 = vmul.f32 0.5, %v13249_v56  ;;  %v3965_v23 = vmul.f32 0.044715, %v3869_v21  ;;  %v4421_v56 = vpop.permute.xlu1 %4420 }
 0x317   : > { %v3813_v11 = vmul.f32 %v13142_v10, %v3758_v53  ;;  %v3812_v8 = vmul.f32 %v13142_v10, %v3757_v3  ;;  %v15459_v12 = vrot.slane %v13206_v50, 1  ;;  %v4728_v35 = vsel %vm4723_vm2, %v4725_v55, %v4727_v0 }
 0x318   : > { %v4294_v20 = vmul.f32 %v4246_v58, %v13256_v34  ;;  %v4154_v45 = vmul.f32 0.7978846, %v4106_v44  ;;  %v4629_v5 = vmul.f32 %v4416_v46, %v4293_v30  ;;  %4798 = vst [vmem:[#allocation2 + $0x18] sm:$0xff] %v4728_v35  ;;  %v13329_v59 = vmul.f32 0.5, %v3866_v52 }
 0x319   : > { %v3868_v27 = vadd.f32 %v13154_v62, %v3813_v11  ;;  %v3728_v9 = vsel %vm3696_vm1, %v15459_v12, %v3664_v1  ;;  %v13327_v38 = vadd.f32 %v13154_v62, %v3812_v8  ;;  %v4013_v37 = vmul.f32 %v3965_v23, %v3869_v21  ;;  %v13331_v50 = vpop.f32.mrb[76].mxu0 }
 0x31a   : > { %v11740_v31 = vpop.eup %11739  ;;  %v4630_v53 = vmul.f32 %v4421_v56, %v4294_v20  ;;  %11745 = vtanh.f32 %v4154_v45  ;;  %v3666_v34 = vrot.slane %v13231_v49, 1  ;;  %v13335_v7 = vpop.f32.mrb[77].mxu0  ;;  %v13337_v47 = vmul.f32 0.5, %v3869_v21 }
 0x31b   : > { %v3964_v4 = vmul.f32 0.044715, %v3868_v27  ;;  %v3963_v55 = vmul.f32 0.044715, %v13327_v38  ;;  %v11742_v32 = vpop.eup %11741  ;;  %v4061_v3 = vmul.f32 %v4013_v37, %v3869_v21  ;;  %v3760_v52 = vadd.f32 %v3728_v9, %v12848_v22  ;;  %v13340_v30 = vpop.f32.mrb[78].mxu0 }
 0x31c   : > { %v4678_v11 = vpack.c.bf16 %v4630_v53, %v4629_v5  ;;  %v4247_v58 = vadd.f32 1.0, %v11742_v32  ;;  %v3667_v8 = vrot.slane %v13239_v61, 1  ;;  %v13344_v23 = vpop.f32.mrb[79].mxu0  ;;  %v4249_v12 = vadd.f32 1.0, %v11740_v31  ;;  %v4426_v5 = vpop.permute.xlu0 %4425 }
 0x31d   : > { %v4012_v51 = vmul.f32 %v3964_v4, %v3868_v27  ;;  %v4011_v44 = vmul.f32 %v3963_v55, %v13327_v38  ;;  %v11744_v49 = vpop.eup %11743  ;;  %v4109_v46 = vadd.f32 %v4061_v3, %v3869_v21  ;;  %v3815_v20 = vmul.f32 %v13142_v10, %v3760_v52  ;;  %v4431_v3 = vpop.permute.xlu1 %4430 }
 0x31e   : > { %v4729_v45 = vrot.slane %v4678_v11, 4  ;;  %v4248_v56 = vadd.f32 1.0, %v11744_v49  ;;  %v4295_v22 = vmul.f32 %v4247_v58, %v13284_v39  ;;  %v3725_v61 = vsel %vm3696_vm1, %v3666_v34, %v3667_v8 }
 0x31f   : > { %v4060_v35 = vmul.f32 %v4012_v51, %v3868_v27  ;;  %v4059_v9 = vmul.f32 %v4011_v44, %v13327_v38  ;;  %v4157_v37 = vmul.f32 0.7978846, %v4109_v46  ;;  %v13350_v53 = vadd.f32 %v13154_v62, %v3815_v20 }
 0x320   : > { %v4730_v21 = vsel %vm4723_vm2, %v4727_v0, %v4729_v45  ;;  %v4296_v31 = vmul.f32 %v4248_v56, %v3912_v43  ;;  %v4631_v55 = vmul.f32 %v4426_v5, %v4295_v22  ;;  %v13356_v39 = vmul.f32 0.5, %v3868_v27 }
 0x321   : > { %v4108_v4 = vadd.f32 %v4060_v35, %v3868_v27  ;;  %v4107_v32 = vadd.f32 %v4059_v9, %v13327_v38  ;;  %4799 = vst [vmem:[#allocation2 + $0x20] sm:$0xff] %v4730_v21  ;;  %11747 = vtanh.f32 %v4157_v37  ;;  %v3966_v52 = vmul.f32 0.044715, %v13350_v53  ;;  %v13359_v11 = vpop.f32.mrb[80].mxu0 }
 0x322   : > { %v4632_v58 = vmul.f32 %v4431_v3, %v4296_v31  ;;  %v3763_v49 = vadd.f32 %v3725_v61, %v12883_v26  ;;  %v3665_v0 = vrot.slane %v13245_v57, 1  ;;  %v13363_v43 = vpop.f32.mrb[81].mxu0  ;;  %v4297_v46 = vmul.f32 %v4249_v12, %v13262_v54  ;;  %v4436_v31 = vpop.permute.xlu0 %4435 }
 0x323   : > { %v4156_v51 = vmul.f32 0.7978846, %v4108_v4  ;;  %v4155_v44 = vmul.f32 0.7978846, %v4107_v32  ;;  %v4014_v35 = vmul.f32 %v3966_v52, %v13350_v53  ;;  %v3668_v27 = vrot.slane %v13268_v41, 1  ;;  %v13368_v20 = vpop.f32.mrb[82].mxu0 }
 0x324   : > { %v11746_v56 = vpop.eup %11745  ;;  %v4679_v22 = vpack.c.bf16 %v4632_v58, %v4631_v55  ;;  %v3818_v9 = vmul.f32 %v13142_v10, %v3763_v49  ;;  %v3726_v26 = vsel %vm3696_vm1, %v3665_v0, %v3666_v34  ;;  %v13373_v57 = vpop.f32.mrb[83].mxu0  ;;  %v3727_v12 = vsel %vm3696_vm1, %v3664_v1, %v3665_v0 }
 0x325   : > { %11749 = vtanh.f32 %v4156_v51  ;;  %v4250_v5 = vadd.f32 1.0, %v11746_v56  ;;  %v4062_v54 = vmul.f32 %v4014_v35, %v13350_v53  ;;  %v3762_v37 = vadd.f32 %v3726_v26, %v12885_v15  ;;  %v4441_v15 = vpop.permute.xlu1 %4440 }
 0x326   : > { %11751 = vtanh.f32 %v4155_v44  ;;  %v4731_v4 = vrot.slane %v4679_v22, 4  ;;  %v3873_v61 = vadd.f32 %v13154_v62, %v3818_v9  ;;  %v3761_v21 = vadd.f32 %v3727_v12, %v12865_v6 }
 0x327   : > { %v3724_v34 = vsel %vm3696_vm1, %v3667_v8, %v3668_v27  ;;  %v4298_v55 = vmul.f32 %v4250_v5, %v13329_v59  ;;  %v4110_v28 = vadd.f32 %v4062_v54, %v13350_v53  ;;  %v3817_v32 = vmul.f32 %v13142_v10, %v3762_v37 }
 0x328   : > { %v3764_v1 = vadd.f32 %v3724_v34, %v12878_v16  ;;  %v4633_v3 = vmul.f32 %v4436_v31, %v4297_v46  ;;  %v4732_v51 = vsel %vm4723_vm2, %v4729_v45, %v4731_v4  ;;  %v3969_v52 = vmul.f32 0.044715, %v3873_v61 }
 0x329   : > { %v3816_v6 = vmul.f32 %v13142_v10, %v3761_v21  ;;  %4800 = vst [vmem:[#allocation2 + $0x28] sm:$0xff] %v4732_v51  ;;  %v4634_v58 = vmul.f32 %v4441_v15, %v4298_v55  ;;  %v4158_v44 = vmul.f32 0.7978846, %v4110_v28  ;;  %v3872_v8 = vadd.f32 %v13154_v62, %v3817_v32  ;;  %v13395_v49 = vpop.f32.mrb[84].mxu0 }
 0x32a   : > { %v3819_v59 = vmul.f32 %v13142_v10, %v3764_v1  ;;  %v3915_v0 = vmul.f32 0.5, %v13327_v38  ;;  %v4017_v35 = vmul.f32 %v3969_v52, %v3873_v61  ;;  %v3671_v45 = vrot.slane %v13277_v33, 1  ;;  %v13402_v46 = vpop.f32.mrb[85].mxu0 }
 0x32b   : > { %v13399_v16 = vadd.f32 %v13154_v62, %v3816_v6  ;;  %v11748_v56 = vpop.eup %11747  ;;  %v4680_v22 = vpack.c.bf16 %v4634_v58, %v4633_v3  ;;  %11753 = vtanh.f32 %v4158_v44  ;;  %v3968_v9 = vmul.f32 0.044715, %v3872_v8  ;;  %v13405_v5 = vpop.f32.mrb[86].mxu0 }
 0x32c   : > { %v3670_v26 = vrot.slane %v13265_v19, 1  ;;  %v3918_v54 = vmul.f32 0.5, %v13350_v53  ;;  %v13408_v12 = vmul.f32 0.5, %v3873_v61  ;;  %v4065_v38 = vmul.f32 %v4017_v35, %v3873_v61  ;;  %v13411_v21 = vpop.f32.mrb[87].mxu0 }
 0x32d   : > { %v3967_v37 = vmul.f32 0.044715, %v13399_v16  ;;  %v4733_v31 = vrot.slane %v4680_v22, 4  ;;  %v4016_v55 = vmul.f32 %v3968_v9, %v3872_v8  ;;  %v13414_v28 = vadd.f32 %v13154_v62, %v3819_v59  ;;  %v4451_v9 = vpop.permute.xlu1 %4450 }
 0x32e   : > { %v3721_v19 = vsel %vm3696_vm1, %v3670_v26, %v3671_v45  ;;  %v4113_v1 = vadd.f32 %v4065_v38, %v3873_v61  ;;  %v3669_v3 = vrot.slane %v13280_v25, 1  ;;  %v13423_v6 = vmul.f32 0.5, %v3872_v8 }
 0x32f   : > { %v11750_v34 = vpop.eup %11749  ;;  %v4015_v15 = vmul.f32 %v3967_v37, %v13399_v16  ;;  %v4734_v51 = vsel %vm4723_vm2, %v4731_v4, %v4733_v31  ;;  %v4064_v58 = vmul.f32 %v4016_v55, %v3872_v8  ;;  %v4253_v44 = vadd.f32 1.0, %v11748_v56  ;;  %v4446_v4 = vpop.permute.xlu0 %4445 }
 0x330   : > { %v11752_v32 = vpop.eup %11751  ;;  %v4252_v53 = vadd.f32 1.0, %v11750_v34  ;;  %4801 = vst [vmem:[#allocation2 + $0x30] sm:$0xff] %v4734_v51  ;;  %v4161_v35 = vmul.f32 0.7978846, %v4113_v1  ;;  %v3970_v38 = vmul.f32 0.044715, %v13414_v28  ;;  %v3767_v25 = vadd.f32 %v3721_v19, %v12919_v18 }
 0x331   : > { %v4251_v52 = vadd.f32 1.0, %v11752_v32  ;;  %v4063_v22 = vmul.f32 %v4015_v15, %v13399_v16  ;;  %v4112_v61 = vadd.f32 %v4064_v58, %v3872_v8  ;;  %v13429_v37 = vpop.f32.mrb[88].mxu0  ;;  %v4301_v18 = vmul.f32 %v4253_v44, %v13337_v47 }
 0x332   : > { %v4300_v59 = vmul.f32 %v4252_v53, %v13356_v39  ;;  %11755 = vtanh.f32 %v4161_v35  ;;  %v3722_v39 = vsel %vm3696_vm1, %v3669_v3, %v3670_v26  ;;  %v13434_v56 = vpop.f32.mrb[89].mxu0  ;;  %v4018_v8 = vmul.f32 %v3970_v38, %v13414_v28 }
 0x333   : > { %v4299_v34 = vmul.f32 %v4251_v52, %v3915_v0  ;;  %v4111_v55 = vadd.f32 %v4063_v22, %v13399_v16  ;;  %v4160_v1 = vmul.f32 0.7978846, %v4112_v61  ;;  %v3822_v0 = vmul.f32 %v13142_v10, %v3767_v25  ;;  %v13438_v15 = vpop.f32.mrb[90].mxu0 }
 0x334   : > { %v4636_v32 = vmul.f32 %v4451_v9, %v4300_v59  ;;  %v3723_v51 = vsel %vm3696_vm1, %v3668_v27, %v3669_v3  ;;  %v3766_v26 = vadd.f32 %v3722_v39, %v12921_v14  ;;  %v13446_v52 = vpop.f32.mrb[91].mxu0  ;;  %v4066_v35 = vmul.f32 %v4018_v8, %v13414_v28 }
 0x335   : > { %v4635_v53 = vmul.f32 %v4446_v4, %v4299_v34  ;;  %v4159_v19 = vmul.f32 0.7978846, %v4111_v55  ;;  %v11754_v58 = vpop.eup %11753  ;;  %11757 = vtanh.f32 %v4160_v1  ;;  %v3877_v22 = vadd.f32 %v13154_v62, %v3822_v0  ;;  %v4461_v34 = vpop.permute.xlu1 %4460 }
 0x336   : > { %v4254_v9 = vadd.f32 1.0, %v11754_v58  ;;  %v3765_v47 = vadd.f32 %v3723_v51, %v12904_v48  ;;  %v3821_v41 = vmul.f32 %v13142_v10, %v3766_v26  ;;  %v4114_v27 = vadd.f32 %v4066_v35, %v13414_v28 }
 0x337   : > { %v4681_v59 = vpack.c.bf16 %v4636_v32, %v4635_v53  ;;  %11759 = vtanh.f32 %v4159_v19  ;;  %v3973_v3 = vmul.f32 0.044715, %v3877_v22  ;;  %v3674_v14 = vrot.slane %v13291_v2, 1  ;;  %v4456_v32 = vpop.permute.xlu0 %4455 }
 0x338   : > { %v4302_v61 = vmul.f32 %v4254_v9, %v3918_v54  ;;  %v3820_v38 = vmul.f32 %v13142_v10, %v3765_v47  ;;  %v3876_v25 = vadd.f32 %v13154_v62, %v3821_v41  ;;  %v3672_v4 = vrot.slane %v13297_v29, 1 }
 0x339   : > { %v4735_v44 = vrot.slane %v4681_v59, 4  ;;  %v4162_v48 = vmul.f32 0.7978846, %v4114_v27  ;;  %v4021_v39 = vmul.f32 %v3973_v3, %v3877_v22  ;;  %v3675_v53 = vrot.slane %v13305_v40, 1  ;;  %v13459_v1 = vpop.f32.mrb[92].mxu0 }
 0x33a   : > { %v4637_v8 = vmul.f32 %v4456_v32, %v4301_v18  ;;  %v4638_v2 = vmul.f32 %v4461_v34, %v4302_v61  ;;  %v13462_v54 = vadd.f32 %v13154_v62, %v3820_v38  ;;  %v3972_v0 = vmul.f32 0.044715, %v3876_v25  ;;  %v13464_v19 = vpop.f32.mrb[93].mxu0 }
 0x33b   : > { %v4736_v55 = vsel %vm4723_vm2, %v4733_v31, %v4735_v44  ;;  %11761 = vtanh.f32 %v4162_v48  ;;  %v4069_v51 = vmul.f32 %v4021_v39, %v3877_v22  ;;  %v3720_v31 = vsel %vm3696_vm1, %v3671_v45, %v3672_v4  ;;  %v13476_v26 = vpop.f32.mrb[94].mxu0 }
 0x33c   : > { %4802 = vst [vmem:[#allocation2 + $0x38] sm:$0xff] %v4736_v55  ;;  %v3717_v18 = vsel %vm3696_vm1, %v3674_v14, %v3675_v53  ;;  %v11756_v58 = vpop.eup %11755  ;;  %v4682_v59 = vpack.c.bf16 %v4638_v2, %v4637_v8  ;;  %v3919_v35 = vmul.f32 0.5, %v13399_v16  ;;  %v3971_v9 = vmul.f32 0.044715, %v13462_v54  ;;  %v13480_v41 = vpop.f32.mrb[95].mxu0 }
 0x33d   : > { %v4020_v47 = vmul.f32 %v3972_v0, %v3876_v25  ;;  %v4257_v33 = vadd.f32 1.0, %v11756_v58  ;;  %v4117_v27 = vadd.f32 %v4069_v51, %v3877_v22  ;;  %v3768_v45 = vadd.f32 %v3720_v31, %v12914_v42  ;;  %v4466_v0 = vpop.permute.xlu0 %4465 }
 0x33e   : > { %v3771_v3 = vadd.f32 %v3717_v18, %v12952_v36  ;;  %v13484_v34 = vrot.slane %v4682_v59, 4  ;;  %v3922_v61 = vmul.f32 0.5, %v13414_v28  ;;  %v4019_v38 = vmul.f32 %v3971_v9, %v13462_v54 }
 0x33f   : > { %v4068_v32 = vmul.f32 %v4020_v47, %v3876_v25  ;;  %v11758_v55 = vpop.eup %11757  ;;  %v4165_v16 = vmul.f32 0.7978846, %v4117_v27  ;;  %v3823_v48 = vmul.f32 %v13142_v10, %v3768_v45  ;;  %v3673_v8 = vrot.slane %v13309_v63, 1 }
 0x340   : > { %v3826_v39 = vmul.f32 %v13142_v10, %v3771_v3  ;;  %v4738_v42 = vsel %vm4723_vm2, %v4735_v44, %v13484_v34  ;;  %v4256_v36 = vadd.f32 1.0, %v11758_v55  ;;  %v4067_v51 = vmul.f32 %v4019_v38, %v13462_v54  ;;  %v4471_v44 = vpop.permute.xlu1 %4470 }
 0x341   : > { %v11760_v2 = vpop.eup %11759  ;;  %v4116_v28 = vadd.f32 %v4068_v32, %v3876_v25  ;;  %4803 = vst [vmem:[#allocation2 + $0x40] sm:$0xff] %v4738_v42  ;;  %v4305_v31 = vmul.f32 %v4257_v33, %v13408_v12  ;;  %v13495_v58 = vmul.f32 0.5, %v3877_v22  ;;  %v3878_v59 = vadd.f32 %v13154_v62, %v3823_v48 }
 0x342   : > { %v4255_v18 = vadd.f32 1.0, %v11760_v2  ;;  %v4304_v9 = vmul.f32 %v4256_v36, %v13423_v6  ;;  %v4115_v63 = vadd.f32 %v4067_v51, %v13462_v54  ;;  %v3881_v27 = vadd.f32 %v13154_v62, %v3826_v39  ;;  %v4476_v2 = vpop.permute.xlu0 %4475 }
 0x343   : > { %v4164_v47 = vmul.f32 0.7978846, %v4116_v28  ;;  %11763 = vtanh.f32 %v4165_v16  ;;  %v3974_v3 = vmul.f32 0.044715, %v3878_v59  ;;  %v3718_v38 = vsel %vm3696_vm1, %v3673_v8, %v3674_v14 }
 0x344   : > { %v4303_v45 = vmul.f32 %v4255_v18, %v3919_v35  ;;  %v4640_v12 = vmul.f32 %v4471_v44, %v4304_v9  ;;  %v3924_v33 = vmul.f32 0.5, %v3876_v25  ;;  %v4163_v22 = vmul.f32 0.7978846, %v4115_v63  ;;  %v13512_v25 = vld [vmem:[%s15400_s5 + $0x40] sm:$0xff]  }
 0x345   : > { %11765 = vtanh.f32 %v4164_v47  ;;  %v11762_v32 = vpop.eup %11761  ;;  %v4022_v48 = vmul.f32 %v3974_v3, %v3878_v59  ;;  %v3977_v6 = vmul.f32 0.044715, %v3881_v27  ;;  %v3719_v39 = vsel %vm3696_vm1, %v3672_v4, %v3673_v8  ;;  %10599 = vmatprep.subr.bf16.mxu0 %v13512_v25 }
 0x346   : > { %v4639_v55 = vmul.f32 %v4466_v0, %v4303_v45  ;;  %v4258_v35 = vadd.f32 1.0, %v11762_v32  ;;  %11767 = vtanh.f32 %v4163_v22  ;;  %v3769_v16 = vadd.f32 %v3719_v39, %v12937_v17  ;;  %v4481_v17 = vpop.permute.xlu1 %4480 }
 0x347   : > { %v3770_v14 = vadd.f32 %v3718_v38, %v12954_v60  ;;  %v4641_v0 = vmul.f32 %v4476_v2, %v4305_v31  ;;  %v4070_v36 = vmul.f32 %v4022_v48, %v3878_v59  ;;  %v4025_v51 = vmul.f32 %v3977_v6, %v3881_v27  ;;  %v15460_v38 = vld [vmem:[#allocation11_spill] sm:$0xff] }
 0x348   : > { %v4683_v42 = vpack.c.bf16 %v4640_v12, %v4639_v55  ;;  %v4306_v29 = vmul.f32 %v4258_v35, %v3922_v61  ;;  %v3824_v28 = vmul.f32 %v13142_v10, %v3769_v16  ;;  %v3676_v8 = vrot.slane %v13335_v7, 1 }
 0x349   : > { %v3825_v4 = vmul.f32 %v13142_v10, %v3770_v14  ;;  %v4118_v18 = vadd.f32 %v4070_v36, %v3878_v59  ;;  %v4073_v9 = vmul.f32 %v4025_v51, %v3881_v27  ;;  %v3679_v63 = vrot.slane %v13340_v30, 1 }
 0x34a   : > { %v4739_v60 = vrot.slane %v4683_v42, 4  ;;  %v4642_v47 = vmul.f32 %v4481_v17, %v4306_v29  ;;  %v3879_v31 = vadd.f32 %v13154_v62, %v3824_v28  ;;  %v3716_v61 = vsel %vm3696_vm1, %v3675_v53, %v3676_v8 }
 0x34b   : > { %v3880_v44 = vadd.f32 %v13154_v62, %v3825_v4  ;;  %v4166_v45 = vmul.f32 0.7978846, %v4118_v18  ;;  %v4121_v3 = vadd.f32 %v4073_v9, %v3881_v27  ;;  %v3772_v12 = vadd.f32 %v3716_v61, %v15460_v38  ;;  %v4491_v18 = vpop.permute.xlu1 %4490  ;;  %v13550_v61 = vld [vmem:[%s15398_s3] ss:$0 sm:$0xff] }
 0x34c   : > { %v4740_v7 = vsel %vm4723_vm2, %v13484_v34, %v4739_v60  ;;  %v4684_v22 = vpack.c.bf16 %v4642_v47, %v4641_v0  ;;  %v3923_v32 = vmul.f32 0.5, %v13462_v54  ;;  %v13529_v55 = vmul.f32 0.5, %v3878_v59 }
 0x34d   : > { %4804 = vst [vmem:[#allocation2 + $0x48] sm:$0xff] %v4740_v7  ;;  %v3678_v48 = vrot.slane %v13331_v50, 1  ;;  %v11764_v6 = vpop.eup %11763  ;;  %11769 = vtanh.f32 %v4166_v45  ;;  %v4169_v40 = vmul.f32 0.7978846, %v4121_v3  ;;  %v3975_v39 = vmul.f32 0.044715, %v3879_v31 }
 0x34e   : > { %v3976_v53 = vmul.f32 0.044715, %v3880_v44  ;;  %v13532_v35 = vrot.slane %v4684_v22, 4  ;;  %v13534_v34 = vmul.f32 0.5, %v3881_v27  ;;  %v3827_v16 = vmul.f32 %v13142_v10, %v3772_v12  ;;  %v15461_v27 = vld [vmem:[#allocation14_spill] sm:$0xff] }
 0x34f   : > { %v11766_v2 = vpop.eup %11765  ;;  %v3713_v54 = vsel %vm3696_vm1, %v3678_v48, %v3679_v63  ;;  %11771 = vtanh.f32 %v4169_v40  ;;  %v4023_v50 = vmul.f32 %v3975_v39, %v3879_v31  ;;  %v4261_v36 = vadd.f32 1.0, %v11764_v6  ;;  %v13557_v22 = vld [vmem:[%s15399_s4] ss:$0 sm:$0xff] }
 0x350   : > { %v4260_v59 = vadd.f32 1.0, %v11766_v2  ;;  %v4024_v14 = vmul.f32 %v3976_v53, %v3880_v44  ;;  %v11768_v0 = vpop.eup %11767  ;;  %v4742_v42 = vsel %vm4723_vm2, %v4739_v60, %v13532_v35  ;;  %v3882_v51 = vadd.f32 %v13154_v62, %v3827_v16  ;;  %v15462_v53 = vld [vmem:[#allocation12_spill] sm:$0xff] }
 0x351   : > { %v3775_v29 = vadd.f32 %v3713_v54, %v15461_v27  ;;  %4805 = vst [vmem:[#allocation2 + $0x50] sm:$0xff] %v4742_v42  ;;  %v4259_v10 = vadd.f32 1.0, %v11768_v0  ;;  %v4071_v4 = vmul.f32 %v4023_v50, %v3879_v31  ;;  %v13545_v9 = vmul.f32 0.5, %v3879_v31  ;;  %v15463_v50 = vld [vmem:[#allocation15_spill] sm:$0xff] }
 0x352   : > { %v4308_v28 = vmul.f32 %v4260_v59, %v3924_v33  ;;  %v4072_v17 = vmul.f32 %v4024_v14, %v3880_v44  ;;  %v3978_v47 = vmul.f32 0.044715, %v3882_v51  ;;  %v3677_v62 = vrot.slane %v13344_v23, 1  ;;  %v4486_v33 = vpop.permute.xlu0 %4485  ;;  %v4823_v0 = vld [vmem:[#allocation2 + $0x10] sm:$0xff] }
 0x353   : > { %v3830_v60 = vmul.f32 %v13550_v61, %v3775_v29  ;;  %v4307_v7 = vmul.f32 %v4259_v10, %v3923_v32  ;;  %v4119_v3 = vadd.f32 %v4071_v4, %v3879_v31  ;;  %v13567_v16 = vmul.f32 0.5, %v3880_v44 }
 0x354   : > { %v4644_v45 = vmul.f32 %v4491_v18, %v4308_v28  ;;  %v4120_v38 = vadd.f32 %v4072_v17, %v3880_v44  ;;  %v4026_v12 = vmul.f32 %v3978_v47, %v3882_v51  ;;  %v3714_v40 = vsel %vm3696_vm1, %v3677_v62, %v3678_v48  ;;  %v4845_v44 = vld [vmem:[#allocation2 + $0x8] sm:$0xf0] }
 0x355   : > { %v13560_v6 = vadd.f32 %v13557_v22, %v3830_v60  ;;  %v3715_v23 = vsel %vm3696_vm1, %v3676_v8, %v3677_v62  ;;  %v4643_v32 = vmul.f32 %v4486_v33, %v4307_v7  ;;  %v4167_v39 = vmul.f32 0.7978846, %v4119_v3 }
 0x356   : > { %v4168_v31 = vmul.f32 0.7978846, %v4120_v38  ;;  %v3773_v2 = vadd.f32 %v3715_v23, %v15462_v53  ;;  %v4074_v54 = vmul.f32 %v4026_v12, %v3882_v51  ;;  %v3774_v14 = vadd.f32 %v3714_v40, %v15463_v50  ;;  %v4496_v3 = vpop.permute.xlu0 %4495 }
 0x357   : > { %v3981_v59 = vmul.f32 0.044715, %v13560_v6  ;;  %v11770_v42 = vpop.eup %11769  ;;  %v4309_v27 = vmul.f32 %v4261_v36, %v13495_v58  ;;  %v4685_v48 = vpack.c.bf16 %v4644_v45, %v4643_v32  ;;  %11773 = vtanh.f32 %v4167_v39  ;;  %v4501_v45 = vpop.permute.xlu1 %4500  ;;  %v13587_v39 = vld [vmem:[#allocation2 + $0x18] sm:$0xff] }
 0x358   : > { %v3828_v8 = vmul.f32 %v13550_v61, %v3773_v2  ;;  %v4262_v29 = vadd.f32 1.0, %v11770_v42  ;;  %11775 = vtanh.f32 %v4168_v31  ;;  %v4122_v10 = vadd.f32 %v4074_v54, %v3882_v51 }
 0x359   : > { %v4029_v28 = vmul.f32 %v3981_v59, %v13560_v6  ;;  %v11772_v4 = vpop.eup %11771  ;;  %v4743_v17 = vrot.slane %v4685_v48, 4  ;;  %v3829_v18 = vmul.f32 %v13550_v61, %v3774_v14  ;;  %v4931_v60 = vrot.slane %v4823_v0, 4 }
 0x35a   : > { %v13576_v47 = vadd.f32 %v13557_v22, %v3828_v8  ;;  %v4310_v58 = vmul.f32 %v4262_v29, %v13529_v55  ;;  %v4265_v36 = vadd.f32 1.0, %v11772_v4  ;;  %v4170_v62 = vmul.f32 0.7978846, %v4122_v10  ;;  %v11668_v29 = vld [vmem:[%s15400_s5 + $0x8] sm:$0xff]  }
 0x35b   : > { %v4077_v7 = vmul.f32 %v4029_v28, %v13560_v6  ;;  %v4744_v38 = vsel %vm4723_vm2, %v13532_v35, %v4743_v17  ;;  %v13583_v33 = vadd.f32 %v13557_v22, %v3829_v18  ;;  %v4930_v40 = vrot.slane %v4845_v44, 4 }
 0x35c   : > { %v3979_v12 = vmul.f32 0.044715, %v13576_v47  ;;  %v4645_v23 = vmul.f32 %v4496_v3, %v4309_v27  ;;  %4806 = vst [vmem:[#allocation2 + $0x58] sm:$0xff] %v4744_v38  ;;  %v4646_v32 = vmul.f32 %v4501_v45, %v4310_v58  ;;  %11777 = vtanh.f32 %v4170_v62  ;;  %v4511_v3 = vpop.permute.xlu1 %4510  ;;  %v4506_v38 = vpop.permute.xlu0 %4505 }
 0x35d   : > { %v4125_v55 = vadd.f32 %v4077_v7, %v13560_v6  ;;  %v13589_v31 = vmul.f32 0.5, %v3882_v51  ;;  %v3980_v53 = vmul.f32 0.044715, %v13583_v33  ;;  %v13594_v2 = vsel %vm4723_vm2, %v4930_v40, %v4931_v60 }
 0x35e   : > { %v4027_v35 = vmul.f32 %v3979_v12, %v13576_v47  ;;  %v4686_v54 = vpack.c.bf16 %v4646_v32, %v4645_v23  ;;  %v13597_v59 = vmul.f32 %v4265_v36, %v13534_v34  ;;  %10359 = vmatprep.mubr.bf16.mxu1 %v13594_v2  ;;  %10551 = vmatprep.mubr.bf16.mxu0 %v13594_v2  ;;  %v3682_v14 = vrot.slane %v13359_v11, 1 }
 0x35f   : > { %v4173_v50 = vmul.f32 0.7978846, %v4125_v55  ;;  %v4028_v51 = vmul.f32 %v3980_v53, %v13583_v33  ;;  %v4933_v42 = vrot.slane %v13587_v39, 4  ;;  %v3680_v27 = vrot.slane %v13363_v43, 1  ;;  %v11669_v55 = vld [vmem:[%s15400_s5 + $0x10] sm:$0xff]  }
 0x360   : > { %v4075_v0 = vmul.f32 %v4027_v35, %v13576_v47  ;;  %v13606_v48 = vrot.slane %v4686_v54, 4  ;;  %v3683_v34 = vrot.slane %v13368_v20, 1  ;;  %v3681_v8 = vrot.slane %v13373_v57, 1  ;;  %v11674_v57 = vld [vmem:[%s15400_s5 + $0x48] sm:$0xff]  }
 0x361   : > { %11779 = vtanh.f32 %v4173_v50  ;;  %v11774_v11 = vpop.eup %11773  ;;  %v4076_v10 = vmul.f32 %v4028_v51, %v13583_v33  ;;  %v13618_v43 = vsel %vm4723_vm2, %v4931_v60, %v4933_v42  ;;  %v3712_v44 = vsel %vm3696_vm1, %v3679_v63, %v3680_v27  ;;  %v15464_v60 = vld [vmem:[#allocation13_spill] sm:$0xff] }
 0x362   : > { %v4123_v28 = vadd.f32 %v4075_v0, %v13576_v47  ;;  %v11776_v4 = vpop.eup %11775  ;;  %v4746_v18 = vsel %vm4723_vm2, %v4743_v17, %v13606_v48  ;;  %v4263_v58 = vadd.f32 1.0, %v11774_v11  ;;  %10360 = vmatmul.mubr.bf16.vlgmr.msra.gmra.mrb[48].mxu1 %v13618_v43  ;;  %10552 = vmatmul.mubr.bf16.vlgmr.msra.gmra.mrb[96].mxu0 %v13618_v43  ;;  %v3776_v36 = vadd.f32 %v3712_v44, %v15464_v60  ;;  %v11921_v17 = vld [vmem:[%s15400_s5] sm:$0xff]   ;;  %v15466_v0 = vld [vmem:[#allocation18_spill] sm:$0xff] }
 0x363   : > { %v3709_v30 = vsel %vm3696_vm1, %v3682_v14, %v3683_v34  ;;  %4807 = vst [vmem:[#allocation2 + $0x60] sm:$0xff] %v4746_v18  ;;  %v4264_v63 = vadd.f32 1.0, %v11776_v4  ;;  %v4124_v62 = vadd.f32 %v4076_v10, %v13583_v33  ;;  %10408 = vmatpush3.bf16.msra.mxu1 %v11921_v17  ;;  %10600 = vmatpush3.bf16.msra.mxu0 %v13512_v25  ;;  %v11670_v18 = vld [vmem:[%s15400_s5 + $0x18] sm:$0xff]  }
 0x364   : > { %v4171_v7 = vmul.f32 0.7978846, %v4123_v28  ;;  %v3779_v45 = vadd.f32 %v3709_v30, %v13012_v13  ;;  %v4311_v12 = vmul.f32 %v4263_v58, %v13545_v9  ;;  %v3831_v40 = vmul.f32 %v13550_v61, %v3776_v36  ;;  %10409 = vmatprep.subr.bf16.mxu1 %v11668_v29  ;;  %v11676_v13 = vld [vmem:[%s15400_s5 + $0x50] sm:$0xff]   ;;  %10601 = vmatprep.subr.bf16.mxu0 %v11674_v57  ;;  %v11677_v58 = vld [vmem:[%s15400_s5 + $0x58] sm:$0xff]  }
 0x365   : > { %v3710_v23 = vsel %vm3696_vm1, %v3681_v8, %v3682_v14  ;;  %v3711_v32 = vsel %vm3696_vm1, %v3680_v27, %v3681_v8  ;;  %v4312_v25 = vmul.f32 %v4264_v63, %v13567_v16  ;;  %v4172_v9 = vmul.f32 0.7978846, %v4124_v62  ;;  %v15465_v14 = vld [vmem:[#allocation16_spill] sm:$0xff]  ;;  %v13662_v16 = vld [vmem:[#allocation2 + $0x20] sm:$0xff]  ;;  %v4521_v63 = vpop.permute.xlu1 %4520  ;;  %v4516_v62 = vpop.permute.xlu0 %4515 }
 0x366   : > { %11781 = vtanh.f32 %v4171_v7  ;;  %v3834_v53 = vmul.f32 %v13550_v61, %v3779_v45  ;;  %v11778_v35 = vpop.eup %11777  ;;  %v4647_v54 = vmul.f32 %v4506_v38, %v4311_v12  ;;  %v3886_v50 = vadd.f32 %v13557_v22, %v3831_v40 }
 0x367   : > { %v3777_v51 = vadd.f32 %v3711_v32, %v15465_v14  ;;  %v3778_v27 = vadd.f32 %v3710_v23, %v15466_v0  ;;  %v4648_v8 = vmul.f32 %v4511_v3, %v4312_v25  ;;  %v4266_v11 = vadd.f32 1.0, %v11778_v35  ;;  %10410 = vmatpush3.bf16.msra.mxu1 %v11668_v29  ;;  %10602 = vmatpush3.bf16.msra.mxu0 %v11674_v57  ;;  %v13710_v14 = vld [vmem:[#allocation2 + $0x28] sm:$0xff] }
 0x368   : > { %11783 = vtanh.f32 %v4172_v9  ;;  %v13660_v10 = vadd.f32 %v13557_v22, %v3834_v53  ;;  %v3982_v28 = vmul.f32 0.044715, %v3886_v50  ;;  %10411 = vmatprep.subr.bf16.mxu1 %v11669_v55  ;;  %10603 = vmatprep.subr.bf16.mxu0 %v11676_v13  ;;  %v13674_v29 = vmul.f32 0.5, %v13560_v6 }
 0x369   : > { %v3832_v44 = vmul.f32 %v13550_v61, %v3777_v51  ;;  %v3833_v4 = vmul.f32 %v13550_v61, %v3778_v27  ;;  %v4687_v60 = vpack.c.bf16 %v4648_v8, %v4647_v54  ;;  %v4314_v36 = vmul.f32 %v4266_v11, %v13589_v31 }
 0x36a   : > { %v3985_v57 = vmul.f32 0.044715, %v13660_v10  ;;  %v4030_v7 = vmul.f32 %v3982_v28, %v3886_v50  ;;  %v4935_v3 = vrot.slane %v13662_v16, 4  ;;  %v4649_v38 = vmul.f32 %v4516_v62, %v13597_v59  ;;  %v11680_v62 = vld [vmem:[%s15400_s5 + $0x68] sm:$0xff]  }
 0x36b   : > { %v11780_v30 = vpop.eup %11779  ;;  %v13678_v17 = vadd.f32 %v13557_v22, %v3832_v44  ;;  %v13681_v45 = vadd.f32 %v13557_v22, %v3833_v4  ;;  %v4747_v31 = vrot.slane %v4687_v60, 4  ;;  %v4650_v12 = vmul.f32 %v4521_v63, %v4314_v36  ;;  %10412 = vmatpush3.bf16.msra.mxu1 %v11669_v55  ;;  %10604 = vmatpush3.bf16.msra.mxu0 %v11676_v13  ;;  %v11672_v63 = vld [vmem:[%s15400_s5 + $0x28] sm:$0xff]  }
 0x36c   : > { %v4033_v6 = vmul.f32 %v3985_v57, %v13660_v10  ;;  %v3931_v40 = vmul.f32 0.5, %v13576_v47  ;;  %v3932_v23 = vmul.f32 0.5, %v13583_v33  ;;  %v4078_v32 = vmul.f32 %v4030_v7, %v3886_v50  ;;  %10413 = vmatprep.subr.bf16.mxu1 %v11670_v18  ;;  %10605 = vmatprep.subr.bf16.mxu0 %v11677_v58  ;;  %v11671_v47 = vld [vmem:[%s15400_s5 + $0x20] sm:$0xff]  }
 0x36d   : > { %v3983_v25 = vmul.f32 0.044715, %v13678_v17  ;;  %v13691_v9 = vsel %vm4723_vm2, %v13606_v48, %v4747_v31  ;;  %v4688_v59 = vpack.c.bf16 %v4650_v12, %v4649_v38  ;;  %v13693_v53 = vmul.f32 0.5, %v3886_v50  ;;  %v11678_v33 = vld [vmem:[%s15400_s5 + $0x60] sm:$0xff]  }
 0x36e   : > { %v4081_v35 = vmul.f32 %v4033_v6, %v13660_v10  ;;  %4808 = vst [vmem:[#allocation2 + $0x68] sm:$0xff] %v13691_v9  ;;  %v4126_v55 = vadd.f32 %v4078_v32, %v3886_v50  ;;  %v3984_v13 = vmul.f32 0.044715, %v13681_v45  ;;  %v13708_v54 = vsel %vm4723_vm2, %v4933_v42, %v4935_v3 }
 0x36f   : > { %v4031_v48 = vmul.f32 %v3983_v25, %v13678_v17  ;;  %v13712_v0 = vrot.slane %v4688_v59, 4  ;;  %v4269_v27 = vadd.f32 1.0, %v11780_v30  ;;  %10363 = vmatprep.mubr.bf16.mxu1 %v13708_v54  ;;  %10555 = vmatprep.mubr.bf16.mxu0 %v13708_v54  ;;  %v3686_v50 = vrot.slane %v13395_v49, 1  ;;  %v4531_v25 = vpop.permute.xlu1 %4530 }
 0x370   : > { %v11782_v51 = vpop.eup %11781  ;;  %v4129_v8 = vadd.f32 %v4081_v35, %v13660_v10  ;;  %v4174_v28 = vmul.f32 0.7978846, %v4126_v55  ;;  %v4032_v39 = vmul.f32 %v3984_v13, %v13681_v45  ;;  %10414 = vmatpush3.bf16.msra.mxu1 %v11670_v18  ;;  %10606 = vmatpush3.bf16.msra.mxu0 %v11677_v58  ;;  %v4937_v36 = vrot.slane %v13710_v14, 4  ;;  %v13728_v58 = vld [vmem:[#allocation2 + $0x30] sm:$0xff]  ;;  %v15467_v35 = vld [vmem:[#allocation17_spill] sm:$0xff] }
 0x371   : > { %v4267_v11 = vadd.f32 1.0, %v11782_v51  ;;  %v4079_v42 = vmul.f32 %v4031_v48, %v13678_v17  ;;  %v13722_v4 = vsel %vm4723_vm2, %v4747_v31, %v13712_v0  ;;  %v3684_v57 = vrot.slane %v13402_v46, 1  ;;  %10415 = vmatprep.subr.bf16.mxu1 %v11671_v47  ;;  %10607 = vmatprep.subr.bf16.mxu0 %v11678_v33  ;;  %v4526_v46 = vpop.permute.xlu0 %4525  ;;  %v15468_v51 = vld [vmem:[#allocation21_spill] sm:$0xff] }
 0x372   : > { %v11784_v44 = vpop.eup %11783  ;;  %v4177_v60 = vmul.f32 0.7978846, %v4129_v8  ;;  %4809 = vst [vmem:[#allocation2 + $0x70] sm:$0xff] %v13722_v4  ;;  %11785 = vtanh.f32 %v4174_v28  ;;  %v4080_v18 = vmul.f32 %v4032_v39, %v13681_v45  ;;  %v13738_v38 = vsel %vm4723_vm2, %v4935_v3, %v4937_v36  ;;  %v11681_v39 = vld [vmem:[%s15400_s5 + $0x70] sm:$0xff]  }
 0x373   : > { %v4268_v49 = vadd.f32 1.0, %v11784_v44  ;;  %v4315_v30 = vmul.f32 %v4267_v11, %v3931_v40  ;;  %v4127_v7 = vadd.f32 %v4079_v42, %v13678_v17  ;;  %v3708_v31 = vsel %vm3696_vm1, %v3683_v34, %v3684_v57  ;;  %10364 = vmatmul.mubr.bf16.gmra.mrb[52].mxu1 %v13738_v38  ;;  %10556 = vmatmul.mubr.bf16.gmra.mrb[100].mxu0 %v13738_v38  ;;  %v13758_v11 = vld [vmem:[#allocation2 + $0x38] sm:$0xff]  ;;  %v15470_v44 = vld [vmem:[#allocation19_spill] sm:$0xff] }
 0x374   : > { %11787 = vtanh.f32 %v4177_v60  ;;  %v4128_v40 = vadd.f32 %v4080_v18, %v13681_v45  ;;  %v3687_v32 = vrot.slane %v13405_v5, 1  ;;  %v3780_v3 = vadd.f32 %v3708_v31, %v15467_v35  ;;  %10416 = vmatpush3.bf16.msra.mxu1 %v11671_v47  ;;  %10608 = vmatpush3.bf16.msra.mxu0 %v11678_v33 }
 0x375   : > { %v4316_v12 = vmul.f32 %v4268_v49, %v3932_v23  ;;  %v4651_v6 = vmul.f32 %v4526_v46, %v4315_v30  ;;  %v4175_v59 = vmul.f32 0.7978846, %v4127_v7  ;;  %v3685_v55 = vrot.slane %v13411_v21, 1  ;;  %10417 = vmatprep.subr.bf16.mxu1 %v11672_v63  ;;  %10609 = vmatprep.subr.bf16.mxu0 %v11680_v62  ;;  %v4536_v35 = vpop.permute.xlu0 %4535 }
 0x376   : > { %v4939_v20 = vrot.slane %v13728_v58, 4  ;;  %v4317_v34 = vmul.f32 %v4269_v27, %v13674_v29  ;;  %v4176_v13 = vmul.f32 0.7978846, %v4128_v40  ;;  %v3705_v48 = vsel %vm3696_vm1, %v3686_v50, %v3687_v32  ;;  %v11675_v29 = vld [vmem:[%s15400_s5 + $0x30] sm:$0xff]   ;;  %v15469_v27 = vld [vmem:[#allocation22_spill] sm:$0xff] }
 0x377   : > { %v4652_v23 = vmul.f32 %v4531_v25, %v4316_v12  ;;  %11789 = vtanh.f32 %v4175_v59  ;;  %v3835_v5 = vmul.f32 %v13550_v61, %v3780_v3  ;;  %v3783_v8 = vadd.f32 %v3705_v48, %v15468_v51  ;;  %v11679_v12 = vld [vmem:[%s15400_s5 + $0x38] sm:$0xff]  }
 0x378   : > { %v3706_v21 = vsel %vm3696_vm1, %v3685_v55, %v3686_v50  ;;  %11791 = vtanh.f32 %v4176_v13  ;;  %v3707_v33 = vsel %vm3696_vm1, %v3684_v57, %v3685_v55  ;;  %v13773_v49 = vsel %vm4723_vm2, %v4937_v36, %v4939_v20  ;;  %10418 = vmatpush3.bf16.msra.mxu1 %v11672_v63  ;;  %10610 = vmatpush3.bf16.msra.mxu0 %v11680_v62 }
 0x379   : > { %v4689_v47 = vpack.c.bf16 %v4652_v23, %v4651_v6  ;;  %v3782_v28 = vadd.f32 %v3706_v21, %v15469_v27  ;;  %v3890_v42 = vadd.f32 %v13557_v22, %v3835_v5  ;;  %v3838_v50 = vmul.f32 %v13550_v61, %v3783_v8  ;;  %10367 = vmatprep.mubr.bf16.mxu1 %v13773_v49  ;;  %v15471_v21 = vld [vmem:[#allocation20_spill] sm:$0xff] }
 0x37a   : > { %v3781_v60 = vadd.f32 %v3707_v33, %v15470_v44  ;;  %10559 = vmatprep.mubr.bf16.mxu0 %v13773_v49  ;;  %v4941_v18 = vrot.slane %v13758_v11, 4  ;;  %v3688_v46 = vrot.slane %v13434_v56, 1  ;;  %v13783_v7 = vmul.f32 0.5, %v13660_v10  ;;  %10419 = vmatprep.subr.bf16.mxu1 %v11675_v29 }
 0x37b   : > { %v13775_v30 = vrot.slane %v4689_v47, 4  ;;  %v3837_v57 = vmul.f32 %v13550_v61, %v3782_v28  ;;  %v3986_v31 = vmul.f32 0.044715, %v3890_v42  ;;  %v13786_v36 = vadd.f32 %v13557_v22, %v3838_v50  ;;  %10611 = vmatprep.subr.bf16.mxu0 %v11681_v39 }
 0x37c   : > { %v3836_v63 = vmul.f32 %v13550_v61, %v3781_v60  ;;  %v11786_v6 = vpop.eup %11785  ;;  %v13803_v25 = vsel %vm4723_vm2, %v4939_v20, %v4941_v18  ;;  %v3704_v59 = vsel %vm3696_vm1, %v3687_v32, %v3688_v46  ;;  %v3935_v3 = vmul.f32 0.5, %v13678_v17  ;;  %v11682_v20 = vld [vmem:[%s15400_s5 + $0x78] sm:$0xff]   ;;  %10420 = vmatpush3.bf16.msra.mxu1 %v11675_v29  ;;  %10612 = vmatpush3.bf16.msra.mxu0 %v11681_v39 }
 0x37d   : > { %v13795_v40 = vsel %vm4723_vm2, %v13712_v0, %v13775_v30  ;;  %v13798_v10 = vadd.f32 %v13557_v22, %v3837_v57  ;;  %v4270_v0 = vadd.f32 1.0, %v11786_v6  ;;  %v4034_v55 = vmul.f32 %v3986_v31, %v3890_v42  ;;  %10368 = vmatmul.mubr.bf16.gmra.mrb[56].mxu1 %v13803_v25  ;;  %10560 = vmatmul.mubr.bf16.gmra.mrb[104].mxu0 %v13803_v25 }
 0x37e   : > { %v11788_v62 = vpop.eup %11787  ;;  %4810 = vst [vmem:[#allocation2 + $0x78] sm:$0xff] %v13795_v40  ;;  %v3989_v23 = vmul.f32 0.044715, %v13786_v36  ;;  %v4653_v32 = vmul.f32 %v4536_v35, %v4317_v34  ;;  %v3936_v13 = vmul.f32 0.5, %v13681_v45  ;;  %v13819_v48 = vadd.f32 %v13557_v22, %v3836_v63  ;;  %10421 = vmatprep.subr.bf16.mxu1 %v11679_v12  ;;  %v13828_v34 = vld [vmem:[%s15400_s5 + $0x180] sm:$0xff]   ;;  %v4541_v45 = vpop.permute.xlu1 %4540  ;;  %10613 = vmatprep.subr.bf16.mxu0 %v11682_v20 }
 0x37f   : > { %v3988_v5 = vmul.f32 0.044715, %v13798_v10  ;;  %v4318_v17 = vmul.f32 %v4270_v0, %v13693_v53  ;;  %v4082_v51 = vmul.f32 %v4034_v55, %v3890_v42  ;;  %v3784_v47 = vadd.f32 %v3704_v59, %v15471_v21 }
 0x380   : > { %v4037_v8 = vmul.f32 %v3989_v23, %v13786_v36  ;;  %v13830_v33 = vmul.f32 0.5, %v3890_v42  ;;  %v3987_v27 = vmul.f32 0.044715, %v13819_v48  ;;  %v3690_v53 = vrot.slane %v13429_v37, 1  ;;  %10422 = vmatpush3.bf16.msra.mxu1 %v11679_v12  ;;  %10614 = vmatpush3.bf16.msra.mxu0 %v11682_v20 }
 0x381   : > { %v4036_v29 = vmul.f32 %v3988_v5, %v13798_v10  ;;  %v11790_v28 = vpop.eup %11789  ;;  %v4654_v50 = vmul.f32 %v4541_v45, %v4318_v17  ;;  %v4130_v44 = vadd.f32 %v4082_v51, %v3890_v42  ;;  %v3839_v57 = vmul.f32 %v13550_v61, %v3784_v47  ;;  %10471 = vmatprep.subr.bf16.mxu1 %v13828_v34  ;;  %v4546_v17 = vpop.permute.xlu0 %4545 }
 0x382   : > { %v4085_v60 = vmul.f32 %v4037_v8, %v13786_v36  ;;  %v11792_v31 = vpop.eup %11791  ;;  %v4273_v63 = vadd.f32 1.0, %v11788_v62  ;;  %v4271_v6 = vadd.f32 1.0, %v11790_v28  ;;  %v4035_v59 = vmul.f32 %v3987_v27, %v13819_v48  ;;  %v13848_v27 = vld [vmem:[#allocation2 + $0x40] sm:$0xff] }
 0x383   : > { %v4084_v35 = vmul.f32 %v4036_v29, %v13798_v10  ;;  %v4690_v0 = vpack.c.bf16 %v4654_v50, %v4653_v32  ;;  %v4272_v55 = vadd.f32 1.0, %v11792_v31  ;;  %v4178_v37 = vmul.f32 0.7978846, %v4130_v44  ;;  %v4551_v32 = vpop.permute.xlu1 %4550  ;;  %v13861_v31 = vld [vmem:[#allocation2 + $0x48] sm:$0xff] }
 0x384   : > { %v4133_v39 = vadd.f32 %v4085_v60, %v13786_v36  ;;  %v4319_v42 = vmul.f32 %v4271_v6, %v3935_v3  ;;  %v4083_v23 = vmul.f32 %v4035_v59, %v13819_v48  ;;  %v13844_v62 = vadd.f32 %v13557_v22, %v3839_v57 }
 0x385   : > { %v4132_v5 = vadd.f32 %v4084_v35, %v13798_v10  ;;  %v4753_v51 = vrot.slane %v4690_v0, 4  ;;  %v4320_v8 = vmul.f32 %v4272_v55, %v3936_v13  ;;  %11793 = vtanh.f32 %v4178_v37  ;;  %v15472_v35 = vld [vmem:[#allocation25_spill] sm:$0xff]  ;;  %v15473_v55 = vld [vmem:[#allocation23_spill] sm:$0xff] }
 0x386   : > { %v4181_v12 = vmul.f32 0.7978846, %v4133_v39  ;;  %v4321_v21 = vmul.f32 %v4273_v63, %v13783_v7  ;;  %v4655_v47 = vmul.f32 %v4546_v17, %v4319_v42  ;;  %v4131_v45 = vadd.f32 %v4083_v23, %v13819_v48  ;;  %v15474_v39 = vld [vmem:[#allocation26_spill] sm:$0xff] }
 0x387   : > { %v4180_v3 = vmul.f32 0.7978846, %v4132_v5  ;;  %v13852_v29 = vsel %vm4723_vm2, %v13775_v30, %v4753_v51  ;;  %v4656_v28 = vmul.f32 %v4551_v32, %v4320_v8  ;;  %v3990_v20 = vmul.f32 0.044715, %v13844_v62 }
 0x388   : > { %11795 = vtanh.f32 %v4181_v12  ;;  %4811 = vst [vmem:[#allocation2 + $0x80] sm:$0xff] %v13852_v29  ;;  %v4179_v13 = vmul.f32 0.7978846, %v4131_v45  ;;  %v3691_v7 = vrot.slane %v13438_v15, 1  ;;  %v3689_v50 = vrot.slane %v13446_v52, 1 }
 0x389   : > { %11797 = vtanh.f32 %v4180_v3  ;;  %v4691_v44 = vpack.c.bf16 %v4656_v28, %v4655_v47  ;;  %v4038_v60 = vmul.f32 %v3990_v20, %v13844_v62  ;;  %v4943_v57 = vrot.slane %v13848_v27, 4  ;;  %v15475_v20 = vld [vmem:[#allocation24_spill] sm:$0xff] }
 0x38a   : > { %v3694_v30 = vrot.slane %v13459_v1, 1  ;;  %11799 = vtanh.f32 %v4179_v13  ;;  %v3701_v63 = vsel %vm3696_vm1, %v3690_v53, %v3691_v7  ;;  %v3702_v6 = vsel %vm3696_vm1, %v3689_v50, %v3690_v53 }
 0x38b   : > { %v3703_v15 = vsel %vm3696_vm1, %v3688_v46, %v3689_v50  ;;  %v13871_v52 = vrot.slane %v4691_v44, 4  ;;  %v4086_v59 = vmul.f32 %v4038_v60, %v13844_v62  ;;  %v3787_v0 = vadd.f32 %v3701_v63, %v15472_v35  ;;  %v4561_v50 = vpop.permute.xlu1 %4560  ;;  %v4556_v63 = vpop.permute.xlu0 %4555 }
 0x38c   : > { %v3785_v37 = vadd.f32 %v3703_v15, %v15473_v55  ;;  %v3786_v42 = vadd.f32 %v3702_v6, %v15474_v39  ;;  %v13880_v23 = vsel %vm4723_vm2, %v4941_v18, %v4943_v57  ;;  %v4945_v56 = vrot.slane %v13861_v31, 4 }
 0x38d   : > { %v3692_v53 = vrot.slane %v13464_v19, 1  ;;  %v13886_v46 = vsel %vm4723_vm2, %v4753_v51, %v13871_v52  ;;  %v4134_v5 = vadd.f32 %v4086_v59, %v13844_v62  ;;  %v3842_v17 = vmul.f32 %v13550_v61, %v3787_v0  ;;  %10371 = vmatprep.mubr.bf16.mxu1 %v13880_v23  ;;  %10563 = vmatprep.mubr.bf16.mxu0 %v13880_v23 }
 0x38e   : > { %v3840_v8 = vmul.f32 %v13550_v61, %v3785_v37  ;;  %4812 = vst [vmem:[#allocation2 + $0x88] sm:$0xff] %v13886_v46  ;;  %v3841_v18 = vmul.f32 %v13550_v61, %v3786_v42  ;;  %v13898_v12 = vsel %vm4723_vm2, %v4943_v57, %v4945_v56  ;;  %v3695_v32 = vrot.slane %v13476_v26, 1 }
 0x38f   : > { %v3700_v51 = vsel %vm3696_vm1, %v3691_v7, %v3692_v53  ;;  %v11794_v47 = vpop.eup %11793  ;;  %v4182_v45 = vmul.f32 0.7978846, %v4134_v5  ;;  %v13906_v3 = vadd.f32 %v13557_v22, %v3842_v17  ;;  %10372 = vmatmul.mubr.bf16.gmra.mrb[60].mxu1 %v13898_v12  ;;  %10564 = vmatmul.mubr.bf16.gmra.mrb[108].mxu0 %v13898_v12  ;;  %v3941_v7 = vmul.f32 0.5, %v13786_v36 }
 0x390   : > { %v13909_v28 = vadd.f32 %v13557_v22, %v3840_v8  ;;  %v3788_v13 = vadd.f32 %v3700_v51, %v15475_v20  ;;  %v4274_v44 = vadd.f32 1.0, %v11794_v47  ;;  %v13916_v26 = vadd.f32 %v13557_v22, %v3841_v18  ;;  %v15476_v51 = vld [vmem:[#allocation29_spill] sm:$0xff]  ;;  %v4571_v20 = vpop.permute.xlu1 %4570 }
 0x391   : > { %v3697_v60 = vsel %vm3696_vm1, %v3694_v30, %v3695_v32  ;;  %v3939_v6 = vmul.f32 0.5, %v13819_v48  ;;  %v3940_v15 = vmul.f32 0.5, %v13798_v10  ;;  %11801 = vtanh.f32 %v4182_v45 }
 0x392   : > { %v11796_v57 = vpop.eup %11795  ;;  %v3993_v59 = vmul.f32 0.044715, %v13906_v3  ;;  %v4657_v0 = vmul.f32 %v4556_v63, %v4321_v21  ;;  %v4322_v36 = vmul.f32 %v4274_v44, %v13830_v33  ;;  %v3942_v55 = vmul.f32 0.5, %v13844_v62 }
 0x393   : > { %v11798_v35 = vpop.eup %11797  ;;  %v3991_v37 = vmul.f32 0.044715, %v13909_v28  ;;  %v3992_v5 = vmul.f32 0.044715, %v13916_v26  ;;  %v3843_v48 = vmul.f32 %v13550_v61, %v3788_v13  ;;  %v4277_v8 = vadd.f32 1.0, %v11796_v57  ;;  %v15477_v13 = vld [vmem:[#allocation4_spill] sm:$0xff] }
 0x394   : > { %v4276_v39 = vadd.f32 1.0, %v11798_v35  ;;  %v4041_v42 = vmul.f32 %v3993_v59, %v13906_v3  ;;  %v11800_v17 = vpop.eup %11799  ;;  %v4658_v10 = vmul.f32 %v4561_v50, %v4322_v36  ;;  %v3791_v21 = vadd.f32 %v3697_v60, %v15476_v51 }
 0x395   : > { %v4039_v18 = vmul.f32 %v3991_v37, %v13909_v28  ;;  %v4275_v47 = vadd.f32 1.0, %v11800_v17  ;;  %v4040_v45 = vmul.f32 %v3992_v5, %v13916_v26  ;;  %v13937_v59 = vadd.f32 %v13557_v22, %v3843_v48  ;;  %v4566_v37 = vpop.permute.xlu0 %4565 }
 0x396   : > { %v4324_v33 = vmul.f32 %v4276_v39, %v3940_v15  ;;  %v4089_v62 = vmul.f32 %v4041_v42, %v13906_v3  ;;  %v4692_v44 = vpack.c.bf16 %v4658_v10, %v4657_v0  ;;  %v15478_v50 = vrot.slane %v15477_v13, 1 }
 0x397   : > { %v4087_v63 = vmul.f32 %v4039_v18, %v13909_v28  ;;  %v4323_v35 = vmul.f32 %v4275_v47, %v3939_v6  ;;  %v4088_v36 = vmul.f32 %v4040_v45, %v13916_v26  ;;  %v4325_v42 = vmul.f32 %v4277_v8, %v3941_v7  ;;  %v15479_v18 = vld [vmem:[#allocation28_spill] sm:$0xff] }
 0x398   : > { %v3744_v57 = vsel %vm3696_vm1, %v3695_v32, %v15478_v50  ;;  %v4660_v60 = vmul.f32 %v4571_v20, %v4324_v33  ;;  %v4137_v15 = vadd.f32 %v4089_v62, %v13906_v3  ;;  %v4757_v39 = vrot.slane %v4692_v44, 4 }
 0x399   : > { %v4135_v0 = vadd.f32 %v4087_v63, %v13909_v28  ;;  %v3994_v5 = vmul.f32 0.044715, %v13937_v59  ;;  %v4659_v48 = vmul.f32 %v4566_v37, %v4323_v35  ;;  %v4136_v10 = vadd.f32 %v4088_v36, %v13916_v26  ;;  %v4576_v50 = vpop.permute.xlu0 %4575  ;;  %v4581_v36 = vpop.permute.xlu1 %4580 }
 0x39a   : > { %v4185_v17 = vmul.f32 0.7978846, %v4137_v15  ;;  %v3792_v51 = vadd.f32 %v3744_v57, %v15479_v18  ;;  %v13951_v32 = vsel %vm4723_vm2, %v13871_v52, %v4757_v39  ;;  %v3846_v33 = vmul.f32 %v13550_v61, %v3791_v21  ;;  %v13967_v15 = vld [vmem:[#allocation2 + $0x50] sm:$0xff] }
 0x39b   : > { %v4183_v6 = vmul.f32 0.7978846, %v4135_v0  ;;  %v4042_v47 = vmul.f32 %v3994_v5, %v13937_v59  ;;  %v11802_v7 = vpop.eup %11801  ;;  %4813 = vst [vmem:[#allocation2 + $0x90] sm:$0xff] %v13951_v32  ;;  %v4693_v8 = vpack.c.bf16 %v4660_v60, %v4659_v48  ;;  %v4184_v62 = vmul.f32 0.7978846, %v4136_v10  ;;  %v13977_v48 = vld [vmem:[#allocation2 + $0x58] sm:$0xff] }
 0x39c   : > { %11803 = vtanh.f32 %v4185_v17  ;;  %v3847_v45 = vmul.f32 %v13550_v61, %v3792_v51  ;;  %v4278_v20 = vadd.f32 1.0, %v11802_v7  ;;  %v13959_v52 = vadd.f32 %v13557_v22, %v3846_v33  ;;  %v15480_v18 = vld [vmem:[#allocation27_spill] sm:$0xff]  ;;  %v15481_v51 = vld [vmem:[#allocation30_spill] sm:$0xff] }
 0x39d   : > { %11805 = vtanh.f32 %v4183_v6  ;;  %v4090_v44 = vmul.f32 %v4042_v47, %v13937_v59  ;;  %v4759_v63 = vrot.slane %v4693_v8, 4  ;;  %v3693_v21 = vrot.slane %v13480_v41, 1  ;;  %v13989_v47 = vld [vmem:[#allocation2 + $0x60] sm:$0xff] }
 0x39e   : > { %11807 = vtanh.f32 %v4184_v62  ;;  %v13962_v13 = vadd.f32 %v13557_v22, %v3847_v45  ;;  %v4326_v57 = vmul.f32 %v4278_v20, %v3942_v55  ;;  %v3997_v60 = vmul.f32 0.044715, %v13959_v52  ;;  %v4586_v20 = vpop.permute.xlu0 %4585 }
 0x39f   : > { %v4138_v35 = vadd.f32 %v4090_v44, %v13937_v59  ;;  %v4661_v37 = vmul.f32 %v4576_v50, %v4325_v42  ;;  %v13970_v0 = vsel %vm4723_vm2, %v4757_v39, %v4759_v63  ;;  %v3698_v41 = vsel %vm3696_vm1, %v3693_v21, %v3694_v30 }
 0x3a0   : > { %v3998_v5 = vmul.f32 0.044715, %v13962_v13  ;;  %4814 = vst [vmem:[#allocation2 + $0x98] sm:$0xff] %v13970_v0  ;;  %v4662_v55 = vmul.f32 %v4581_v36, %v4326_v57  ;;  %v4045_v10 = vmul.f32 %v3997_v60, %v13959_v52  ;;  %v3699_v39 = vsel %vm3696_vm1, %v3692_v53, %v3693_v21 }
 0x3a1   : > { %v4186_v17 = vmul.f32 0.7978846, %v4138_v35  ;;  %v3789_v1 = vadd.f32 %v3699_v39, %v15480_v18  ;;  %v3790_v6 = vadd.f32 %v3698_v41, %v15481_v51  ;;  %v4947_v30 = vrot.slane %v13967_v15, 4  ;;  %v4591_v35 = vpop.permute.xlu1 %4590 }
 0x3a2   : > { %v4046_v42 = vmul.f32 %v3998_v5, %v13962_v13  ;;  %v4694_v33 = vpack.c.bf16 %v4662_v55, %v4661_v37  ;;  %v4093_v7 = vmul.f32 %v4045_v10, %v13959_v52  ;;  %v4949_v8 = vrot.slane %v13977_v48, 4  ;;  %v14022_v37 = vld [vmem:[%s15400_s5 + $0x1c0] sm:$0xff]  }
 0x3a3   : > { %11809 = vtanh.f32 %v4186_v17  ;;  %v3844_v53 = vmul.f32 %v13550_v61, %v3789_v1  ;;  %v3845_v62 = vmul.f32 %v13550_v61, %v3790_v6  ;;  %v13999_v45 = vsel %vm4723_vm2, %v4945_v56, %v4947_v30  ;;  %10663 = vmatprep.subr.bf16.mxu0 %v14022_v37 }
 0x3a4   : > { %v4094_v19 = vmul.f32 %v4046_v42, %v13962_v13  ;;  %v14001_v44 = vrot.slane %v4694_v33, 4  ;;  %v4141_v21 = vadd.f32 %v4093_v7, %v13959_v52  ;;  %10375 = vmatprep.mubr.bf16.mxu1 %v13999_v45  ;;  %10567 = vmatprep.mubr.bf16.mxu0 %v13999_v45  ;;  %v14007_v50 = vsel %vm4723_vm2, %v4947_v30, %v4949_v8 }
 0x3a5   : > { %v4951_v57 = vrot.slane %v13989_v47, 4  ;;  %v14012_v56 = vadd.f32 %v13557_v22, %v3844_v53  ;;  %v14015_v36 = vadd.f32 %v13557_v22, %v3845_v62  ;;  %10376 = vmatmul.mubr.bf16.gmra.mrb[64].mxu1 %v14007_v50  ;;  %10568 = vmatmul.mubr.bf16.gmra.mrb[112].mxu0 %v14007_v50  ;;  %v3943_v10 = vmul.f32 0.5, %v13909_v28  ;;  %v4596_v28 = vpop.permute.xlu0 %4595 }
 0x3a6   : > { %v11804_v61 = vpop.eup %11803  ;;  %v4142_v60 = vadd.f32 %v4094_v19, %v13962_v13  ;;  %v14026_v41 = vsel %vm4723_vm2, %v4759_v63, %v14001_v44  ;;  %v4189_v55 = vmul.f32 0.7978846, %v4141_v21  ;;  %v3944_v18 = vmul.f32 0.5, %v13916_v26  ;;  %v4601_v26 = vpop.permute.xlu1 %4600 }
 0x3a7   : > { %v11806_v5 = vpop.eup %11805  ;;  %v14029_v17 = vsel %vm4723_vm2, %v4949_v8, %v4951_v57  ;;  %4815 = vst [vmem:[#allocation2 + $0xa0] sm:$0xff] %v14026_v41  ;;  %v3995_v63 = vmul.f32 0.044715, %v14012_v56  ;;  %v4281_v51 = vadd.f32 1.0, %v11804_v61  ;;  %v3996_v30 = vmul.f32 0.044715, %v14015_v36 }
 0x3a8   : > { %v11808_v22 = vpop.eup %11807  ;;  %v4279_v39 = vadd.f32 1.0, %v11806_v5  ;;  %v4190_v42 = vmul.f32 0.7978846, %v4142_v60  ;;  %10379 = vmatprep.mubr.bf16.mxu1 %v14029_v17  ;;  %10571 = vmatprep.mubr.bf16.mxu0 %v14029_v17  ;;  %11811 = vtanh.f32 %v4189_v55  ;;  %v4953_v8 = vrot.slane %v13691_v9, 4 }
 0x3a9   : > { %v4280_v1 = vadd.f32 1.0, %v11808_v22  ;;  %v4043_v7 = vmul.f32 %v3995_v63, %v14012_v56  ;;  %v4955_v19 = vrot.slane %v13722_v4, 4  ;;  %v3945_v53 = vmul.f32 0.5, %v13906_v3 }
 0x3aa   : > { %v4327_v6 = vmul.f32 %v4279_v39, %v3943_v10  ;;  %11813 = vtanh.f32 %v4190_v42  ;;  %v4044_v21 = vmul.f32 %v3996_v30, %v14015_v36  ;;  %v3946_v5 = vmul.f32 0.5, %v13937_v59  ;;  %v4606_v42 = vpop.permute.xlu0 %4605 }
 0x3ab   : > { %v4328_v33 = vmul.f32 %v4280_v1, %v3944_v18  ;;  %v4091_v55 = vmul.f32 %v4043_v7, %v14012_v56  ;;  %v14047_v22 = vsel %vm4723_vm2, %v4951_v57, %v4953_v8  ;;  %v4329_v10 = vmul.f32 %v4281_v51, %v3945_v53  ;;  %v4611_v51 = vpop.permute.xlu1 %4610 }
 0x3ac   : > { %v4663_v62 = vmul.f32 %v4586_v20, %v4327_v6  ;;  %v4092_v9 = vmul.f32 %v4044_v21, %v14015_v36  ;;  %v14053_v3 = vsel %vm4723_vm2, %v4953_v8, %v4955_v19  ;;  %v4957_v63 = vrot.slane %v13795_v40, 4 }
 0x3ad   : > { %v11810_v60 = vpop.eup %11809  ;;  %v4664_v61 = vmul.f32 %v4591_v35, %v4328_v33  ;;  %10380 = vmatmul.mubr.bf16.gmra.mrb[68].mxu1 %v14047_v22  ;;  %10572 = vmatmul.mubr.bf16.gmra.mrb[116].mxu0 %v14047_v22  ;;  %v4139_v35 = vadd.f32 %v4091_v55, %v14012_v56  ;;  %v4665_v6 = vmul.f32 %v4596_v28, %v4329_v10  ;;  %v4959_v7 = vrot.slane %v13852_v29, 4 }
 0x3ae   : > { %v4282_v39 = vadd.f32 1.0, %v11810_v60  ;;  %10383 = vmatprep.mubr.bf16.mxu1 %v14053_v3  ;;  %10575 = vmatprep.mubr.bf16.mxu0 %v14053_v3  ;;  %v4140_v57 = vadd.f32 %v4092_v9, %v14015_v36  ;;  %v3949_v60 = vmul.f32 0.5, %v13959_v52  ;;  %v3950_v28 = vmul.f32 0.5, %v13962_v13 }
 0x3af   : > { %v4695_v20 = vpack.c.bf16 %v4664_v61, %v4663_v62  ;;  %v4187_v1 = vmul.f32 0.7978846, %v4139_v35  ;;  %v4621_v52 = vpop.permute.xlu1 %4620  ;;  %v4961_v35 = vrot.slane %v13886_v46, 4 }
 0x3b0   : > { %v4330_v59 = vmul.f32 %v4282_v39, %v3946_v5  ;;  %v4188_v33 = vmul.f32 0.7978846, %v4140_v57  ;;  %v14069_v5 = vsel %vm4723_vm2, %v4955_v19, %v4957_v63  ;;  %v4616_v39 = vpop.permute.xlu0 %4615 }
 0x3b1   : > { %v4763_v18 = vrot.slane %v4695_v20, 4  ;;  %11815 = vtanh.f32 %v4187_v1 }
 0x3b2   : > { %v4666_v30 = vmul.f32 %v4601_v26, %v4330_v59  ;;  %v11812_v8 = vpop.eup %11811  ;;  %11817 = vtanh.f32 %v4188_v33  ;;  %v4963_v59 = vrot.slane %v13951_v32, 4  ;;  %v3947_v33 = vmul.f32 0.5, %v14012_v56 }
 0x3b3   : > { %v14063_v53 = vsel %vm4723_vm2, %v14001_v44, %v4763_v18  ;;  %v4285_v61 = vadd.f32 1.0, %v11812_v8  ;;  %v14074_v44 = vsel %vm4723_vm2, %v4957_v63, %v4959_v7  ;;  %v4965_v56 = vrot.slane %v13970_v0, 4 }
 0x3b4   : > { %v11814_v62 = vpop.eup %11813  ;;  %4816 = vst [vmem:[#allocation2 + $0xa8] sm:$0xff] %v14063_v53  ;;  %v4696_v21 = vpack.c.bf16 %v4666_v30, %v4665_v6  ;;  %v14085_v6 = vsel %vm4723_vm2, %v4959_v7, %v4961_v35 }
 0x3b5   : > { %v4286_v26 = vadd.f32 1.0, %v11814_v62  ;;  %v4333_v10 = vmul.f32 %v4285_v61, %v3949_v60  ;;  %10384 = vmatmul.mubr.bf16.gmra.mrb[72].mxu1 %v14069_v5  ;;  %10576 = vmatmul.mubr.bf16.gmra.mrb[120].mxu0 %v14069_v5  ;;  %v3948_v62 = vmul.f32 0.5, %v14015_v36 }
 0x3b6   : > { %v4765_v55 = vrot.slane %v4696_v21, 4  ;;  %10387 = vmatprep.mubr.bf16.mxu1 %v14074_v44  ;;  %10579 = vmatprep.mubr.bf16.mxu0 %v14074_v44 }
 0x3b7   : > { %v4334_v9 = vmul.f32 %v4286_v26, %v3950_v28  ;;  %v4669_v19 = vmul.f32 %v4616_v39, %v4333_v10  ;;  %v4967_v28 = vrot.slane %v14026_v41, 4  ;;  %v14099_v39 = vsel %vm4723_vm2, %v4963_v59, %v4965_v56 }
 0x3b8   : > { %v14079_v13 = vsel %vm4723_vm2, %v4763_v18, %v4765_v55  ;;  %v14091_v18 = vsel %vm4723_vm2, %v4961_v35, %v4963_v59 }
 0x3b9   : > { %4817 = vst [vmem:[#allocation2 + $0xb0] sm:$0xff] %v14079_v13  ;;  %v4670_v20 = vmul.f32 %v4621_v52, %v4334_v9  ;;  %v14104_v36 = vsel %vm4723_vm2, %v4965_v56, %v4967_v28  ;;  %v4969_v52 = vrot.slane %v14063_v53, 4  ;;  %v11685_v56 = vld [vmem:[%s15400_s5 + $0x190] sm:$0xff]  }
 0x3bb   : > { %v4698_v57 = vpack.c.bf16 %v4670_v20, %v4669_v19  ;;  %v11816_v1 = vpop.eup %11815  ;;  %v4971_v19 = vrot.slane %v14079_v13, 4  ;;  %v14119_v20 = vsel %vm4723_vm2, %v4967_v28, %v4969_v52  ;;  %v14174_v28 = vld [vmem:[#allocation2 + $0x18] sm:$0xff] }
 0x3bc   : > { %v11818_v30 = vpop.eup %11817  ;;  %v4283_v8 = vadd.f32 1.0, %v11816_v1 }
 0x3bd   : > { %v4769_v63 = vrot.slane %v4698_v57, 4  ;;  %10388 = vmatmul.mubr.bf16.gmra.mrb[76].mxu1 %v14085_v6  ;;  %10580 = vmatmul.mubr.bf16.gmra.mrb[124].mxu0 %v14085_v6  ;;  %v4284_v21 = vadd.f32 1.0, %v11818_v30 }
 0x3be   : > { %10391 = vmatprep.mubr.bf16.mxu1 %v14091_v18  ;;  %10583 = vmatprep.mubr.bf16.mxu0 %v14091_v18  ;;  %v4331_v7 = vmul.f32 %v4283_v8, %v3947_v33  ;;  %v14145_v8 = vld [vmem:[#allocation2] sm:$0xff] }
 0x3bf   : > { %4820 = vst [vmem:[#allocation2 + $0xc8] sm:$0xf] %v4769_v63  ;;  %v4332_v60 = vmul.f32 %v4284_v21, %v3948_v62  ;;  %v11684_v62 = vld [vmem:[%s15400_s5 + $0x188] sm:$0xff]  }
 0x3c0   : > { %v4667_v61 = vmul.f32 %v4606_v42, %v4331_v7  ;;  %v14152_v21 = vld [vmem:[#allocation2 + $0x8] sm:$0xff] }
 0x3c1   : > { %v4668_v26 = vmul.f32 %v4611_v51, %v4332_v60  ;;  %v11690_v7 = vld [vmem:[%s15400_s5 + $0x1c8] sm:$0xff]   ;;  %v14159_v60 = vld [vmem:[#allocation2 + $0x10] sm:$0xff] }
 0x3c3   : > { %v4697_v10 = vpack.c.bf16 %v4668_v26, %v4667_v61  ;;  %v11692_v61 = vld [vmem:[%s15400_s5 + $0x1d0] sm:$0xff]   ;;  %v11687_v26 = vld [vmem:[%s15400_s5 + $0x1a0] sm:$0xff]  }
 0x3c5   : > { %10392 = vmatmul.mubr.bf16.gmra.mrb[80].mxu1 %v14099_v39  ;;  %10584 = vmatmul.mubr.bf16.gmra.mrb[128].mxu0 %v14099_v39  ;;  %v4767_v9 = vrot.slane %v4697_v10, 4  ;;  %v11694_v10 = vld [vmem:[%s15400_s5 + $0x1e0] sm:$0xff]  }
 0x3c6   : > { %10395 = vmatprep.mubr.bf16.mxu1 %v14104_v36  ;;  %10587 = vmatprep.mubr.bf16.mxu0 %v14104_v36 }
 0x3c7   : > { %v14109_v42 = vsel %vm4723_vm2, %v4765_v55, %v4767_v9  ;;  %v14112_v51 = vsel %vm4723_vm2, %v4767_v9, %v4769_v63  ;;  %v14124_v55 = vsel %vm4723_vm2, %v4969_v52, %v4971_v19  ;;  %v4847_v63 = vld [vmem:[#allocation2 + $0xc8] sm:$0xf]  ;;  %v11691_v52 = vld [vmem:[%s15400_s5 + $0x1b0] sm:$0xff]  }
 0x3c8   : > { %4818 = vst [vmem:[#allocation2 + $0xb8] sm:$0xff] %v14109_v42  ;;  %4819 = vst [vmem:[#allocation2 + $0xc0] sm:$0xff] %v14112_v51  ;;  %v4973_v35 = vrot.slane %v14109_v42, 4  ;;  %v4975_v59 = vrot.slane %v14112_v51, 4  ;;  %v4977_v30 = vrot.slane %v4847_v63, 4  ;;  %v11688_v9 = vld [vmem:[%s15400_s5 + $0x1a8] sm:$0xff]  }
 0x3c9   : > { %v11703_v63 = vld [vmem:[%s15400_s5 + $0x160] sm:$0xff]  }
 0x3ca   : > { %v14131_v57 = vsel %vm4723_vm2, %v4971_v19, %v4973_v35  ;;  %v14136_v1 = vsel %vm4723_vm2, %v4973_v35, %v4975_v59  ;;  %v14141_v33 = vsel %vm4723_vm2, %v4975_v59, %v4977_v30  ;;  %v11695_v19 = vld [vmem:[%s15400_s5 + $0x1b8] sm:$0xff]   ;;  %v11699_v35 = vld [vmem:[%s15400_s5 + $0x140] sm:$0xff]   ;;  %v14226_v59 = vld [vmem:[#allocation2 + $0x68] sm:$0xff] }
 0x3cb   : > { %v11704_v30 = vld [vmem:[%s15400_s5 + $0x168] sm:$0xff]  }
 0x3cd   : > { %10396 = vmatmul.mubr.bf16.gmra.mrb[84].mxu1 %v14119_v20  ;;  %10588 = vmatmul.mubr.bf16.gmra.mrb[132].mxu0 %v14119_v20 }
 0x3ce   : > { %10399 = vmatprep.mubr.bf16.mxu1 %v14124_v55  ;;  %10591 = vmatprep.mubr.bf16.mxu0 %v14124_v55 }
 0x3d5   : > { %10400 = vmatmul.mubr.bf16.gmra.mrb[88].mxu1 %v14131_v57  ;;  %10592 = vmatmul.mubr.bf16.gmra.mrb[136].mxu0 %v14131_v57 }
 0x3d6   : > { %10403 = vmatprep.mubr.bf16.mxu1 %v14136_v1  ;;  %10595 = vmatprep.mubr.bf16.mxu0 %v14136_v1 }
 0x3dd   : > { %10404 = vmatmul.mubr.bf16.gmra.mrb[92].mxu1 %v14141_v33  ;;  %10596 = vmatmul.mubr.bf16.gmra.mrb[140].mxu0 %v14141_v33 }
 0x3de   : > { %10423 = vmatprep.mubr.bf16.mxu1 %v14145_v8  ;;  %10615 = vmatprep.mubr.bf16.mxu0 %v14145_v8 }
 0x3e5   : > { %10424 = vmatmul.mubr.bf16.vlgmr.msra.gmra.mrb[48].mxu1 %v14152_v21  ;;  %10616 = vmatmul.mubr.bf16.vlgmr.msra.gmra.mrb[96].mxu0 %v14152_v21 }
 0x3e6   : > { %10427 = vmatprep.mubr.bf16.mxu1 %v14159_v60  ;;  %10472 = vmatpush3.bf16.msra.mxu1 %v13828_v34  ;;  %v11686_v34 = vld [vmem:[%s15400_s5 + $0x198] sm:$0xff]  }
 0x3e7   : > { %10619 = vmatprep.mubr.bf16.mxu0 %v14159_v60  ;;  %10473 = vmatprep.subr.bf16.mxu1 %v11684_v62 }
 0x3e8   : > { %10664 = vmatpush3.bf16.msra.mxu0 %v14022_v37  ;;  %v11693_v37 = vld [vmem:[%s15400_s5 + $0x1d8] sm:$0xff]  }
 0x3e9   : > { %10665 = vmatprep.subr.bf16.mxu0 %v11690_v7 }
 0x3ea   : > { %10474 = vmatpush3.bf16.msra.mxu1 %v11684_v62  ;;  %v11706_v62 = vld [vmem:[%s15400_s5 + $0x178] sm:$0xff]  }
 0x3eb   : > { %10475 = vmatprep.subr.bf16.mxu1 %v11685_v56 }
 0x3ec   : > { %10666 = vmatpush3.bf16.msra.mxu0 %v11690_v7  ;;  %v14306_v7 = vld [vmem:[#allocation2 + $0x70] sm:$0xff] }
 0x3ed   : > { %10428 = vmatmul.mubr.bf16.gmra.mrb[52].mxu1 %v14174_v28  ;;  %10620 = vmatmul.mubr.bf16.gmra.mrb[100].mxu0 %v14174_v28 }
 0x3ee   : > { %10431 = vmatprep.mubr.bf16.mxu1 %v13662_v16  ;;  %10623 = vmatprep.mubr.bf16.mxu0 %v13662_v16  ;;  %v11696_v16 = vld [vmem:[%s15400_s5 + $0x1e8] sm:$0xff]  }
 0x3ef   : > { %10476 = vmatpush3.bf16.msra.mxu1 %v11685_v56  ;;  %10667 = vmatprep.subr.bf16.mxu0 %v11692_v61  ;;  %v14310_v56 = vld [vmem:[#allocation2 + $0x78] sm:$0xff] }
 0x3f0   : > { %10477 = vmatprep.subr.bf16.mxu1 %v11686_v34  ;;  %10668 = vmatpush3.bf16.msra.mxu0 %v11692_v61  ;;  %v14314_v61 = vld [vmem:[#allocation2 + $0x80] sm:$0xff] }
 0x3f1   : > { %10669 = vmatprep.subr.bf16.mxu0 %v11693_v37 }
 0x3f3   : > { %10478 = vmatpush3.bf16.msra.mxu1 %v11686_v34  ;;  %v14318_v34 = vld [vmem:[#allocation2 + $0x88] sm:$0xff] }
 0x3f4   : > { %10479 = vmatprep.subr.bf16.mxu1 %v11687_v26  ;;  %10670 = vmatpush3.bf16.msra.mxu0 %v11693_v37  ;;  %v14322_v37 = vld [vmem:[#allocation2 + $0x90] sm:$0xff] }
 0x3f5   : > { %10432 = vmatmul.mubr.bf16.gmra.mrb[56].mxu1 %v13710_v14  ;;  %10624 = vmatmul.mubr.bf16.gmra.mrb[104].mxu0 %v13710_v14  ;;  %v11697_v14 = vld [vmem:[%s15400_s5 + $0x1f0] sm:$0xff]  }
 0x3f6   : > { %10435 = vmatprep.mubr.bf16.mxu1 %v13728_v58  ;;  %10627 = vmatprep.mubr.bf16.mxu0 %v13728_v58  ;;  %v11698_v58 = vld [vmem:[%s15400_s5 + $0x1f8] sm:$0xff]  }
 0x3f7   : > { %10480 = vmatpush3.bf16.msra.mxu1 %v11687_v26  ;;  %10671 = vmatprep.subr.bf16.mxu0 %v11694_v10  ;;  %v14326_v26 = vld [vmem:[#allocation2 + $0x98] sm:$0xff] }
 0x3f8   : > { %10481 = vmatprep.subr.bf16.mxu1 %v11688_v9  ;;  %10672 = vmatpush3.bf16.msra.mxu0 %v11694_v10  ;;  %v14330_v10 = vld [vmem:[#allocation2 + $0xa0] sm:$0xff] }
 0x3f9   : > { %10673 = vmatprep.subr.bf16.mxu0 %v11696_v16 }
 0x3fb   : > { %10482 = vmatpush3.bf16.msra.mxu1 %v11688_v9  ;;  %v14342_v9 = vld [vmem:[#allocation2 + $0xc8] sm:$0xff] }
 0x3fc   : > { %10483 = vmatprep.subr.bf16.mxu1 %v11691_v52  ;;  %10674 = vmatpush3.bf16.msra.mxu0 %v11696_v16  ;;  %v11708_v16 = vld [vmem:[%s15400_s5 + $0x88] sm:$0xff]  }
 0x3fd   : > { %10436 = vmatmul.mubr.bf16.gmra.mrb[60].mxu1 %v13758_v11  ;;  %10628 = vmatmul.mubr.bf16.gmra.mrb[108].mxu0 %v13758_v11 }
 0x3fe   : > { %10439 = vmatprep.mubr.bf16.mxu1 %v13848_v27  ;;  %10631 = vmatprep.mubr.bf16.mxu0 %v13848_v27 }
 0x3ff   : > { %10484 = vmatpush3.bf16.msra.mxu1 %v11691_v52  ;;  %10675 = vmatprep.subr.bf16.mxu0 %v11697_v14  ;;  %v14429_v52 = vld [vmem:[#allocation2 + $0x38] sm:$0xff] }
 0x400   : > { %10485 = vmatprep.subr.bf16.mxu1 %v11695_v19  ;;  %10676 = vmatpush3.bf16.msra.mxu0 %v11697_v14 }
 0x401   : > { %10677 = vmatprep.subr.bf16.mxu0 %v11698_v58 }
 0x403   : > { %10486 = vmatpush3.bf16.msra.mxu1 %v11695_v19 }
 0x404   : > { %10678 = vmatpush3.bf16.msra.mxu0 %v11698_v58  ;;  %10727 = vmatprep.subr.bf16.mxu1 %v11699_v35 }
 0x405   : > { %10440 = vmatmul.mubr.bf16.gmra.mrb[64].mxu1 %v13861_v31  ;;  %10632 = vmatmul.mubr.bf16.gmra.mrb[112].mxu0 %v13861_v31 }
 0x406   : > { %10443 = vmatprep.mubr.bf16.mxu1 %v13967_v15  ;;  %10635 = vmatprep.mubr.bf16.mxu0 %v13967_v15 }
 0x40d   : > { %10444 = vmatmul.mubr.bf16.gmra.mrb[68].mxu1 %v13977_v48  ;;  %10636 = vmatmul.mubr.bf16.gmra.mrb[116].mxu0 %v13977_v48 }
 0x40e   : > { %10447 = vmatprep.mubr.bf16.mxu1 %v13989_v47  ;;  %10639 = vmatprep.mubr.bf16.mxu0 %v13989_v47 }
 0x415   : > { %10448 = vmatmul.mubr.bf16.gmra.mrb[72].mxu1 %v14226_v59  ;;  %10640 = vmatmul.mubr.bf16.gmra.mrb[120].mxu0 %v14226_v59 }
 0x416   : > { %10451 = vmatprep.mubr.bf16.mxu1 %v13722_v4  ;;  %10643 = vmatprep.mubr.bf16.mxu0 %v13722_v4  ;;  %v14250_v4 = vld [vmem:[#allocation2 + $0x18] sm:$0xff] }
 0x41d   : > { %10452 = vmatmul.mubr.bf16.gmra.mrb[76].mxu1 %v13795_v40  ;;  %10644 = vmatmul.mubr.bf16.gmra.mrb[124].mxu0 %v13795_v40  ;;  %v14254_v40 = vld [vmem:[#allocation2 + $0x20] sm:$0xff] }
 0x41e   : > { %10455 = vmatprep.mubr.bf16.mxu1 %v13852_v29  ;;  %10647 = vmatprep.mubr.bf16.mxu0 %v13852_v29  ;;  %v11700_v29 = vld [vmem:[%s15400_s5 + $0x148] sm:$0xff]  }
 0x425   : > { %10456 = vmatmul.mubr.bf16.gmra.mrb[80].mxu1 %v13886_v46  ;;  %10648 = vmatmul.mubr.bf16.gmra.mrb[128].mxu0 %v13886_v46  ;;  %v14261_v46 = vld [vmem:[#allocation2 + $0x28] sm:$0xff] }
 0x426   : > { %10459 = vmatprep.mubr.bf16.mxu1 %v13951_v32  ;;  %10651 = vmatprep.mubr.bf16.mxu0 %v13951_v32  ;;  %v11701_v32 = vld [vmem:[%s15400_s5 + $0x150] sm:$0xff]  }
 0x42d   : > { %10460 = vmatmul.mubr.bf16.gmra.mrb[84].mxu1 %v13970_v0  ;;  %10652 = vmatmul.mubr.bf16.gmra.mrb[132].mxu0 %v13970_v0  ;;  %v11702_v0 = vld [vmem:[%s15400_s5 + $0x158] sm:$0xff]  }
 0x42e   : > { %10463 = vmatprep.mubr.bf16.mxu1 %v14026_v41  ;;  %10655 = vmatprep.mubr.bf16.mxu0 %v14026_v41  ;;  %v14271_v41 = vld [vmem:[#allocation2 + $0x30] sm:$0xff] }
 0x435   : > { %10464 = vmatmul.mubr.bf16.gmra.mrb[88].mxu1 %v14063_v53  ;;  %10656 = vmatmul.mubr.bf16.gmra.mrb[136].mxu0 %v14063_v53 }
 0x436   : > { %10467 = vmatprep.mubr.bf16.mxu1 %v14079_v13  ;;  %10659 = vmatprep.mubr.bf16.mxu0 %v14079_v13 }
 0x43d   : > { %10468 = vmatmul.mubr.bf16.gmra.mrb[92].mxu1 %v14109_v42  ;;  %10660 = vmatmul.mubr.bf16.gmra.mrb[140].mxu0 %v14109_v42 }
 0x43e   : > { %10487 = vmatprep.mubr.bf16.mxu1 %v14250_v4  ;;  %10679 = vmatprep.mubr.bf16.mxu0 %v14250_v4 }
 0x445   : > { %10488 = vmatmul.mubr.bf16.vlgmr.msra.gmra.mrb[48].mxu1 %v14254_v40  ;;  %10680 = vmatmul.mubr.bf16.vlgmr.msra.gmra.mrb[96].mxu0 %v14254_v40 }
 0x446   : > { %10491 = vmatprep.mubr.bf16.mxu1 %v14261_v46  ;;  %10683 = vmatprep.mubr.bf16.mxu0 %v14261_v46 }
 0x447   : > { %10728 = vmatpush3.bf16.msra.mxu1 %v11699_v35  ;;  %v14440_v35 = vld [vmem:[#allocation2 + $0x40] sm:$0xff] }
 0x448   : > { %10729 = vmatprep.subr.bf16.mxu1 %v11700_v29 }
 0x44b   : > { %10730 = vmatpush3.bf16.msra.mxu1 %v11700_v29 }
 0x44c   : > { %10731 = vmatprep.subr.bf16.mxu1 %v11701_v32 }
 0x44d   : > { %10492 = vmatmul.mubr.bf16.gmra.mrb[52].mxu1 %v14271_v41  ;;  %10684 = vmatmul.mubr.bf16.gmra.mrb[100].mxu0 %v14271_v41 }
 0x44e   : > { %10495 = vmatprep.mubr.bf16.mxu1 %v13758_v11  ;;  %10687 = vmatprep.mubr.bf16.mxu0 %v13758_v11  ;;  %v11705_v11 = vld [vmem:[%s15400_s5 + $0x170] sm:$0xff]  }
 0x44f   : > { %10732 = vmatpush3.bf16.msra.mxu1 %v11701_v32 }
 0x450   : > { %10733 = vmatprep.subr.bf16.mxu1 %v11702_v0 }
 0x453   : > { %10734 = vmatpush3.bf16.msra.mxu1 %v11702_v0 }
 0x454   : > { %10735 = vmatprep.subr.bf16.mxu1 %v11703_v63 }
 0x455   : > { %10496 = vmatmul.mubr.bf16.gmra.mrb[56].mxu1 %v13848_v27  ;;  %10688 = vmatmul.mubr.bf16.gmra.mrb[104].mxu0 %v13848_v27  ;;  %v11707_v27 = vld [vmem:[%s15400_s5 + $0x80] sm:$0xff]  }
 0x456   : > { %10499 = vmatprep.mubr.bf16.mxu1 %v13861_v31  ;;  %10691 = vmatprep.mubr.bf16.mxu0 %v13861_v31  ;;  %v14302_v31 = vld [vmem:[#allocation2 + $0x68] sm:$0xff] }
 0x457   : > { %10736 = vmatpush3.bf16.msra.mxu1 %v11703_v63 }
 0x458   : > { %10737 = vmatprep.subr.bf16.mxu1 %v11704_v30 }
 0x45b   : > { %10738 = vmatpush3.bf16.msra.mxu1 %v11704_v30 }
 0x45c   : > { %10739 = vmatprep.subr.bf16.mxu1 %v11705_v11 }
 0x45d   : > { %10500 = vmatmul.mubr.bf16.gmra.mrb[60].mxu1 %v13967_v15  ;;  %10692 = vmatmul.mubr.bf16.gmra.mrb[108].mxu0 %v13967_v15 }
 0x45e   : > { %10503 = vmatprep.mubr.bf16.mxu1 %v13977_v48  ;;  %10695 = vmatprep.mubr.bf16.mxu0 %v13977_v48 }
 0x45f   : > { %10740 = vmatpush3.bf16.msra.mxu1 %v11705_v11 }
 0x460   : > { %10741 = vmatprep.subr.bf16.mxu1 %v11706_v62 }
 0x463   : > { %10742 = vmatpush3.bf16.msra.mxu1 %v11706_v62 }
 0x464   : > { %10791 = vmatprep.subr.bf16.mxu1 %v11707_v27 }
 0x465   : > { %10504 = vmatmul.mubr.bf16.gmra.mrb[64].mxu1 %v13989_v47  ;;  %10696 = vmatmul.mubr.bf16.gmra.mrb[112].mxu0 %v13989_v47 }
 0x466   : > { %10507 = vmatprep.mubr.bf16.mxu1 %v14302_v31  ;;  %10699 = vmatprep.mubr.bf16.mxu0 %v14302_v31 }
 0x46d   : > { %10508 = vmatmul.mubr.bf16.gmra.mrb[68].mxu1 %v14306_v7  ;;  %10700 = vmatmul.mubr.bf16.gmra.mrb[116].mxu0 %v14306_v7 }
 0x46e   : > { %10511 = vmatprep.mubr.bf16.mxu1 %v14310_v56  ;;  %10703 = vmatprep.mubr.bf16.mxu0 %v14310_v56 }
 0x475   : > { %10512 = vmatmul.mubr.bf16.gmra.mrb[72].mxu1 %v14314_v61  ;;  %10704 = vmatmul.mubr.bf16.gmra.mrb[120].mxu0 %v14314_v61 }
 0x476   : > { %10515 = vmatprep.mubr.bf16.mxu1 %v14318_v34  ;;  %10707 = vmatprep.mubr.bf16.mxu0 %v14318_v34 }
 0x47d   : > { %10516 = vmatmul.mubr.bf16.gmra.mrb[76].mxu1 %v14322_v37  ;;  %10708 = vmatmul.mubr.bf16.gmra.mrb[124].mxu0 %v14322_v37 }
 0x47e   : > { %10519 = vmatprep.mubr.bf16.mxu1 %v14326_v26  ;;  %10711 = vmatprep.mubr.bf16.mxu0 %v14326_v26 }
 0x485   : > { %10520 = vmatmul.mubr.bf16.gmra.mrb[80].mxu1 %v14330_v10  ;;  %10712 = vmatmul.mubr.bf16.gmra.mrb[128].mxu0 %v14330_v10 }
 0x486   : > { %10523 = vmatprep.mubr.bf16.mxu1 %v14063_v53  ;;  %10715 = vmatprep.mubr.bf16.mxu0 %v14063_v53 }
 0x48d   : > { %10524 = vmatmul.mubr.bf16.gmra.mrb[84].mxu1 %v14079_v13  ;;  %10716 = vmatmul.mubr.bf16.gmra.mrb[132].mxu0 %v14079_v13 }
 0x48e   : > { %10527 = vmatprep.mubr.bf16.mxu1 %v14109_v42  ;;  %10719 = vmatprep.mubr.bf16.mxu0 %v14109_v42 }
 0x495   : > { %10528 = vmatmul.mubr.bf16.gmra.mrb[88].mxu1 %v14112_v51  ;;  %10720 = vmatmul.mubr.bf16.gmra.mrb[136].mxu0 %v14112_v51  ;;  %v11709_v51 = vld [vmem:[%s15400_s5 + $0x90] sm:$0xff]  }
 0x496   : > { %10531 = vmatprep.mubr.bf16.mxu1 %v14342_v9  ;;  %10723 = vmatprep.mubr.bf16.mxu0 %v14342_v9 }
 0x49d   : > { %10532 = vmatmul.mubr.bf16.gmra.mrb[92].mxu1 %v14145_v8  ;;  %10724 = vmatmul.mubr.bf16.gmra.mrb[140].mxu0 %v14145_v8 }
 0x49e   : > { %10743 = vmatprep.mubr.bf16.mxu1 %v13594_v2  ;;  %v11710_v2 = vld [vmem:[%s15400_s5 + $0x98] sm:$0xff]  }
 0x4a5   : > { %10744 = vmatmul.mubr.bf16.vlgmr.msra.gmra.mrb[96].mxu1 %v13618_v43  ;;  %v11711_v43 = vld [vmem:[%s15400_s5 + $0xa0] sm:$0xff]  }
 0x4a6   : > { %10747 = vmatprep.mubr.bf16.mxu1 %v13708_v54  ;;  %10792 = vmatpush3.bf16.msra.mxu1 %v11707_v27  ;;  %v11712_v54 = vld [vmem:[%s15400_s5 + $0xa8] sm:$0xff]  }
 0x4a7   : > { %10793 = vmatprep.subr.bf16.mxu1 %v11708_v16 }
 0x4aa   : > { %10794 = vmatpush3.bf16.msra.mxu1 %v11708_v16 }
 0x4ab   : > { %10795 = vmatprep.subr.bf16.mxu1 %v11709_v51 }
 0x4ad   : > { %10748 = vmatmul.mubr.bf16.gmra.mrb[100].mxu1 %v13738_v38  ;;  %v11713_v38 = vld [vmem:[%s15400_s5 + $0xb0] sm:$0xff]  }
 0x4ae   : > { %10751 = vmatprep.mubr.bf16.mxu1 %v13773_v49  ;;  %10796 = vmatpush3.bf16.msra.mxu1 %v11709_v51  ;;  %v11714_v49 = vld [vmem:[%s15400_s5 + $0xb8] sm:$0xff]  }
 0x4af   : > { %10797 = vmatprep.subr.bf16.mxu1 %v11710_v2 }
 0x4b2   : > { %10798 = vmatpush3.bf16.msra.mxu1 %v11710_v2 }
 0x4b3   : > { %10799 = vmatprep.subr.bf16.mxu1 %v11711_v43 }
 0x4b5   : > { %10752 = vmatmul.mubr.bf16.gmra.mrb[104].mxu1 %v13803_v25  ;;  %v11715_v25 = vld [vmem:[%s15400_s5 + $0x200] sm:$0xff]  }
 0x4b6   : > { %10755 = vmatprep.mubr.bf16.mxu1 %v13880_v23  ;;  %10800 = vmatpush3.bf16.msra.mxu1 %v11711_v43  ;;  %v11716_v23 = vld [vmem:[%s15400_s5 + $0x208] sm:$0xff]  }
 0x4b7   : > { %10801 = vmatprep.subr.bf16.mxu1 %v11712_v54 }
 0x4ba   : > { %10802 = vmatpush3.bf16.msra.mxu1 %v11712_v54 }
 0x4bb   : > { %10803 = vmatprep.subr.bf16.mxu1 %v11713_v38 }
 0x4bd   : > { %10756 = vmatmul.mubr.bf16.gmra.mrb[108].mxu1 %v13898_v12  ;;  %v11717_v12 = vld [vmem:[%s15400_s5 + $0x210] sm:$0xff]  }
 0x4be   : > { %10759 = vmatprep.mubr.bf16.mxu1 %v13999_v45  ;;  %10804 = vmatpush3.bf16.msra.mxu1 %v11713_v38  ;;  %v11718_v45 = vld [vmem:[%s15400_s5 + $0x218] sm:$0xff]  }
 0x4bf   : > { %10805 = vmatprep.subr.bf16.mxu1 %v11714_v49 }
 0x4c2   : > { %10806 = vmatpush3.bf16.msra.mxu1 %v11714_v49 }
 0x4c3   : > { %10855 = vmatprep.subr.bf16.mxu1 %v11715_v25 }
 0x4c5   : > { %10760 = vmatmul.mubr.bf16.gmra.mrb[112].mxu1 %v14007_v50  ;;  %v11927_v50 = vld [vmem:[#allocation2 + $0x20] sm:$0xff] }
 0x4c6   : > { %10763 = vmatprep.mubr.bf16.mxu1 %v14029_v17  ;;  %v11719_v17 = vld [vmem:[%s15400_s5 + $0x220] sm:$0xff]  }
 0x4cd   : > { %10764 = vmatmul.mubr.bf16.gmra.mrb[116].mxu1 %v14047_v22  ;;  %v11720_v22 = vld [vmem:[%s15400_s5 + $0x228] sm:$0xff]  }
 0x4ce   : > { %10767 = vmatprep.mubr.bf16.mxu1 %v14053_v3  ;;  %v11928_v3 = vld [vmem:[#allocation2 + $0x28] sm:$0xff] }
 0x4d5   : > { %10768 = vmatmul.mubr.bf16.gmra.mrb[120].mxu1 %v14069_v5  ;;  %v11721_v5 = vld [vmem:[%s15400_s5 + $0x230] sm:$0xff]  }
 0x4d6   : > { %10771 = vmatprep.mubr.bf16.mxu1 %v14074_v44 }
 0x4dd   : > { %10772 = vmatmul.mubr.bf16.gmra.mrb[124].mxu1 %v14085_v6 }
 0x4de   : > { %10775 = vmatprep.mubr.bf16.mxu1 %v14091_v18 }
 0x4e5   : > { %10776 = vmatmul.mubr.bf16.gmra.mrb[128].mxu1 %v14099_v39 }
 0x4e6   : > { %10779 = vmatprep.mubr.bf16.mxu1 %v14104_v36 }
 0x4ed   : > { %10780 = vmatmul.mubr.bf16.gmra.mrb[132].mxu1 %v14119_v20 }
 0x4ee   : > { %10783 = vmatprep.mubr.bf16.mxu1 %v14124_v55 }
 0x4f5   : > { %10784 = vmatmul.mubr.bf16.gmra.mrb[136].mxu1 %v14131_v57 }
 0x4f6   : > { %10787 = vmatprep.mubr.bf16.mxu1 %v14136_v1 }
 0x4fd   : > { %10788 = vmatmul.mubr.bf16.gmra.mrb[140].mxu1 %v14141_v33 }
 0x4fe   : > { %10807 = vmatprep.mubr.bf16.mxu1 %v14145_v8  ;;  %v11722_v8 = vld [vmem:[%s15400_s5 + $0x238] sm:$0xff]  }
 0x505   : > { %10808 = vmatmul.mubr.bf16.vlgmr.msra.gmra.mrb[96].mxu1 %v14152_v21 }
 0x506   : > { %10811 = vmatprep.mubr.bf16.mxu1 %v14159_v60  ;;  %10856 = vmatpush3.bf16.msra.mxu1 %v11715_v25 }
 0x507   : > { %10857 = vmatprep.subr.bf16.mxu1 %v11716_v23 }
 0x50a   : > { %10858 = vmatpush3.bf16.msra.mxu1 %v11716_v23 }
 0x50b   : > { %10859 = vmatprep.subr.bf16.mxu1 %v11717_v12 }
 0x50d   : > { %10812 = vmatmul.mubr.bf16.gmra.mrb[100].mxu1 %v14174_v28 }
 0x50e   : > { %10815 = vmatprep.mubr.bf16.mxu1 %v11927_v50  ;;  %10860 = vmatpush3.bf16.msra.mxu1 %v11717_v12  ;;  %v14453_v12 = vld [vmem:[#allocation2 + $0x48] sm:$0xff] }
 0x50f   : > { %10861 = vmatprep.subr.bf16.mxu1 %v11718_v45 }
 0x512   : > { %10862 = vmatpush3.bf16.msra.mxu1 %v11718_v45 }
 0x513   : > { %10863 = vmatprep.subr.bf16.mxu1 %v11719_v17 }
 0x515   : > { %10816 = vmatmul.mubr.bf16.gmra.mrb[104].mxu1 %v11928_v3 }
 0x516   : > { %10819 = vmatprep.mubr.bf16.mxu1 %v14271_v41  ;;  %10864 = vmatpush3.bf16.msra.mxu1 %v11719_v17 }
 0x517   : > { %10865 = vmatprep.subr.bf16.mxu1 %v11720_v22 }
 0x518   : > { %v10489_v44 = vpop.f32.mrb[48].mxu1  ;;  %v10681_v6 = vpop.f32.mrb[96].mxu0 }
 0x519   : > { %v14419_v18 = vpop.f32.mrb[49].mxu1  ;;  %v14421_v39 = vpop.f32.mrb[97].mxu0  ;;  %v7725_v55 = vrot.slane %v10489_v44, 7 }
 0x51a   : > { %v10490_v36 = vpop.f32.mrb[50].mxu1  ;;  %v10682_v20 = vpop.f32.mrb[98].mxu0  ;;  %10866 = vmatpush3.bf16.msra.mxu1 %v11720_v22  ;;  %v15415_v21 = vrot.slane %v14419_v18, 7 }
 0x51b   : > { %v7726_v57 = vrot.slane %v10490_v36, 7  ;;  %v5651_v1 = vpop.f32.mrb[51].mxu1  ;;  %v6569_v33 = vpop.f32.mrb[99].mxu0  ;;  %10867 = vmatprep.subr.bf16.mxu1 %v11721_v5 }
 0x51c   : > { %v7724_v60 = vrot.slane %v5651_v1, 7 }
 0x51d   : > { %v7815_v28 = vsel %vm3551_vm0, %v7725_v55, %v7726_v57  ;;  %10820 = vmatmul.mubr.bf16.gmra.mrb[108].mxu1 %v14429_v52 }
 0x51e   : > { %v14432_v14 = vadd.f32 %v10682_v20, %v7815_v28  ;;  %v7816_v19 = vsel %vm3551_vm0, %v7724_v60, %v7725_v55  ;;  %v7817_v58 = vsel %vm3551_vm0, %v15415_v21, %v7724_v60  ;;  %10823 = vmatprep.mubr.bf16.mxu1 %v14440_v35  ;;  %10868 = vmatpush3.bf16.msra.mxu1 %v11721_v5 }
 0x51f   : > { %v14443_v29 = vadd.f32 %v10681_v6, %v7816_v19  ;;  %v14445_v32 = vadd.f32 %v7817_v58, %v6569_v33  ;;  %10869 = vmatprep.subr.bf16.mxu1 %v11722_v8 }
 0x520   : > { %v10493_v0 = vpop.f32.mrb[52].mxu1  ;;  %v10685_v63 = vpop.f32.mrb[100].mxu0 }
 0x521   : > { %v5664_v30 = vpop.f32.mrb[53].mxu1  ;;  %v6582_v11 = vpop.f32.mrb[101].mxu0  ;;  %v7729_v51 = vrot.slane %v10493_v0, 7 }
 0x522   : > { %v7727_v62 = vrot.slane %v5664_v30, 7  ;;  %v10494_v27 = vpop.f32.mrb[54].mxu1  ;;  %v10686_v16 = vpop.f32.mrb[102].mxu0  ;;  %10870 = vmatpush3.bf16.msra.mxu1 %v11722_v8 }
 0x523   : > { %v7730_v2 = vrot.slane %v10494_v27, 7  ;;  %v5667_v43 = vpop.f32.mrb[55].mxu1  ;;  %v6585_v54 = vpop.f32.mrb[103].mxu0 }
 0x524   : > { %v7814_v38 = vsel %vm3551_vm0, %v7726_v57, %v7727_v62  ;;  %v7728_v49 = vrot.slane %v5667_v43, 7 }
 0x525   : > { %v14449_v25 = vadd.f32 %v7814_v38, %v6582_v11  ;;  %v7811_v23 = vsel %vm3551_vm0, %v7729_v51, %v7730_v2  ;;  %10824 = vmatmul.mubr.bf16.gmra.mrb[112].mxu1 %v14453_v12 }
 0x526   : > { %v14456_v45 = vadd.f32 %v10686_v16, %v7811_v23  ;;  %v7812_v50 = vsel %vm3551_vm0, %v7728_v49, %v7729_v51  ;;  %v7813_v17 = vsel %vm3551_vm0, %v7727_v62, %v7728_v49  ;;  %10827 = vmatprep.mubr.bf16.mxu1 %v13967_v15 }
 0x527   : > { %v14463_v22 = vadd.f32 %v10685_v63, %v7812_v50  ;;  %v14465_v3 = vadd.f32 %v7813_v17, %v6585_v54 }
 0x528   : > { %v10497_v5 = vpop.f32.mrb[56].mxu1  ;;  %v10689_v44 = vpop.f32.mrb[104].mxu0 }
 0x529   : > { %v5680_v6 = vpop.f32.mrb[57].mxu1  ;;  %v6598_v36 = vpop.f32.mrb[105].mxu0  ;;  %v7733_v1 = vrot.slane %v10497_v5, 7 }
 0x52a   : > { %v7731_v20 = vrot.slane %v5680_v6, 7  ;;  %v10498_v55 = vpop.f32.mrb[58].mxu1  ;;  %v10690_v57 = vpop.f32.mrb[106].mxu0 }
 0x52b   : > { %v7734_v33 = vrot.slane %v10498_v55, 7  ;;  %v5683_v8 = vpop.f32.mrb[59].mxu1  ;;  %v6601_v60 = vpop.f32.mrb[107].mxu0  ;;  %v11932_v55 = vld [vmem:[#allocation2 + $0x70] sm:$0xff] }
 0x52c   : > { %v7810_v28 = vsel %vm3551_vm0, %v7730_v2, %v7731_v20  ;;  %v7732_v19 = vrot.slane %v5683_v8, 7 }
 0x52d   : > { %v14469_v15 = vadd.f32 %v7810_v28, %v6598_v36  ;;  %v7807_v58 = vsel %vm3551_vm0, %v7733_v1, %v7734_v33  ;;  %10828 = vmatmul.mubr.bf16.gmra.mrb[116].mxu1 %v13977_v48 }
 0x52e   : > { %v14474_v0 = vadd.f32 %v10690_v57, %v7807_v58  ;;  %v7808_v63 = vsel %vm3551_vm0, %v7732_v19, %v7733_v1  ;;  %v7809_v30 = vsel %vm3551_vm0, %v7731_v20, %v7732_v19  ;;  %10831 = vmatprep.mubr.bf16.mxu1 %v13989_v47 }
 0x52f   : > { %v14481_v11 = vadd.f32 %v10689_v44, %v7808_v63  ;;  %v14483_v62 = vadd.f32 %v7809_v30, %v6601_v60 }
 0x530   : > { %v10501_v27 = vpop.f32.mrb[60].mxu1  ;;  %v10693_v16 = vpop.f32.mrb[108].mxu0 }
 0x531   : > { %v5696_v51 = vpop.f32.mrb[61].mxu1  ;;  %v6614_v2 = vpop.f32.mrb[109].mxu0  ;;  %v7737_v38 = vrot.slane %v10501_v27, 7 }
 0x532   : > { %v7735_v43 = vrot.slane %v5696_v51, 7  ;;  %v10502_v48 = vpop.f32.mrb[62].mxu1  ;;  %v10694_v54 = vpop.f32.mrb[110].mxu0 }
 0x533   : > { %v7738_v49 = vrot.slane %v10502_v48, 7  ;;  %v5699_v23 = vpop.f32.mrb[63].mxu1  ;;  %v6617_v50 = vpop.f32.mrb[111].mxu0 }
 0x534   : > { %v7806_v17 = vsel %vm3551_vm0, %v7734_v33, %v7735_v43  ;;  %v7736_v5 = vrot.slane %v5699_v23, 7 }
 0x535   : > { %v14487_v47 = vadd.f32 %v7806_v17, %v6614_v2  ;;  %v7803_v44 = vsel %vm3551_vm0, %v7737_v38, %v7738_v49  ;;  %10832 = vmatmul.mubr.bf16.gmra.mrb[120].mxu1 %v14226_v59  ;;  %v11934_v17 = vld [vmem:[#allocation2 + $0x80] sm:$0xff] }
 0x536   : > { %v14492_v6 = vadd.f32 %v10694_v54, %v7803_v44  ;;  %v7804_v36 = vsel %vm3551_vm0, %v7736_v5, %v7737_v38  ;;  %v7805_v20 = vsel %vm3551_vm0, %v7735_v43, %v7736_v5  ;;  %10835 = vmatprep.mubr.bf16.mxu1 %v11932_v55  ;;  %v11933_v54 = vld [vmem:[#allocation2 + $0x78] sm:$0xff] }
 0x537   : > { %v14498_v57 = vadd.f32 %v10693_v16, %v7804_v36  ;;  %v14500_v1 = vadd.f32 %v7805_v20, %v6617_v50 }
 0x538   : > { %v10505_v33 = vpop.f32.mrb[64].mxu1  ;;  %v10697_v8 = vpop.f32.mrb[112].mxu0 }
 0x539   : > { %v5712_v60 = vpop.f32.mrb[65].mxu1  ;;  %v6630_v28 = vpop.f32.mrb[113].mxu0  ;;  %v7741_v63 = vrot.slane %v10505_v33, 7 }
 0x53a   : > { %v7739_v19 = vrot.slane %v5712_v60, 7  ;;  %v10506_v59 = vpop.f32.mrb[66].mxu1  ;;  %v10698_v58 = vpop.f32.mrb[114].mxu0 }
 0x53b   : > { %v7742_v30 = vrot.slane %v10506_v59, 7  ;;  %v5715_v27 = vpop.f32.mrb[67].mxu1  ;;  %v6633_v51 = vpop.f32.mrb[115].mxu0 }
 0x53c   : > { %v7802_v2 = vsel %vm3551_vm0, %v7738_v49, %v7739_v19  ;;  %v7740_v43 = vrot.slane %v5715_v27, 7 }
 0x53d   : > { %v14504_v48 = vadd.f32 %v7802_v2, %v6630_v28  ;;  %v7799_v16 = vsel %vm3551_vm0, %v7741_v63, %v7742_v30  ;;  %10836 = vmatmul.mubr.bf16.gmra.mrb[124].mxu1 %v11933_v54 }
 0x53e   : > { %v14508_v38 = vadd.f32 %v10698_v58, %v7799_v16  ;;  %v7800_v23 = vsel %vm3551_vm0, %v7740_v43, %v7741_v63  ;;  %v7801_v50 = vsel %vm3551_vm0, %v7739_v19, %v7740_v43  ;;  %10839 = vmatprep.mubr.bf16.mxu1 %v11934_v17 }
 0x53f   : > { %v14514_v5 = vadd.f32 %v10697_v8, %v7800_v23  ;;  %v14516_v49 = vadd.f32 %v7801_v50, %v6633_v51  ;;  %v11935_v51 = vld [vmem:[#allocation2 + $0x88] sm:$0xff]  ;;  %v11936_v50 = vld [vmem:[#allocation2 + $0x90] sm:$0xff] }
 0x540   : > { %v10509_v44 = vpop.f32.mrb[68].mxu1  ;;  %v10701_v36 = vpop.f32.mrb[116].mxu0 }
 0x541   : > { %v5728_v20 = vpop.f32.mrb[69].mxu1  ;;  %v6646_v55 = vpop.f32.mrb[117].mxu0  ;;  %v7745_v59 = vrot.slane %v10509_v44, 7 }
 0x542   : > { %v7743_v33 = vrot.slane %v5728_v20, 7  ;;  %v10510_v60 = vpop.f32.mrb[70].mxu1  ;;  %v10702_v28 = vpop.f32.mrb[118].mxu0 }
 0x543   : > { %v7746_v58 = vrot.slane %v10510_v60, 7  ;;  %v5731_v27 = vpop.f32.mrb[71].mxu1  ;;  %v6649_v63 = vpop.f32.mrb[119].mxu0 }
 0x544   : > { %v7798_v19 = vsel %vm3551_vm0, %v7742_v30, %v7743_v33  ;;  %v7744_v2 = vrot.slane %v5731_v27, 7 }
 0x545   : > { %v14520_v43 = vadd.f32 %v7798_v19, %v6646_v55  ;;  %v7795_v8 = vsel %vm3551_vm0, %v7745_v59, %v7746_v58  ;;  %10840 = vmatmul.mubr.bf16.gmra.mrb[128].mxu1 %v11935_v51 }
 0x546   : > { %v14524_v16 = vadd.f32 %v10702_v28, %v7795_v8  ;;  %v7796_v54 = vsel %vm3551_vm0, %v7744_v2, %v7745_v59  ;;  %v7797_v23 = vsel %vm3551_vm0, %v7743_v33, %v7744_v2  ;;  %10843 = vmatprep.mubr.bf16.mxu1 %v11936_v50 }
 0x547   : > { %15482 = vst [vmem:[#allocation5_spill] sm:$0xff] %v14520_v43  ;;  %v14530_v17 = vadd.f32 %v10701_v36, %v7796_v54  ;;  %v14532_v30 = vadd.f32 %v7797_v23, %v6649_v63  ;;  %v11937_v63 = vld [vmem:[#allocation2 + $0x98] sm:$0xff] }
 0x548   : > { %15483 = vst [vmem:[#allocation6_spill] sm:$0xff] %v14524_v16  ;;  %v10513_v44 = vpop.f32.mrb[72].mxu1  ;;  %v10705_v20 = vpop.f32.mrb[120].mxu0 }
 0x549   : > { %v5744_v55 = vpop.f32.mrb[73].mxu1  ;;  %v6662_v60 = vpop.f32.mrb[121].mxu0  ;;  %v7749_v8 = vrot.slane %v10513_v44, 7 }
 0x54a   : > { %v7747_v27 = vrot.slane %v5744_v55, 7  ;;  %v10514_v19 = vpop.f32.mrb[74].mxu1  ;;  %v10706_v28 = vpop.f32.mrb[122].mxu0  ;;  %v11938_v55 = vld [vmem:[#allocation2 + $0xa0] sm:$0xff] }
 0x54b   : > { %v7750_v51 = vrot.slane %v10514_v19, 7  ;;  %v5747_v21 = vpop.f32.mrb[75].mxu1  ;;  %v6665_v59 = vpop.f32.mrb[123].mxu0 }
 0x54c   : > { %v7794_v33 = vsel %vm3551_vm0, %v7746_v58, %v7747_v27  ;;  %v7748_v2 = vrot.slane %v5747_v21, 7 }
 0x54d   : > { %v14536_v50 = vadd.f32 %v7794_v33, %v6662_v60  ;;  %v7791_v36 = vsel %vm3551_vm0, %v7749_v8, %v7750_v51  ;;  %10844 = vmatmul.mubr.bf16.gmra.mrb[132].mxu1 %v11937_v63 }
 0x54e   : > { %v14540_v54 = vadd.f32 %v10706_v28, %v7791_v36  ;;  %v7792_v23 = vsel %vm3551_vm0, %v7748_v2, %v7749_v8  ;;  %v7793_v44 = vsel %vm3551_vm0, %v7747_v27, %v7748_v2  ;;  %10847 = vmatprep.mubr.bf16.mxu1 %v11938_v55 }
 0x54f   : > { %15484 = vst [vmem:[#allocation7_spill] sm:$0xff] %v14536_v50  ;;  %v14546_v19 = vadd.f32 %v10705_v20, %v7792_v23  ;;  %v14548_v21 = vadd.f32 %v7793_v44, %v6665_v59 }
 0x550   : > { %15485 = vst [vmem:[#allocation8_spill] sm:$0xff] %v14540_v54  ;;  %v10517_v58 = vpop.f32.mrb[76].mxu1  ;;  %v10709_v60 = vpop.f32.mrb[124].mxu0 }
 0x551   : > { %v5760_v33 = vpop.f32.mrb[77].mxu1  ;;  %v6678_v50 = vpop.f32.mrb[125].mxu0  ;;  %v7753_v36 = vrot.slane %v10517_v58, 7 }
 0x552   : > { %v7751_v16 = vrot.slane %v5760_v33, 7  ;;  %v10518_v63 = vpop.f32.mrb[78].mxu1  ;;  %v10710_v28 = vpop.f32.mrb[126].mxu0 }
 0x553   : > { %v7754_v54 = vrot.slane %v10518_v63, 7  ;;  %v5763_v43 = vpop.f32.mrb[79].mxu1  ;;  %v6681_v8 = vpop.f32.mrb[127].mxu0 }
 0x554   : > { %v7790_v27 = vsel %vm3551_vm0, %v7750_v51, %v7751_v16  ;;  %v7752_v2 = vrot.slane %v5763_v43, 7 }
 0x555   : > { %v14552_v55 = vadd.f32 %v7790_v27, %v6678_v50  ;;  %v7787_v20 = vsel %vm3551_vm0, %v7753_v36, %v7754_v54  ;;  %10848 = vmatmul.mubr.bf16.gmra.mrb[136].mxu1 %v14063_v53 }
 0x556   : > { %v14557_v59 = vadd.f32 %v10710_v28, %v7787_v20  ;;  %v7788_v23 = vsel %vm3551_vm0, %v7752_v2, %v7753_v36  ;;  %v7789_v44 = vsel %vm3551_vm0, %v7751_v16, %v7752_v2  ;;  %10851 = vmatprep.mubr.bf16.mxu1 %v14079_v13 }
 0x557   : > { %15486 = vst [vmem:[#allocation9_spill] sm:$0xff] %v14552_v55  ;;  %v14564_v58 = vadd.f32 %v10709_v60, %v7788_v23  ;;  %v14566_v43 = vadd.f32 %v7789_v44, %v6681_v8 }
 0x558   : > { %15487 = vst [vmem:[#allocation10_spill] sm:$0xff] %v14557_v59  ;;  %v10521_v51 = vpop.f32.mrb[80].mxu1  ;;  %v10713_v50 = vpop.f32.mrb[128].mxu0 }
 0x559   : > { %v5776_v33 = vpop.f32.mrb[81].mxu1  ;;  %v6694_v63 = vpop.f32.mrb[129].mxu0  ;;  %v7757_v20 = vrot.slane %v10521_v51, 7 }
 0x55a   : > { %v7755_v27 = vrot.slane %v5776_v33, 7  ;;  %v10522_v53 = vpop.f32.mrb[82].mxu1  ;;  %v10714_v28 = vpop.f32.mrb[130].mxu0 }
 0x55b   : > { %v7758_v59 = vrot.slane %v10522_v53, 7  ;;  %v5779_v55 = vpop.f32.mrb[83].mxu1  ;;  %v6697_v36 = vpop.f32.mrb[131].mxu0 }
 0x55c   : > { %v7786_v16 = vsel %vm3551_vm0, %v7754_v54, %v7755_v27  ;;  %v7756_v2 = vrot.slane %v5779_v55, 7 }
 0x55d   : > { %v14570_v13 = vadd.f32 %v7786_v16, %v6694_v63  ;;  %v7783_v60 = vsel %vm3551_vm0, %v7757_v20, %v7758_v59  ;;  %10852 = vmatmul.mubr.bf16.gmra.mrb[140].mxu1 %v14109_v42 }
 0x55e   : > { %v14575_v8 = vadd.f32 %v10714_v28, %v7783_v60  ;;  %v7784_v23 = vsel %vm3551_vm0, %v7756_v2, %v7757_v20  ;;  %v7785_v44 = vsel %vm3551_vm0, %v7755_v27, %v7756_v2  ;;  %10871 = vmatprep.mubr.bf16.mxu1 %v14250_v4 }
 0x55f   : > { %15488 = vst [vmem:[#allocation11_spill] sm:$0xff] %v14570_v13  ;;  %v14582_v51 = vadd.f32 %v10713_v50, %v7784_v23  ;;  %v14584_v54 = vadd.f32 %v7785_v44, %v6697_v36 }
 0x560   : > { %15489 = vst [vmem:[#allocation14_spill] sm:$0xff] %v14575_v8  ;;  %v10525_v55 = vpop.f32.mrb[84].mxu1  ;;  %v10717_v33 = vpop.f32.mrb[132].mxu0 }
 0x561   : > { %v5792_v63 = vpop.f32.mrb[85].mxu1  ;;  %v6710_v53 = vpop.f32.mrb[133].mxu0  ;;  %v7761_v60 = vrot.slane %v10525_v55, 7 }
 0x562   : > { %v7759_v16 = vrot.slane %v5792_v63, 7  ;;  %v10526_v42 = vpop.f32.mrb[86].mxu1  ;;  %v10718_v28 = vpop.f32.mrb[134].mxu0 }
 0x563   : > { %v7762_v8 = vrot.slane %v10526_v42, 7  ;;  %v5795_v13 = vpop.f32.mrb[87].mxu1  ;;  %v6713_v20 = vpop.f32.mrb[135].mxu0 }
 0x564   : > { %v7782_v27 = vsel %vm3551_vm0, %v7758_v59, %v7759_v16  ;;  %v7760_v2 = vrot.slane %v5795_v13, 7 }
 0x565   : > { %v14588_v4 = vadd.f32 %v7782_v27, %v6710_v53  ;;  %v7779_v50 = vsel %vm3551_vm0, %v7761_v60, %v7762_v8  ;;  %10872 = vmatmul.mubr.bf16.vlgmr.msra.gmra.mrb[96].mxu1 %v14254_v40 }
 0x566   : > { %v14593_v36 = vadd.f32 %v10718_v28, %v7779_v50  ;;  %v7780_v23 = vsel %vm3551_vm0, %v7760_v2, %v7761_v60  ;;  %v7781_v44 = vsel %vm3551_vm0, %v7759_v16, %v7760_v2  ;;  %10875 = vmatprep.mubr.bf16.mxu1 %v14261_v46 }
 0x567   : > { %15490 = vst [vmem:[#allocation12_spill] sm:$0xff] %v14588_v4  ;;  %v14600_v55 = vadd.f32 %v10717_v33, %v7780_v23  ;;  %v14602_v59 = vadd.f32 %v7781_v44, %v6713_v20 }
 0x568   : > { %15491 = vst [vmem:[#allocation15_spill] sm:$0xff] %v14593_v36  ;;  %v10529_v13 = vpop.f32.mrb[88].mxu1  ;;  %v10721_v63 = vpop.f32.mrb[136].mxu0 }
 0x569   : > { %v5808_v53 = vpop.f32.mrb[89].mxu1  ;;  %v6726_v42 = vpop.f32.mrb[137].mxu0  ;;  %v7765_v50 = vrot.slane %v10529_v13, 7 }
 0x56a   : > { %v7763_v27 = vrot.slane %v5808_v53, 7  ;;  %v10530_v40 = vpop.f32.mrb[90].mxu1  ;;  %v10722_v28 = vpop.f32.mrb[138].mxu0 }
 0x56b   : > { %v7766_v36 = vrot.slane %v10530_v40, 7  ;;  %v5811_v4 = vpop.f32.mrb[91].mxu1  ;;  %v6729_v60 = vpop.f32.mrb[139].mxu0 }
 0x56c   : > { %v7778_v16 = vsel %vm3551_vm0, %v7762_v8, %v7763_v27  ;;  %v7764_v2 = vrot.slane %v5811_v4, 7 }
 0x56d   : > { %v14606_v46 = vadd.f32 %v7778_v16, %v6726_v42  ;;  %v7775_v33 = vsel %vm3551_vm0, %v7765_v50, %v7766_v36  ;;  %10876 = vmatmul.mubr.bf16.gmra.mrb[100].mxu1 %v14271_v41 }
 0x56e   : > { %v14611_v20 = vadd.f32 %v10722_v28, %v7775_v33  ;;  %v7776_v23 = vsel %vm3551_vm0, %v7764_v2, %v7765_v50  ;;  %v7777_v44 = vsel %vm3551_vm0, %v7763_v27, %v7764_v2  ;;  %10879 = vmatprep.mubr.bf16.mxu1 %v14429_v52 }
 0x56f   : > { %15492 = vst [vmem:[#allocation13_spill] sm:$0xff] %v14606_v46  ;;  %v14618_v13 = vadd.f32 %v10721_v63, %v7776_v23  ;;  %v14620_v8 = vadd.f32 %v7777_v44, %v6729_v60  ;;  %v15497_v63 = vrot.slane %v14419_v18, 7 }
 0x570   : > { %15493 = vst [vmem:[#allocation16_spill] sm:$0xff] %v14611_v20  ;;  %v10533_v4 = vpop.f32.mrb[92].mxu1  ;;  %v10725_v53 = vpop.f32.mrb[140].mxu0 }
 0x571   : > { %15494 = vst [vmem:[#allocation18_spill] sm:$0xff] %v14618_v13  ;;  %15495 = vst [vmem:[#allocation17_spill] sm:$0xff] %v14620_v8  ;;  %v5824_v42 = vpop.f32.mrb[93].mxu1  ;;  %v6742_v40 = vpop.f32.mrb[141].mxu0  ;;  %v7769_v33 = vrot.slane %v10533_v4, 7 }
 0x572   : > { %v7767_v16 = vrot.slane %v5824_v42, 7  ;;  %v10534_v41 = vpop.f32.mrb[94].mxu1  ;;  %v10726_v28 = vpop.f32.mrb[142].mxu0 }
 0x573   : > { %v7770_v20 = vrot.slane %v10534_v41, 7  ;;  %v5827_v46 = vpop.f32.mrb[95].mxu1  ;;  %v6745_v50 = vpop.f32.mrb[143].mxu0 }
 0x574   : > { %v7774_v27 = vsel %vm3551_vm0, %v7766_v36, %v7767_v16  ;;  %v7768_v2 = vrot.slane %v5827_v46, 7 }
 0x575   : > { %v14624_v52 = vadd.f32 %v7774_v27, %v6742_v40  ;;  %v7818_v60 = vsel %vm3551_vm0, %v7770_v20, %v15497_v63  ;;  %v7771_v23 = vsel %vm3551_vm0, %v7769_v33, %v7770_v20  ;;  %10880 = vmatmul.mubr.bf16.gmra.mrb[104].mxu1 %v14440_v35  ;;  %v11939_v40 = vld [vmem:[#allocation2 + $0x50] sm:$0xff]  ;;  %v11940_v20 = vld [vmem:[#allocation2 + $0x58] sm:$0xff]  ;;  %v11941_v35 = vld [vmem:[#allocation2 + $0x60] sm:$0xff] }
 0x576   : > { %v7819_v44 = vadd.f32 %v7818_v60, %v14421_v39  ;;  %v14634_v4 = vadd.f32 %v10726_v28, %v7771_v23  ;;  %v7772_v36 = vsel %vm3551_vm0, %v7768_v2, %v7769_v33  ;;  %v7773_v46 = vsel %vm3551_vm0, %v7767_v16, %v7768_v2  ;;  %10883 = vmatprep.mubr.bf16.mxu1 %v14453_v12  ;;  %v11942_v39 = vld [vmem:[#allocation2 + $0xa8] sm:$0xff]  ;;  %v11943_v12 = vld [vmem:[#allocation2 + $0xb0] sm:$0xff]  ;;  %v14662_v33 = vld [vmem:[%s15401_s6] ss:$0 sm:$0xff] }
 0x577   : > { %15496 = vst [vmem:[#allocation21_spill] sm:$0xff] %v14624_v52  ;;  %v14641_v18 = vadd.f32 %v10725_v53, %v7772_v36  ;;  %v14643_v42 = vadd.f32 %v7773_v46, %v6745_v50  ;;  %v11944_v53 = vld [vmem:[#allocation2 + $0xb8] sm:$0xff]  ;;  %v14674_v2 = vld [vmem:[%s15402_s7] ss:$0 sm:$0xff] }
 0x578   : > { %15498 = vst [vmem:[#allocation22_spill] sm:$0xff] %v14634_v4 }
 0x579   : > { %15499 = vst [vmem:[#allocation19_spill] sm:$0xff] %v14641_v18  ;;  %15500 = vst [vmem:[#allocation20_spill] sm:$0xff] %v14643_v42 }
 0x57d   : > { %10884 = vmatmul.mubr.bf16.gmra.mrb[108].mxu1 %v11939_v40 }
 0x57e   : > { %10887 = vmatprep.mubr.bf16.mxu1 %v11940_v20 }
 0x585   : > { %10888 = vmatmul.mubr.bf16.gmra.mrb[112].mxu1 %v11941_v35 }
 0x586   : > { %10891 = vmatprep.mubr.bf16.mxu1 %v14302_v31  ;;  %v11945_v31 = vld [vmem:[#allocation2 + $0xc0] sm:$0xff] }
 0x58d   : > { %10892 = vmatmul.mubr.bf16.gmra.mrb[116].mxu1 %v14306_v7  ;;  %v11946_v7 = vld [vmem:[#allocation2] sm:$0xff] }
 0x58e   : > { %10895 = vmatprep.mubr.bf16.mxu1 %v14310_v56 }
 0x595   : > { %10896 = vmatmul.mubr.bf16.gmra.mrb[120].mxu1 %v14314_v61 }
 0x596   : > { %10899 = vmatprep.mubr.bf16.mxu1 %v14318_v34 }
 0x59d   : > { %10900 = vmatmul.mubr.bf16.gmra.mrb[124].mxu1 %v14322_v37 }
 0x59e   : > { %10903 = vmatprep.mubr.bf16.mxu1 %v14326_v26 }
 0x5a5   : > { %10904 = vmatmul.mubr.bf16.gmra.mrb[128].mxu1 %v14330_v10 }
 0x5a6   : > { %10907 = vmatprep.mubr.bf16.mxu1 %v11942_v39 }
 0x5ad   : > { %10908 = vmatmul.mubr.bf16.gmra.mrb[132].mxu1 %v11943_v12 }
 0x5ae   : > { %10911 = vmatprep.mubr.bf16.mxu1 %v11944_v53 }
 0x5b5   : > { %10912 = vmatmul.mubr.bf16.gmra.mrb[136].mxu1 %v11945_v31 }
 0x5b6   : > { %10915 = vmatprep.mubr.bf16.mxu1 %v14342_v9 }
 0x5bd   : > { %10916 = vmatmul.mubr.bf16.gmra.mrb[140].mxu1 %v11946_v7 }
 0x638   : > { %v10873_v56 = vpop.f32.mrb[96].mxu1 }
 0x639   : > { %v14654_v61 = vpop.f32.mrb[97].mxu1  ;;  %v7869_v37 = vrot.slane %v10873_v56, 1 }
 0x63a   : > { %15501 = vst [vmem:[#allocation25_spill] sm:$0xff] %v14654_v61  ;;  %v10874_v34 = vpop.f32.mrb[98].mxu1  ;;  %v15416_v10 = vrot.slane %v14654_v61, 1 }
 0x63b   : > { %v7870_v26 = vrot.slane %v10874_v34, 1  ;;  %v7487_v16 = vpop.f32.mrb[99].mxu1 }
 0x63c   : > { %v7868_v41 = vrot.slane %v7487_v16, 1 }
 0x63d   : > { %v7959_v28 = vsel %vm3696_vm1, %v7869_v37, %v7870_v26 }
 0x63e   : > { %v7965_v9 = vadd.f32 %v7959_v28, %v14443_v29  ;;  %v7960_v50 = vsel %vm3696_vm1, %v7868_v41, %v7869_v37  ;;  %v7961_v27 = vsel %vm3696_vm1, %v15416_v10, %v7868_v41 }
 0x63f   : > { %v7963_v63 = vadd.f32 %v7961_v27, %v7819_v44  ;;  %v7964_v60 = vadd.f32 %v7960_v50, %v14445_v32 }
 0x640   : > { %v8020_v23 = vmul.f32 %v14662_v33, %v7965_v9  ;;  %v10877_v36 = vpop.f32.mrb[100].mxu1 }
 0x641   : > { %v8018_v29 = vmul.f32 %v14662_v33, %v7963_v63  ;;  %v8019_v46 = vmul.f32 %v14662_v33, %v7964_v60  ;;  %v7500_v40 = vpop.f32.mrb[101].mxu1  ;;  %v7873_v7 = vrot.slane %v10877_v36, 1 }
 0x642   : > { %v8075_v20 = vadd.f32 %v14674_v2, %v8020_v23  ;;  %v7871_v35 = vrot.slane %v7500_v40, 1  ;;  %v10878_v39 = vpop.f32.mrb[102].mxu1 }
 0x643   : > { %v8073_v12 = vadd.f32 %v14674_v2, %v8018_v29  ;;  %v14683_v53 = vadd.f32 %v14674_v2, %v8019_v46  ;;  %v7874_v44 = vrot.slane %v10878_v39, 1  ;;  %v7503_v31 = vpop.f32.mrb[103].mxu1 }
 0x644   : > { %v8171_v32 = vmul.f32 0.044715, %v8075_v20  ;;  %v7958_v56 = vsel %vm3696_vm1, %v7870_v26, %v7871_v35  ;;  %v7872_v34 = vrot.slane %v7503_v31, 1 }
 0x645   : > { %v8169_v37 = vmul.f32 0.044715, %v8073_v12  ;;  %v8170_v16 = vmul.f32 0.044715, %v14683_v53  ;;  %v7966_v28 = vadd.f32 %v7958_v56, %v14432_v14  ;;  %v7955_v9 = vsel %vm3696_vm1, %v7873_v7, %v7874_v44 }
 0x646   : > { %v8219_v41 = vmul.f32 %v8171_v32, %v8075_v20  ;;  %v7956_v50 = vsel %vm3696_vm1, %v7872_v34, %v7873_v7  ;;  %v7969_v60 = vadd.f32 %v7955_v9, %v14463_v22  ;;  %v7957_v26 = vsel %vm3696_vm1, %v7871_v35, %v7872_v34 }
 0x647   : > { %v8217_v27 = vmul.f32 %v8169_v37, %v8073_v12  ;;  %v8218_v63 = vmul.f32 %v8170_v16, %v14683_v53  ;;  %v8021_v36 = vmul.f32 %v14662_v33, %v7966_v28  ;;  %v7967_v29 = vadd.f32 %v7957_v26, %v14449_v25 }
 0x648   : > { %v8267_v23 = vmul.f32 %v8219_v41, %v8075_v20  ;;  %v7968_v14 = vadd.f32 %v7956_v50, %v14465_v3  ;;  %v10881_v46 = vpop.f32.mrb[104].mxu1  ;;  %v8024_v31 = vmul.f32 %v14662_v33, %v7969_v60 }
 0x649   : > { %v8265_v40 = vmul.f32 %v8217_v27, %v8073_v12  ;;  %v8266_v39 = vmul.f32 %v8218_v63, %v14683_v53  ;;  %v7516_v32 = vpop.f32.mrb[105].mxu1  ;;  %v8076_v22 = vadd.f32 %v14674_v2, %v8021_v36  ;;  %v8022_v56 = vmul.f32 %v14662_v33, %v7967_v29 }
 0x64a   : > { %v8315_v7 = vadd.f32 %v8267_v23, %v8075_v20  ;;  %v8023_v35 = vmul.f32 %v14662_v33, %v7968_v14  ;;  %v14705_v34 = vpop.f32.mrb[106].mxu1  ;;  %v8079_v3 = vadd.f32 %v14674_v2, %v8024_v31  ;;  %v7875_v50 = vrot.slane %v7516_v32, 1 }
 0x64b   : > { %v8313_v37 = vadd.f32 %v8265_v40, %v8073_v12  ;;  %v8314_v25 = vadd.f32 %v8266_v39, %v14683_v53  ;;  %v7519_v16 = vpop.f32.mrb[107].mxu1  ;;  %v8172_v28 = vmul.f32 0.044715, %v8076_v22  ;;  %v8077_v9 = vadd.f32 %v14674_v2, %v8022_v56 }
 0x64c   : > { %v8363_v41 = vmul.f32 0.7978846, %v8315_v7  ;;  %v14710_v27 = vmul.f32 0.5, %v8075_v20  ;;  %v8078_v60 = vadd.f32 %v14674_v2, %v8023_v35  ;;  %v8175_v36 = vmul.f32 0.044715, %v8079_v3 }
 0x64d   : > { %v8361_v63 = vmul.f32 0.7978846, %v8313_v37  ;;  %v8362_v26 = vmul.f32 0.7978846, %v8314_v25  ;;  %v8220_v23 = vmul.f32 %v8172_v28, %v8076_v22  ;;  %v14713_v29 = vmul.f32 0.5, %v8073_v12 }
 0x64e   : > { %11819 = vtanh.f32 %v8363_v41  ;;  %v8173_v14 = vmul.f32 0.044715, %v8077_v9  ;;  %v8174_v40 = vmul.f32 0.044715, %v8078_v60  ;;  %v8223_v31 = vmul.f32 %v8175_v36, %v8079_v3 }
 0x64f   : > { %11821 = vtanh.f32 %v8361_v63  ;;  %v8268_v39 = vmul.f32 %v8220_v23, %v8076_v22  ;;  %v7877_v7 = vrot.slane %v10881_v46, 1  ;;  %v7954_v32 = vsel %vm3696_vm1, %v7874_v44, %v7875_v50 }
 0x650   : > { %v14717_v20 = vpop.f32.mrb[108].mxu1  ;;  %v8221_v56 = vmul.f32 %v8173_v14, %v8077_v9  ;;  %v8222_v37 = vmul.f32 %v8174_v40, %v8078_v60  ;;  %v7970_v35 = vadd.f32 %v7954_v32, %v14456_v45  ;;  %v7878_v25 = vrot.slane %v14705_v34, 1 }
 0x651   : > { %v14721_v41 = vpop.f32.mrb[109].mxu1  ;;  %11823 = vtanh.f32 %v8362_v26  ;;  %v8316_v12 = vadd.f32 %v8268_v39, %v8076_v22  ;;  %v8271_v28 = vmul.f32 %v8223_v31, %v8079_v3  ;;  %v7876_v63 = vrot.slane %v7519_v16, 1 }
 0x652   : > { %v14723_v23 = vpop.f32.mrb[110].mxu1  ;;  %v8269_v46 = vmul.f32 %v8221_v56, %v8077_v9  ;;  %v8270_v36 = vmul.f32 %v8222_v37, %v8078_v60  ;;  %v8025_v44 = vmul.f32 %v14662_v33, %v7970_v35  ;;  %v7951_v14 = vsel %vm3696_vm1, %v7877_v7, %v7878_v25 }
 0x653   : > { %v14728_v40 = vpop.f32.mrb[111].mxu1  ;;  %v8364_v45 = vmul.f32 0.7978846, %v8316_v12  ;;  %v8319_v32 = vadd.f32 %v8271_v28, %v8079_v3  ;;  %v7973_v34 = vadd.f32 %v7951_v14, %v14481_v11  ;;  %v7952_v26 = vsel %vm3696_vm1, %v7876_v63, %v7877_v7 }
 0x654   : > { %v8317_v39 = vadd.f32 %v8269_v46, %v8077_v9  ;;  %v8318_v16 = vadd.f32 %v8270_v36, %v8078_v60  ;;  %v8080_v31 = vadd.f32 %v14674_v2, %v8025_v44  ;;  %v7953_v56 = vsel %vm3696_vm1, %v7875_v50, %v7876_v63 }
 0x655   : > { %v14737_v37 = vmul.f32 0.5, %v14683_v53  ;;  %11825 = vtanh.f32 %v8364_v45  ;;  %v8028_v35 = vmul.f32 %v14662_v33, %v7973_v34  ;;  %v7971_v12 = vadd.f32 %v7953_v56, %v14469_v15 }
 0x656   : > { %v8124_v28 = vmul.f32 0.5, %v8076_v22  ;;  %v8365_v11 = vmul.f32 0.7978846, %v8317_v39  ;;  %v8366_v14 = vmul.f32 0.7978846, %v8318_v16  ;;  %v7972_v7 = vadd.f32 %v7952_v26, %v14483_v62 }
 0x657   : > { %v14742_v36 = vmul.f32 0.5, %v8079_v3  ;;  %v8176_v44 = vmul.f32 0.044715, %v8080_v31  ;;  %v14745_v10 = vadd.f32 %v14674_v2, %v8028_v35  ;;  %v8026_v53 = vmul.f32 %v14662_v33, %v7971_v12 }
 0x658   : > { %v11820_v46 = vpop.eup %11819  ;;  %v14748_v50 = vpop.f32.mrb[112].mxu1  ;;  %v8367_v45 = vmul.f32 0.7978846, %v8319_v32  ;;  %11827 = vtanh.f32 %v8365_v11  ;;  %v8027_v15 = vmul.f32 %v14662_v33, %v7972_v7  ;;  %v8125_v3 = vmul.f32 0.5, %v8077_v9 }
 0x659   : > { %v11822_v63 = vpop.eup %11821  ;;  %v14752_v34 = vpop.f32.mrb[113].mxu1  ;;  %v8459_v62 = vadd.f32 1.0, %v11820_v46  ;;  %11829 = vtanh.f32 %v8366_v14  ;;  %v8224_v26 = vmul.f32 %v8176_v44, %v8080_v31  ;;  %v8126_v16 = vmul.f32 0.5, %v8078_v60 }
 0x65a   : > { %v14754_v39 = vpop.f32.mrb[114].mxu1  ;;  %v8179_v56 = vmul.f32 0.044715, %v14745_v10  ;;  %v14758_v35 = vadd.f32 %v14674_v2, %v8026_v53  ;;  %v7881_v32 = vrot.slane %v14717_v20, 1  ;;  %v8457_v7 = vadd.f32 1.0, %v11822_v63 }
 0x65b   : > { %v14761_v12 = vpop.f32.mrb[115].mxu1  ;;  %v11824_v11 = vpop.eup %11823  ;;  %v8272_v22 = vmul.f32 %v8224_v26, %v8080_v31  ;;  %v14764_v46 = vadd.f32 %v14674_v2, %v8027_v15  ;;  %v15502_v9 = vrot.slane %v14721_v41, 1  ;;  %11831 = vtanh.f32 %v8367_v45 }
 0x65c   : > { %v14770_v14 = vmul.f32 0.5, %v8080_v31  ;;  %v8227_v44 = vmul.f32 %v8179_v56, %v14745_v10  ;;  %v8177_v20 = vmul.f32 0.044715, %v14758_v35  ;;  %v14775_v53 = vmul.f32 %v8459_v62, %v14710_v27 }
 0x65d   : > { %v7950_v60 = vsel %vm3696_vm1, %v7878_v25, %v15502_v9  ;;  %v8320_v63 = vadd.f32 %v8272_v22, %v8080_v31  ;;  %v8178_v26 = vmul.f32 0.044715, %v14764_v46  ;;  %v8458_v42 = vadd.f32 1.0, %v11824_v11 }
 0x65e   : > { %v7974_v15 = vadd.f32 %v7950_v60, %v14474_v0  ;;  %v8275_v52 = vmul.f32 %v8227_v44, %v14745_v10  ;;  %v8225_v25 = vmul.f32 %v8177_v20, %v14758_v35  ;;  %v15417_v45 = vrot.slane %v14723_v23, 1 }
 0x65f   : > { %v11826_v9 = vpop.eup %11825  ;;  %v8505_v56 = vmul.f32 %v8457_v7, %v14713_v29  ;;  %v8368_v4 = vmul.f32 0.7978846, %v8320_v63  ;;  %v8226_v18 = vmul.f32 %v8178_v26, %v14764_v46 }
 0x660   : > { %v8029_v27 = vmul.f32 %v14662_v33, %v7974_v15  ;;  %v14785_v31 = vpop.f32.mrb[116].mxu1  ;;  %v8460_v22 = vadd.f32 1.0, %v11826_v9  ;;  %v8323_v0 = vadd.f32 %v8275_v52, %v14745_v10  ;;  %v8273_v62 = vmul.f32 %v8225_v25, %v14758_v35 }
 0x661   : > { %v7947_v11 = vsel %vm3696_vm1, %v7881_v32, %v15417_v45  ;;  %v14793_v60 = vpop.f32.mrb[117].mxu1  ;;  %11833 = vtanh.f32 %v8368_v4  ;;  %v8274_v29 = vmul.f32 %v8226_v18, %v14764_v46  ;;  %v7880_v25 = vrot.slane %v14728_v40, 1 }
 0x662   : > { %v14797_v7 = vadd.f32 %v14674_v2, %v8029_v27  ;;  %v7977_v44 = vadd.f32 %v7947_v11, %v14498_v57  ;;  %v14800_v20 = vpop.f32.mrb[118].mxu1  ;;  %v11828_v52 = vpop.eup %11827  ;;  %v8508_v63 = vmul.f32 %v8460_v22, %v8124_v28  ;;  %v8371_v26 = vmul.f32 0.7978846, %v8323_v0 }
 0x663   : > { %v8321_v15 = vadd.f32 %v8273_v62, %v14758_v35  ;;  %v14804_v9 = vpop.f32.mrb[119].mxu1  ;;  %v11830_v45 = vpop.eup %11829  ;;  %v8506_v4 = vmul.f32 %v8458_v42, %v14737_v37  ;;  %v8461_v18 = vadd.f32 1.0, %v11828_v52  ;;  %v8322_v27 = vadd.f32 %v8274_v29, %v14764_v46 }
 0x664   : > { %v8180_v61 = vmul.f32 0.044715, %v14797_v7  ;;  %v8553_v57 = vmax.f32 %v8505_v56, %v8508_v63  ;;  %v8462_v11 = vadd.f32 1.0, %v11830_v45  ;;  %11835 = vtanh.f32 %v8371_v26 }
 0x665   : > { %v7885_v28 = vrot.slane %v14748_v50, 1  ;;  %v8509_v22 = vmul.f32 %v8461_v18, %v8125_v3  ;;  %v8369_v0 = vmul.f32 0.7978846, %v8321_v15  ;;  %v8370_v62 = vmul.f32 0.7978846, %v8322_v27  ;;  %v11832_v8 = vpop.eup %11831 }
 0x666   : > { %v8228_v40 = vmul.f32 %v8180_v61, %v14797_v7  ;;  %8577 = vst [vmem:[#allocation3] sm:$0xff] %v8553_v57  ;;  %v8510_v13 = vmul.f32 %v8462_v11, %v8126_v16  ;;  %v8032_v42 = vmul.f32 %v14662_v33, %v7977_v44  ;;  %v7948_v37 = vsel %vm3696_vm1, %v7880_v25, %v7881_v32 }
 0x667   : > { %v15503_v29 = vrot.slane %v14721_v41, 1  ;;  %v8554_v56 = vmax.f32 %v8506_v4, %v8509_v22  ;;  %11837 = vtanh.f32 %v8369_v0  ;;  %v7976_v32 = vadd.f32 %v7948_v37, %v14500_v1 }
 0x668   : > { %v8276_v50 = vmul.f32 %v8228_v40, %v14797_v7  ;;  %v14820_v61 = vpop.f32.mrb[120].mxu1  ;;  %v8555_v16 = vmax.f32 %v14775_v53, %v8510_v13  ;;  %11839 = vtanh.f32 %v8370_v62  ;;  %v14824_v44 = vadd.f32 %v14674_v2, %v8032_v42 }
 0x669   : > { %v7949_v45 = vsel %vm3696_vm1, %v15503_v29, %v7880_v25  ;;  %v14827_v41 = vpop.f32.mrb[121].mxu1  ;;  %8578 = vst [vmem:[#allocation3 + $0x8] sm:$0xff] %v8554_v56  ;;  %v7883_v26 = vrot.slane %v14752_v34, 1  ;;  %v8131_v13 = vmul.f32 0.5, %v14745_v10  ;;  %v8031_v1 = vmul.f32 %v14662_v33, %v7976_v32 }
 0x66a   : > { %v7975_v3 = vadd.f32 %v7949_v45, %v14487_v47  ;;  %v8324_v52 = vadd.f32 %v8276_v50, %v14797_v7  ;;  %v7886_v47 = vrot.slane %v14754_v39, 1  ;;  %v14833_v15 = vpop.f32.mrb[122].mxu1  ;;  %8579 = vst [vmem:[#allocation3 + $0x10] sm:$0xff] %v8555_v16  ;;  %v8183_v53 = vmul.f32 0.044715, %v14824_v44 }
 0x66b   : > { %v7884_v25 = vrot.slane %v14761_v12, 1  ;;  %v14839_v4 = vpop.f32.mrb[123].mxu1  ;;  %v11834_v18 = vpop.eup %11833  ;;  %v15504_v57 = vrot.slane %v14723_v23, 1  ;;  %v14854_v0 = vadd.f32 %v14674_v2, %v8031_v1  ;;  %v8129_v40 = vmul.f32 0.5, %v14758_v35 }
 0x66c   : > { %v8030_v63 = vmul.f32 %v14662_v33, %v7975_v3  ;;  %v8372_v27 = vmul.f32 0.7978846, %v8324_v52  ;;  %v7943_v10 = vsel %vm3696_vm1, %v7885_v28, %v7886_v47  ;;  %v8464_v22 = vadd.f32 1.0, %v11834_v18 }
 0x66d   : > { %v7946_v11 = vsel %vm3696_vm1, %v15504_v57, %v7883_v26  ;;  %v8231_v12 = vmul.f32 %v8183_v53, %v14824_v44  ;;  %v7981_v42 = vadd.f32 %v7943_v10, %v14514_v5  ;;  %v8463_v29 = vadd.f32 1.0, %v11832_v8 }
 0x66e   : > { %v14842_v34 = vadd.f32 %v14674_v2, %v8030_v63  ;;  %v7978_v62 = vadd.f32 %v7946_v11, %v14492_v6  ;;  %11841 = vtanh.f32 %v8372_v27  ;;  %v11836_v37 = vpop.eup %11835  ;;  %v8512_v45 = vmul.f32 %v8464_v22, %v14770_v14 }
 0x66f   : > { %v8279_v56 = vmul.f32 %v8231_v12, %v14824_v44  ;;  %v8182_v50 = vmul.f32 0.044715, %v14854_v0  ;;  %v8467_v3 = vadd.f32 1.0, %v11836_v37  ;;  %v8036_v35 = vmul.f32 %v14662_v33, %v7981_v42 }
 0x670   : > { %v8181_v23 = vmul.f32 0.044715, %v14842_v34  ;;  %v8033_v6 = vmul.f32 %v14662_v33, %v7978_v62  ;;  %v14867_v32 = vpop.f32.mrb[124].mxu1  ;;  %v8602_v52 = vld [vmem:[#allocation3 + $0x1] ss:$2 sm:$0xff]  ;;  %v7944_v14 = vsel %vm3696_vm1, %v7884_v25, %v7885_v28  ;;  %v7945_v63 = vsel %vm3696_vm1, %v7883_v26, %v7884_v25 }
 0x671   : > { %v8327_v5 = vadd.f32 %v8279_v56, %v14824_v44  ;;  %v8230_v8 = vmul.f32 %v8182_v50, %v14854_v0  ;;  %v14875_v53 = vpop.f32.mrb[125].mxu1  ;;  %v11838_v1 = vpop.eup %11837  ;;  %v8618_v18 = vld [vmem:[#allocation3 + $0x2] ss:$2 sm:$0xff]  ;;  %v8515_v27 = vmul.f32 %v8467_v3, %v8131_v13  ;;  %v14887_v28 = vadd.f32 %v14674_v2, %v8036_v35 }
 0x672   : > { %v8229_v16 = vmul.f32 %v8181_v23, %v14842_v34  ;;  %v14884_v11 = vadd.f32 %v14674_v2, %v8033_v6  ;;  %v14889_v26 = vpop.f32.mrb[126].mxu1  ;;  %v11840_v25 = vpop.eup %11839  ;;  %v8633_v10 = vmax.f32 %v8602_v52, %v8618_v18  ;;  %v8465_v22 = vadd.f32 1.0, %v11838_v1 }
 0x673   : > { %v8375_v12 = vmul.f32 0.7978846, %v8327_v5  ;;  %v8278_v62 = vmul.f32 %v8230_v8, %v14854_v0  ;;  %v14892_v23 = vpop.f32.mrb[127].mxu1  ;;  %v8557_v13 = vmax.f32 %v8512_v45, %v8515_v27  ;;  %v8130_v42 = vmul.f32 0.5, %v14764_v46 }
 0x674   : > { %v8277_v57 = vmul.f32 %v8229_v16, %v14842_v34  ;;  %v8466_v37 = vadd.f32 1.0, %v11840_v25  ;;  %v8511_v50 = vmul.f32 %v8463_v29, %v14742_v36  ;;  %8641 = vst [vmem:[%s14880_s22] sm:$0xff] %v8633_v10  ;;  %v8132_v3 = vmul.f32 0.5, %v14797_v7 }
 0x675   : > { %v8326_v16 = vadd.f32 %v8278_v62, %v14854_v0  ;;  %v8184_v6 = vmul.f32 0.044715, %v14884_v11  ;;  %8581 = vst [vmem:[#allocation3 + $0x20] sm:$0xff] %v8557_v13  ;;  %v8513_v35 = vmul.f32 %v8465_v22, %v8129_v40  ;;  %v8187_v45 = vmul.f32 0.044715, %v14887_v28 }
 0x676   : > { %v8325_v56 = vadd.f32 %v8277_v57, %v14842_v34  ;;  %v8514_v52 = vmul.f32 %v8466_v37, %v8130_v42  ;;  %11843 = vtanh.f32 %v8375_v12  ;;  %v7979_v8 = vadd.f32 %v7945_v63, %v14504_v48 }
 0x677   : > { %v8232_v46 = vmul.f32 %v8184_v6, %v14884_v11  ;;  %v7980_v36 = vadd.f32 %v7944_v14, %v14516_v49  ;;  %v8374_v7 = vmul.f32 0.7978846, %v8326_v16  ;;  %v8235_v18 = vmul.f32 %v8187_v45, %v14887_v28 }
 0x678   : > { %v8373_v5 = vmul.f32 0.7978846, %v8325_v56  ;;  %v11842_v29 = vpop.eup %11841  ;;  %v8556_v1 = vmax.f32 %v8511_v50, %v8514_v52  ;;  %v14906_v27 = vpop.f32.mrb[128].mxu1  ;;  %v8034_v25 = vmul.f32 %v14662_v33, %v7979_v8  ;;  %v7889_v10 = vrot.slane %v14785_v31, 1 }
 0x679   : > { %v8468_v40 = vadd.f32 1.0, %v11842_v29  ;;  %v8280_v57 = vmul.f32 %v8232_v46, %v14884_v11  ;;  %v14911_v22 = vpop.f32.mrb[129].mxu1  ;;  %v8283_v48 = vmul.f32 %v8235_v18, %v14887_v28  ;;  %v8035_v49 = vmul.f32 %v14662_v33, %v7980_v36 }
 0x67a   : > { %11845 = vtanh.f32 %v8373_v5  ;;  %8580 = vst [vmem:[#allocation3 + $0x18] sm:$0xff] %v8556_v1  ;;  %v7887_v14 = vrot.slane %v14793_v60, 1  ;;  %v7890_v63 = vrot.slane %v14800_v20, 1  ;;  %v14917_v12 = vpop.f32.mrb[130].mxu1  ;;  %v8089_v42 = vadd.f32 %v14674_v2, %v8034_v25 }
 0x67b   : > { %v8516_v62 = vmul.f32 %v8468_v40, %v8132_v3  ;;  %v8328_v13 = vadd.f32 %v8280_v57, %v14884_v11  ;;  %v7888_v31 = vrot.slane %v14804_v9, 1  ;;  %v14922_v37 = vpop.f32.mrb[131].mxu1  ;;  %v8331_v56 = vadd.f32 %v8283_v48, %v14887_v28  ;;  %v15505_v48 = vld [vmem:[#allocation5_spill] sm:$0xff] }
 0x67c   : > { %v8090_v50 = vadd.f32 %v14674_v2, %v8035_v49  ;;  %v7942_v60 = vsel %vm3696_vm1, %v7886_v47, %v7887_v14  ;;  %v7939_v3 = vsel %vm3696_vm1, %v7889_v10, %v7890_v63  ;;  %11847 = vtanh.f32 %v8374_v7 }
 0x67d   : > { %v8558_v16 = vmax.f32 %v8513_v35, %v8516_v62  ;;  %v8376_v6 = vmul.f32 0.7978846, %v8328_v13  ;;  %v8185_v9 = vmul.f32 0.044715, %v8089_v42  ;;  %v8135_v52 = vmul.f32 0.5, %v14824_v44 }
 0x67e   : > { %v14936_v5 = vmul.f32 0.5, %v14842_v34  ;;  %v8186_v45 = vmul.f32 0.044715, %v8090_v50  ;;  %v7982_v39 = vadd.f32 %v7942_v60, %v14508_v38  ;;  %v7985_v46 = vadd.f32 %v7939_v3, %v14530_v17 }
 0x67f   : > { %8582 = vst [vmem:[#allocation3 + $0x28] sm:$0xff] %v8558_v16  ;;  %11849 = vtanh.f32 %v8376_v6  ;;  %v8233_v47 = vmul.f32 %v8185_v9, %v8089_v42  ;;  %v7940_v8 = vsel %vm3696_vm1, %v7888_v31, %v7889_v10  ;;  %v14943_v35 = vmul.f32 0.5, %v14854_v0 }
 0x680   : > { %v8379_v36 = vmul.f32 0.7978846, %v8331_v56  ;;  %v8234_v29 = vmul.f32 %v8186_v45, %v8090_v50  ;;  %v8037_v44 = vmul.f32 %v14662_v33, %v7982_v39  ;;  %v14946_v34 = vpop.f32.mrb[132].mxu1  ;;  %v11844_v1 = vpop.eup %11843  ;;  %v8040_v38 = vmul.f32 %v14662_v33, %v7985_v46 }
 0x681   : > { %v8281_v7 = vmul.f32 %v8233_v47, %v8089_v42  ;;  %v7941_v18 = vsel %vm3696_vm1, %v7887_v14, %v7888_v31  ;;  %v7984_v17 = vadd.f32 %v7940_v8, %v14532_v30  ;;  %v14952_v40 = vpop.f32.mrb[133].mxu1  ;;  %v8136_v0 = vmul.f32 0.5, %v14884_v11  ;;  %v8604_v6 = vld [vmem:[#allocation3 + $0x19] ss:$2 sm:$0xff] }
 0x682   : > { %v8282_v25 = vmul.f32 %v8234_v29, %v8090_v50  ;;  %v14956_v10 = vadd.f32 %v14674_v2, %v8037_v44  ;;  %v7983_v49 = vadd.f32 %v7941_v18, %v15505_v48  ;;  %v14959_v62 = vpop.f32.mrb[134].mxu1  ;;  %v14962_v13 = vmul.f32 0.5, %v14887_v28 }
 0x683   : > { %v8329_v56 = vadd.f32 %v8281_v7, %v8089_v42  ;;  %v14965_v14 = vadd.f32 %v14674_v2, %v8040_v38  ;;  %v8039_v30 = vmul.f32 %v14662_v33, %v7984_v17  ;;  %v14968_v31 = vpop.f32.mrb[135].mxu1  ;;  %v8471_v11 = vadd.f32 1.0, %v11844_v1 }
 0x684   : > { %v11846_v57 = vpop.eup %11845  ;;  %v14970_v60 = vmul.f32 0.5, %v8089_v42  ;;  %v8330_v3 = vadd.f32 %v8282_v25, %v8090_v50  ;;  %v8188_v16 = vmul.f32 0.044715, %v14956_v10  ;;  %11851 = vtanh.f32 %v8379_v36 }
 0x685   : > { %v8377_v9 = vmul.f32 0.7978846, %v8329_v56  ;;  %v8191_v28 = vmul.f32 0.044715, %v14965_v14  ;;  %v8469_v39 = vadd.f32 1.0, %v11846_v57  ;;  %v8038_v8 = vmul.f32 %v14662_v33, %v7983_v49 }
 0x686   : > { %v8620_v45 = vld [vmem:[#allocation3 + $0x1a] ss:$2 sm:$0xff]  ;;  %v8378_v47 = vmul.f32 0.7978846, %v8330_v3  ;;  %v8236_v46 = vmul.f32 %v8188_v16, %v14956_v10  ;;  %v11848_v29 = vpop.eup %11847  ;;  %v14978_v1 = vadd.f32 %v14674_v2, %v8039_v30  ;;  %v14980_v36 = vmul.f32 0.5, %v8090_v50 }
 0x687   : > { %v8634_v44 = vmax.f32 %v8604_v6, %v8620_v45  ;;  %11853 = vtanh.f32 %v8377_v9  ;;  %v8239_v42 = vmul.f32 %v8191_v28, %v14965_v14  ;;  %v14984_v38 = vadd.f32 %v14674_v2, %v8038_v8  ;;  %v15506_v8 = vld [vmem:[#allocation6_spill] sm:$0xff] }
 0x688   : > { %11855 = vtanh.f32 %v8378_v47  ;;  %v8284_v7 = vmul.f32 %v8236_v46, %v14956_v10  ;;  %v14986_v18 = vpop.f32.mrb[136].mxu1  ;;  %v14989_v57 = vmul.f32 %v8471_v11, %v8135_v52  ;;  %v8190_v48 = vmul.f32 0.044715, %v14978_v1 }
 0x689   : > { %v11850_v17 = vpop.eup %11849  ;;  %8642 = vst [vmem:[%s14880_s22 + $0x8] sm:$0xff] %v8634_v44  ;;  %v8287_v25 = vmul.f32 %v8239_v42, %v14965_v14  ;;  %v7891_v49 = vrot.slane %v14827_v41, 1  ;;  %v14994_v50 = vpop.f32.mrb[137].mxu1  ;;  %v8470_v56 = vadd.f32 1.0, %v11848_v29  ;;  %v8189_v16 = vmul.f32 0.044715, %v14984_v38 }
 0x68a   : > { %v8472_v30 = vadd.f32 1.0, %v11850_v17  ;;  %v8332_v3 = vadd.f32 %v8284_v7, %v14956_v10  ;;  %v14998_v6 = vpop.f32.mrb[138].mxu1  ;;  %v8517_v9 = vmul.f32 %v8469_v39, %v14936_v5  ;;  %v8238_v11 = vmul.f32 %v8190_v48, %v14978_v1 }
 0x68b   : > { %v8335_v52 = vadd.f32 %v8287_v25, %v14965_v14  ;;  %v7938_v41 = vsel %vm3696_vm1, %v7890_v63, %v7891_v49  ;;  %v15007_v28 = vpop.f32.mrb[139].mxu1  ;;  %v8237_v46 = vmul.f32 %v8189_v16, %v14984_v38  ;;  %v7893_v39 = vrot.slane %v14820_v61, 1 }
 0x68c   : > { %v8520_v45 = vmul.f32 %v8472_v30, %v8136_v0  ;;  %v8380_v47 = vmul.f32 0.7978846, %v8332_v3  ;;  %v7986_v29 = vadd.f32 %v7938_v41, %v15506_v8  ;;  %v8286_v5 = vmul.f32 %v8238_v11, %v14978_v1 }
 0x68d   : > { %v8383_v44 = vmul.f32 0.7978846, %v8335_v52  ;;  %v7894_v42 = vrot.slane %v14833_v15, 1  ;;  %v8285_v20 = vmul.f32 %v8237_v46, %v14984_v38  ;;  %v7892_v48 = vrot.slane %v14839_v4, 1 }
 0x68e   : > { %v8559_v7 = vmax.f32 %v8517_v9, %v8520_v45  ;;  %11857 = vtanh.f32 %v8380_v47  ;;  %v8041_v63 = vmul.f32 %v14662_v33, %v7986_v29  ;;  %v11852_v17 = vpop.eup %11851  ;;  %v8334_v0 = vadd.f32 %v8286_v5, %v14978_v1  ;;  %v15507_v5 = vld [vmem:[#allocation7_spill] sm:$0xff] }
 0x68f   : > { %11859 = vtanh.f32 %v8383_v44  ;;  %v7935_v25 = vsel %vm3696_vm1, %v7893_v39, %v7894_v42  ;;  %v8140_v61 = vmul.f32 0.5, %v14956_v10  ;;  %v8333_v15 = vadd.f32 %v8285_v20, %v14984_v38 }
 0x690   : > { %8583 = vst [vmem:[#allocation3 + $0x30] sm:$0xff] %v8559_v7  ;;  %v15023_v30 = vadd.f32 %v14674_v2, %v8041_v63  ;;  %v7989_v3 = vadd.f32 %v7935_v25, %v14546_v19  ;;  %v15026_v16 = vpop.f32.mrb[140].mxu1  ;;  %v8382_v52 = vmul.f32 0.7978846, %v8334_v0  ;;  %v7936_v11 = vsel %vm3696_vm1, %v7892_v48, %v7893_v39 }
 0x691   : > { %v11854_v9 = vpop.eup %11853  ;;  %v7937_v4 = vsel %vm3696_vm1, %v7891_v49, %v7892_v48  ;;  %v7895_v41 = vrot.slane %v14875_v53, 1  ;;  %v15033_v10 = vpop.f32.mrb[141].mxu1  ;;  %v8518_v47 = vmul.f32 %v8470_v56, %v14943_v35  ;;  %v8381_v8 = vmul.f32 0.7978846, %v8333_v15 }
 0x692   : > { %v11856_v45 = vpop.eup %11855  ;;  %v8473_v46 = vadd.f32 1.0, %v11854_v9  ;;  %v8192_v19 = vmul.f32 0.044715, %v15023_v30  ;;  %11861 = vtanh.f32 %v8382_v52  ;;  %v8044_v44 = vmul.f32 %v14662_v33, %v7989_v3  ;;  %v15039_v7 = vpop.f32.mrb[142].mxu1 }
 0x693   : > { %v8474_v29 = vadd.f32 1.0, %v11856_v45  ;;  %v7987_v39 = vadd.f32 %v7937_v4, %v15507_v5  ;;  %11863 = vtanh.f32 %v8381_v8  ;;  %v7988_v63 = vadd.f32 %v7936_v11, %v14548_v21  ;;  %v15044_v35 = vpop.f32.mrb[143].mxu1  ;;  %v15508_v21 = vld [vmem:[#allocation8_spill] sm:$0xff] }
 0x694   : > { %v8521_v49 = vmul.f32 %v8473_v46, %v14970_v60  ;;  %v8240_v20 = vmul.f32 %v8192_v19, %v15023_v30  ;;  %v15048_v0 = vadd.f32 %v14674_v2, %v8044_v44  ;;  %v7934_v48 = vsel %vm3696_vm1, %v7894_v42, %v7895_v41 }
 0x695   : > { %v8522_v56 = vmul.f32 %v8474_v29, %v14980_v36  ;;  %v8042_v25 = vmul.f32 %v14662_v33, %v7987_v39  ;;  %v8043_v3 = vmul.f32 %v14662_v33, %v7988_v63  ;;  %v7990_v9 = vadd.f32 %v7934_v48, %v15508_v21 }
 0x696   : > { %v8560_v60 = vmax.f32 %v8518_v47, %v8521_v49  ;;  %v8288_v15 = vmul.f32 %v8240_v20, %v15023_v30  ;;  %v8143_v36 = vmul.f32 0.5, %v14965_v14  ;;  %v8195_v11 = vmul.f32 0.044715, %v15048_v0 }
 0x697   : > { %v8561_v52 = vmax.f32 %v14989_v57, %v8522_v56  ;;  %v15062_v4 = vadd.f32 %v14674_v2, %v8042_v25  ;;  %v15066_v47 = vadd.f32 %v14674_v2, %v8043_v3  ;;  %v8045_v46 = vmul.f32 %v14662_v33, %v7990_v9 }
 0x698   : > { %v11858_v45 = vpop.eup %11857  ;;  %8584 = vst [vmem:[#allocation3 + $0x38] sm:$0xff] %v8560_v60  ;;  %v8336_v42 = vadd.f32 %v8288_v15, %v15023_v30  ;;  %v7898_v8 = vrot.slane %v14889_v26, 1  ;;  %v8475_v57 = vadd.f32 1.0, %v11852_v17  ;;  %v8243_v29 = vmul.f32 %v8195_v11, %v15048_v0 }
 0x699   : > { %v11860_v19 = vpop.eup %11859  ;;  %8585 = vst [vmem:[#allocation3 + $0x40] sm:$0xff] %v8561_v52  ;;  %v8476_v14 = vadd.f32 1.0, %v11858_v45  ;;  %v8193_v44 = vmul.f32 0.044715, %v15062_v4  ;;  %v8194_v49 = vmul.f32 0.044715, %v15066_v47  ;;  %v15077_v48 = vadd.f32 %v14674_v2, %v8045_v46 }
 0x69a   : > { %v8479_v5 = vadd.f32 1.0, %v11860_v19  ;;  %v8384_v39 = vmul.f32 0.7978846, %v8336_v42  ;;  %v7897_v20 = vrot.slane %v14867_v32, 1  ;;  %v8291_v56 = vmul.f32 %v8243_v29, %v15048_v0 }
 0x69b   : > { %v8524_v63 = vmul.f32 %v8476_v14, %v8140_v61  ;;  %v8241_v25 = vmul.f32 %v8193_v44, %v15062_v4  ;;  %v8242_v60 = vmul.f32 %v8194_v49, %v15066_v47  ;;  %v8523_v32 = vmul.f32 %v8475_v57, %v14962_v13 }
 0x69c   : > { %v8527_v17 = vmul.f32 %v8479_v5, %v8143_v36  ;;  %11865 = vtanh.f32 %v8384_v39  ;;  %v7931_v15 = vsel %vm3696_vm1, %v7897_v20, %v7898_v8  ;;  %v11862_v3 = vpop.eup %11861  ;;  %v8142_v61 = vmul.f32 0.5, %v14978_v1 }
 0x69d   : > { %v8289_v21 = vmul.f32 %v8241_v25, %v15062_v4  ;;  %v8196_v9 = vmul.f32 0.044715, %v15077_v48  ;;  %v11864_v52 = vpop.eup %11863  ;;  %v8478_v36 = vadd.f32 1.0, %v11862_v3  ;;  %v8290_v45 = vmul.f32 %v8242_v60, %v15066_v47 }
 0x69e   : > { %v8563_v11 = vmax.f32 %v8524_v63, %v8527_v17  ;;  %v7993_v42 = vadd.f32 %v7931_v15, %v14564_v58  ;;  %v8477_v19 = vadd.f32 1.0, %v11864_v52  ;;  %v8339_v14 = vadd.f32 %v8291_v56, %v15048_v0 }
 0x69f   : > { %v8606_v46 = vld [vmem:[#allocation3 + $0x31] ss:$2 sm:$0xff]  ;;  %v8337_v13 = vadd.f32 %v8289_v21, %v15062_v4  ;;  %v8244_v1 = vmul.f32 %v8196_v9, %v15077_v48  ;;  %v8526_v29 = vmul.f32 %v8478_v36, %v8142_v61  ;;  %v8338_v44 = vadd.f32 %v8290_v45, %v15066_v47  ;;  %v15509_v21 = vld [vmem:[#allocation9_spill] sm:$0xff] }
 0x6a0   : > { %v8622_v57 = vld [vmem:[#allocation3 + $0x32] ss:$2 sm:$0xff]  ;;  %8587 = vst [vmem:[#allocation3 + $0x50] sm:$0xff] %v8563_v11  ;;  %v8048_v5 = vmul.f32 %v14662_v33, %v7993_v42  ;;  %v7896_v39 = vrot.slane %v14892_v23, 1  ;;  %v8141_v58 = vmul.f32 0.5, %v14984_v38  ;;  %v8144_v56 = vmul.f32 0.5, %v15023_v30 }
 0x6a1   : > { %v8635_v49 = vmax.f32 %v8606_v46, %v8622_v57  ;;  %v8385_v63 = vmul.f32 0.7978846, %v8337_v13  ;;  %v8562_v25 = vmax.f32 %v8523_v32, %v8526_v29  ;;  %v8292_v17 = vmul.f32 %v8244_v1, %v15077_v48  ;;  %v15510_v13 = vld [vmem:[#allocation10_spill] sm:$0xff] }
 0x6a2   : > { %v15100_v60 = vadd.f32 %v14674_v2, %v8048_v5  ;;  %v8387_v15 = vmul.f32 0.7978846, %v8339_v14  ;;  %v7932_v3 = vsel %vm3696_vm1, %v7896_v39, %v7897_v20  ;;  %v7933_v23 = vsel %vm3696_vm1, %v7895_v41, %v7896_v39 }
 0x6a3   : > { %8643 = vst [vmem:[%s14880_s22 + $0x10] sm:$0xff] %v8635_v49  ;;  %11867 = vtanh.f32 %v8385_v63  ;;  %v8525_v38 = vmul.f32 %v8477_v19, %v8141_v58  ;;  %8586 = vst [vmem:[#allocation3 + $0x48] sm:$0xff] %v8562_v25  ;;  %v8386_v32 = vmul.f32 0.7978846, %v8338_v44  ;;  %v8340_v30 = vadd.f32 %v8292_v17, %v15077_v48 }
 0x6a4   : > { %v8199_v61 = vmul.f32 0.044715, %v15100_v60  ;;  %v7991_v9 = vadd.f32 %v7933_v23, %v15509_v21  ;;  %v7992_v52 = vadd.f32 %v7932_v3, %v14566_v43  ;;  %v7899_v11 = vrot.slane %v14911_v22, 1  ;;  %v15511_v3 = vld [vmem:[#allocation11_spill] sm:$0xff] }
 0x6a5   : > { %v7902_v20 = vrot.slane %v14917_v12, 1  ;;  %v8388_v53 = vmul.f32 0.7978846, %v8340_v30  ;;  %v7901_v41 = vrot.slane %v14906_v27, 1  ;;  %v7900_v42 = vrot.slane %v14922_v37, 1 }
 0x6a6   : > { %v11866_v36 = vpop.eup %11865  ;;  %v8247_v45 = vmul.f32 %v8199_v61, %v15100_v60  ;;  %v8046_v19 = vmul.f32 %v14662_v33, %v7991_v9  ;;  %v8047_v14 = vmul.f32 %v14662_v33, %v7992_v52  ;;  %v7930_v43 = vsel %vm3696_vm1, %v7898_v8, %v7899_v11 }
 0x6a7   : > { %v8480_v46 = vadd.f32 1.0, %v11866_v36  ;;  %11869 = vtanh.f32 %v8388_v53  ;;  %v7994_v1 = vadd.f32 %v7930_v43, %v15510_v13  ;;  %v7927_v27 = vsel %vm3696_vm1, %v7901_v41, %v7902_v20 }
 0x6a8   : > { %v8295_v22 = vmul.f32 %v8247_v45, %v15100_v60  ;;  %v15131_v57 = vadd.f32 %v14674_v2, %v8046_v19  ;;  %v15134_v29 = vadd.f32 %v14674_v2, %v8047_v14  ;;  %v7997_v26 = vadd.f32 %v7927_v27, %v14582_v51 }
 0x6a9   : > { %v8528_v37 = vmul.f32 %v8480_v46, %v8144_v56  ;;  %v8049_v44 = vmul.f32 %v14662_v33, %v7994_v1  ;;  %v7928_v5 = vsel %vm3696_vm1, %v7900_v42, %v7901_v41  ;;  %v7929_v39 = vsel %vm3696_vm1, %v7899_v11, %v7900_v42  ;;  %v15152_v33 = vld [vmem:[%s15401_s6] ss:$0 sm:$0xff] }
 0x6aa   : > { %v8343_v8 = vadd.f32 %v8295_v22, %v15100_v60  ;;  %v8197_v58 = vmul.f32 0.044715, %v15131_v57  ;;  %11871 = vtanh.f32 %v8387_v15  ;;  %v8198_v63 = vmul.f32 0.044715, %v15134_v29  ;;  %v8608_v14 = vld [vmem:[#allocation3 + $0x49] ss:$2 sm:$0xff] }
 0x6ab   : > { %v8564_v49 = vmax.f32 %v8525_v38, %v8528_v37  ;;  %v15146_v25 = vadd.f32 %v14674_v2, %v8049_v44  ;;  %v8052_v17 = vmul.f32 %v15152_v33, %v7997_v26  ;;  %v7995_v23 = vadd.f32 %v7929_v39, %v15511_v3 }
 0x6ac   : > { %v8245_v56 = vmul.f32 %v8197_v58, %v15131_v57  ;;  %v7996_v15 = vadd.f32 %v7928_v5, %v14584_v54  ;;  %v15158_v38 = vmul.f32 0.5, %v15048_v0  ;;  %11873 = vtanh.f32 %v8386_v32  ;;  %v15171_v54 = vld [vmem:[%s15402_s7] ss:$0 sm:$0xff] }
 0x6ad   : > { %v11868_v51 = vpop.eup %11867  ;;  %8588 = vst [vmem:[#allocation3 + $0x58] sm:$0xff] %v8564_v49  ;;  %v8391_v2 = vmul.f32 0.7978846, %v8343_v8  ;;  %v8246_v30 = vmul.f32 %v8198_v63, %v15134_v29  ;;  %v8145_v61 = vmul.f32 0.5, %v15062_v4  ;;  %v15163_v21 = vmul.f32 0.5, %v15066_v47 }
 0x6ae   : > { %v8293_v9 = vmul.f32 %v8245_v56, %v15131_v57  ;;  %v8200_v52 = vmul.f32 0.044715, %v15146_v25  ;;  %v8481_v11 = vadd.f32 1.0, %v11868_v51  ;;  %v15174_v0 = vadd.f32 %v15171_v54, %v8052_v17 }
 0x6af   : > { %v8294_v36 = vmul.f32 %v8246_v30, %v15134_v29  ;;  %v8050_v4 = vmul.f32 %v15152_v33, %v7995_v23  ;;  %v8148_v47 = vmul.f32 0.5, %v15077_v48  ;;  %v8051_v45 = vmul.f32 %v15152_v33, %v7996_v15  ;;  %v15512_v30 = vld [vmem:[#allocation14_spill] sm:$0xff] }
 0x6b0   : > { %v8341_v32 = vadd.f32 %v8293_v9, %v15131_v57  ;;  %v8248_v53 = vmul.f32 %v8200_v52, %v15146_v25  ;;  %11875 = vtanh.f32 %v8391_v2  ;;  %v8203_v46 = vmul.f32 0.044715, %v15174_v0 }
 0x6b1   : > { %v11870_v41 = vpop.eup %11869  ;;  %v8342_v42 = vadd.f32 %v8294_v36, %v15134_v29  ;;  %v15184_v19 = vadd.f32 %v15171_v54, %v8050_v4  ;;  %v15188_v13 = vadd.f32 %v15171_v54, %v8051_v45  ;;  %v8529_v27 = vmul.f32 %v8481_v11, %v8145_v61 }
 0x6b2   : > { %v8484_v43 = vadd.f32 1.0, %v11870_v41  ;;  %v8389_v22 = vmul.f32 0.7978846, %v8341_v32  ;;  %v8296_v48 = vmul.f32 %v8248_v53, %v15146_v25  ;;  %v8251_v26 = vmul.f32 %v8203_v46, %v15174_v0 }
 0x6b3   : > { %v8390_v37 = vmul.f32 0.7978846, %v8342_v42  ;;  %v7903_v8 = vrot.slane %v14952_v40, 1  ;;  %v8201_v63 = vmul.f32 0.044715, %v15184_v19  ;;  %v7905_v51 = vrot.slane %v14946_v34, 1 }
 0x6b4   : > { %v8624_v1 = vld [vmem:[#allocation3 + $0x4a] ss:$2 sm:$0xff]  ;;  %v8532_v5 = vmul.f32 %v8484_v43, %v8148_v47  ;;  %11877 = vtanh.f32 %v8389_v22  ;;  %v8344_v39 = vadd.f32 %v8296_v48, %v15146_v25  ;;  %v11872_v49 = vpop.eup %11871  ;;  %v8299_v58 = vmul.f32 %v8251_v26, %v15174_v0  ;;  %v15513_v43 = vld [vmem:[#allocation12_spill] sm:$0xff] }
 0x6b5   : > { %v8636_v44 = vmax.f32 %v8608_v14, %v8624_v1  ;;  %11879 = vtanh.f32 %v8390_v37  ;;  %v8202_v3 = vmul.f32 0.044715, %v15188_v13  ;;  %v7926_v40 = vsel %vm3696_vm1, %v7902_v20, %v7903_v8 }
 0x6b6   : > { %v8565_v56 = vmax.f32 %v8529_v27, %v8532_v5  ;;  %v8392_v17 = vmul.f32 0.7978846, %v8344_v39  ;;  %v11874_v23 = vpop.eup %11873  ;;  %v8347_v15 = vadd.f32 %v8299_v58, %v15174_v0  ;;  %v8249_v2 = vmul.f32 %v8201_v63, %v15184_v19 }
 0x6b7   : > { %8644 = vst [vmem:[%s14880_s22 + $0x18] sm:$0xff] %v8636_v44  ;;  %v7998_v61 = vadd.f32 %v7926_v40, %v15512_v30  ;;  %v7906_v9 = vrot.slane %v14959_v62, 1  ;;  %v8483_v34 = vadd.f32 1.0, %v11872_v49  ;;  %v8250_v52 = vmul.f32 %v8202_v3, %v15188_v13 }
 0x6b8   : > { %8589 = vst [vmem:[#allocation3 + $0x60] sm:$0xff] %v8565_v56  ;;  %11881 = vtanh.f32 %v8392_v17  ;;  %v7904_v11 = vrot.slane %v14968_v31, 1  ;;  %v8395_v12 = vmul.f32 0.7978846, %v8347_v15  ;;  %v8297_v36 = vmul.f32 %v8249_v2, %v15184_v19 }
 0x6b9   : > { %v8053_v20 = vmul.f32 %v15152_v33, %v7998_v61  ;;  %v7923_v4 = vsel %vm3696_vm1, %v7905_v51, %v7906_v9  ;;  %v8482_v47 = vadd.f32 1.0, %v11874_v23  ;;  %v8298_v32 = vmul.f32 %v8250_v52, %v15188_v13 }
 0x6ba   : > { %v8001_v62 = vadd.f32 %v7923_v4, %v14600_v55  ;;  %v7924_v53 = vsel %vm3696_vm1, %v7904_v11, %v7905_v51  ;;  %v11876_v45 = vpop.eup %11875  ;;  %11883 = vtanh.f32 %v8395_v12  ;;  %v8345_v31 = vadd.f32 %v8297_v36, %v15184_v19 }
 0x6bb   : > { %v15218_v41 = vadd.f32 %v15171_v54, %v8053_v20  ;;  %v7925_v42 = vsel %vm3696_vm1, %v7903_v8, %v7904_v11  ;;  %v8346_v46 = vadd.f32 %v8298_v32, %v15188_v13  ;;  %v8000_v55 = vadd.f32 %v7924_v53, %v14602_v59 }
 0x6bc   : > { %v8056_v14 = vmul.f32 %v15152_v33, %v8001_v62  ;;  %v7999_v22 = vadd.f32 %v7925_v42, %v15513_v43  ;;  %v8531_v48 = vmul.f32 %v8483_v34, %v15158_v38  ;;  %v8149_v1 = vmul.f32 0.5, %v15131_v57 }
 0x6bd   : > { %v8150_v27 = vmul.f32 0.5, %v15134_v29  ;;  %v8204_v37 = vmul.f32 0.044715, %v15218_v41  ;;  %v8394_v44 = vmul.f32 0.7978846, %v8346_v46  ;;  %v8055_v39 = vmul.f32 %v15152_v33, %v8000_v55  ;;  %v15515_v46 = vld [vmem:[#allocation18_spill] sm:$0xff] }
 0x6be   : > { %v11878_v26 = vpop.eup %11877  ;;  %v15231_v8 = vadd.f32 %v15171_v54, %v8056_v14  ;;  %v8054_v5 = vmul.f32 %v15152_v33, %v7999_v22  ;;  %v8393_v59 = vmul.f32 0.7978846, %v8345_v31  ;;  %v7907_v57 = vrot.slane %v14994_v50, 1 }
 0x6bf   : > { %v11880_v49 = vpop.eup %11879  ;;  %v8485_v58 = vadd.f32 1.0, %v11878_v26  ;;  %v8252_v38 = vmul.f32 %v8204_v37, %v15218_v41  ;;  %v8530_v29 = vmul.f32 %v8482_v47, %v15163_v21  ;;  %11885 = vtanh.f32 %v8394_v44  ;;  %v15514_v47 = vld [vmem:[#allocation15_spill] sm:$0xff] }
 0x6c0   : > { %v8486_v63 = vadd.f32 1.0, %v11880_v49  ;;  %v8207_v51 = vmul.f32 0.044715, %v15231_v8  ;;  %v15241_v3 = vadd.f32 %v15171_v54, %v8054_v5  ;;  %v15244_v40 = vadd.f32 %v15171_v54, %v8055_v39 }
 0x6c1   : > { %v8533_v56 = vmul.f32 %v8485_v58, %v8149_v1  ;;  %v8300_v17 = vmul.f32 %v8252_v38, %v15218_v41  ;;  %v8152_v2 = vmul.f32 0.5, %v15146_v25  ;;  %v7922_v50 = vsel %vm3696_vm1, %v7906_v9, %v7907_v57 }
 0x6c2   : > { %v11882_v23 = vpop.eup %11881  ;;  %v8534_v15 = vmul.f32 %v8486_v63, %v8150_v27  ;;  %v7910_v21 = vrot.slane %v14998_v6, 1  ;;  %11887 = vtanh.f32 %v8393_v59  ;;  %v8155_v11 = vmul.f32 0.5, %v15174_v0 }
 0x6c3   : > { %v8566_v30 = vmax.f32 %v8530_v29, %v8533_v56  ;;  %v8488_v61 = vadd.f32 1.0, %v11882_v23  ;;  %v8348_v34 = vadd.f32 %v8300_v17, %v15218_v41  ;;  %v8205_v12 = vmul.f32 0.044715, %v15241_v3 }
 0x6c4   : > { %v8567_v52 = vmax.f32 %v8531_v48, %v8534_v15  ;;  %v7909_v36 = vrot.slane %v14986_v18, 1  ;;  %v11884_v20 = vpop.eup %11883  ;;  %v8255_v4 = vmul.f32 %v8207_v51, %v15231_v8  ;;  %v8206_v9 = vmul.f32 0.044715, %v15244_v40 }
 0x6c5   : > { %8590 = vst [vmem:[#allocation3 + $0x68] sm:$0xff] %v8566_v30  ;;  %v8396_v25 = vmul.f32 0.7978846, %v8348_v34  ;;  %v8002_v32 = vadd.f32 %v7922_v50, %v15514_v47  ;;  %v8536_v62 = vmul.f32 %v8488_v61, %v8152_v2  ;;  %v8491_v53 = vadd.f32 1.0, %v11884_v20  ;;  %v15516_v61 = vld [vmem:[#allocation13_spill] sm:$0xff] }
 0x6c6   : > { %8591 = vst [vmem:[#allocation3 + $0x70] sm:$0xff] %v8567_v52  ;;  %v8253_v31 = vmul.f32 %v8205_v12, %v15241_v3  ;;  %v7919_v0 = vsel %vm3696_vm1, %v7909_v36, %v7910_v21  ;;  %v8487_v18 = vadd.f32 1.0, %v11876_v45  ;;  %v8254_v22 = vmul.f32 %v8206_v9, %v15244_v40  ;;  %v15517_v12 = vld [vmem:[#allocation17_spill] sm:$0xff] }
 0x6c7   : > { %11889 = vtanh.f32 %v8396_v25  ;;  %v8057_v42 = vmul.f32 %v15152_v33, %v8002_v32  ;;  %v8005_v14 = vadd.f32 %v7919_v0, %v15515_v46  ;;  %v8539_v43 = vmul.f32 %v8491_v53, %v8155_v11  ;;  %v15518_v53 = vld [vmem:[#allocation16_spill] sm:$0xff] }
 0x6c8   : > { %v8301_v55 = vmul.f32 %v8253_v31, %v15241_v3  ;;  %v7908_v48 = vrot.slane %v15007_v28, 1  ;;  %v8151_v37 = vmul.f32 0.5, %v15100_v60  ;;  %v8303_v45 = vmul.f32 %v8255_v4, %v15231_v8 }
 0x6c9   : > { %v15268_v1 = vadd.f32 %v15171_v54, %v8057_v42  ;;  %v11886_v27 = vpop.eup %11885  ;;  %v8569_v26 = vmax.f32 %v8536_v62, %v8539_v43  ;;  %v8154_v5 = vmul.f32 0.5, %v15188_v13  ;;  %v8153_v28 = vmul.f32 0.5, %v15184_v19  ;;  %v15519_v43 = vld [vmem:[#allocation25_spill] sm:$0xff] }
 0x6ca   : > { %v8349_v44 = vadd.f32 %v8301_v55, %v15241_v3  ;;  %v8490_v39 = vadd.f32 1.0, %v11886_v27  ;;  %v8535_v58 = vmul.f32 %v8487_v18, %v8151_v37  ;;  %v8302_v38 = vmul.f32 %v8254_v22, %v15244_v40 }
 0x6cb   : > { %v8208_v49 = vmul.f32 0.044715, %v15268_v1  ;;  %8593 = vst [vmem:[#allocation3 + $0x80] sm:$0xff] %v8569_v26  ;;  %v7920_v60 = vsel %vm3696_vm1, %v7908_v48, %v7909_v36  ;;  %v7921_v17 = vsel %vm3696_vm1, %v7907_v57, %v7908_v48  ;;  %v8156_v15 = vmul.f32 0.5, %v15218_v41 }
 0x6cc   : > { %v8610_v59 = vld [vmem:[#allocation3 + $0x61] ss:$2 sm:$0xff]  ;;  %v11888_v29 = vpop.eup %11887  ;;  %v8538_v51 = vmul.f32 %v8490_v39, %v8154_v5  ;;  %v8397_v56 = vmul.f32 0.7978846, %v8349_v44  ;;  %v8351_v19 = vadd.f32 %v8303_v45, %v15231_v8  ;;  %v8060_v2 = vmul.f32 %v15152_v33, %v8005_v14 }
 0x6cd   : > { %v8626_v63 = vld [vmem:[#allocation3 + $0x62] ss:$2 sm:$0xff]  ;;  %v8256_v13 = vmul.f32 %v8208_v49, %v15268_v1  ;;  %v8003_v34 = vadd.f32 %v7921_v17, %v15516_v61  ;;  %v7913_v52 = vrot.slane %v15026_v16, 1  ;;  %v8489_v11 = vadd.f32 1.0, %v11888_v29 }
 0x6ce   : > { %v8637_v23 = vmax.f32 %v8610_v59, %v8626_v63  ;;  %v8568_v50 = vmax.f32 %v8535_v58, %v8538_v51  ;;  %v8004_v36 = vadd.f32 %v7920_v60, %v15517_v12  ;;  %v7911_v57 = vrot.slane %v15033_v10, 1  ;;  %v15522_v49 = vld [vmem:[#allocation22_spill] sm:$0xff] }
 0x6cf   : > { %v8304_v30 = vmul.f32 %v8256_v13, %v15268_v1  ;;  %v7914_v20 = vrot.slane %v15039_v7, 1  ;;  %v8350_v25 = vadd.f32 %v8302_v38, %v15244_v40  ;;  %11891 = vtanh.f32 %v8397_v56 }
 0x6d0   : > { %8645 = vst [vmem:[%s14880_s22 + $0x20] sm:$0xff] %v8637_v23  ;;  %8592 = vst [vmem:[#allocation3 + $0x78] sm:$0xff] %v8568_v50  ;;  %v8058_v9 = vmul.f32 %v15152_v33, %v8003_v34  ;;  %v15296_v16 = vadd.f32 %v15171_v54, %v8060_v2  ;;  %v8059_v32 = vmul.f32 %v15152_v33, %v8004_v36  ;;  %v7912_v14 = vrot.slane %v15044_v35, 1  ;;  %v15521_v35 = vld [vmem:[#allocation19_spill] sm:$0xff]  ;;  %v15523_v34 = vld [vmem:[#allocation21_spill] sm:$0xff] }
 0x6d1   : > { %v11890_v41 = vpop.eup %11889  ;;  %v8352_v4 = vadd.f32 %v8304_v30, %v15268_v1  ;;  %v7918_v10 = vsel %vm3696_vm1, %v7910_v21, %v7911_v57  ;;  %v7915_v0 = vsel %vm3696_vm1, %v7913_v52, %v7914_v20  ;;  %v8537_v18 = vmul.f32 %v8489_v11, %v8153_v28 }
 0x6d2   : > { %v8492_v47 = vadd.f32 1.0, %v11890_v41  ;;  %v15304_v62 = vadd.f32 %v15171_v54, %v8058_v9  ;;  %v8006_v31 = vadd.f32 %v7918_v10, %v15518_v53  ;;  %v15310_v46 = vadd.f32 %v15171_v54, %v8059_v32 }
 0x6d3   : > { %v8400_v7 = vmul.f32 0.7978846, %v8352_v4  ;;  %v8399_v6 = vmul.f32 0.7978846, %v8351_v19  ;;  %v15520_v22 = vrot.slane %v15519_v43, 1  ;;  %v8009_v5 = vadd.f32 %v7915_v0, %v15521_v35 }
 0x6d4   : > { %v8540_v42 = vmul.f32 %v8492_v47, %v8156_v15  ;;  %v8209_v21 = vmul.f32 0.044715, %v15304_v62  ;;  %v8211_v27 = vmul.f32 0.044715, %v15296_v16  ;;  %v8210_v37 = vmul.f32 0.044715, %v15310_v46 }
 0x6d5   : > { %11893 = vtanh.f32 %v8400_v7  ;;  %v7962_v55 = vsel %vm3696_vm1, %v7914_v20, %v15520_v22  ;;  %v8398_v26 = vmul.f32 0.7978846, %v8350_v25  ;;  %v8061_v44 = vmul.f32 %v15152_v33, %v8006_v31 }
 0x6d6   : > { %v8570_v48 = vmax.f32 %v8537_v18, %v8540_v42  ;;  %v8257_v45 = vmul.f32 %v8209_v21, %v15304_v62  ;;  %v8258_v39 = vmul.f32 %v8210_v37, %v15310_v46  ;;  %v8010_v58 = vadd.f32 %v7962_v55, %v15522_v49 }
 0x6d7   : > { %v7916_v59 = vsel %vm3696_vm1, %v7912_v14, %v7913_v52  ;;  %11895 = vtanh.f32 %v8399_v6  ;;  %v15329_v38 = vadd.f32 %v15171_v54, %v8061_v44  ;;  %v8064_v60 = vmul.f32 %v15152_v33, %v8009_v5  ;;  %v15524_v52 = vld [vmem:[#allocation20_spill] sm:$0xff] }
 0x6d8   : > { %8594 = vst [vmem:[#allocation3 + $0x88] sm:$0xff] %v8570_v48  ;;  %v8305_v28 = vmul.f32 %v8257_v45, %v15304_v62  ;;  %v8259_v29 = vmul.f32 %v8211_v27, %v15296_v16  ;;  %v8306_v63 = vmul.f32 %v8258_v39, %v15310_v46  ;;  %v8065_v51 = vmul.f32 %v15152_v33, %v8010_v58  ;;  %v8612_v41 = vld [vmem:[#allocation3 + $0x79] ss:$2 sm:$0xff] }
 0x6d9   : > { %v7917_v56 = vsel %vm3696_vm1, %v7911_v57, %v7912_v14  ;;  %v11892_v13 = vpop.eup %11891  ;;  %v8157_v17 = vmul.f32 0.5, %v15241_v3  ;;  %11897 = vtanh.f32 %v8398_v26  ;;  %v8212_v15 = vmul.f32 0.044715, %v15329_v38 }
 0x6da   : > { %v8353_v23 = vadd.f32 %v8305_v28, %v15304_v62  ;;  %v8160_v19 = vmul.f32 0.5, %v15268_v1  ;;  %v8354_v2 = vadd.f32 %v8306_v63, %v15310_v46  ;;  %v15343_v50 = vadd.f32 %v15171_v54, %v8064_v60 }
 0x6db   : > { %v15346_v30 = vadd.f32 %v15171_v54, %v8065_v51  ;;  %v8260_v61 = vmul.f32 %v8212_v15, %v15329_v38  ;;  %v8007_v3 = vadd.f32 %v7917_v56, %v15523_v34  ;;  %v8008_v11 = vadd.f32 %v7916_v59, %v15524_v52 }
 0x6dc   : > { %v8401_v24 = vmul.f32 0.7978846, %v8353_v23  ;;  %v8493_v12 = vadd.f32 1.0, %v11892_v13  ;;  %v8307_v36 = vmul.f32 %v8259_v29, %v15296_v16  ;;  %v8402_v57 = vmul.f32 0.7978846, %v8354_v2 }
 0x6dd   : > { %v8215_v1 = vmul.f32 0.044715, %v15343_v50  ;;  %v8308_v4 = vmul.f32 %v8260_v61, %v15329_v38  ;;  %v8216_v9 = vmul.f32 0.044715, %v15346_v30  ;;  %v8062_v47 = vmul.f32 %v15152_v33, %v8007_v3 }
 0x6de   : > { %11899 = vtanh.f32 %v8401_v24  ;;  %v8063_v0 = vmul.f32 %v15152_v33, %v8008_v11  ;;  %v8541_v42 = vmul.f32 %v8493_v12, %v8157_v17  ;;  %v8355_v43 = vadd.f32 %v8307_v36, %v15296_v16 }
 0x6df   : > { %v11894_v20 = vpop.eup %11893  ;;  %v8628_v25 = vld [vmem:[#allocation3 + $0x7a] ss:$2 sm:$0xff]  ;;  %11901 = vtanh.f32 %v8402_v57  ;;  %v8263_v7 = vmul.f32 %v8215_v1, %v15343_v50  ;;  %v8356_v53 = vadd.f32 %v8308_v4, %v15329_v38  ;;  %v8264_v31 = vmul.f32 %v8216_v9, %v15346_v30 }
 0x6e0   : > { %v8638_v32 = vmax.f32 %v8612_v41, %v8628_v25  ;;  %v8496_v10 = vadd.f32 1.0, %v11894_v20  ;;  %v15361_v18 = vadd.f32 %v15171_v54, %v8062_v47  ;;  %v15368_v48 = vadd.f32 %v15171_v54, %v8063_v0 }
 0x6e1   : > { %v8311_v6 = vmul.f32 %v8263_v7, %v15343_v50  ;;  %v11896_v21 = vpop.eup %11895  ;;  %v8404_v22 = vmul.f32 0.7978846, %v8356_v53  ;;  %v8312_v55 = vmul.f32 %v8264_v31, %v15346_v30  ;;  %v8403_v39 = vmul.f32 0.7978846, %v8355_v43 }
 0x6e2   : > { %8646 = vst [vmem:[%s14880_s22 + $0x28] sm:$0xff] %v8638_v32  ;;  %v8544_v14 = vmul.f32 %v8496_v10, %v8160_v19  ;;  %v8213_v37 = vmul.f32 0.044715, %v15361_v18  ;;  %v8214_v35 = vmul.f32 0.044715, %v15368_v48  ;;  %v8495_v60 = vadd.f32 1.0, %v11896_v21 }
 0x6e3   : > { %v8359_v33 = vadd.f32 %v8311_v6, %v15343_v50  ;;  %v11898_v26 = vpop.eup %11897  ;;  %11903 = vtanh.f32 %v8404_v22  ;;  %v8360_v45 = vadd.f32 %v8312_v55, %v15346_v30  ;;  %v8158_v29 = vmul.f32 0.5, %v15244_v40 }
 0x6e4   : > { %v8571_v27 = vmax.f32 %v8541_v42, %v8544_v14  ;;  %v8261_v5 = vmul.f32 %v8213_v37, %v15361_v18  ;;  %v8494_v58 = vadd.f32 1.0, %v11898_v26  ;;  %v8262_v54 = vmul.f32 %v8214_v35, %v15368_v48 }
 0x6e5   : > { %v8407_v44 = vmul.f32 0.7978846, %v8359_v33  ;;  %v8408_v49 = vmul.f32 0.7978846, %v8360_v45  ;;  %v8161_v51 = vmul.f32 0.5, %v15304_v62  ;;  %v8159_v23 = vmul.f32 0.5, %v15231_v8 }
 0x6e6   : > { %8595 = vst [vmem:[#allocation3 + $0x90] sm:$0xff] %v8571_v27  ;;  %v8309_v59 = vmul.f32 %v8261_v5, %v15361_v18  ;;  %v8310_v13 = vmul.f32 %v8262_v54, %v15368_v48  ;;  %v8162_v15 = vmul.f32 0.5, %v15310_v46  ;;  %v8542_v2 = vmul.f32 %v8494_v58, %v8158_v29 }
 0x6e7   : > { %11905 = vtanh.f32 %v8407_v44  ;;  %v8543_v34 = vmul.f32 %v8495_v60, %v8159_v23  ;;  %v8164_v8 = vmul.f32 0.5, %v15329_v38  ;;  %v8167_v20 = vmul.f32 0.5, %v15343_v50 }
 0x6e8   : > { %v11900_v28 = vpop.eup %11899  ;;  %11907 = vtanh.f32 %v8408_v49  ;;  %v8357_v17 = vadd.f32 %v8309_v59, %v15361_v18  ;;  %v8358_v61 = vadd.f32 %v8310_v13, %v15368_v48  ;;  %v8168_v32 = vmul.f32 0.5, %v15346_v30 }
 0x6e9   : > { %v11902_v63 = vpop.eup %11901  ;;  %v8497_v56 = vadd.f32 1.0, %v11900_v28  ;;  %11909 = vtanh.f32 %v8403_v39  ;;  %v8165_v38 = vmul.f32 0.5, %v15361_v18  ;;  %v8163_v6 = vmul.f32 0.5, %v15296_v16 }
 0x6ea   : > { %v8498_v19 = vadd.f32 1.0, %v11902_v63  ;;  %v8405_v40 = vmul.f32 0.7978846, %v8357_v17  ;;  %v8406_v62 = vmul.f32 0.7978846, %v8358_v61  ;;  %v8166_v21 = vmul.f32 0.5, %v15368_v48 }
 0x6eb   : > { %v8545_v24 = vmul.f32 %v8497_v56, %v8161_v51 }
 0x6ec   : > { %v8546_v3 = vmul.f32 %v8498_v19, %v8162_v15  ;;  %11911 = vtanh.f32 %v8405_v40 }
 0x6ed   : > { %v8572_v52 = vmax.f32 %v8542_v2, %v8545_v24  ;;  %v11904_v11 = vpop.eup %11903  ;;  %11913 = vtanh.f32 %v8406_v62 }
 0x6ee   : > { %v8573_v12 = vmax.f32 %v8543_v34, %v8546_v3  ;;  %v8500_v36 = vadd.f32 1.0, %v11904_v11 }
 0x6ef   : > { %8596 = vst [vmem:[#allocation3 + $0x98] sm:$0xff] %v8572_v52 }
 0x6f0   : > { %8597 = vst [vmem:[#allocation3 + $0xa0] sm:$0xff] %v8573_v12  ;;  %v8548_v1 = vmul.f32 %v8500_v36, %v8164_v8 }
 0x6f1   : > { %v11906_v46 = vpop.eup %11905 }
 0x6f2   : > { %v11908_v57 = vpop.eup %11907  ;;  %v8503_v41 = vadd.f32 1.0, %v11906_v46 }
 0x6f3   : > { %v11910_v25 = vpop.eup %11909  ;;  %v8504_v4 = vadd.f32 1.0, %v11908_v57 }
 0x6f4   : > { %v8551_v9 = vmul.f32 %v8503_v41, %v8167_v20  ;;  %v8499_v53 = vadd.f32 1.0, %v11910_v25 }
 0x6f5   : > { %v8552_v42 = vmul.f32 %v8504_v4, %v8168_v32 }
 0x6f6   : > { %v8614_v47 = vld [vmem:[#allocation3 + $0x91] ss:$2 sm:$0xff]  ;;  %v8575_v10 = vmax.f32 %v8548_v1, %v8551_v9  ;;  %v11912_v7 = vpop.eup %11911  ;;  %v8547_v30 = vmul.f32 %v8499_v53, %v8163_v6 }
 0x6f7   : > { %v8630_v31 = vld [vmem:[#allocation3 + $0x92] ss:$2 sm:$0xff]  ;;  %v8501_v14 = vadd.f32 1.0, %v11912_v7  ;;  %v11914_v50 = vpop.eup %11913 }
 0x6f8   : > { %v8639_v0 = vmax.f32 %v8614_v47, %v8630_v31  ;;  %8599 = vst [vmem:[#allocation3 + $0xb0] sm:$0xff] %v8575_v10  ;;  %v8502_v43 = vadd.f32 1.0, %v11914_v50 }
 0x6f9   : > { %v8549_v22 = vmul.f32 %v8501_v14, %v8165_v38 }
 0x6fa   : > { %8647 = vst [vmem:[%s14880_s22 + $0x30] sm:$0xff] %v8639_v0  ;;  %v8550_v55 = vmul.f32 %v8502_v43, %v8166_v21 }
 0x6fb   : > { %v8576_v27 = vmax.f32 %v8549_v22, %v8552_v42 }
 0x6fc   : > { %v8574_v33 = vmax.f32 %v8547_v30, %v8550_v55 }
 0x6fd   : > { %8600 = vst [vmem:[#allocation3 + $0xb8] sm:$0xff] %v8576_v27 }
 0x6fe   : > { %8598 = vst [vmem:[#allocation3 + $0xa8] sm:$0xff] %v8574_v33 }
 0x705   : > { %v8616_v37 = vld [vmem:[#allocation3 + $0xa9] ss:$2 sm:$0xff]  ;;  %v8632_v26 = vld [vmem:[#allocation3 + $0xaa] ss:$2 sm:$0xff] }
 0x706   : > { %v8640_v45 = vmax.f32 %v8616_v37, %v8632_v26 }
 0x708   : > { %8648 = vst [vmem:[%s14880_s22 + $0x38] sm:$0xff] %v8640_v45 }
 0x709 PF: > { %s18_s27 = sadd.s32 1, %s11955_s27  }
 0x70a   : > { %p15_p4 = scmp.ge.s32.totalorder %s18_s27, 4  }
 0x70c   :  { %17 = sbr.rel (!%p15_p4) target bundleno = 1 (0x1), region = 114 }

</bundles_post_ra>
